<compile_context>
chip_gen: v7x
topology: tpu7x:2x2x1
jax: 0.10.0
libtpu: 0.0.40
codegen_flags: <defaults>
</compile_context>

<pallas_src>
import jax
import jax.numpy as jnp
from jax import lax
from jax.experimental import pallas as pl
from jax.experimental.pallas import tpu as pltpu


# ------------------------------- activation --------------------------------
def _mish_kernel(v):
    # mish(v) = v * tanh(softplus(v)) = v * (t - 1) / (t + 1),  t = (1 + e^v)^2
    # 1 exp + 1 approx reciprocal (both on the EUP slot) instead of exp + log1p + tanh.
    e = jnp.exp(jnp.minimum(v, 20.0))        # for v > 20 the ratio is 1.0 in f32
    t = (1.0 + e) * (1.0 + e)
    return v * (t - 1.0) * pl.reciprocal(t + 1.0, approx=True)


def _mish_ref(v):
    sp = jnp.where(v > 20.0, v, jnp.log1p(jnp.exp(jnp.minimum(v, 20.0))))
    return v * jnp.tanh(sp)


# --------------------------------- kernel -----------------------------------
def _make_kernel(use_xlu_roll):
    def kernel(x_ref, xt_ref, xb_ref, w1_ref, b1_ref, w2_ref, b2_ref, o_ref):
        # x_ref : (1, TH, W, Cin) main row tile    xt_ref/xb_ref: (1, 1, W, Cin) halo rows
        # w1_ref: (Cin, Cmid)  w2_ref: (3, 3, Cmid, Cout)  b1/b2: (1, C) folded BN biases
        # o_ref : (1, TH, W, Cout)
        _, TH, W, Cin = x_ref.shape
        Cmid = w1_ref.shape[1]
        Cout = w2_ref.shape[3]
        t = pl.program_id(1)
        nt = pl.num_programs(1)
        M = (TH + 2) * W                     # rows of the halo-extended, row-flattened tile

        # ---- assemble TH+2 input rows: [top halo, TH rows, bottom halo] and flatten ----
        x_ext = jnp.concatenate([xt_ref[0], x_ref[0], xb_ref[0]], axis=0)   # (TH+2, W, Cin)

        # ---- conv1: 1x1 conv == channel matmul (BN scale pre-folded into w1) ----
        h = jnp.dot(x_ext.reshape(M, Cin), w1_ref[...],
                    preferred_element_type=jnp.float32)                     # (M, Cmid) f32
        h = _mish_kernel(h + b1_ref[...])

        # zero halo rows outside the image (they are conv2's zero padding in h-space)
        ridx = lax.broadcasted_iota(jnp.int32, (M, 1), 0)
        keep = jnp.logical_and(jnp.logical_or(ridx >= W, t != 0),
                               jnp.logical_or(ridx < (TH + 1) * W, t != nt - 1))
        h = jnp.where(keep, h, 0.0).astype(x_ref.dtype)   # back to the (bf16-ready) MXU dtype

        # ---- conv2: 3x3 conv (pad=1) as 9 MXU matmuls with an SSA f32 accumulator ----
        if use_xlu_roll:
            # Column taps via XLU sublane rotation + one-column mask (no padded copies).
            wpos = ridx % W                               # column of each flattened row
            h_l = jnp.where(wpos > 0,
                            pltpu.roll(h, shift=1, axis=0), 0.0).astype(h.dtype)
            h_r = jnp.where(wpos < W - 1,
                            pltpu.roll(h, shift=M - 1, axis=0), 0.0).astype(h.dtype)
            taps = (h_l, h, h_r)                          # dx = -1, 0, +1
        else:
            # Fallback: single W-pad + three column-shifted views (extra copies).
            h3 = h.reshape(TH + 2, W, Cmid)
            zcol = jnp.zeros((TH + 2, 1, Cmid), h.dtype)
            hp = jnp.concatenate([zcol, h3, zcol], axis=1)                  # (TH+2, W+2, Cmid)
            taps = tuple(hp[:, dx:dx + W, :].reshape(M, Cmid) for dx in range(3))

        acc = None
        for dy in range(3):
            for dx in range(3):
                win = taps[dx][dy * W:dy * W + TH * W]    # row-aligned static slice
                part = jnp.dot(win, w2_ref[dy, dx], preferred_element_type=jnp.float32)
                acc = part if acc is None else acc + part

        # ---- BN bias + Mish + residual add (Cin == Cout) ----
        y = _mish_kernel(acc + b2_ref[...])
        o_ref[0] = (y.reshape(TH, W, Cout) + x_ref[0].astype(jnp.float32)).astype(o_ref.dtype)

    return kernel


# ------------------------------ tile heuristics ------------------------------
def _vmem_capacity_bytes():
    """Physical VMEM per TensorCore (generation-aware; v7x-safe 64 MiB fallback)."""
    try:
        return int(pltpu.get_tpu_info().vmem_capacity_bytes)
    except Exception:
        return 64 * 1024 * 1024


def _estimate_vmem_bytes(TH, W, cin, cmid, cout, itemsize):
    """Rough per-grid-step VMEM working set (double-buffered blocks + live values)."""
    M = (TH + 2) * W
    blk_in = M * cin * itemsize                       # main tile + 2 halo rows
    blk_out = TH * W * cout * itemsize
    weights = (cin * cmid + 9 * cmid * cout + cmid + cout) * 4
    live = (M * cin * itemsize                        # x_ext assembly
            + M * cmid * 4                            # conv1 output (f32 epilogue)
            + 3 * M * cmid * itemsize                 # centre + two column taps
            + 2 * TH * W * cout * 4)                  # f32 accumulator + Mish epilogue
    return 2 * (blk_in + blk_out + weights) + live


def _choose_block_rows(H, W, cin, cmid, cout, itemsize, budget_bytes):
    """Largest divisor of H whose per-tile working set fits the VMEM budget."""
    th = 1
    for cand in range(1, H + 1):
        if H % cand == 0 and _estimate_vmem_bytes(cand, W, cin, cmid, cout,
                                                  itemsize) <= budget_bytes:
            th = cand
    return th


# --------------------------------- wrappers -----------------------------------
def bottleneck_pallas_nhwc(x, params, *, block_rows=None):
    """Bottleneck forward on an NHWC input.  `params` must be BN-folded (fold_bn_params)."""
    N, H, W, C = x.shape
    w1 = params["w1"].astype(x.dtype)        # (Cin, Cmid), BN scale folded in
    w2 = params["w2"].astype(x.dtype)        # (3, 3, Cmid, Cout), BN scale folded in
    b1 = params["b1"].astype(jnp.float32)    # (1, Cmid)
    b2 = params["b2"].astype(jnp.float32)    # (1, Cout)
    Cin, Cmid = w1.shape
    Cout = w2.shape[3]
    assert Cin == C and Cout == C, "residual shortcut needs in_channels == out_channels"

    itemsize = jnp.dtype(x.dtype).itemsize
    cap = _vmem_capacity_bytes()
    if block_rows is None:
        # Big row tiles: amortize per-grid-step overhead, keep the matmul M dim large.
        TH = _choose_block_rows(H, W, Cin, Cmid, Cout, itemsize,
                                budget_bytes=int(0.4 * cap))
    else:
        TH = block_rows
    assert H % TH == 0, "block_rows must divide H"
    nt = H // TH

    est = _estimate_vmem_bytes(TH, W, Cin, Cmid, Cout, itemsize)
    vmem_limit = None
    if 2 * est > 32 * 1024 * 1024:
        # Leave headroom for compiler-internal scratch; cap is generation-aware
        # (64 MiB per TC on v7x, 128 MiB on v5e/v6e).
        vmem_limit = int(min(0.85 * cap, max(2 * est, 32 * 1024 * 1024)))

    def build(use_xlu_roll):
        return pl.pallas_call(
            _make_kernel(use_xlu_roll),
            out_shape=jax.ShapeDtypeStruct((N, H, W, Cout), x.dtype),
            grid_spec=pltpu.PrefetchScalarGridSpec(
                num_scalar_prefetch=0,
                grid=(N, nt),
                in_specs=[
                    # main TH-row tile
                    pl.BlockSpec((1, TH, W, Cin), lambda n, t: (n, t, 0, 0)),
                    # single-row halo blocks (row index clamped into the image; the
                    # kernel zeroes them when they fall outside)
                    pl.BlockSpec((1, 1, W, Cin),
                                 lambda n, t: (n, jnp.maximum(t * TH - 1, 0), 0, 0)),
                    pl.BlockSpec((1, 1, W, Cin),
                                 lambda n, t: (n, jnp.minimum((t + 1) * TH, H - 1), 0, 0)),
                    # weights / folded BN biases: constant block index -> VMEM resident
                    pl.BlockSpec((Cin, Cmid), lambda n, t: (0, 0)),
                    pl.BlockSpec((1, Cmid), lambda n, t: (0, 0)),
                    pl.BlockSpec((3, 3, Cmid, Cout), lambda n, t: (0, 0, 0, 0)),
                    pl.BlockSpec((1, Cout), lambda n, t: (0, 0)),
                ],
                out_specs=pl.BlockSpec((1, TH, W, Cout), lambda n, t: (n, t, 0, 0)),
            ),
            compiler_params=pltpu.CompilerParams(
                dimension_semantics=("parallel", "parallel"),
                vmem_limit_bytes=vmem_limit,
            ),
        )

    try:
        return build(True)(x, x, x, w1, b1, w2, b2)
    except Exception:
        # Fallback path for toolchains without the sublane-roll lowering.
        return build(False)(x, x, x, w1, b1, w2, b2)


def bottleneck_pallas(x_nchw, params, *, block_rows=None):
    """NCHW interface matching the PyTorch module (params BN-folded via fold_bn_params).

    TODO(synk): keep the surrounding model NHWC end-to-end; these two transposes are full
    extra HBM passes and dominate wall clock for this memory-bound block.
    """
    x = jnp.transpose(x_nchw, (0, 2, 3, 1))                # NHWC
    out = bottleneck_pallas_nhwc(x, params, block_rows=block_rows)
    return jnp.transpose(out, (0, 3, 1, 2))                # back to NCHW


# ------------------------ parameters & pure-JAX reference ------------------------
def make_params(key, in_channels, out_channels):
    """PyTorch-equivalent parameters: conv weights + inference-mode BN as scale/bias."""
    mid = out_channels // 2
    ks = jax.random.split(key, 10)
    eps = 1e-5
    w1 = jax.random.normal(ks[0], (in_channels, mid), jnp.float32) * 0.1
    w2 = jax.random.normal(ks[1], (3, 3, mid, out_channels), jnp.float32) * 0.1
    gamma1 = 1.0 + 0.2 * jax.random.normal(ks[2], (mid,), jnp.float32)
    beta1 = 0.1 * jax.random.normal(ks[3], (mid,), jnp.float32)
    mean1 = 0.1 * jax.random.normal(ks[4], (mid,), jnp.float32)
    var1 = 1.0 + 0.2 * jax.random.uniform(ks[5], (mid,), jnp.float32)
    gamma2 = 1.0 + 0.2 * jax.random.normal(ks[6], (out_channels,), jnp.float32)
    beta2 = 0.1 * jax.random.normal(ks[7], (out_channels,), jnp.float32)
    mean2 = 0.1 * jax.random.normal(ks[8], (out_channels,), jnp.float32)
    var2 = 1.0 + 0.2 * jax.random.uniform(ks[9], (out_channels,), jnp.float32)
    s1 = gamma1 / jnp.sqrt(var1 + eps); b1 = beta1 - mean1 * s1
    s2 = gamma2 / jnp.sqrt(var2 + eps); b2 = beta2 - mean2 * s2
    return {"w1": w1, "w2": w2,
            "s1": s1[None, :], "b1": b1[None, :],
            "s2": s2[None, :], "b2": b2[None, :]}


def fold_bn_params(params):
    """One-time constant fold of the BN scales into the conv weights (inference mode)."""
    return {"w1": params["w1"] * params["s1"],            # scale across Cmid columns
            "b1": params["b1"],
            "w2": params["w2"] * params["s2"][0],         # scale across the Cout axis
            "b2": params["b2"]}


def bottleneck_ref(x_nchw, params):
    w1_t = jnp.transpose(params["w1"], (1, 0))[:, :, None, None]          # (Cmid,Cin,1,1)
    w2_t = jnp.transpose(params["w2"], (3, 2, 0, 1))                      # (Cout,Cmid,3,3)

    def conv(x, w, pad):
        return lax.conv_general_dilated(
            x, w, window_strides=(1, 1), padding=[(pad, pad), (pad, pad)],
            dimension_numbers=("NCHW", "OIHW", "NCHW"))

    h = conv(x_nchw, w1_t, 0)
    h = h * params["s1"][0][None, :, None, None] + params["b1"][0][None, :, None, None]
    h = _mish_ref(h)
    y = conv(h, w2_t, 1)
    y = y * params["s2"][0][None, :, None, None] + params["b2"][0][None, :, None, None]
    y = _mish_ref(y)
    return y + x_nchw


if __name__ == "__main__":
    key = jax.random.PRNGKey(0)
    kx, kp = jax.random.split(key)

    N, C, H, W = 2, 4, 16, 16                              # in_channels == out_channels
    x = jax.random.normal(kx, (N, C, H, W), jnp.float32)
    params = make_params(kp, in_channels=C, out_channels=C)
    kparams = fold_bn_params(params)                       # one-time BN fold into weights

    out = bottleneck_pallas(x, kparams)
    out = jax.block_until_ready(out)

    ref = bottleneck_ref(x, params)
    assert out.shape == (N, C, H, W)
    max_err = float(jnp.max(jnp.abs(out - ref)))
    assert jnp.allclose(out, ref, atol=5e-3, rtol=5e-3), (
        f"mismatch vs reference (max err {max_err})")

    print("KERNEL_OK")
</pallas_src>

<mosaic_0001>
module attributes {stable_mosaic.version = 11 : i64} {
  func.func @kernel(%arg0: i32, %arg1: i32, %arg2: memref<1x16x16x4xf32, #tpu.memory_space<vmem>>, %arg3: memref<1x1x16x4xf32, #tpu.memory_space<vmem>>, %arg4: memref<1x1x16x4xf32, #tpu.memory_space<vmem>>, %arg5: memref<4x2xf32, #tpu.memory_space<vmem>>, %arg6: memref<1x2xf32, #tpu.memory_space<vmem>>, %arg7: memref<3x3x2x4xf32, #tpu.memory_space<vmem>>, %arg8: memref<1x4xf32, #tpu.memory_space<vmem>>, %arg9: memref<1x16x16x4xf32, #tpu.memory_space<vmem>>) attributes {dimension_semantics = [#tpu.dimension_semantics<parallel>, #tpu.dimension_semantics<parallel>], iteration_bounds = array<i64: 2, 1>, scalar_prefetch = 0 : i64, scratch_operands = 0 : i64, tpu.core_type = #tpu.core_type<tc>, window_params = [{transform_indices = @transform_0, window_bounds = array<i64: 1, 16, 16, 4>}, {transform_indices = @transform_1, window_bounds = array<i64: 1, 1, 16, 4>}, {transform_indices = @transform_2, window_bounds = array<i64: 1, 1, 16, 4>}, {pipeline_mode = #tpu.pipeline_mode<synchronous>, transform_indices = @transform_3, window_bounds = array<i64: 4, 2>}, {pipeline_mode = #tpu.pipeline_mode<synchronous>, transform_indices = @transform_4, window_bounds = array<i64: 1, 2>}, {pipeline_mode = #tpu.pipeline_mode<synchronous>, transform_indices = @transform_5, window_bounds = array<i64: 3, 3, 2, 4>}, {pipeline_mode = #tpu.pipeline_mode<synchronous>, transform_indices = @transform_6, window_bounds = array<i64: 1, 4>}, {transform_indices = @transform_7, window_bounds = array<i64: 1, 16, 16, 4>}]} {
    %c0 = arith.constant 0 : index
    %c0_0 = arith.constant 0 : index
    %c0_1 = arith.constant 0 : index
    %c0_2 = arith.constant 0 : index
    %0 = vector.load %arg3[%c0, %c0_0, %c0_1, %c0_2] : memref<1x1x16x4xf32, #tpu.memory_space<vmem>>, vector<1x1x16x4xf32>
    %1 = vector.shape_cast %0 : vector<1x1x16x4xf32> to vector<1x16x4xf32>
    %c0_3 = arith.constant 0 : index
    %c0_4 = arith.constant 0 : index
    %c0_5 = arith.constant 0 : index
    %c0_6 = arith.constant 0 : index
    %2 = vector.load %arg2[%c0_3, %c0_4, %c0_5, %c0_6] : memref<1x16x16x4xf32, #tpu.memory_space<vmem>>, vector<1x16x16x4xf32>
    %3 = vector.shape_cast %2 : vector<1x16x16x4xf32> to vector<16x16x4xf32>
    %c0_7 = arith.constant 0 : index
    %c0_8 = arith.constant 0 : index
    %c0_9 = arith.constant 0 : index
    %c0_10 = arith.constant 0 : index
    %4 = vector.load %arg4[%c0_7, %c0_8, %c0_9, %c0_10] : memref<1x1x16x4xf32, #tpu.memory_space<vmem>>, vector<1x1x16x4xf32>
    %5 = vector.shape_cast %4 : vector<1x1x16x4xf32> to vector<1x16x4xf32>
    %6 = tpu.concatenate %1, %3, %5 in 0 : vector<1x16x4xf32>, vector<16x16x4xf32>, vector<1x16x4xf32> -> vector<18x16x4xf32>
    %7 = vector.shape_cast %6 : vector<18x16x4xf32> to vector<288x4xf32>
    %c0_11 = arith.constant 0 : index
    %c0_12 = arith.constant 0 : index
    %8 = vector.load %arg5[%c0_11, %c0_12] : memref<4x2xf32, #tpu.memory_space<vmem>>, vector<4x2xf32>
    %cst = arith.constant dense<0.000000e+00> : vector<288x2xf32>
    %9 = tpu.matmul %7, %8, %cst {dimension_numbers = #tpu.dot_dimension_numbers<[1], [0], [0], [1], [0, 0, 1, 1], [], []>} : vector<288x4xf32>, vector<4x2xf32>, vector<288x2xf32> -> vector<288x2xf32>
    %c0_13 = arith.constant 0 : index
    %c0_14 = arith.constant 0 : index
    %10 = vector.load %arg6[%c0_13, %c0_14] : memref<1x2xf32, #tpu.memory_space<vmem>>, vector<1x2xf32>
    %11 = vector.broadcast %10 : vector<1x2xf32> to vector<288x2xf32>
    %12 = arith.addf %9, %11 : vector<288x2xf32>
    %cst_15 = arith.constant 2.000000e+01 : f32
    %13 = vector.broadcast %cst_15 : f32 to vector<288x2xf32>
    %14 = arith.minimumf %12, %13 : vector<288x2xf32>
    %15 = math.exp %14 : vector<288x2xf32>
    %cst_16 = arith.constant 1.000000e+00 : f32
    %16 = vector.broadcast %cst_16 : f32 to vector<288x2xf32>
    %17 = arith.addf %16, %15 : vector<288x2xf32>
    %cst_17 = arith.constant 1.000000e+00 : f32
    %18 = vector.broadcast %cst_17 : f32 to vector<288x2xf32>
    %19 = arith.addf %18, %15 : vector<288x2xf32>
    %20 = arith.mulf %17, %19 : vector<288x2xf32>
    %cst_18 = arith.constant 1.000000e+00 : f32
    %21 = vector.broadcast %cst_18 : f32 to vector<288x2xf32>
    %22 = arith.subf %20, %21 : vector<288x2xf32>
    %23 = arith.mulf %12, %22 : vector<288x2xf32>
    %cst_19 = arith.constant 1.000000e+00 : f32
    %24 = vector.broadcast %cst_19 : f32 to vector<288x2xf32>
    %25 = arith.addf %20, %24 : vector<288x2xf32>
    %26 = tpu.reciprocal %25 {approx = true} : vector<288x2xf32> -> vector<288x2xf32>
    %27 = arith.mulf %23, %26 : vector<288x2xf32>
    %28 = tpu.iota {dimensions = array<i32: 0>} : vector<288x1xi32>
    %c16_i32 = arith.constant 16 : i32
    %29 = vector.broadcast %c16_i32 : i32 to vector<288x1xi32>
    %30 = arith.cmpi sge, %28, %29 : vector<288x1xi32>
    %c0_i32 = arith.constant 0 : i32
    %31 = arith.cmpi ne, %arg1, %c0_i32 : i32
    %32 = vector.broadcast %31 : i1 to vector<288x1xi1>
    %33 = arith.ori %30, %32 : vector<288x1xi1>
    %c272_i32 = arith.constant 272 : i32
    %34 = vector.broadcast %c272_i32 : i32 to vector<288x1xi32>
    %35 = arith.cmpi slt, %28, %34 : vector<288x1xi32>
    %c0_i32_20 = arith.constant 0 : i32
    %36 = arith.cmpi ne, %arg1, %c0_i32_20 : i32
    %37 = vector.broadcast %36 : i1 to vector<288x1xi1>
    %38 = arith.ori %35, %37 : vector<288x1xi1>
    %39 = arith.andi %33, %38 : vector<288x1xi1>
    %cst_21 = arith.constant 0.000000e+00 : f32
    %40 = vector.shape_cast %39 : vector<288x1xi1> to vector<288x1xi1>
    %41 = vector.broadcast %40 : vector<288x1xi1> to vector<288x2xi1>
    %42 = vector.broadcast %cst_21 : f32 to vector<288x2xf32>
    %43 = arith.select %41, %27, %42 : vector<288x2xi1>, vector<288x2xf32>
    %c16_i32_22 = arith.constant 16 : i32
    %c0_i32_23 = arith.constant 0 : i32
    %44 = arith.cmpi eq, %c16_i32_22, %c0_i32_23 : i32
    %c1_i32 = arith.constant 1 : i32
    %45 = arith.select %44, %c1_i32, %c16_i32_22 : i32
    %46 = vector.broadcast %45 : i32 to vector<288x1xi32>
    %47 = arith.remsi %28, %46 : vector<288x1xi32>
    %c0_i32_24 = arith.constant 0 : i32
    %48 = vector.broadcast %c0_i32_24 : i32 to vector<288x1xi32>
    %49 = arith.cmpi ne, %47, %48 : vector<288x1xi32>
    %c0_i32_25 = arith.constant 0 : i32
    %50 = vector.broadcast %c0_i32_25 : i32 to vector<288x1xi32>
    %51 = arith.cmpi slt, %47, %50 : vector<288x1xi32>
    %c0_i32_26 = arith.constant 0 : i32
    %52 = arith.cmpi slt, %45, %c0_i32_26 : i32
    %53 = vector.broadcast %52 : i1 to vector<288x1xi1>
    %54 = vector.broadcast %53 : vector<288x1xi1> to vector<288x1xi1>
    %55 = arith.xori %51, %54 : vector<288x1xi1>
    %56 = arith.andi %55, %49 : vector<288x1xi1>
    %57 = vector.broadcast %45 : i32 to vector<288x1xi32>
    %58 = arith.addi %47, %57 : vector<288x1xi32>
    %59 = arith.select %56, %58, %47 : vector<288x1xi1>, vector<288x1xi32>
    %c0_i32_27 = arith.constant 0 : i32
    %60 = vector.broadcast %c0_i32_27 : i32 to vector<288x1xi32>
    %61 = arith.cmpi sgt, %59, %60 : vector<288x1xi32>
    %c1_i32_28 = arith.constant 1 : i32
    %62 = tpu.dynamic_rotate %43 by %c1_i32_28 dim 0 : vector<288x2xf32>, i32 -> vector<288x2xf32>
    %cst_29 = arith.constant 0.000000e+00 : f32
    %63 = vector.shape_cast %61 : vector<288x1xi1> to vector<288x1xi1>
    %64 = vector.broadcast %63 : vector<288x1xi1> to vector<288x2xi1>
    %65 = vector.broadcast %cst_29 : f32 to vector<288x2xf32>
    %66 = arith.select %64, %62, %65 : vector<288x2xi1>, vector<288x2xf32>
    %c15_i32 = arith.constant 15 : i32
    %67 = vector.broadcast %c15_i32 : i32 to vector<288x1xi32>
    %68 = arith.cmpi slt, %59, %67 : vector<288x1xi32>
    %c287_i32 = arith.constant 287 : i32
    %69 = tpu.dynamic_rotate %43 by %c287_i32 dim 0 : vector<288x2xf32>, i32 -> vector<288x2xf32>
    %cst_30 = arith.constant 0.000000e+00 : f32
    %70 = vector.shape_cast %68 : vector<288x1xi1> to vector<288x1xi1>
    %71 = vector.broadcast %70 : vector<288x1xi1> to vector<288x2xi1>
    %72 = vector.broadcast %cst_30 : f32 to vector<288x2xf32>
    %73 = arith.select %71, %69, %72 : vector<288x2xi1>, vector<288x2xf32>
    %74 = vector.extract_strided_slice %66 {offsets = [0, 0], sizes = [256, 2], strides = [1, 1]} : vector<288x2xf32> to vector<256x2xf32>
    %c0_31 = arith.constant 0 : index
    %c0_32 = arith.constant 0 : index
    %c0_33 = arith.constant 0 : index
    %c0_34 = arith.constant 0 : index
    %75 = vector.load %arg7[%c0_31, %c0_32, %c0_33, %c0_34] : memref<3x3x2x4xf32, #tpu.memory_space<vmem>>, vector<1x1x2x4xf32>
    %76 = vector.shape_cast %75 : vector<1x1x2x4xf32> to vector<2x4xf32>
    %cst_35 = arith.constant dense<0.000000e+00> : vector<256x4xf32>
    %77 = tpu.matmul %74, %76, %cst_35 {dimension_numbers = #tpu.dot_dimension_numbers<[1], [0], [0], [1], [0, 0, 1, 1], [], []>} : vector<256x2xf32>, vector<2x4xf32>, vector<256x4xf32> -> vector<256x4xf32>
    %78 = vector.extract_strided_slice %43 {offsets = [0, 0], sizes = [256, 2], strides = [1, 1]} : vector<288x2xf32> to vector<256x2xf32>
    %c0_36 = arith.constant 0 : index
    %c1 = arith.constant 1 : index
    %c0_37 = arith.constant 0 : index
    %c0_38 = arith.constant 0 : index
    %79 = vector.load %arg7[%c0_36, %c1, %c0_37, %c0_38] : memref<3x3x2x4xf32, #tpu.memory_space<vmem>>, vector<1x1x2x4xf32>
    %80 = vector.shape_cast %79 : vector<1x1x2x4xf32> to vector<2x4xf32>
    %cst_39 = arith.constant dense<0.000000e+00> : vector<256x4xf32>
    %81 = tpu.matmul %78, %80, %cst_39 {dimension_numbers = #tpu.dot_dimension_numbers<[1], [0], [0], [1], [0, 0, 1, 1], [], []>} : vector<256x2xf32>, vector<2x4xf32>, vector<256x4xf32> -> vector<256x4xf32>
    %82 = arith.addf %77, %81 : vector<256x4xf32>
    %83 = vector.extract_strided_slice %73 {offsets = [0, 0], sizes = [256, 2], strides = [1, 1]} : vector<288x2xf32> to vector<256x2xf32>
    %c0_40 = arith.constant 0 : index
    %c2 = arith.constant 2 : index
    %c0_41 = arith.constant 0 : index
    %c0_42 = arith.constant 0 : index
    %84 = vector.load %arg7[%c0_40, %c2, %c0_41, %c0_42] : memref<3x3x2x4xf32, #tpu.memory_space<vmem>>, vector<1x1x2x4xf32>
    %85 = vector.shape_cast %84 : vector<1x1x2x4xf32> to vector<2x4xf32>
    %cst_43 = arith.constant dense<0.000000e+00> : vector<256x4xf32>
    %86 = tpu.matmul %83, %85, %cst_43 {dimension_numbers = #tpu.dot_dimension_numbers<[1], [0], [0], [1], [0, 0, 1, 1], [], []>} : vector<256x2xf32>, vector<2x4xf32>, vector<256x4xf32> -> vector<256x4xf32>
    %87 = arith.addf %82, %86 : vector<256x4xf32>
    %88 = vector.extract_strided_slice %66 {offsets = [16, 0], sizes = [256, 2], strides = [1, 1]} : vector<288x2xf32> to vector<256x2xf32>
    %c1_44 = arith.constant 1 : index
    %c0_45 = arith.constant 0 : index
    %c0_46 = arith.constant 0 : index
    %c0_47 = arith.constant 0 : index
    %89 = vector.load %arg7[%c1_44, %c0_45, %c0_46, %c0_47] : memref<3x3x2x4xf32, #tpu.memory_space<vmem>>, vector<1x1x2x4xf32>
    %90 = vector.shape_cast %89 : vector<1x1x2x4xf32> to vector<2x4xf32>
    %cst_48 = arith.constant dense<0.000000e+00> : vector<256x4xf32>
    %91 = tpu.matmul %88, %90, %cst_48 {dimension_numbers = #tpu.dot_dimension_numbers<[1], [0], [0], [1], [0, 0, 1, 1], [], []>} : vector<256x2xf32>, vector<2x4xf32>, vector<256x4xf32> -> vector<256x4xf32>
    %92 = arith.addf %87, %91 : vector<256x4xf32>
    %93 = vector.extract_strided_slice %43 {offsets = [16, 0], sizes = [256, 2], strides = [1, 1]} : vector<288x2xf32> to vector<256x2xf32>
    %c1_49 = arith.constant 1 : index
    %c1_50 = arith.constant 1 : index
    %c0_51 = arith.constant 0 : index
    %c0_52 = arith.constant 0 : index
    %94 = vector.load %arg7[%c1_49, %c1_50, %c0_51, %c0_52] : memref<3x3x2x4xf32, #tpu.memory_space<vmem>>, vector<1x1x2x4xf32>
    %95 = vector.shape_cast %94 : vector<1x1x2x4xf32> to vector<2x4xf32>
    %cst_53 = arith.constant dense<0.000000e+00> : vector<256x4xf32>
    %96 = tpu.matmul %93, %95, %cst_53 {dimension_numbers = #tpu.dot_dimension_numbers<[1], [0], [0], [1], [0, 0, 1, 1], [], []>} : vector<256x2xf32>, vector<2x4xf32>, vector<256x4xf32> -> vector<256x4xf32>
    %97 = arith.addf %92, %96 : vector<256x4xf32>
    %98 = vector.extract_strided_slice %73 {offsets = [16, 0], sizes = [256, 2], strides = [1, 1]} : vector<288x2xf32> to vector<256x2xf32>
    %c1_54 = arith.constant 1 : index
    %c2_55 = arith.constant 2 : index
    %c0_56 = arith.constant 0 : index
    %c0_57 = arith.constant 0 : index
    %99 = vector.load %arg7[%c1_54, %c2_55, %c0_56, %c0_57] : memref<3x3x2x4xf32, #tpu.memory_space<vmem>>, vector<1x1x2x4xf32>
    %100 = vector.shape_cast %99 : vector<1x1x2x4xf32> to vector<2x4xf32>
    %cst_58 = arith.constant dense<0.000000e+00> : vector<256x4xf32>
    %101 = tpu.matmul %98, %100, %cst_58 {dimension_numbers = #tpu.dot_dimension_numbers<[1], [0], [0], [1], [0, 0, 1, 1], [], []>} : vector<256x2xf32>, vector<2x4xf32>, vector<256x4xf32> -> vector<256x4xf32>
    %102 = arith.addf %97, %101 : vector<256x4xf32>
    %103 = vector.extract_strided_slice %66 {offsets = [32, 0], sizes = [256, 2], strides = [1, 1]} : vector<288x2xf32> to vector<256x2xf32>
    %c2_59 = arith.constant 2 : index
    %c0_60 = arith.constant 0 : index
    %c0_61 = arith.constant 0 : index
    %c0_62 = arith.constant 0 : index
    %104 = vector.load %arg7[%c2_59, %c0_60, %c0_61, %c0_62] : memref<3x3x2x4xf32, #tpu.memory_space<vmem>>, vector<1x1x2x4xf32>
    %105 = vector.shape_cast %104 : vector<1x1x2x4xf32> to vector<2x4xf32>
    %cst_63 = arith.constant dense<0.000000e+00> : vector<256x4xf32>
    %106 = tpu.matmul %103, %105, %cst_63 {dimension_numbers = #tpu.dot_dimension_numbers<[1], [0], [0], [1], [0, 0, 1, 1], [], []>} : vector<256x2xf32>, vector<2x4xf32>, vector<256x4xf32> -> vector<256x4xf32>
    %107 = arith.addf %102, %106 : vector<256x4xf32>
    %108 = vector.extract_strided_slice %43 {offsets = [32, 0], sizes = [256, 2], strides = [1, 1]} : vector<288x2xf32> to vector<256x2xf32>
    %c2_64 = arith.constant 2 : index
    %c1_65 = arith.constant 1 : index
    %c0_66 = arith.constant 0 : index
    %c0_67 = arith.constant 0 : index
    %109 = vector.load %arg7[%c2_64, %c1_65, %c0_66, %c0_67] : memref<3x3x2x4xf32, #tpu.memory_space<vmem>>, vector<1x1x2x4xf32>
    %110 = vector.shape_cast %109 : vector<1x1x2x4xf32> to vector<2x4xf32>
    %cst_68 = arith.constant dense<0.000000e+00> : vector<256x4xf32>
    %111 = tpu.matmul %108, %110, %cst_68 {dimension_numbers = #tpu.dot_dimension_numbers<[1], [0], [0], [1], [0, 0, 1, 1], [], []>} : vector<256x2xf32>, vector<2x4xf32>, vector<256x4xf32> -> vector<256x4xf32>
    %112 = arith.addf %107, %111 : vector<256x4xf32>
    %113 = vector.extract_strided_slice %73 {offsets = [32, 0], sizes = [256, 2], strides = [1, 1]} : vector<288x2xf32> to vector<256x2xf32>
    %c2_69 = arith.constant 2 : index
    %c2_70 = arith.constant 2 : index
    %c0_71 = arith.constant 0 : index
    %c0_72 = arith.constant 0 : index
    %114 = vector.load %arg7[%c2_69, %c2_70, %c0_71, %c0_72] : memref<3x3x2x4xf32, #tpu.memory_space<vmem>>, vector<1x1x2x4xf32>
    %115 = vector.shape_cast %114 : vector<1x1x2x4xf32> to vector<2x4xf32>
    %cst_73 = arith.constant dense<0.000000e+00> : vector<256x4xf32>
    %116 = tpu.matmul %113, %115, %cst_73 {dimension_numbers = #tpu.dot_dimension_numbers<[1], [0], [0], [1], [0, 0, 1, 1], [], []>} : vector<256x2xf32>, vector<2x4xf32>, vector<256x4xf32> -> vector<256x4xf32>
    %117 = arith.addf %112, %116 : vector<256x4xf32>
    %c0_74 = arith.constant 0 : index
    %c0_75 = arith.constant 0 : index
    %118 = vector.load %arg8[%c0_74, %c0_75] : memref<1x4xf32, #tpu.memory_space<vmem>>, vector<1x4xf32>
    %119 = vector.broadcast %118 : vector<1x4xf32> to vector<256x4xf32>
    %120 = arith.addf %117, %119 : vector<256x4xf32>
    %cst_76 = arith.constant 2.000000e+01 : f32
    %121 = vector.broadcast %cst_76 : f32 to vector<256x4xf32>
    %122 = arith.minimumf %120, %121 : vector<256x4xf32>
    %123 = math.exp %122 : vector<256x4xf32>
    %cst_77 = arith.constant 1.000000e+00 : f32
    %124 = vector.broadcast %cst_77 : f32 to vector<256x4xf32>
    %125 = arith.addf %124, %123 : vector<256x4xf32>
    %cst_78 = arith.constant 1.000000e+00 : f32
    %126 = vector.broadcast %cst_78 : f32 to vector<256x4xf32>
    %127 = arith.addf %126, %123 : vector<256x4xf32>
    %128 = arith.mulf %125, %127 : vector<256x4xf32>
    %cst_79 = arith.constant 1.000000e+00 : f32
    %129 = vector.broadcast %cst_79 : f32 to vector<256x4xf32>
    %130 = arith.subf %128, %129 : vector<256x4xf32>
    %131 = arith.mulf %120, %130 : vector<256x4xf32>
    %cst_80 = arith.constant 1.000000e+00 : f32
    %132 = vector.broadcast %cst_80 : f32 to vector<256x4xf32>
    %133 = arith.addf %128, %132 : vector<256x4xf32>
    %134 = tpu.reciprocal %133 {approx = true} : vector<256x4xf32> -> vector<256x4xf32>
    %135 = arith.mulf %131, %134 : vector<256x4xf32>
    %136 = vector.shape_cast %135 : vector<256x4xf32> to vector<16x16x4xf32>
    %c0_81 = arith.constant 0 : index
    %c0_82 = arith.constant 0 : index
    %c0_83 = arith.constant 0 : index
    %c0_84 = arith.constant 0 : index
    %137 = vector.load %arg2[%c0_81, %c0_82, %c0_83, %c0_84] : memref<1x16x16x4xf32, #tpu.memory_space<vmem>>, vector<1x16x16x4xf32>
    %138 = vector.shape_cast %137 : vector<1x16x16x4xf32> to vector<16x16x4xf32>
    %139 = arith.addf %136, %138 : vector<16x16x4xf32>
    %c0_85 = arith.constant 0 : index
    %c0_86 = arith.constant 0 : index
    %c0_87 = arith.constant 0 : index
    %c0_88 = arith.constant 0 : index
    %140 = vector.load %arg9[%c0_85, %c0_86, %c0_87, %c0_88] : memref<1x16x16x4xf32, #tpu.memory_space<vmem>>, vector<1x16x16x4xf32>
    %141 = vector.shape_cast %140 : vector<1x16x16x4xf32> to vector<16x16x4xf32>
    %142 = vector.shape_cast %139 : vector<16x16x4xf32> to vector<1x16x16x4xf32>
    tpu.vector_store %arg9[%c0_85, %c0_86, %c0_87, %c0_88], %142 {strides = array<i32>} : memref<1x16x16x4xf32, #tpu.memory_space<vmem>>, vector<1x16x16x4xf32>,
    return
  }
  func.func @transform_0(%arg0: i32, %arg1: i32) -> (i32, i32, i32, i32) {
    %c0_i32 = arith.constant 0 : i32
    %c0_i32_0 = arith.constant 0 : i32
    %c0_i32_1 = arith.constant 0 : i32
    return %arg0, %arg1, %c0_i32, %c0_i32_0 : i32, i32, i32, i32
  }
  func.func @transform_1(%arg0: i32, %arg1: i32) -> (i32, i32, i32, i32) {
    %c16_i32 = arith.constant 16 : i32
    %0 = arith.muli %arg1, %c16_i32 : i32
    %c1_i32 = arith.constant 1 : i32
    %1 = arith.subi %0, %c1_i32 : i32
    %c0_i32 = arith.constant 0 : i32
    %2 = arith.maxsi %1, %c0_i32 : i32
    %c0_i32_0 = arith.constant 0 : i32
    %c0_i32_1 = arith.constant 0 : i32
    %c0_i32_2 = arith.constant 0 : i32
    return %arg0, %2, %c0_i32_0, %c0_i32_1 : i32, i32, i32, i32
  }
  func.func @transform_2(%arg0: i32, %arg1: i32) -> (i32, i32, i32, i32) {
    %c1_i32 = arith.constant 1 : i32
    %0 = arith.addi %arg1, %c1_i32 : i32
    %c16_i32 = arith.constant 16 : i32
    %1 = arith.muli %0, %c16_i32 : i32
    %c15_i32 = arith.constant 15 : i32
    %2 = arith.minsi %1, %c15_i32 : i32
    %c0_i32 = arith.constant 0 : i32
    %c0_i32_0 = arith.constant 0 : i32
    %c0_i32_1 = arith.constant 0 : i32
    return %arg0, %2, %c0_i32, %c0_i32_0 : i32, i32, i32, i32
  }
  func.func @transform_3(%arg0: i32, %arg1: i32) -> (i32, i32) {
    %c0_i32 = arith.constant 0 : i32
    %c0_i32_0 = arith.constant 0 : i32
    %c0_i32_1 = arith.constant 0 : i32
    return %c0_i32, %c0_i32_0 : i32, i32
  }
  func.func @transform_4(%arg0: i32, %arg1: i32) -> (i32, i32) {
    %c0_i32 = arith.constant 0 : i32
    %c0_i32_0 = arith.constant 0 : i32
    %c0_i32_1 = arith.constant 0 : i32
    return %c0_i32, %c0_i32_0 : i32, i32
  }
  func.func @transform_5(%arg0: i32, %arg1: i32) -> (i32, i32, i32, i32) {
    %c0_i32 = arith.constant 0 : i32
    %c0_i32_0 = arith.constant 0 : i32
    %c0_i32_1 = arith.constant 0 : i32
    %c0_i32_2 = arith.constant 0 : i32
    %c0_i32_3 = arith.constant 0 : i32
    return %c0_i32, %c0_i32_0, %c0_i32_1, %c0_i32_2 : i32, i32, i32, i32
  }
  func.func @transform_6(%arg0: i32, %arg1: i32) -> (i32, i32) {
    %c0_i32 = arith.constant 0 : i32
    %c0_i32_0 = arith.constant 0 : i32
    %c0_i32_1 = arith.constant 0 : i32
    return %c0_i32, %c0_i32_0 : i32, i32
  }
  func.func @transform_7(%arg0: i32, %arg1: i32) -> (i32, i32, i32, i32) {
    %c0_i32 = arith.constant 0 : i32
    %c0_i32_0 = arith.constant 0 : i32
    %c0_i32_1 = arith.constant 0 : i32
    return %arg0, %arg1, %c0_i32, %c0_i32_0 : i32, i32, i32, i32
  }
}

module attributes {stable_mosaic.version = 11 : i64} {
  func.func @kernel(%arg0: i32, %arg1: i32, %arg2: memref<1x16x16x4xf32, #tpu.memory_space<vmem>>, %arg3: memref<1x1x16x4xf32, #tpu.memory_space<vmem>>, %arg4: memref<1x1x16x4xf32, #tpu.memory_space<vmem>>, %arg5: memref<4x2xf32, #tpu.memory_space<vmem>>, %arg6: memref<1x2xf32, #tpu.memory_space<vmem>>, %arg7: memref<3x3x2x4xf32, #tpu.memory_space<vmem>>, %arg8: memref<1x4xf32, #tpu.memory_space<vmem>>, %arg9: memref<1x16x16x4xf32, #tpu.memory_space<vmem>>) attributes {dimension_semantics = [#tpu.dimension_semantics<parallel>, #tpu.dimension_semantics<parallel>], iteration_bounds = array<i64: 2, 1>, scalar_prefetch = 0 : i64, scratch_operands = 0 : i64, tpu.core_type = #tpu.core_type<tc>, window_params = [{transform_indices = @transform_0, window_bounds = array<i64: 1, 16, 16, 4>}, {transform_indices = @transform_1, window_bounds = array<i64: 1, 1, 16, 4>}, {transform_indices = @transform_2, window_bounds = array<i64: 1, 1, 16, 4>}, {pipeline_mode = #tpu.pipeline_mode<synchronous>, transform_indices = @transform_3, window_bounds = array<i64: 4, 2>}, {pipeline_mode = #tpu.pipeline_mode<synchronous>, transform_indices = @transform_4, window_bounds = array<i64: 1, 2>}, {pipeline_mode = #tpu.pipeline_mode<synchronous>, transform_indices = @transform_5, window_bounds = array<i64: 3, 3, 2, 4>}, {pipeline_mode = #tpu.pipeline_mode<synchronous>, transform_indices = @transform_6, window_bounds = array<i64: 1, 4>}, {transform_indices = @transform_7, window_bounds = array<i64: 1, 16, 16, 4>}]} {
    %c0 = arith.constant 0 : index
    %c0_0 = arith.constant 0 : index
    %c0_1 = arith.constant 0 : index
    %c0_2 = arith.constant 0 : index
    %0 = vector.load %arg3[%c0, %c0_0, %c0_1, %c0_2] : memref<1x1x16x4xf32, #tpu.memory_space<vmem>>, vector<1x1x16x4xf32>
    %1 = vector.shape_cast %0 : vector<1x1x16x4xf32> to vector<1x16x4xf32>
    %c0_3 = arith.constant 0 : index
    %c0_4 = arith.constant 0 : index
    %c0_5 = arith.constant 0 : index
    %c0_6 = arith.constant 0 : index
    %2 = vector.load %arg2[%c0_3, %c0_4, %c0_5, %c0_6] : memref<1x16x16x4xf32, #tpu.memory_space<vmem>>, vector<1x16x16x4xf32>
    %3 = vector.shape_cast %2 : vector<1x16x16x4xf32> to vector<16x16x4xf32>
    %c0_7 = arith.constant 0 : index
    %c0_8 = arith.constant 0 : index
    %c0_9 = arith.constant 0 : index
    %c0_10 = arith.constant 0 : index
    %4 = vector.load %arg4[%c0_7, %c0_8, %c0_9, %c0_10] : memref<1x1x16x4xf32, #tpu.memory_space<vmem>>, vector<1x1x16x4xf32>
    %5 = vector.shape_cast %4 : vector<1x1x16x4xf32> to vector<1x16x4xf32>
    %6 = tpu.concatenate %1, %3, %5 in 0 : vector<1x16x4xf32>, vector<16x16x4xf32>, vector<1x16x4xf32> -> vector<18x16x4xf32>
    %7 = vector.shape_cast %6 : vector<18x16x4xf32> to vector<288x4xf32>
    %c0_11 = arith.constant 0 : index
    %c0_12 = arith.constant 0 : index
    %8 = vector.load %arg5[%c0_11, %c0_12] : memref<4x2xf32, #tpu.memory_space<vmem>>, vector<4x2xf32>
    %cst = arith.constant dense<0.000000e+00> : vector<288x2xf32>
    %9 = tpu.matmul %7, %8, %cst {dimension_numbers = #tpu.dot_dimension_numbers<[1], [0], [0], [1], [0, 0, 1, 1], [], []>} : vector<288x4xf32>, vector<4x2xf32>, vector<288x2xf32> -> vector<288x2xf32>
    %c0_13 = arith.constant 0 : index
    %c0_14 = arith.constant 0 : index
    %10 = vector.load %arg6[%c0_13, %c0_14] : memref<1x2xf32, #tpu.memory_space<vmem>>, vector<1x2xf32>
    %11 = vector.broadcast %10 : vector<1x2xf32> to vector<288x2xf32>
    %12 = arith.addf %9, %11 : vector<288x2xf32>
    %cst_15 = arith.constant 2.000000e+01 : f32
    %13 = vector.broadcast %cst_15 : f32 to vector<288x2xf32>
    %14 = arith.minimumf %12, %13 : vector<288x2xf32>
    %15 = math.exp %14 : vector<288x2xf32>
    %cst_16 = arith.constant 1.000000e+00 : f32
    %16 = vector.broadcast %cst_16 : f32 to vector<288x2xf32>
    %17 = arith.addf %16, %15 : vector<288x2xf32>
    %cst_17 = arith.constant 1.000000e+00 : f32
    %18 = vector.broadcast %cst_17 : f32 to vector<288x2xf32>
    %19 = arith.addf %18, %15 : vector<288x2xf32>
    %20 = arith.mulf %17, %19 : vector<288x2xf32>
    %cst_18 = arith.constant 1.000000e+00 : f32
    %21 = vector.broadcast %cst_18 : f32 to vector<288x2xf32>
    %22 = arith.subf %20, %21 : vector<288x2xf32>
    %23 = arith.mulf %12, %22 : vector<288x2xf32>
    %cst_19 = arith.constant 1.000000e+00 : f32
    %24 = vector.broadcast %cst_19 : f32 to vector<288x2xf32>
    %25 = arith.addf %20, %24 : vector<288x2xf32>
    %26 = tpu.reciprocal %25 {approx = true} : vector<288x2xf32> -> vector<288x2xf32>
    %27 = arith.mulf %23, %26 : vector<288x2xf32>
    %28 = tpu.iota {dimensions = array<i32: 0>} : vector<288x1xi32>
    %c16_i32 = arith.constant 16 : i32
    %29 = vector.broadcast %c16_i32 : i32 to vector<288x1xi32>
    %30 = arith.cmpi sge, %28, %29 : vector<288x1xi32>
    %c0_i32 = arith.constant 0 : i32
    %31 = arith.cmpi ne, %arg1, %c0_i32 : i32
    %32 = vector.broadcast %31 : i1 to vector<288x1xi1>
    %33 = arith.ori %30, %32 : vector<288x1xi1>
    %c272_i32 = arith.constant 272 : i32
    %34 = vector.broadcast %c272_i32 : i32 to vector<288x1xi32>
    %35 = arith.cmpi slt, %28, %34 : vector<288x1xi32>
    %c0_i32_20 = arith.constant 0 : i32
    %36 = arith.cmpi ne, %arg1, %c0_i32_20 : i32
    %37 = vector.broadcast %36 : i1 to vector<288x1xi1>
    %38 = arith.ori %35, %37 : vector<288x1xi1>
    %39 = arith.andi %33, %38 : vector<288x1xi1>
    %cst_21 = arith.constant 0.000000e+00 : f32
    %40 = vector.shape_cast %39 : vector<288x1xi1> to vector<288x1xi1>
    %41 = vector.broadcast %40 : vector<288x1xi1> to vector<288x2xi1>
    %42 = vector.broadcast %cst_21 : f32 to vector<288x2xf32>
    %43 = arith.select %41, %27, %42 : vector<288x2xi1>, vector<288x2xf32>
    %44 = vector.shape_cast %43 : vector<288x2xf32> to vector<18x16x2xf32>
    %cst_22 = arith.constant 0.000000e+00 : f32
    %45 = vector.broadcast %cst_22 : f32 to vector<18x1x2xf32>
    %46 = tpu.concatenate %45, %44, %45 in 1 : vector<18x1x2xf32>, vector<18x16x2xf32>, vector<18x1x2xf32> -> vector<18x18x2xf32>
    %47 = vector.extract_strided_slice %46 {offsets = [0, 0, 0], sizes = [18, 16, 2], strides = [1, 1, 1]} : vector<18x18x2xf32> to vector<18x16x2xf32>
    %48 = vector.shape_cast %47 : vector<18x16x2xf32> to vector<288x2xf32>
    %49 = vector.extract_strided_slice %46 {offsets = [0, 1, 0], sizes = [18, 16, 2], strides = [1, 1, 1]} : vector<18x18x2xf32> to vector<18x16x2xf32>
    %50 = vector.shape_cast %49 : vector<18x16x2xf32> to vector<288x2xf32>
    %51 = vector.extract_strided_slice %46 {offsets = [0, 2, 0], sizes = [18, 16, 2], strides = [1, 1, 1]} : vector<18x18x2xf32> to vector<18x16x2xf32>
    %52 = vector.shape_cast %51 : vector<18x16x2xf32> to vector<288x2xf32>
    %53 = vector.extract_strided_slice %48 {offsets = [0, 0], sizes = [256, 2], strides = [1, 1]} : vector<288x2xf32> to vector<256x2xf32>
    %c0_23 = arith.constant 0 : index
    %c0_24 = arith.constant 0 : index
    %c0_25 = arith.constant 0 : index
    %c0_26 = arith.constant 0 : index
    %54 = vector.load %arg7[%c0_23, %c0_24, %c0_25, %c0_26] : memref<3x3x2x4xf32, #tpu.memory_space<vmem>>, vector<1x1x2x4xf32>
    %55 = vector.shape_cast %54 : vector<1x1x2x4xf32> to vector<2x4xf32>
    %cst_27 = arith.constant dense<0.000000e+00> : vector<256x4xf32>
    %56 = tpu.matmul %53, %55, %cst_27 {dimension_numbers = #tpu.dot_dimension_numbers<[1], [0], [0], [1], [0, 0, 1, 1], [], []>} : vector<256x2xf32>, vector<2x4xf32>, vector<256x4xf32> -> vector<256x4xf32>
    %57 = vector.extract_strided_slice %50 {offsets = [0, 0], sizes = [256, 2], strides = [1, 1]} : vector<288x2xf32> to vector<256x2xf32>
    %c0_28 = arith.constant 0 : index
    %c1 = arith.constant 1 : index
    %c0_29 = arith.constant 0 : index
    %c0_30 = arith.constant 0 : index
    %58 = vector.load %arg7[%c0_28, %c1, %c0_29, %c0_30] : memref<3x3x2x4xf32, #tpu.memory_space<vmem>>, vector<1x1x2x4xf32>
    %59 = vector.shape_cast %58 : vector<1x1x2x4xf32> to vector<2x4xf32>
    %cst_31 = arith.constant dense<0.000000e+00> : vector<256x4xf32>
    %60 = tpu.matmul %57, %59, %cst_31 {dimension_numbers = #tpu.dot_dimension_numbers<[1], [0], [0], [1], [0, 0, 1, 1], [], []>} : vector<256x2xf32>, vector<2x4xf32>, vector<256x4xf32> -> vector<256x4xf32>
    %61 = arith.addf %56, %60 : vector<256x4xf32>
    %62 = vector.extract_strided_slice %52 {offsets = [0, 0], sizes = [256, 2], strides = [1, 1]} : vector<288x2xf32> to vector<256x2xf32>
    %c0_32 = arith.constant 0 : index
    %c2 = arith.constant 2 : index
    %c0_33 = arith.constant 0 : index
    %c0_34 = arith.constant 0 : index
    %63 = vector.load %arg7[%c0_32, %c2, %c0_33, %c0_34] : memref<3x3x2x4xf32, #tpu.memory_space<vmem>>, vector<1x1x2x4xf32>
    %64 = vector.shape_cast %63 : vector<1x1x2x4xf32> to vector<2x4xf32>
    %cst_35 = arith.constant dense<0.000000e+00> : vector<256x4xf32>
    %65 = tpu.matmul %62, %64, %cst_35 {dimension_numbers = #tpu.dot_dimension_numbers<[1], [0], [0], [1], [0, 0, 1, 1], [], []>} : vector<256x2xf32>, vector<2x4xf32>, vector<256x4xf32> -> vector<256x4xf32>
    %66 = arith.addf %61, %65 : vector<256x4xf32>
    %67 = vector.extract_strided_slice %48 {offsets = [16, 0], sizes = [256, 2], strides = [1, 1]} : vector<288x2xf32> to vector<256x2xf32>
    %c1_36 = arith.constant 1 : index
    %c0_37 = arith.constant 0 : index
    %c0_38 = arith.constant 0 : index
    %c0_39 = arith.constant 0 : index
    %68 = vector.load %arg7[%c1_36, %c0_37, %c0_38, %c0_39] : memref<3x3x2x4xf32, #tpu.memory_space<vmem>>, vector<1x1x2x4xf32>
    %69 = vector.shape_cast %68 : vector<1x1x2x4xf32> to vector<2x4xf32>
    %cst_40 = arith.constant dense<0.000000e+00> : vector<256x4xf32>
    %70 = tpu.matmul %67, %69, %cst_40 {dimension_numbers = #tpu.dot_dimension_numbers<[1], [0], [0], [1], [0, 0, 1, 1], [], []>} : vector<256x2xf32>, vector<2x4xf32>, vector<256x4xf32> -> vector<256x4xf32>
    %71 = arith.addf %66, %70 : vector<256x4xf32>
    %72 = vector.extract_strided_slice %50 {offsets = [16, 0], sizes = [256, 2], strides = [1, 1]} : vector<288x2xf32> to vector<256x2xf32>
    %c1_41 = arith.constant 1 : index
    %c1_42 = arith.constant 1 : index
    %c0_43 = arith.constant 0 : index
    %c0_44 = arith.constant 0 : index
    %73 = vector.load %arg7[%c1_41, %c1_42, %c0_43, %c0_44] : memref<3x3x2x4xf32, #tpu.memory_space<vmem>>, vector<1x1x2x4xf32>
    %74 = vector.shape_cast %73 : vector<1x1x2x4xf32> to vector<2x4xf32>
    %cst_45 = arith.constant dense<0.000000e+00> : vector<256x4xf32>
    %75 = tpu.matmul %72, %74, %cst_45 {dimension_numbers = #tpu.dot_dimension_numbers<[1], [0], [0], [1], [0, 0, 1, 1], [], []>} : vector<256x2xf32>, vector<2x4xf32>, vector<256x4xf32> -> vector<256x4xf32>
    %76 = arith.addf %71, %75 : vector<256x4xf32>
    %77 = vector.extract_strided_slice %52 {offsets = [16, 0], sizes = [256, 2], strides = [1, 1]} : vector<288x2xf32> to vector<256x2xf32>
    %c1_46 = arith.constant 1 : index
    %c2_47 = arith.constant 2 : index
    %c0_48 = arith.constant 0 : index
    %c0_49 = arith.constant 0 : index
    %78 = vector.load %arg7[%c1_46, %c2_47, %c0_48, %c0_49] : memref<3x3x2x4xf32, #tpu.memory_space<vmem>>, vector<1x1x2x4xf32>
    %79 = vector.shape_cast %78 : vector<1x1x2x4xf32> to vector<2x4xf32>
    %cst_50 = arith.constant dense<0.000000e+00> : vector<256x4xf32>
    %80 = tpu.matmul %77, %79, %cst_50 {dimension_numbers = #tpu.dot_dimension_numbers<[1], [0], [0], [1], [0, 0, 1, 1], [], []>} : vector<256x2xf32>, vector<2x4xf32>, vector<256x4xf32> -> vector<256x4xf32>
    %81 = arith.addf %76, %80 : vector<256x4xf32>
    %82 = vector.extract_strided_slice %48 {offsets = [32, 0], sizes = [256, 2], strides = [1, 1]} : vector<288x2xf32> to vector<256x2xf32>
    %c2_51 = arith.constant 2 : index
    %c0_52 = arith.constant 0 : index
    %c0_53 = arith.constant 0 : index
    %c0_54 = arith.constant 0 : index
    %83 = vector.load %arg7[%c2_51, %c0_52, %c0_53, %c0_54] : memref<3x3x2x4xf32, #tpu.memory_space<vmem>>, vector<1x1x2x4xf32>
    %84 = vector.shape_cast %83 : vector<1x1x2x4xf32> to vector<2x4xf32>
    %cst_55 = arith.constant dense<0.000000e+00> : vector<256x4xf32>
    %85 = tpu.matmul %82, %84, %cst_55 {dimension_numbers = #tpu.dot_dimension_numbers<[1], [0], [0], [1], [0, 0, 1, 1], [], []>} : vector<256x2xf32>, vector<2x4xf32>, vector<256x4xf32> -> vector<256x4xf32>
    %86 = arith.addf %81, %85 : vector<256x4xf32>
    %87 = vector.extract_strided_slice %50 {offsets = [32, 0], sizes = [256, 2], strides = [1, 1]} : vector<288x2xf32> to vector<256x2xf32>
    %c2_56 = arith.constant 2 : index
    %c1_57 = arith.constant 1 : index
    %c0_58 = arith.constant 0 : index
    %c0_59 = arith.constant 0 : index
    %88 = vector.load %arg7[%c2_56, %c1_57, %c0_58, %c0_59] : memref<3x3x2x4xf32, #tpu.memory_space<vmem>>, vector<1x1x2x4xf32>
    %89 = vector.shape_cast %88 : vector<1x1x2x4xf32> to vector<2x4xf32>
    %cst_60 = arith.constant dense<0.000000e+00> : vector<256x4xf32>
    %90 = tpu.matmul %87, %89, %cst_60 {dimension_numbers = #tpu.dot_dimension_numbers<[1], [0], [0], [1], [0, 0, 1, 1], [], []>} : vector<256x2xf32>, vector<2x4xf32>, vector<256x4xf32> -> vector<256x4xf32>
    %91 = arith.addf %86, %90 : vector<256x4xf32>
    %92 = vector.extract_strided_slice %52 {offsets = [32, 0], sizes = [256, 2], strides = [1, 1]} : vector<288x2xf32> to vector<256x2xf32>
    %c2_61 = arith.constant 2 : index
    %c2_62 = arith.constant 2 : index
    %c0_63 = arith.constant 0 : index
    %c0_64 = arith.constant 0 : index
    %93 = vector.load %arg7[%c2_61, %c2_62, %c0_63, %c0_64] : memref<3x3x2x4xf32, #tpu.memory_space<vmem>>, vector<1x1x2x4xf32>
    %94 = vector.shape_cast %93 : vector<1x1x2x4xf32> to vector<2x4xf32>
    %cst_65 = arith.constant dense<0.000000e+00> : vector<256x4xf32>
    %95 = tpu.matmul %92, %94, %cst_65 {dimension_numbers = #tpu.dot_dimension_numbers<[1], [0], [0], [1], [0, 0, 1, 1], [], []>} : vector<256x2xf32>, vector<2x4xf32>, vector<256x4xf32> -> vector<256x4xf32>
    %96 = arith.addf %91, %95 : vector<256x4xf32>
    %c0_66 = arith.constant 0 : index
    %c0_67 = arith.constant 0 : index
    %97 = vector.load %arg8[%c0_66, %c0_67] : memref<1x4xf32, #tpu.memory_space<vmem>>, vector<1x4xf32>
    %98 = vector.broadcast %97 : vector<1x4xf32> to vector<256x4xf32>
    %99 = arith.addf %96, %98 : vector<256x4xf32>
    %cst_68 = arith.constant 2.000000e+01 : f32
    %100 = vector.broadcast %cst_68 : f32 to vector<256x4xf32>
    %101 = arith.minimumf %99, %100 : vector<256x4xf32>
    %102 = math.exp %101 : vector<256x4xf32>
    %cst_69 = arith.constant 1.000000e+00 : f32
    %103 = vector.broadcast %cst_69 : f32 to vector<256x4xf32>
    %104 = arith.addf %103, %102 : vector<256x4xf32>
    %cst_70 = arith.constant 1.000000e+00 : f32
    %105 = vector.broadcast %cst_70 : f32 to vector<256x4xf32>
    %106 = arith.addf %105, %102 : vector<256x4xf32>
    %107 = arith.mulf %104, %106 : vector<256x4xf32>
    %cst_71 = arith.constant 1.000000e+00 : f32
    %108 = vector.broadcast %cst_71 : f32 to vector<256x4xf32>
    %109 = arith.subf %107, %108 : vector<256x4xf32>
    %110 = arith.mulf %99, %109 : vector<256x4xf32>
    %cst_72 = arith.constant 1.000000e+00 : f32
    %111 = vector.broadcast %cst_72 : f32 to vector<256x4xf32>
    %112 = arith.addf %107, %111 : vector<256x4xf32>
    %113 = tpu.reciprocal %112 {approx = true} : vector<256x4xf32> -> vector<256x4xf32>
    %114 = arith.mulf %110, %113 : vector<256x4xf32>
    %115 = vector.shape_cast %114 : vector<256x4xf32> to vector<16x16x4xf32>
    %c0_73 = arith.constant 0 : index
    %c0_74 = arith.constant 0 : index
    %c0_75 = arith.constant 0 : index
    %c0_76 = arith.constant 0 : index
    %116 = vector.load %arg2[%c0_73, %c0_74, %c0_75, %c0_76] : memref<1x16x16x4xf32, #tpu.memory_space<vmem>>, vector<1x16x16x4xf32>
    %117 = vector.shape_cast %116 : vector<1x16x16x4xf32> to vector<16x16x4xf32>
    %118 = arith.addf %115, %117 : vector<16x16x4xf32>
    %c0_77 = arith.constant 0 : index
    %c0_78 = arith.constant 0 : index
    %c0_79 = arith.constant 0 : index
    %c0_80 = arith.constant 0 : index
    %119 = vector.load %arg9[%c0_77, %c0_78, %c0_79, %c0_80] : memref<1x16x16x4xf32, #tpu.memory_space<vmem>>, vector<1x16x16x4xf32>
    %120 = vector.shape_cast %119 : vector<1x16x16x4xf32> to vector<16x16x4xf32>
    %121 = vector.shape_cast %118 : vector<16x16x4xf32> to vector<1x16x16x4xf32>
    tpu.vector_store %arg9[%c0_77, %c0_78, %c0_79, %c0_80], %121 {strides = array<i32>} : memref<1x16x16x4xf32, #tpu.memory_space<vmem>>, vector<1x16x16x4xf32>,
    return
  }
  func.func @transform_0(%arg0: i32, %arg1: i32) -> (i32, i32, i32, i32) {
    %c0_i32 = arith.constant 0 : i32
    %c0_i32_0 = arith.constant 0 : i32
    %c0_i32_1 = arith.constant 0 : i32
    return %arg0, %arg1, %c0_i32, %c0_i32_0 : i32, i32, i32, i32
  }
  func.func @transform_1(%arg0: i32, %arg1: i32) -> (i32, i32, i32, i32) {
    %c16_i32 = arith.constant 16 : i32
    %0 = arith.muli %arg1, %c16_i32 : i32
    %c1_i32 = arith.constant 1 : i32
    %1 = arith.subi %0, %c1_i32 : i32
    %c0_i32 = arith.constant 0 : i32
    %2 = arith.maxsi %1, %c0_i32 : i32
    %c0_i32_0 = arith.constant 0 : i32
    %c0_i32_1 = arith.constant 0 : i32
    %c0_i32_2 = arith.constant 0 : i32
    return %arg0, %2, %c0_i32_0, %c0_i32_1 : i32, i32, i32, i32
  }
  func.func @transform_2(%arg0: i32, %arg1: i32) -> (i32, i32, i32, i32) {
    %c1_i32 = arith.constant 1 : i32
    %0 = arith.addi %arg1, %c1_i32 : i32
    %c16_i32 = arith.constant 16 : i32
    %1 = arith.muli %0, %c16_i32 : i32
    %c15_i32 = arith.constant 15 : i32
    %2 = arith.minsi %1, %c15_i32 : i32
    %c0_i32 = arith.constant 0 : i32
    %c0_i32_0 = arith.constant 0 : i32
    %c0_i32_1 = arith.constant 0 : i32
    return %arg0, %2, %c0_i32, %c0_i32_0 : i32, i32, i32, i32
  }
  func.func @transform_3(%arg0: i32, %arg1: i32) -> (i32, i32) {
    %c0_i32 = arith.constant 0 : i32
    %c0_i32_0 = arith.constant 0 : i32
    %c0_i32_1 = arith.constant 0 : i32
    return %c0_i32, %c0_i32_0 : i32, i32
  }
  func.func @transform_4(%arg0: i32, %arg1: i32) -> (i32, i32) {
    %c0_i32 = arith.constant 0 : i32
    %c0_i32_0 = arith.constant 0 : i32
    %c0_i32_1 = arith.constant 0 : i32
    return %c0_i32, %c0_i32_0 : i32, i32
  }
  func.func @transform_5(%arg0: i32, %arg1: i32) -> (i32, i32, i32, i32) {
    %c0_i32 = arith.constant 0 : i32
    %c0_i32_0 = arith.constant 0 : i32
    %c0_i32_1 = arith.constant 0 : i32
    %c0_i32_2 = arith.constant 0 : i32
    %c0_i32_3 = arith.constant 0 : i32
    return %c0_i32, %c0_i32_0, %c0_i32_1, %c0_i32_2 : i32, i32, i32, i32
  }
  func.func @transform_6(%arg0: i32, %arg1: i32) -> (i32, i32) {
    %c0_i32 = arith.constant 0 : i32
    %c0_i32_0 = arith.constant 0 : i32
    %c0_i32_1 = arith.constant 0 : i32
    return %c0_i32, %c0_i32_0 : i32, i32
  }
  func.func @transform_7(%arg0: i32, %arg1: i32) -> (i32, i32, i32, i32) {
    %c0_i32 = arith.constant 0 : i32
    %c0_i32_0 = arith.constant 0 : i32
    %c0_i32_1 = arith.constant 0 : i32
    return %arg0, %arg1, %c0_i32, %c0_i32_0 : i32, i32, i32, i32
  }
}

</mosaic_0001>

<bundles_post_ra>
// kernel: tpu_custom_call.1
= control target key start
LH: loop header
LB: loop body
LE: loop exit
PB: predicated region body
PF: predicated region fallthrough
CT: control target
= control target key end

     0   :  { %s7491_s24 = smov 0   ;;  %s7493_s25 = smov 0   ;;  %s9294_s0 = inlined_call_operand.vmem [shape: f32[2,16,16,4], index: 0, kind: input, shape index: {}]   ;;  %s9295_s1 = inlined_call_operand.vmem [shape: f32[2,16,16,4], index: 1, kind: input, shape index: {}]   ;;  %s9296_s2 = inlined_call_operand.vmem [shape: f32[2,16,16,4], index: 2, kind: input, shape index: {}]   ;;  %s9297_s3 = inlined_call_operand.vmem [shape: f32[4,2], index: 3, kind: input, shape index: {}]   ;;  %s9298_s4 = inlined_call_operand.vmem [shape: f32[1,2], index: 4, kind: input, shape index: {}]   ;;  %s9299_s5 = inlined_call_operand.vmem [shape: f32[3,3,2,4], index: 5, kind: input, shape index: {}]   ;;  %s9300_s6 = inlined_call_operand.vmem [shape: f32[1,4], index: 6, kind: input, shape index: {}]   ;;  %s9301_s7 = inlined_call_operand.vmem [shape: f32[2,16,16,4], index: 7, kind: output, shape index: {}]  }
   0x1   :  { %s7495_s26 = smov 0  }
   0x2 LB: > { %s29_s27 = sadd.s32 1, %s7444_s25  ;;  %p5588_p0 = scmp.ge.s32.totalorder %s7448_s26, 1  ;;  %s7448_s26 = sphi %s7495_s26, %s17_s26   ;;  %s7444_s25 = sphi %s7493_s25, %s9440_s25   ;;  %s7440_s24 = sphi %s7491_s24, %s9439_s24  }
   0x3   : > { %p31_p1 = scmp.ge.s32.totalorder %s29_s27, 2  ;;  %p323_p2 = scmp.lt.s32.totalorder %s7448_s26, 3 }
   0x5   : > { %s9442_s27 = smov (%p31_p1, %s29_s27), 0  ;;  %p324_p3 = pnand %p5588_p0, %p323_p2 }
   0x7   : > { %327 = sbr.rel (%p324_p3) target bundleno = 967 (0x3c7), region = 48 }
   0xe   : > { %v483_v0 = vld [vmem:[%s9297_s3] sm:$0xf]  ;;  %vm600_vm0 = vcmask 1043456   ;;  %p392_p4 = scmp.lt.s32.totalorder %s7440_s24, 1  ;;  %vm491_vm1 = vcmask 31744   ;;  %vm2504_vm2 = vcmask 1041408  }
   0xf   : > { %6347 = vmatprep.subr.msk.mxu0 %vm600_vm0, %v483_v0  ;;  %v5671_v37 = vld [vmem:[%s9299_s5 + $0x2] sm:$0x3]  ;;  %v9303_v38 = vmov 0.0   ;;  %v2404_v39 = vld [vmem:[%s9299_s5] sm:$0x3]  ;;  %vm2407_vm3 = vcmask 15360  }
  0x10   : > { %6348 = vmatpush3.msk.msra.mxu0 %vm600_vm0, %v483_v0  ;;  %s9444_s24 = smov (!%p392_p4, %s7440_s24), 1  ;;  %v5770_v40 = vld [vmem:[%s9299_s5 + $0x6] sm:$0x3]  ;;  %v5804_v42 = vld [vmem:[%s9299_s5 + $0x8] sm:$0x3] }
  0x11   : > { %s7512_s30 = sshll.u32 %s9444_s24, 8  ;;  %6403 = vmatprep.subr.msk.mxu0 %vm2504_vm2, %v5671_v37  ;;  %6853 = vmatprep.subr.msk.mxu1 %vm2504_vm2, %v5770_v40  ;;  %v7619_v44 = vld [vmem:[%s9298_s4] ss:$0 sm:$0xff] }
  0x12   : > { %s7518_s10 = scalar_lea.vmem %s9294_s0, %s7512_s30  ;;  %s414_s13 = scalar_lea.vmem %s9295_s1, %s7512_s30  ;;  %6854 = vmatpush3.msk.msra.mxu1 %vm2504_vm2, %v5770_v40 }
  0x13   : > { %v447_v1 = vld [vmem:[%s414_s13] sm:$0xff]  ;;  %v448_v2 = vld [vmem:[%s414_s13 + $0x8] sm:$0xff]  ;;  %v451_v5 = vld [vmem:[%s7518_s10 + $0x10] sm:$0xff]  ;;  %s6010_s14 = sadd.s32 240, %s7512_s30  ;;  %6603 = vmatprep.subr.msk.mxu1 %vm2504_vm2, %v5804_v42  ;;  %s9022_s9 = scalar_lea.vmem %s9301_s7, %s7512_s30 }
  0x14   : > { %v449_v3 = vld [vmem:[%s7518_s10] sm:$0xff]  ;;  %6349 = vmatprep.mubr.msk.f32.mxu0 %vm491_vm1, %v447_v1  ;;  %v450_v4 = vld [vmem:[%s7518_s10 + $0x8] sm:$0xff]  ;;  %v452_v6 = vld [vmem:[%s7518_s10 + $0x18] sm:$0xff]  ;;  %s431_s17 = scalar_lea.vmem %s9296_s2, %s6010_s14 }
  0x15   : > { %6350 = vmatmul.mubr.msk.f32.vlgmr.msra.gmra.mrb[0].mxu0 %vm491_vm1, %v448_v2  ;;  %v453_v7 = vld [vmem:[%s7518_s10 + $0x20] sm:$0xff]  ;;  %v454_v8 = vld [vmem:[%s7518_s10 + $0x28] sm:$0xff]  ;;  %v455_v9 = vld [vmem:[%s7518_s10 + $0x30] sm:$0xff] }
  0x16   : > { %6352 = vmatprep.mubr.msk.f32.mxu0 %vm491_vm1, %v449_v3  ;;  %v456_v10 = vld [vmem:[%s7518_s10 + $0x38] sm:$0xff]  ;;  %v457_v11 = vld [vmem:[%s7518_s10 + $0x40] sm:$0xff]  ;;  %v458_v12 = vld [vmem:[%s7518_s10 + $0x48] sm:$0xff]  ;;  %6404 = vmatpush3.msk.msra.mxu0 %vm2504_vm2, %v5671_v37 }
  0x17   : > { %v459_v13 = vld [vmem:[%s7518_s10 + $0x50] sm:$0xff]  ;;  %v460_v14 = vld [vmem:[%s7518_s10 + $0x58] sm:$0xff]  ;;  %v461_v15 = vld [vmem:[%s7518_s10 + $0x60] sm:$0xff]  ;;  %6453 = vmatprep.subr.msk.mxu0 %vm2504_vm2, %v2404_v39 }
  0x18   : > { %v462_v16 = vld [vmem:[%s7518_s10 + $0x68] sm:$0xff]  ;;  %v463_v17 = vld [vmem:[%s7518_s10 + $0x70] sm:$0xff]  ;;  %v464_v18 = vld [vmem:[%s7518_s10 + $0x78] sm:$0xff] }
  0x19   : > { %6353 = vmatmul.mubr.msk.f32.gmra.mrb[2].mxu0 %vm491_vm1, %v450_v4  ;;  %v465_v19 = vld [vmem:[%s7518_s10 + $0x80] sm:$0xff]  ;;  %v466_v20 = vld [vmem:[%s7518_s10 + $0x88] sm:$0xff]  ;;  %v467_v21 = vld [vmem:[%s7518_s10 + $0x90] sm:$0xff] }
  0x1a   : > { %6355 = vmatprep.mubr.msk.f32.mxu0 %vm491_vm1, %v451_v5  ;;  %v468_v22 = vld [vmem:[%s7518_s10 + $0x98] sm:$0xff]  ;;  %v469_v23 = vld [vmem:[%s7518_s10 + $0xa0] sm:$0xff]  ;;  %v470_v24 = vld [vmem:[%s7518_s10 + $0xa8] sm:$0xff] }
  0x1b   : > { %v471_v25 = vld [vmem:[%s7518_s10 + $0xb0] sm:$0xff]  ;;  %v472_v26 = vld [vmem:[%s7518_s10 + $0xb8] sm:$0xff]  ;;  %v473_v27 = vld [vmem:[%s7518_s10 + $0xc0] sm:$0xff] }
  0x1c   : > { %v474_v28 = vld [vmem:[%s7518_s10 + $0xc8] sm:$0xff]  ;;  %v475_v29 = vld [vmem:[%s7518_s10 + $0xd0] sm:$0xff]  ;;  %v476_v30 = vld [vmem:[%s7518_s10 + $0xd8] sm:$0xff] }
  0x1d   : > { %6356 = vmatmul.mubr.msk.f32.gmra.mrb[4].mxu0 %vm491_vm1, %v452_v6  ;;  %v477_v31 = vld [vmem:[%s7518_s10 + $0xe0] sm:$0xff]  ;;  %v478_v32 = vld [vmem:[%s7518_s10 + $0xe8] sm:$0xff]  ;;  %v479_v33 = vld [vmem:[%s7518_s10 + $0xf0] sm:$0xff] }
  0x1e   : > { %6358 = vmatprep.mubr.msk.f32.mxu0 %vm491_vm1, %v453_v7  ;;  %v480_v34 = vld [vmem:[%s7518_s10 + $0xf8] sm:$0xff]  ;;  %v481_v35 = vld [vmem:[%s431_s17] sm:$0xff]  ;;  %v482_v36 = vld [vmem:[%s431_s17 + $0x8] sm:$0xff] }
  0x21   : > { %6359 = vmatmul.mubr.msk.f32.gmra.mrb[6].mxu0 %vm491_vm1, %v454_v8 }
  0x22   : > { %6361 = vmatprep.mubr.msk.f32.mxu0 %vm491_vm1, %v455_v9 }
  0x25   : > { %6362 = vmatmul.mubr.msk.f32.gmra.mrb[8].mxu0 %vm491_vm1, %v456_v10 }
  0x26   : > { %6364 = vmatprep.mubr.msk.f32.mxu0 %vm491_vm1, %v457_v11 }
  0x29   : > { %6365 = vmatmul.mubr.msk.f32.gmra.mrb[10].mxu0 %vm491_vm1, %v458_v12 }
  0x2a   : > { %6367 = vmatprep.mubr.msk.f32.mxu0 %vm491_vm1, %v459_v13 }
  0x2d   : > { %6368 = vmatmul.mubr.msk.f32.gmra.mrb[12].mxu0 %vm491_vm1, %v460_v14 }
  0x2e   : > { %6370 = vmatprep.mubr.msk.f32.mxu0 %vm491_vm1, %v461_v15 }
  0x31   : > { %6371 = vmatmul.mubr.msk.f32.gmra.mrb[14].mxu0 %vm491_vm1, %v462_v16 }
  0x32   : > { %6373 = vmatprep.mubr.msk.f32.mxu0 %vm491_vm1, %v463_v17 }
  0x35   : > { %6374 = vmatmul.mubr.msk.f32.gmra.mrb[16].mxu0 %vm491_vm1, %v464_v18 }
  0x36   : > { %6376 = vmatprep.mubr.msk.f32.mxu0 %vm491_vm1, %v465_v19 }
  0x39   : > { %6377 = vmatmul.mubr.msk.f32.gmra.mrb[18].mxu0 %vm491_vm1, %v466_v20 }
  0x3a   : > { %6379 = vmatprep.mubr.msk.f32.mxu0 %vm491_vm1, %v467_v21 }
  0x3d   : > { %6380 = vmatmul.mubr.msk.f32.gmra.mrb[20].mxu0 %vm491_vm1, %v468_v22 }
  0x3e   : > { %6382 = vmatprep.mubr.msk.f32.mxu0 %vm491_vm1, %v469_v23 }
  0x41   : > { %6383 = vmatmul.mubr.msk.f32.gmra.mrb[22].mxu0 %vm491_vm1, %v470_v24 }
  0x42   : > { %6385 = vmatprep.mubr.msk.f32.mxu0 %vm491_vm1, %v471_v25 }
  0x45   : > { %6386 = vmatmul.mubr.msk.f32.gmra.mrb[24].mxu0 %vm491_vm1, %v472_v26 }
  0x46   : > { %6388 = vmatprep.mubr.msk.f32.mxu0 %vm491_vm1, %v473_v27 }
  0x49   : > { %6389 = vmatmul.mubr.msk.f32.gmra.mrb[26].mxu0 %vm491_vm1, %v474_v28 }
  0x4a   : > { %6391 = vmatprep.mubr.msk.f32.mxu0 %vm491_vm1, %v475_v29 }
  0x4d   : > { %6392 = vmatmul.mubr.msk.f32.gmra.mrb[28].mxu0 %vm491_vm1, %v476_v30 }
  0x4e   : > { %6394 = vmatprep.mubr.msk.f32.mxu0 %vm491_vm1, %v477_v31 }
  0x51   : > { %6395 = vmatmul.mubr.msk.f32.gmra.mrb[30].mxu0 %vm491_vm1, %v478_v32 }
  0x52   : > { %6397 = vmatprep.mubr.msk.f32.mxu0 %vm491_vm1, %v479_v33 }
  0x55   : > { %6398 = vmatmul.mubr.msk.f32.gmra.mrb[32].mxu0 %vm491_vm1, %v480_v34 }
  0x56   : > { %6400 = vmatprep.mubr.msk.f32.mxu0 %vm491_vm1, %v481_v35 }
  0x59   : > { %6401 = vmatmul.mubr.msk.f32.gmra.mrb[34].mxu0 %vm491_vm1, %v482_v36 }
  0x5a   : > { %6405 = vmatprep.mubr.f32.mxu0 %v9303_v38 }
  0x5d   : > { %6406 = vmatmul.mubr.f32.vlgmr.msra.gmra.mrb[36].mxu0 %v9303_v38 }
  0x5e   : > { %6454 = vmatpush3.msk.msra.mxu0 %vm2504_vm2, %v2404_v39 }
  0xe8   : > { %v6351_v41 = vpop.f32.mrb[0].mxu0 }
  0xe9   : > { %v670_v43 = vpop.f32.mrb[1].mxu0 }
  0xec   : > { %v6354_v45 = vpop.f32.mrb[2].mxu0 }
  0xed   : > { %v7623_v46 = vadd.f32 %v6354_v45, %v7619_v44  ;;  %v680_v47 = vpop.f32.mrb[3].mxu0 }
  0xee   : > { %v7626_v48 = vadd.f32 %v7619_v44, %v680_v47 }
  0xef   : > { %v852_v49 = vmin.f32 %v7623_v46, 20.0 }
  0xf0   : > { %v851_v50 = vmin.f32 %v7626_v48, 20.0  ;;  %v6357_v51 = vpop.f32.mrb[4].mxu0 }
  0xf1   : > { %v891_v52 = vmul.f32 1.442695, %v852_v49  ;;  %v7631_v53 = vadd.f32 %v6357_v51, %v7619_v44  ;;  %v690_v54 = vpop.f32.mrb[5].mxu0 }
  0xf2   : > { %v889_v55 = vmul.f32 1.442695, %v851_v50  ;;  %v7634_v56 = vadd.f32 %v7619_v44, %v690_v54 }
  0xf3   : > { %7136 = vpow2.f32 %v891_v52  ;;  %v854_v57 = vmin.f32 %v7631_v53, 20.0 }
  0xf4   : > { %7138 = vpow2.f32 %v889_v55  ;;  %v853_v58 = vmin.f32 %v7634_v56, 20.0  ;;  %v6360_v59 = vpop.f32.mrb[6].mxu0 }
  0xf5   : > { %v895_v60 = vmul.f32 1.442695, %v854_v57  ;;  %v7639_v61 = vadd.f32 %v6360_v59, %v7619_v44  ;;  %v700_v62 = vpop.f32.mrb[7].mxu0 }
  0xf6   : > { %v893_v63 = vmul.f32 1.442695, %v853_v58  ;;  %v7642_v0 = vadd.f32 %v7619_v44, %v700_v62 }
  0xf7   : > { %7140 = vpow2.f32 %v895_v60  ;;  %v856_v1 = vmin.f32 %v7639_v61, 20.0 }
  0xf8   : > { %7142 = vpow2.f32 %v893_v63  ;;  %v855_v2 = vmin.f32 %v7642_v0, 20.0  ;;  %v6363_v3 = vpop.f32.mrb[8].mxu0 }
  0xf9   : > { %v899_v4 = vmul.f32 1.442695, %v856_v1  ;;  %v7647_v5 = vadd.f32 %v6363_v3, %v7619_v44  ;;  %v710_v6 = vpop.f32.mrb[9].mxu0 }
  0xfa   : > { %v897_v7 = vmul.f32 1.442695, %v855_v2  ;;  %v7650_v8 = vadd.f32 %v7619_v44, %v710_v6 }
  0xfb   : > { %7144 = vpow2.f32 %v899_v4  ;;  %v858_v9 = vmin.f32 %v7647_v5, 20.0 }
  0xfc   : > { %7146 = vpow2.f32 %v897_v7  ;;  %v857_v10 = vmin.f32 %v7650_v8, 20.0  ;;  %v6366_v11 = vpop.f32.mrb[10].mxu0 }
  0xfd   : > { %v7137_v12 = vpop.eup %7136  ;;  %v903_v13 = vmul.f32 1.442695, %v858_v9  ;;  %v7655_v14 = vadd.f32 %v6366_v11, %v7619_v44  ;;  %v720_v15 = vpop.f32.mrb[11].mxu0 }
  0xfe   : > { %v7139_v16 = vpop.eup %7138  ;;  %v960_v17 = vadd.f32 1.0, %v7137_v12  ;;  %v901_v18 = vmul.f32 1.442695, %v857_v10  ;;  %v7658_v19 = vadd.f32 %v7619_v44, %v720_v15 }
  0xff   : > { %v959_v20 = vadd.f32 1.0, %v7139_v16  ;;  %7148 = vpow2.f32 %v903_v13  ;;  %v860_v21 = vmin.f32 %v7655_v14, 20.0 }
 0x100   : > { %v996_v22 = vmul.f32 %v960_v17, %v960_v17  ;;  %7150 = vpow2.f32 %v901_v18  ;;  %v859_v23 = vmin.f32 %v7658_v19, 20.0  ;;  %v6369_v24 = vpop.f32.mrb[12].mxu0 }
 0x101   : > { %v7141_v25 = vpop.eup %7140  ;;  %v995_v26 = vmul.f32 %v959_v20, %v959_v20  ;;  %v907_v27 = vmul.f32 1.442695, %v860_v21  ;;  %v7663_v28 = vadd.f32 %v6369_v24, %v7619_v44  ;;  %v730_v29 = vpop.f32.mrb[13].mxu0 }
 0x102   : > { %v7143_v30 = vpop.eup %7142  ;;  %v1104_v31 = vadd.f32 1.0, %v996_v22  ;;  %v962_v32 = vadd.f32 1.0, %v7141_v25  ;;  %v905_v33 = vmul.f32 1.442695, %v859_v23  ;;  %v5638_v41 = vadd.f32 -1.0, %v996_v22 }
 0x103   : > { %v1103_v34 = vadd.f32 1.0, %v995_v26  ;;  %v961_v35 = vadd.f32 1.0, %v7143_v30  ;;  %7152 = vpow2.f32 %v907_v27  ;;  %v862_v37 = vmin.f32 %v7663_v28, 20.0 }
 0x104   : > { %7154 = vrcp.f32 %v1104_v31  ;;  %v998_v36 = vmul.f32 %v962_v32, %v962_v32  ;;  %v6372_v39 = vpop.f32.mrb[14].mxu0  ;;  %v7667_v43 = vadd.f32 %v7619_v44, %v730_v29  ;;  %v5637_v55 = vadd.f32 -1.0, %v995_v26 }
 0x105   : > { %v7145_v40 = vpop.eup %7144  ;;  %7156 = vrcp.f32 %v1103_v34  ;;  %v997_v42 = vmul.f32 %v961_v35, %v961_v35  ;;  %v740_v45 = vpop.f32.mrb[15].mxu0  ;;  %v911_v54 = vmul.f32 1.442695, %v862_v37  ;;  %v1068_v62 = vmul.f32 %v5638_v41, %v7623_v46 }
 0x106   : > { %v7147_v47 = vpop.eup %7146  ;;  %v1106_v49 = vadd.f32 1.0, %v998_v36  ;;  %v964_v50 = vadd.f32 1.0, %v7145_v40  ;;  %7158 = vpow2.f32 %v905_v33  ;;  %v861_v58 = vmin.f32 %v7667_v43, 20.0 }
 0x107   : > { %v1105_v51 = vadd.f32 1.0, %v997_v42  ;;  %v963_v52 = vadd.f32 1.0, %v7147_v47  ;;  %v7672_v1 = vadd.f32 %v6372_v39, %v7619_v44  ;;  %v5640_v4 = vadd.f32 -1.0, %v998_v36 }
 0x108   : > { %7160 = vrcp.f32 %v1106_v49  ;;  %v1000_v57 = vmul.f32 %v964_v50, %v964_v50  ;;  %v6375_v59 = vpop.f32.mrb[16].mxu0  ;;  %v5639_v9 = vadd.f32 -1.0, %v997_v42  ;;  %v909_v12 = vmul.f32 1.442695, %v861_v58 }
 0x109   : > { %v7149_v60 = vpop.eup %7148  ;;  %7162 = vrcp.f32 %v1105_v51  ;;  %v999_v63 = vmul.f32 %v963_v52, %v963_v52  ;;  %v750_v2 = vpop.f32.mrb[17].mxu0  ;;  %v1067_v13 = vmul.f32 %v5637_v55, %v7626_v48  ;;  %v864_v46 = vmin.f32 %v7672_v1, 20.0 }
 0x10a   : > { %v7151_v3 = vpop.eup %7150  ;;  %v1108_v6 = vadd.f32 1.0, %v1000_v57  ;;  %v966_v7 = vadd.f32 1.0, %v7149_v60  ;;  %7164 = vpow2.f32 %v911_v54  ;;  %v5642_v18 = vadd.f32 -1.0, %v1000_v57 }
 0x10b   : > { %v1107_v10 = vadd.f32 1.0, %v999_v63  ;;  %v965_v11 = vadd.f32 1.0, %v7151_v3  ;;  %v7677_v21 = vadd.f32 %v7619_v44, %v740_v45  ;;  %v5641_v24 = vadd.f32 -1.0, %v999_v63 }
 0x10c   : > { %7166 = vrcp.f32 %v1108_v6  ;;  %v1002_v15 = vmul.f32 %v966_v7, %v966_v7  ;;  %v6378_v16 = vpop.f32.mrb[18].mxu0  ;;  %v1070_v48 = vmul.f32 %v5640_v4, %v7631_v53  ;;  %v1069_v29 = vmul.f32 %v5639_v9, %v7634_v56 }
 0x10d   : > { %v7153_v17 = vpop.eup %7152  ;;  %7168 = vrcp.f32 %v1107_v10  ;;  %v1001_v20 = vmul.f32 %v965_v11, %v965_v11  ;;  %v760_v22 = vpop.f32.mrb[19].mxu0  ;;  %v915_v31 = vmul.f32 1.442695, %v864_v46  ;;  %v863_v40 = vmin.f32 %v7677_v21, 20.0 }
 0x10e   : > { %v7155_v23 = vpop.eup %7154  ;;  %v1110_v25 = vadd.f32 1.0, %v1002_v15  ;;  %v968_v26 = vadd.f32 1.0, %v7153_v17  ;;  %7170 = vpow2.f32 %v909_v12  ;;  %v5644_v34 = vadd.f32 -1.0, %v1002_v15 }
 0x10f   : > { %v7157_v27 = vpop.eup %7156  ;;  %v1109_v30 = vadd.f32 1.0, %v1001_v20  ;;  %v7683_v37 = vmul.f32 %v7155_v23, %v1068_v62  ;;  %v1072_v53 = vmul.f32 %v5642_v18, %v7639_v61  ;;  %v1071_v56 = vmul.f32 %v5641_v24, %v7642_v0 }
 0x110   : > { %v7159_v32 = vpop.eup %7158  ;;  %v7681_v33 = vmul.f32 %v7157_v27, %v1067_v13  ;;  %7172 = vrcp.f32 %v1110_v25  ;;  %v1004_v35 = vmul.f32 %v968_v26, %v968_v26  ;;  %v6381_v36 = vpop.f32.mrb[20].mxu0  ;;  %v5643_v49 = vadd.f32 -1.0, %v1001_v20 }
 0x111   : > { %7174 = vrcp.f32 %v1109_v30  ;;  %v967_v39 = vadd.f32 1.0, %v7159_v32  ;;  %v770_v41 = vpop.f32.mrb[21].mxu0  ;;  %v913_v51 = vmul.f32 1.442695, %v863_v40  ;;  %v7691_v52 = vadd.f32 %v6375_v59, %v7619_v44 }
 0x112   : > { %v7161_v42 = vpop.eup %7160  ;;  %v1112_v45 = vadd.f32 1.0, %v1004_v35  ;;  %7176 = vpow2.f32 %v915_v31  ;;  %6408 = vmatprep.mubr.msk.f32.mxu0 %vm2407_vm3, %v7681_v33  ;;  %v1074_v61 = vmul.f32 %v5644_v34, %v7647_v5  ;;  %v7699_v0 = vadd.f32 %v7619_v44, %v750_v2 }
 0x113   : > { %v7163_v47 = vpop.eup %7162  ;;  %v1003_v50 = vmul.f32 %v967_v39, %v967_v39  ;;  %6409 = vmatmul.mubr.msk.f32.gmra.mrb[38].mxu0 %vm2407_vm3, %v7683_v37  ;;  %v7701_v58 = vmul.f32 %v7161_v42, %v1070_v48  ;;  %v866_v3 = vmin.f32 %v7691_v52, 20.0  ;;  %v7708_v6 = vadd.f32 %v6378_v16, %v7619_v44 }
 0x114   : > { %v7165_v54 = vpop.eup %7164  ;;  %v7695_v55 = vmul.f32 %v7163_v47, %v1069_v29  ;;  %7178 = vrcp.f32 %v1112_v45  ;;  %v6384_v57 = vpop.f32.mrb[22].mxu0  ;;  %v865_v4 = vmin.f32 %v7699_v0, 20.0  ;;  %v7711_v5 = vadd.f32 %v7619_v44, %v760_v22 }
 0x115   : > { %v1111_v60 = vadd.f32 1.0, %v1003_v50  ;;  %v970_v62 = vadd.f32 1.0, %v7165_v54  ;;  %7180 = vpow2.f32 %v913_v51  ;;  %v7703_v59 = vpop.f32.mrb[23].mxu0  ;;  %v1073_v7 = vmul.f32 %v5643_v49, %v7650_v8 }
 0x116   : > { %9354 = vst [vmem:[#allocation2_spill] sm:$0xff] %v7695_v55  ;;  %v7167_v63 = vpop.eup %7166  ;;  %6411 = vmatprep.mubr.msk.f32.mxu0 %vm2407_vm3, %v7695_v55  ;;  %v5646_v9 = vadd.f32 -1.0, %v1004_v35  ;;  %v919_v13 = vmul.f32 1.442695, %v866_v3  ;;  %v917_v15 = vmul.f32 1.442695, %v865_v4  ;;  %v7725_v25 = vadd.f32 %v6381_v36, %v7619_v44 }
 0x117   : > { %v7169_v2 = vpop.eup %7168  ;;  %7182 = vrcp.f32 %v1111_v60  ;;  %v1006_v10 = vmul.f32 %v970_v62, %v970_v62  ;;  %6412 = vmatmul.mubr.msk.f32.gmra.mrb[40].mxu0 %vm2407_vm3, %v7701_v58  ;;  %v868_v46 = vmin.f32 %v7708_v6, 20.0  ;;  %v7721_v17 = vmul.f32 %v7167_v63, %v1072_v53 }
 0x118   : > { %v7171_v11 = vpop.eup %7170  ;;  %v7718_v12 = vmul.f32 %v7169_v2, %v1071_v56  ;;  %v6387_v16 = vpop.f32.mrb[24].mxu0  ;;  %v867_v8 = vmin.f32 %v7711_v5, 20.0  ;;  %7184 = vpow2.f32 %v919_v13  ;;  %v7728_v26 = vadd.f32 %v7619_v44, %v770_v41 }
 0x119   : > { %v1114_v18 = vadd.f32 1.0, %v1006_v10  ;;  %v969_v20 = vadd.f32 1.0, %v7171_v11  ;;  %v790_v22 = vpop.f32.mrb[25].mxu0  ;;  %v923_v24 = vmul.f32 1.442695, %v868_v46  ;;  %v1076_v48 = vmul.f32 %v5646_v9, %v7655_v14 }
 0x11a   : > { %v7173_v23 = vpop.eup %7172  ;;  %6414 = vmatprep.mubr.msk.f32.mxu0 %vm2407_vm3, %v7718_v12  ;;  %v5645_v29 = vadd.f32 -1.0, %v1003_v50  ;;  %v921_v34 = vmul.f32 1.442695, %v867_v8  ;;  %v870_v35 = vmin.f32 %v7725_v25, 20.0  ;;  %v869_v56 = vmin.f32 %v7728_v26, 20.0 }
 0x11b   : > { %v7175_v27 = vpop.eup %7174  ;;  %7186 = vrcp.f32 %v1114_v18  ;;  %v1005_v30 = vmul.f32 %v969_v20, %v969_v20  ;;  %6415 = vmatmul.mubr.msk.f32.gmra.mrb[42].mxu0 %vm2407_vm3, %v7721_v17  ;;  %v7738_v39 = vmul.f32 %v7173_v23, %v1074_v61  ;;  %v7744_v45 = vadd.f32 %v6384_v57, %v7619_v44  ;;  %v7768_v11 = vld [vmem:[%s9299_s5 + $0x4] sm:$0x3] }
 0x11c   : > { %v7177_v31 = vpop.eup %7176  ;;  %v7735_v32 = vmul.f32 %v7175_v27, %v1073_v7  ;;  %7188 = vpow2.f32 %v917_v15  ;;  %v6390_v36 = vpop.f32.mrb[26].mxu0  ;;  %v927_v53 = vmul.f32 1.442695, %v870_v35  ;;  %v1075_v49 = vmul.f32 %v5645_v29, %v7658_v19  ;;  %6503 = vmatprep.subr.msk.mxu0 %vm2504_vm2, %v7768_v11 }
 0x11d   : > { %v1113_v40 = vadd.f32 1.0, %v1005_v30  ;;  %v972_v41 = vadd.f32 1.0, %v7177_v31  ;;  %7190 = vpow2.f32 %v923_v24  ;;  %v7740_v14 = vpop.f32.mrb[27].mxu0  ;;  %v5648_v50 = vadd.f32 -1.0, %v1006_v10 }
 0x11e   : > { %v7179_v42 = vpop.eup %7178  ;;  %7192 = vpow2.f32 %v921_v34  ;;  %6417 = vmatprep.mubr.msk.f32.mxu0 %vm2407_vm3, %v7735_v32  ;;  %v925_v61 = vmul.f32 1.442695, %v869_v56  ;;  %v872_v60 = vmin.f32 %v7744_v45, 20.0  ;;  %v5647_v63 = vadd.f32 -1.0, %v1005_v30 }
 0x11f   : > { %v7181_v47 = vpop.eup %7180  ;;  %7194 = vrcp.f32 %v1113_v40  ;;  %v1008_v51 = vmul.f32 %v972_v41, %v972_v41  ;;  %6418 = vmatmul.mubr.msk.f32.gmra.mrb[44].mxu0 %vm2407_vm3, %v7738_v39  ;;  %v7756_v4 = vadd.f32 %v7619_v44, %v7703_v59  ;;  %v7759_v19 = vadd.f32 %v6387_v16, %v7619_v44 }
 0x120   : > { %v971_v54 = vadd.f32 1.0, %v7181_v47  ;;  %7196 = vpow2.f32 %v927_v53  ;;  %v7752_v62 = vpop.f32.mrb[28].mxu0  ;;  %v931_v10 = vmul.f32 1.442695, %v872_v60  ;;  %v7770_v13 = vmul.f32 %v7179_v42, %v1076_v48 }
 0x121   : > { %v7183_v57 = vpop.eup %7182  ;;  %v1116_v3 = vadd.f32 1.0, %v1008_v51  ;;  %v7761_v2 = vpop.f32.mrb[29].mxu0  ;;  %7198 = vpow2.f32 %v925_v61  ;;  %v871_v59 = vmin.f32 %v7756_v4, 20.0  ;;  %v874_v15 = vmin.f32 %v7759_v19, 20.0 }
 0x122   : > { %v7763_v7 = vmul.f32 %v7183_v57, %v1075_v49  ;;  %v1007_v9 = vmul.f32 %v971_v54, %v971_v54  ;;  %v7185_v46 = vpop.eup %7184  ;;  %v7777_v18 = vadd.f32 %v7619_v44, %v790_v22  ;;  %v7784_v48 = vadd.f32 %v6390_v36, %v7619_v44 }
 0x123   : > { %7200 = vrcp.f32 %v1116_v3  ;;  %v974_v23 = vadd.f32 1.0, %v7185_v46  ;;  %v929_v24 = vmul.f32 1.442695, %v871_v59  ;;  %v935_v27 = vmul.f32 1.442695, %v874_v15 }
 0x124   : > { %v1115_v16 = vadd.f32 1.0, %v1007_v9  ;;  %7202 = vpow2.f32 %v931_v10  ;;  %6420 = vmatprep.mubr.msk.f32.mxu0 %vm2407_vm3, %v7763_v7  ;;  %v7781_v20 = vpop.f32.mrb[30].mxu0  ;;  %v1078_v22 = vmul.f32 %v5648_v50, %v7663_v28  ;;  %v1077_v31 = vmul.f32 %v5647_v63, %v7667_v43 }
 0x125   : > { %v7187_v8 = vpop.eup %7186  ;;  %6421 = vmatmul.mubr.msk.f32.gmra.mrb[46].mxu0 %vm2407_vm3, %v7770_v13  ;;  %v7788_v29 = vpop.f32.mrb[31].mxu0  ;;  %v873_v34 = vmin.f32 %v7777_v18, 20.0  ;;  %v1010_v40 = vmul.f32 %v974_v23, %v974_v23  ;;  %v876_v36 = vmin.f32 %v7784_v48, 20.0  ;;  %v5650_v53 = vadd.f32 -1.0, %v1008_v51 }
 0x126   : > { %v7189_v30 = vpop.eup %7188  ;;  %7204 = vrcp.f32 %v1115_v16  ;;  %v7798_v61 = vadd.f32 %v7619_v44, %v7740_v14  ;;  %v5649_v3 = vadd.f32 -1.0, %v1007_v9  ;;  %v7804_v10 = vmul.f32 %v7187_v8, %v1078_v22 }
 0x127   : > { %v7191_v35 = vpop.eup %7190  ;;  %v973_v41 = vadd.f32 1.0, %v7189_v30  ;;  %7206 = vpow2.f32 %v929_v24  ;;  %v933_v47 = vmul.f32 1.442695, %v873_v34  ;;  %v1118_v28 = vadd.f32 1.0, %v1010_v40 }
 0x128   : > { %v7193_v42 = vpop.eup %7192  ;;  %v976_v56 = vadd.f32 1.0, %v7191_v35  ;;  %7208 = vpow2.f32 %v935_v27  ;;  %v7794_v49 = vpop.f32.mrb[32].mxu0  ;;  %v939_v15 = vmul.f32 1.442695, %v876_v36  ;;  %v875_v30 = vmin.f32 %v7798_v61, 20.0 }
 0x129   : > { %v7195_v54 = vpop.eup %7194  ;;  %v1009_v50 = vmul.f32 %v973_v41, %v973_v41  ;;  %v975_v43 = vadd.f32 1.0, %v7193_v42  ;;  %v7800_v60 = vpop.f32.mrb[33].mxu0  ;;  %7210 = vpow2.f32 %v933_v47  ;;  %v1080_v8 = vmul.f32 %v5650_v53, %v7672_v1 }
 0x12a   : > { %v7197_v57 = vpop.eup %7196  ;;  %v7802_v63 = vmul.f32 %v7195_v54, %v1077_v31  ;;  %v1012_v51 = vmul.f32 %v976_v56, %v976_v56  ;;  %7212 = vrcp.f32 %v1118_v28  ;;  %v1079_v22 = vmul.f32 %v5649_v3, %v7677_v21 }
 0x12b   : > { %v1117_v59 = vadd.f32 1.0, %v1009_v50  ;;  %v7199_v46 = vpop.eup %7198  ;;  %v1011_v23 = vmul.f32 %v975_v43, %v975_v43  ;;  %v978_v24 = vadd.f32 1.0, %v7197_v57  ;;  %v5652_v42 = vadd.f32 -1.0, %v1010_v40 }
 0x12c   : > { %v1120_v16 = vadd.f32 1.0, %v1012_v51  ;;  %6423 = vmatprep.mubr.msk.f32.mxu0 %vm2407_vm3, %v7802_v63  ;;  %v977_v27 = vadd.f32 1.0, %v7199_v46  ;;  %v5651_v56 = vadd.f32 -1.0, %v1009_v50  ;;  %v7815_v47 = vadd.f32 %v7752_v62, %v7619_v44 }
 0x12d   : > { %v7201_v14 = vpop.eup %7200  ;;  %7214 = vrcp.f32 %v1117_v59  ;;  %6424 = vmatmul.mubr.msk.f32.gmra.mrb[48].mxu0 %vm2407_vm3, %v7804_v10  ;;  %v1119_v31 = vadd.f32 1.0, %v1011_v23  ;;  %v1014_v34 = vmul.f32 %v978_v24, %v978_v24  ;;  %v937_v53 = vmul.f32 1.442695, %v875_v30 }
 0x12e   : > { %v7203_v9 = vpop.eup %7202  ;;  %7216 = vrcp.f32 %v1120_v16  ;;  %v1013_v35 = vmul.f32 %v977_v27, %v977_v27  ;;  %v7819_v43 = vmul.f32 %v7201_v14, %v1080_v8  ;;  %v5654_v40 = vadd.f32 -1.0, %v1012_v51 }
 0x12f   : > { %v980_v41 = vadd.f32 1.0, %v7203_v9  ;;  %7218 = vpow2.f32 %v939_v15  ;;  %v1122_v1 = vadd.f32 1.0, %v1014_v34  ;;  %v878_v15 = vmin.f32 %v7815_v47, 20.0 }
 0x130   : > { %v7205_v36 = vpop.eup %7204  ;;  %7220 = vrcp.f32 %v1119_v31  ;;  %v1121_v57 = vadd.f32 1.0, %v1013_v35  ;;  %v5653_v46 = vadd.f32 -1.0, %v1011_v23  ;;  %v1082_v30 = vmul.f32 %v5652_v42, %v7691_v52 }
 0x131   : > { %v7207_v54 = vpop.eup %7206  ;;  %v7817_v28 = vmul.f32 %v7205_v36, %v1079_v22  ;;  %v7821_v3 = vmul.f32 %v980_v41, %v980_v41  ;;  %7222 = vrcp.f32 %v1122_v1  ;;  %v1081_v9 = vmul.f32 %v5651_v56, %v7699_v0 }
 0x132   : > { %v7209_v21 = vpop.eup %7208  ;;  %v979_v59 = vadd.f32 1.0, %v7207_v54  ;;  %7224 = vrcp.f32 %v1121_v57  ;;  %v5655_v8 = vadd.f32 -1.0, %v1013_v35  ;;  %v943_v22 = vmul.f32 1.442695, %v878_v15 }
 0x133   : > { %v982_v50 = vadd.f32 1.0, %v7209_v21  ;;  %6426 = vmatprep.mubr.msk.f32.mxu0 %vm2407_vm3, %v7817_v28  ;;  %v7211_v62 = vpop.eup %7210  ;;  %v1124_v16 = vadd.f32 1.0, %v7821_v3  ;;  %7226 = vpow2.f32 %v937_v53  ;;  %v1084_v23 = vmul.f32 %v5654_v40, %v7708_v6 }
 0x134   : > { %6427 = vmatmul.mubr.msk.f32.gmra.mrb[50].mxu0 %vm2407_vm3, %v7819_v43  ;;  %v1015_v24 = vmul.f32 %v979_v59, %v979_v59  ;;  %v981_v27 = vadd.f32 1.0, %v7211_v62  ;;  %v7213_v51 = vpop.eup %7212  ;;  %v7839_v53 = vadd.f32 %v7619_v44, %v7761_v2  ;;  %v1083_v0 = vmul.f32 %v5653_v46, %v7711_v5 }
 0x135   : > { %v7829_v14 = vmul.f32 %v982_v50, %v982_v50  ;;  %7228 = vrcp.f32 %v1124_v16  ;;  %v7841_v52 = vmul.f32 %v7213_v51, %v1082_v30  ;;  %v5656_v35 = vadd.f32 -1.0, %v1014_v34 }
 0x136   : > { %v1123_v41 = vadd.f32 1.0, %v1015_v24  ;;  %v1017_v21 = vmul.f32 %v981_v27, %v981_v27  ;;  %7230 = vpow2.f32 %v943_v22  ;;  %v1085_v42 = vmul.f32 %v5655_v8, %v7728_v26 }
 0x137   : > { %v7215_v31 = vpop.eup %7214  ;;  %v1126_v36 = vadd.f32 1.0, %v7829_v14  ;;  %v877_v57 = vmin.f32 %v7839_v53, 20.0  ;;  %v7850_v2 = vadd.f32 %v7781_v20, %v7619_v44  ;;  %v7854_v5 = vadd.f32 %v7619_v44, %v7788_v29 }
 0x138   : > { %v7217_v54 = vpop.eup %7216  ;;  %v7835_v1 = vmul.f32 %v7215_v31, %v1081_v9  ;;  %7232 = vrcp.f32 %v1123_v41  ;;  %v1125_v56 = vadd.f32 1.0, %v1017_v21  ;;  %v7858_v26 = vadd.f32 %v7794_v49, %v7619_v44 }
 0x139   : > { %v7219_v6 = vpop.eup %7218  ;;  %7234 = vrcp.f32 %v1126_v36  ;;  %v7862_v34 = vmul.f32 %v7217_v54, %v1084_v23  ;;  %v941_v15 = vmul.f32 1.442695, %v877_v57  ;;  %v880_v46 = vmin.f32 %v7850_v2, 20.0 }
 0x13a   : > { %6429 = vmatprep.mubr.msk.f32.mxu0 %vm2407_vm3, %v7835_v1  ;;  %v7221_v59 = vpop.eup %7220  ;;  %v984_v40 = vadd.f32 1.0, %v7219_v6  ;;  %7236 = vrcp.f32 %v1125_v56  ;;  %v879_v29 = vmin.f32 %v7854_v5, 20.0  ;;  %v882_v16 = vmin.f32 %v7858_v26, 20.0 }
 0x13b   : > { %6430 = vmatmul.mubr.msk.f32.gmra.mrb[52].mxu0 %vm2407_vm3, %v7841_v52  ;;  %v7864_v50 = vmul.f32 %v7221_v59, %v1083_v0  ;;  %v7223_v62 = vpop.eup %7222  ;;  %v1086_v49 = vmul.f32 %v5656_v35, %v7725_v25  ;;  %v5657_v51 = vadd.f32 -1.0, %v1015_v24  ;;  %7238 = vpow2.f32 %v941_v15 }
 0x13c   : > { %v1020_v20 = vmul.f32 %v984_v40, %v984_v40  ;;  %v7225_v27 = vpop.eup %7224  ;;  %v7872_v30 = vadd.f32 %v7619_v44, %v7800_v60  ;;  %v5658_v22 = vadd.f32 -1.0, %v7821_v3  ;;  %v947_v23 = vmul.f32 1.442695, %v880_v46 }
 0x13d   : > { %6432 = vmatprep.mubr.msk.f32.mxu0 %vm2407_vm3, %v7864_v50  ;;  %v7227_v9 = vpop.eup %7226  ;;  %v7876_v8 = vmul.f32 %v7225_v27, %v1085_v42  ;;  %v945_v24 = vmul.f32 1.442695, %v879_v29  ;;  %v951_v41 = vmul.f32 1.442695, %v882_v16  ;;  %v7882_v60 = vmul.f32 %v7223_v62, %v1086_v49 }
 0x13e   : > { %v1128_v31 = vadd.f32 1.0, %v1020_v20  ;;  %v983_v25 = vadd.f32 1.0, %v7227_v9  ;;  %v881_v36 = vmin.f32 %v7872_v30, 20.0  ;;  %v5659_v54 = vadd.f32 -1.0, %v1017_v21 }
 0x13f   : > { %9355 = vst [vmem:[#allocation3_spill] sm:$0xff] %v7876_v8  ;;  %6433 = vmatmul.mubr.msk.f32.gmra.mrb[54].mxu0 %vm2407_vm3, %v7862_v34  ;;  %v7229_v44 = vpop.eup %7228  ;;  %v1087_v3 = vmul.f32 %v5657_v51, %v7756_v4  ;;  %v1088_v56 = vmul.f32 %v5658_v22, %v7744_v45  ;;  %v5660_v57 = vadd.f32 -1.0, %v7829_v14 }
 0x140   : > { %7240 = vrcp.f32 %v1128_v31  ;;  %6435 = vmatprep.mubr.msk.f32.mxu0 %vm2407_vm3, %v7876_v8  ;;  %v7231_v0 = vpop.eup %7230  ;;  %v1019_v35 = vmul.f32 %v983_v25, %v983_v25  ;;  %v949_v6 = vmul.f32 1.442695, %v881_v36  ;;  %v1089_v4 = vmul.f32 %v5659_v54, %v7777_v18 }
 0x141   : > { %7242 = vpow2.f32 %v947_v23  ;;  %v986_v59 = vadd.f32 1.0, %v7231_v0  ;;  %v7893_v62 = vmul.f32 %v7229_v44, %v1088_v56  ;;  %v1090_v14 = vmul.f32 %v5660_v57, %v7759_v19 }
 0x142   : > { %v7233_v42 = vpop.eup %7232  ;;  %7244 = vpow2.f32 %v945_v24  ;;  %v1127_v15 = vadd.f32 1.0, %v1019_v35  ;;  %v5661_v9 = vadd.f32 -1.0, %v1019_v35  ;;  %v5662_v31 = vadd.f32 -1.0, %v1020_v20 }
 0x143   : > { %6436 = vmatmul.mubr.msk.f32.gmra.mrb[56].mxu0 %vm2407_vm3, %v7882_v60  ;;  %v7235_v21 = vpop.eup %7234  ;;  %v7891_v40 = vmul.f32 %v7233_v42, %v1087_v3  ;;  %7246 = vpow2.f32 %v951_v41  ;;  %v1022_v45 = vmul.f32 %v986_v59, %v986_v59 }
 0x144   : > { %7248 = vpow2.f32 %v949_v6  ;;  %v7237_v46 = vpop.eup %7236  ;;  %v7903_v27 = vmul.f32 %v7235_v21, %v1090_v14  ;;  %v1091_v54 = vmul.f32 %v5661_v9, %v7798_v61  ;;  %v1092_v35 = vmul.f32 %v5662_v31, %v7784_v48 }
 0x145   : > { %7250 = vrcp.f32 %v1127_v15  ;;  %6438 = vmatprep.mubr.msk.f32.mxu0 %vm2407_vm3, %v7891_v40  ;;  %v7899_v29 = vmul.f32 %v7237_v46, %v1089_v4  ;;  %v7239_v16 = vpop.eup %7238  ;;  %v1130_v18 = vadd.f32 1.0, %v1022_v45  ;;  %v1209_v46 = vlaneseq }
 0x146   : > { %v985_v49 = vadd.f32 1.0, %v7239_v16  ;;  %v5664_v48 = vadd.f32 -1.0, %v1022_v45 }
 0x147   : > { %6439 = vmatmul.mubr.msk.f32.gmra.mrb[58].mxu0 %vm2407_vm3, %v7893_v62  ;;  %7252 = vrcp.f32 %v1130_v18 }
 0x148   : > { %6441 = vmatprep.mubr.msk.f32.mxu0 %vm2407_vm3, %v7899_v29  ;;  %v1021_v22 = vmul.f32 %v985_v49, %v985_v49  ;;  %v7919_v49 = vshrl.u32 %v1209_v46, 7  ;;  %v1094_v31 = vmul.f32 %v5664_v48, %v7815_v47 }
 0x14a   : > { %v7241_v51 = vpop.eup %7240  ;;  %v1129_v25 = vadd.f32 1.0, %v1021_v22  ;;  %v5663_v61 = vadd.f32 -1.0, %v1021_v22  ;;  %v1542_v9 = vand.u32 15, %v7919_v49  ;;  %v1212_v45 = vadd.s32 16, %v7919_v49 }
 0x14b   : > { %6442 = vmatmul.mubr.msk.f32.gmra.mrb[60].mxu0 %vm2407_vm3, %v7903_v27  ;;  %v7243_v19 = vpop.eup %7242  ;;  %v7913_v21 = vmul.f32 %v7241_v51, %v1092_v35  ;;  %vm2042_vm5 = vcmp.lt.s32.totalorder %v7919_v49, 1 }
 0x14c   : > { %v7245_v23 = vpop.eup %7244  ;;  %v988_v24 = vadd.f32 1.0, %v7243_v19  ;;  %7254 = vrcp.f32 %v1129_v25  ;;  %v1093_v51 = vmul.f32 %v5663_v61, %v7839_v53  ;;  %vm7931_vm4 = vcmp.gt.s32.totalorder %v1542_v9, 0 }
 0x14d   : > { %v7247_v41 = vpop.eup %7246  ;;  %v987_v36 = vadd.f32 1.0, %v7245_v23 }
 0x14e   : > { %v7249_v44 = vpop.eup %7248  ;;  %v1024_v0 = vmul.f32 %v988_v24, %v988_v24  ;;  %v990_v3 = vadd.f32 1.0, %v7247_v41 }
 0x14f   : > { %v7251_v6 = vpop.eup %7250  ;;  %v1023_v42 = vmul.f32 %v987_v36, %v987_v36  ;;  %v989_v56 = vadd.f32 1.0, %v7249_v44  ;;  %v1242_v44 = vadd.s32 256, %v7919_v49 }
 0x150   : > { %v7911_v57 = vmul.f32 %v7251_v6, %v1091_v54  ;;  %v1132_v20 = vadd.f32 1.0, %v1024_v0  ;;  %v1026_v59 = vmul.f32 %v990_v3, %v990_v3  ;;  %v5666_v25 = vadd.f32 -1.0, %v1024_v0 }
 0x151   : > { %v1131_v15 = vadd.f32 1.0, %v1023_v42  ;;  %v1025_v4 = vmul.f32 %v989_v56, %v989_v56  ;;  %v7253_v18 = vpop.eup %7252  ;;  %v5665_v23 = vadd.f32 -1.0, %v1023_v42  ;;  %v7940_v0 = vrot.slane %v9303_v38, 7 }
 0x152   : > { %7256 = vrcp.f32 %v1132_v20  ;;  %v1134_v14 = vadd.f32 1.0, %v1026_v59  ;;  %6444 = vmatprep.mubr.msk.f32.mxu0 %vm2407_vm3, %v7911_v57  ;;  %v5668_v24 = vadd.f32 -1.0, %v1026_v59  ;;  %v7927_v41 = vmul.f32 %v7253_v18, %v1094_v31 }
 0x153   : > { %7258 = vrcp.f32 %v1131_v15  ;;  %6445 = vmatmul.mubr.msk.f32.gmra.mrb[62].mxu0 %vm2407_vm3, %v7913_v21  ;;  %v1133_v16 = vadd.f32 1.0, %v1025_v4  ;;  %v5667_v36 = vadd.f32 -1.0, %v1025_v4  ;;  %v1095_v54 = vmul.f32 %v5665_v23, %v7854_v5  ;;  %9358 = vst [vmem:[#allocation4_spill] sm:$0xff] %v7940_v0 }
 0x154   : > { %7260 = vrcp.f32 %v1134_v14  ;;  %v1096_v6 = vmul.f32 %v5666_v25, %v7850_v2  ;;  %v1098_v35 = vmul.f32 %v5668_v24, %v7858_v26  ;;  %v1556_v42 = vand.u32 15, %v1212_v45 }
 0x155   : > { %7262 = vrcp.f32 %v1133_v16  ;;  %v1214_v56 = vadd.s32 32, %v7919_v49  ;;  %v2151_v5 = vsel %vm7931_vm4, %v7940_v0, 0.0  ;;  %v2008_v15 = vrot.slane %v7681_v33, 7 }
 0x156   : > { %v7255_v19 = vpop.eup %7254  ;;  %v1097_v2 = vmul.f32 %v5667_v36, %v7872_v30  ;;  %v1766_v26 = vand.u32 15, %v1242_v44  ;;  %vm1972_vm6 = vcmp.gt.s32.totalorder %v1556_v42, 0  ;;  %v2010_v30 = vrot.slane %v7695_v55, 7  ;;  %v7393_v42 = vld [vmem:[%s9299_s5 + $0x8] sm:$0x3] }
 0x157   : > { %v7924_v22 = vmul.f32 %v7255_v19, %v1093_v51  ;;  %v1570_v48 = vand.u32 15, %v1214_v56  ;;  %v2076_v16 = vsel %vm2042_vm5, %v7940_v0, %v2008_v15  ;;  %v1216_v18 = vadd.s32 48, %v7919_v49 }
 0x158   : > { %vm2002_vm7 = vcmp.gt.s32.totalorder %v1766_v26, 0  ;;  %v2009_v31 = vrot.slane %v7683_v37, 7  ;;  %v7975_v23 = vsel %vm1972_vm6, %v2076_v16, 0.0  ;;  %v1218_v45 = vadd.s32 64, %v7919_v49 }
 0x159   : > { %6447 = vmatprep.mubr.msk.f32.mxu0 %vm2407_vm3, %v7924_v22  ;;  %vm7981_vm8 = vcmp.gt.s32.totalorder %v1570_v48, 0  ;;  %v1584_v44 = vand.u32 15, %v1216_v18  ;;  %v1220_v26 = vadd.s32 80, %v7919_v49  ;;  %v2013_v16 = vrot.slane %v7721_v17, 7  ;;  %v8049_v18 = vld [vmem:[%s9299_s5 + $0xc] sm:$0x3] }
 0x15a   : > { %6448 = vmatmul.mubr.msk.f32.gmra.mrb[64].mxu0 %vm2407_vm3, %v7927_v41  ;;  %v2074_v53 = vsel %vm2042_vm5, %v2009_v31, %v2010_v30  ;;  %v1222_v24 = vadd.s32 96, %v7919_v49 }
 0x15b   : > { %v8028_v56 = vsel %vm7981_vm8, %v2074_v53, 0.0  ;;  %vm1976_vm9 = vcmp.gt.s32.totalorder %v1584_v44, 0  ;;  %v2015_v53 = vrot.slane %v7738_v39, 7 }
 0x15c   : > { %v7257_v47 = vpop.eup %7256 }
 0x15d   : > { %v7259_v3 = vpop.eup %7258  ;;  %v7952_v4 = vmul.f32 %v7257_v47, %v1096_v6  ;;  %v2012_v47 = vrot.slane %v7718_v12, 7  ;;  %v5838_v6 = vld [vmem:[%s9299_s5 + $0xa] sm:$0x3] }
 0x15e   : > { %v7261_v20 = vpop.eup %7260  ;;  %v7945_v59 = vmul.f32 %v7259_v3, %v1095_v54  ;;  %v8006_v3 = vld [vmem:[%s9299_s5 + $0x6] sm:$0x3] }
 0x15f   : > { %v7954_v46 = vmul.f32 %v7261_v20, %v1098_v35  ;;  %v7263_v14 = vpop.eup %7262  ;;  %v9302_v51 = vrot.slane %v7952_v4, 7  ;;  %v2011_v35 = vrot.slane %v7701_v58, 7  ;;  %v1598_v20 = vand.u32 15, %v1218_v45 }
 0x160   : > { %6450 = vmatprep.mubr.msk.f32.mxu0 %vm2407_vm3, %v7945_v59  ;;  %v7959_v61 = vmul.f32 %v7263_v14, %v1097_v2  ;;  %v2014_v2 = vrot.slane %v7735_v32, 7  ;;  %v8068_v45 = vsel %vm2042_vm5, %v2012_v47, %v2013_v16 }
 0x161   : > { %6451 = vmatmul.mubr.msk.f32.gmra.mrb[66].mxu0 %vm2407_vm3, %v7952_v4  ;;  %v2039_v19 = vrot.slane %v7954_v46, 7  ;;  %v8041_v48 = vsel %vm2042_vm5, %v2010_v30, %v2011_v35  ;;  %vm1978_vm10 = vcmp.gt.s32.totalorder %v1598_v20, 0 }
 0x162   : > { %6455 = vmatprep.mubr.msk.f32.mxu0 %vm2407_vm3, %v2151_v5  ;;  %v2038_v9 = vrot.slane %v7959_v61, 7  ;;  %v6402_v5 = vpop.f32.mrb[34].mxu0  ;;  %v2070_v30 = vsel %vm2042_vm5, %v2013_v16, %v2014_v2  ;;  %v8087_v20 = vsel %vm2042_vm5, %v2014_v2, %v2015_v53  ;;  %v1226_v16 = vadd.s32 128, %v7919_v49 }
 0x163   : > { %v840_v14 = vpop.f32.mrb[35].mxu0  ;;  %v8075_v44 = vsel %vm1978_vm10, %v2070_v30, 0.0  ;;  %v2017_v5 = vrot.slane %v7770_v13, 7  ;;  %vm2259_vm10 = vcmp.lt.s32.totalorder %v7919_v49, 7 }
 0x164   : > { %v2046_v25 = vsel %vm2042_vm5, %v9302_v51, %v2038_v9  ;;  %v8001_v54 = vsel %vm2042_vm5, %v2038_v9, %v2039_v19  ;;  %v2020_v14 = vrot.slane %v7817_v28, 7 }
 0x165   : > { %6456 = vmatmul.mubr.msk.f32.vlgmr.msra.gmra.mrb[36].mxu0 %vm2407_vm3, %v7940_v0  ;;  %v7988_v36 = vsel %vm2002_vm7, %v2046_v25, 0.0  ;;  %9362 = vst [vmem:[#allocation6_spill] sm:$0xff] %v8001_v54  ;;  %v2016_v25 = vrot.slane %v7763_v7, 7 }
 0x166   : > { %6458 = vmatprep.mubr.msk.f32.mxu0 %vm2407_vm3, %v7975_v23  ;;  %9361 = vst [vmem:[#allocation5_spill] sm:$0xff] %v7988_v36  ;;  %6504 = vmatpush3.msk.msra.mxu0 %vm2504_vm2, %v7768_v11  ;;  %v8012_v11 = vsel %vm2042_vm5, %v2008_v15, %v2009_v31  ;;  %v2072_v15 = vsel %vm2042_vm5, %v2011_v35, %v2012_v47  ;;  %v1612_v31 = vand.u32 15, %v1220_v26  ;;  %v1626_v35 = vand.u32 15, %v1222_v24 }
 0x167   : > { %6600 = vmatprep.mubr.msk.f32.mxu1 %vm2407_vm3, %v7988_v36  ;;  %6553 = vmatprep.subr.msk.mxu0 %vm2504_vm2, %v8006_v3  ;;  %v8054_v9 = vsel %vm1976_vm9, %v2072_v15, 0.0  ;;  %v2068_v47 = vsel %vm2042_vm5, %v2015_v53, %v2016_v25  ;;  %v8106_v30 = vsel %vm2042_vm5, %v2016_v25, %v2017_v5  ;;  %v1654_v53 = vand.u32 15, %v1226_v16 }
 0x168   : > { %6601 = vmatmul.mubr.msk.f32.vlgmr.msra.gmra.mrb[0].mxu1 %vm2407_vm3, %v8001_v54  ;;  %vm1980_vm11 = vcmp.gt.s32.totalorder %v1612_v31, 0  ;;  %vm1982_vm12 = vcmp.gt.s32.totalorder %v1626_v35, 0  ;;  %v2019_v31 = vrot.slane %v7804_v10, 7  ;;  %v2030_v36 = vrot.slane %v7899_v29, 7 }
 0x169   : > { %6459 = vmatmul.mubr.msk.f32.gmra.mrb[38].mxu0 %vm2407_vm3, %v8012_v11  ;;  %6604 = vmatpush3.msk.msra.mxu1 %vm2504_vm2, %v7393_v42  ;;  %v2018_v42 = vrot.slane %v7802_v63, 7  ;;  %v8094_v15 = vsel %vm1980_vm11, %v2068_v47, 0.0  ;;  %v1228_v47 = vadd.s32 144, %v7919_v49  ;;  %vm1986_vm14 = vcmp.gt.s32.totalorder %v1654_v53, 0 }
 0x16a   : > { %6461 = vmatprep.mubr.msk.f32.mxu0 %vm2407_vm3, %v8028_v56  ;;  %6605 = vmatprep.mubr.msk.f32.mxu1 %vm2407_vm3, %v7681_v33  ;;  %v2064_v25 = vsel %vm2042_vm5, %v2019_v31, %v2020_v14 }
 0x16b   : > { %6653 = vmatprep.subr.msk.mxu1 %vm2504_vm2, %v5838_v6  ;;  %v2066_v2 = vsel %vm2042_vm5, %v2017_v5, %v2018_v42  ;;  %v8125_v35 = vsel %vm2042_vm5, %v2018_v42, %v2019_v31  ;;  %v2021_v5 = vrot.slane %v7819_v43, 7  ;;  %v1230_v42 = vadd.s32 160, %v7919_v49 }
 0x16c   : > { %6606 = vmatmul.mubr.msk.f32.vlgmr.msra.gmra.mrb[2].mxu1 %vm2407_vm3, %v7683_v37  ;;  %v8113_v24 = vsel %vm1982_vm12, %v2066_v2, 0.0  ;;  %v1668_v31 = vand.u32 15, %v1228_v47  ;;  %v2026_v47 = vrot.slane %v7876_v8, 7 }
 0x16d   : > { %6462 = vmatmul.mubr.msk.f32.gmra.mrb[40].mxu0 %vm2407_vm3, %v8041_v48  ;;  %6654 = vmatpush3.msk.msra.mxu1 %vm2504_vm2, %v5838_v6  ;;  %v1224_v6 = vadd.s32 112, %v7919_v49  ;;  %v8151_v51 = vsel %vm2042_vm5, %v2020_v14, %v2021_v5  ;;  %v1682_v53 = vand.u32 15, %v1230_v42  ;;  %v2025_v42 = vrot.slane %v7862_v34, 7 }
 0x16e   : > { %6464 = vmatprep.mubr.msk.f32.mxu0 %vm2407_vm3, %v8054_v9  ;;  %6608 = vmatprep.mubr.msk.f32.mxu1 %vm2407_vm3, %v7695_v55  ;;  %vm1988_vm15 = vcmp.gt.s32.totalorder %v1668_v31, 0 }
 0x16f   : > { %6703 = vmatprep.subr.msk.mxu1 %vm2504_vm2, %v8049_v18  ;;  %v1640_v26 = vand.u32 15, %v1224_v6  ;;  %v2022_v6 = vrot.slane %v7835_v1, 7  ;;  %vm1990_vm0 = vcmp.gt.s32.totalorder %v1682_v53, 0  ;;  %v2027_v53 = vrot.slane %v7882_v60, 7 }
 0x170   : > { %6609 = vmatmul.mubr.msk.f32.gmra.mrb[4].mxu1 %vm2407_vm3, %v7701_v58 }
 0x171   : > { %6465 = vmatmul.mubr.msk.f32.gmra.mrb[42].mxu0 %vm2407_vm3, %v8068_v45  ;;  %6611 = vmatprep.mubr.msk.f32.mxu1 %vm2407_vm3, %v7718_v12  ;;  %vm1984_vm13 = vcmp.gt.s32.totalorder %v1640_v26, 0  ;;  %v8135_v26 = vsel %vm2042_vm5, %v2039_v19, %v7940_v0  ;;  %v2062_v16 = vsel %vm2042_vm5, %v2021_v5, %v2022_v6  ;;  %v2024_v19 = vrot.slane %v7864_v50, 7 }
 0x172   : > { %6467 = vmatprep.mubr.msk.f32.mxu0 %vm2407_vm3, %v8075_v44  ;;  %9363 = vst [vmem:[#allocation7_spill] sm:$0xff] %v8135_v26  ;;  %v8139_v2 = vsel %vm1984_vm13, %v2064_v25, 0.0  ;;  %v2023_v25 = vrot.slane %v7841_v52, 7  ;;  %v8158_v38 = vsel %vm1986_vm14, %v2062_v16, 0.0  ;;  %v1232_v5 = vadd.s32 176, %v7919_v49 }
 0x173   : > { %v1234_v26 = vadd.s32 192, %v7919_v49  ;;  %v8189_v54 = vsel %vm2042_vm5, %v2024_v19, %v2025_v42 }
 0x174   : > { %6612 = vmatmul.mubr.msk.f32.gmra.mrb[6].mxu1 %vm2407_vm3, %v7721_v17  ;;  %v2060_v14 = vsel %vm2042_vm5, %v2023_v25, %v2024_v19  ;;  %v8170_v0 = vsel %vm2042_vm5, %v2022_v6, %v2023_v25  ;;  %v2058_v6 = vsel %vm2042_vm5, %v2025_v42, %v2026_v47  ;;  %v1696_v31 = vand.u32 15, %v1232_v5  ;;  %9364 = vst [vmem:[#allocation8_spill] sm:$0xff] %v8189_v54 }
 0x175   : > { %6468 = vmatmul.mubr.msk.f32.gmra.mrb[44].mxu0 %vm2407_vm3, %v8087_v20  ;;  %6614 = vmatprep.mubr.msk.f32.mxu1 %vm2407_vm3, %v7735_v32  ;;  %v8177_v16 = vsel %vm1988_vm15, %v2060_v14, 0.0  ;;  %v2028_v25 = vrot.slane %v7891_v40, 7  ;;  %v8196_v14 = vsel %vm1990_vm0, %v2058_v6, 0.0  ;;  %v1236_v5 = vadd.s32 208, %v7919_v49 }
 0x176   : > { %6470 = vmatprep.mubr.msk.f32.mxu0 %vm2407_vm3, %v8094_v15  ;;  %9365 = vst [vmem:[#allocation9_spill] sm:$0xff] %v8196_v14  ;;  %vm1992_vm4 = vcmp.gt.s32.totalorder %v1696_v31, 0  ;;  %v1710_v42 = vand.u32 15, %v1234_v26  ;;  %v2029_v6 = vrot.slane %v7893_v62, 7  ;;  %v2032_v31 = vrot.slane %v7911_v57, 7 }
 0x177   : > { %v2056_v19 = vsel %vm2042_vm5, %v2027_v53, %v2028_v25  ;;  %v1724_v26 = vand.u32 15, %v1236_v5  ;;  %v2031_v5 = vrot.slane %v7903_v27, 7 }
 0x178   : > { %6615 = vmatmul.mubr.msk.f32.gmra.mrb[8].mxu1 %vm2407_vm3, %v7738_v39  ;;  %vm1994_vm6 = vcmp.gt.s32.totalorder %v1710_v42, 0 }
 0x179   : > { %6471 = vmatmul.mubr.msk.f32.gmra.mrb[46].mxu0 %vm2407_vm3, %v8106_v30  ;;  %6617 = vmatprep.mubr.msk.f32.mxu1 %vm2407_vm3, %v7763_v7  ;;  %vm1996_vm7 = vcmp.gt.s32.totalorder %v1724_v26, 0  ;;  %v2033_v26 = vrot.slane %v7913_v21, 7 }
 0x17a   : > { %6473 = vmatprep.mubr.msk.f32.mxu0 %vm2407_vm3, %v8113_v24 }
 0x17c   : > { %6618 = vmatmul.mubr.msk.f32.gmra.mrb[10].mxu1 %vm2407_vm3, %v7770_v13 }
 0x17d   : > { %6474 = vmatmul.mubr.msk.f32.gmra.mrb[48].mxu0 %vm2407_vm3, %v8125_v35  ;;  %6620 = vmatprep.mubr.msk.f32.mxu1 %vm2407_vm3, %v7802_v63 }
 0x17e   : > { %6476 = vmatprep.mubr.msk.f32.mxu0 %vm2407_vm3, %v8139_v2 }
 0x180   : > { %6621 = vmatmul.mubr.msk.f32.gmra.mrb[12].mxu1 %vm2407_vm3, %v7804_v10 }
 0x181   : > { %6477 = vmatmul.mubr.msk.f32.gmra.mrb[50].mxu0 %vm2407_vm3, %v8151_v51  ;;  %6623 = vmatprep.mubr.msk.f32.mxu1 %vm2407_vm3, %v7817_v28 }
 0x182   : > { %6479 = vmatprep.mubr.msk.f32.mxu0 %vm2407_vm3, %v8158_v38 }
 0x184   : > { %6624 = vmatmul.mubr.msk.f32.gmra.mrb[14].mxu1 %vm2407_vm3, %v7819_v43 }
 0x185   : > { %6480 = vmatmul.mubr.msk.f32.gmra.mrb[52].mxu0 %vm2407_vm3, %v8170_v0  ;;  %6626 = vmatprep.mubr.msk.f32.mxu1 %vm2407_vm3, %v7835_v1 }
 0x186   : > { %6482 = vmatprep.mubr.msk.f32.mxu0 %vm2407_vm3, %v8177_v16 }
 0x188   : > { %6627 = vmatmul.mubr.msk.f32.gmra.mrb[16].mxu1 %vm2407_vm3, %v7841_v52 }
 0x189   : > { %6483 = vmatmul.mubr.msk.f32.gmra.mrb[54].mxu0 %vm2407_vm3, %v8189_v54  ;;  %6629 = vmatprep.mubr.msk.f32.mxu1 %vm2407_vm3, %v7864_v50  ;;  %v8208_v54 = vsel %vm2042_vm5, %v2026_v47, %v2027_v53  ;;  %v2054_v47 = vsel %vm2042_vm5, %v2029_v6, %v2030_v36  ;;  %v1238_v53 = vadd.s32 224, %v7919_v49 }
 0x18a   : > { %6485 = vmatprep.mubr.msk.f32.mxu0 %vm2407_vm3, %v8196_v14  ;;  %9366 = vst [vmem:[#allocation10_spill] sm:$0xff] %v8208_v54  ;;  %v8215_v14 = vsel %vm1992_vm4, %v2056_v19, 0.0  ;;  %v8234_v19 = vsel %vm1994_vm6, %v2054_v47, 0.0 }
 0x18b   : > { %9367 = vst [vmem:[#allocation11_spill] sm:$0xff] %v8215_v14  ;;  %9369 = vst [vmem:[#allocation13_spill] sm:$0xff] %v8234_v19  ;;  %v1738_v42 = vand.u32 15, %v1238_v53 }
 0x18c   : > { %6630 = vmatmul.mubr.msk.f32.gmra.mrb[18].mxu1 %vm2407_vm3, %v7862_v34 }
 0x18d   : > { %6486 = vmatmul.mubr.msk.f32.gmra.mrb[56].mxu0 %vm2407_vm3, %v8208_v54  ;;  %6632 = vmatprep.mubr.msk.f32.mxu1 %vm2407_vm3, %v7876_v8  ;;  %v8227_v54 = vsel %vm2042_vm5, %v2028_v25, %v2029_v6  ;;  %v2052_v25 = vsel %vm2042_vm5, %v2031_v5, %v2032_v31  ;;  %v2034_v6 = vrot.slane %v7924_v22, 7  ;;  %vm1998_vm8 = vcmp.gt.s32.totalorder %v1738_v42, 0 }
 0x18e   : > { %6488 = vmatprep.mubr.msk.f32.mxu0 %vm2407_vm3, %v8215_v14  ;;  %9368 = vst [vmem:[#allocation12_spill] sm:$0xff] %v8227_v54  ;;  %v1240_v14 = vadd.s32 240, %v7919_v49  ;;  %v8253_v47 = vsel %vm1996_vm7, %v2052_v25, 0.0  ;;  %v2035_v25 = vrot.slane %v7927_v41, 7 }
 0x18f   : > { %9370 = vst [vmem:[#allocation14_spill] sm:$0xff] %v8253_v47 }
 0x190   : > { %6633 = vmatmul.mubr.msk.f32.gmra.mrb[20].mxu1 %vm2407_vm3, %v7882_v60  ;;  %v1752_v53 = vand.u32 15, %v1240_v14  ;;  %v1211_v14 = vadd.s32 8, %v7919_v49  ;;  %v8282_v42 = vsel %vm2042_vm5, %v2034_v6, %v2035_v25 }
 0x191   : > { %6489 = vmatmul.mubr.msk.f32.gmra.mrb[58].mxu0 %vm2407_vm3, %v8227_v54  ;;  %6635 = vmatprep.mubr.msk.f32.mxu1 %vm2407_vm3, %v7891_v40  ;;  %v8246_v54 = vsel %vm2042_vm5, %v2030_v36, %v2031_v5  ;;  %v2050_v36 = vsel %vm2042_vm5, %v2033_v26, %v2034_v6  ;;  %v2036_v5 = vrot.slane %v7945_v59, 7  ;;  %9373 = vst [vmem:[#allocation17_spill] sm:$0xff] %v8282_v42 }
 0x192   : > { %6491 = vmatprep.mubr.msk.f32.mxu0 %vm2407_vm3, %v8234_v19  ;;  %v8264_v19 = vsel %vm2042_vm5, %v2032_v31, %v2033_v26  ;;  %vm2000_vm9 = vcmp.gt.s32.totalorder %v1752_v53, 0  ;;  %v1213_v26 = vadd.s32 24, %v7919_v49  ;;  %v9374_v53 = vmov 0.0  }
 0x193   : > { %9371 = vst [vmem:[#allocation15_spill] sm:$0xff] %v8264_v19  ;;  %v2048_v31 = vsel %vm2042_vm5, %v2035_v25, %v2036_v5  ;;  %v1549_v6 = vand.u32 15, %v1211_v14  ;;  %v9375_v25 = vrot.slane %v7952_v4, 7 }
 0x194   : > { %6636 = vmatmul.mubr.msk.f32.gmra.mrb[22].mxu1 %vm2407_vm3, %v7893_v62 }
 0x195   : > { %6492 = vmatmul.mubr.msk.f32.gmra.mrb[60].mxu0 %vm2407_vm3, %v8246_v54  ;;  %6638 = vmatprep.mubr.msk.f32.mxu1 %vm2407_vm3, %v7899_v29  ;;  %vm2188_vm11 = vcmp.lt.s32.totalorder %v1549_v6, 15 }
 0x196   : > { %6494 = vmatprep.mubr.msk.f32.mxu0 %vm2407_vm3, %v8253_v47  ;;  %v8271_v47 = vsel %vm1998_vm8, %v2050_v36, 0.0  ;;  %v2225_v36 = vrot.slane %v7681_v33, 1  ;;  %v8304_v33 = vsel %vm2042_vm5, %v2036_v5, %v9375_v25  ;;  %v2226_v5 = vrot.slane %v7683_v37, 1 }
 0x197   : > { %9372 = vst [vmem:[#allocation16_spill] sm:$0xff] %v8271_v47  ;;  %9376 = vst [vmem:[#allocation18_spill] sm:$0xff] %v8304_v33  ;;  %v2227_v25 = vrot.slane %v7695_v55, 1  ;;  %v2229_v55 = vrot.slane %v7718_v12, 1 }
 0x198   : > { %6639 = vmatmul.mubr.msk.f32.gmra.mrb[24].mxu1 %vm2407_vm3, %v7903_v27  ;;  %v2292_v6 = vsel %vm2259_vm10, %v2225_v36, %v2226_v5 }
 0x199   : > { %6495 = vmatmul.mubr.msk.f32.gmra.mrb[62].mxu0 %vm2407_vm3, %v8264_v19  ;;  %6641 = vmatprep.mubr.msk.f32.mxu1 %vm2407_vm3, %v7911_v57  ;;  %v8290_v19 = vsel %vm2000_vm9, %v2048_v31, 0.0  ;;  %v1563_v31 = vand.u32 15, %v1213_v26  ;;  %v2291_v37 = vsel %vm2259_vm10, %v2226_v5, %v2227_v25 }
 0x19a   : > { %6497 = vmatprep.mubr.msk.f32.mxu0 %vm2407_vm3, %v8271_v47  ;;  %v8295_v47 = vrot.slane %v9374_v53, 1 }
 0x19b   : > { %vm2190_vm5 = vcmp.lt.s32.totalorder %v1563_v31, 15  ;;  %v1219_v31 = vadd.s32 72, %v7919_v49 }
 0x19c   : > { %6642 = vmatmul.mubr.msk.f32.gmra.mrb[26].mxu1 %vm2407_vm3, %v7913_v21  ;;  %v2293_v14 = vsel %vm2259_vm10, %v8295_v47, %v2225_v36 }
 0x19d   : > { %6498 = vmatmul.mubr.msk.f32.gmra.mrb[64].mxu0 %vm2407_vm3, %v8282_v42  ;;  %6644 = vmatprep.mubr.msk.f32.mxu1 %vm2407_vm3, %v7924_v22  ;;  %v1215_v42 = vadd.s32 40, %v7919_v49  ;;  %v2369_v26 = vsel %vm2188_vm11, %v2293_v14, 0.0  ;;  %v2228_v14 = vrot.slane %v7701_v58, 1 }
 0x19e   : > { %6500 = vmatprep.mubr.msk.f32.mxu0 %vm2407_vm3, %v8290_v19 }
 0x19f   : > { %v1577_v53 = vand.u32 15, %v1215_v42  ;;  %v2371_v42 = vsel %vm2190_vm5, %v2291_v37, 0.0  ;;  %v8341_v5 = vsel %vm2259_vm10, %v2227_v25, %v2228_v14  ;;  %v2231_v37 = vrot.slane %v7735_v32, 1 }
 0x1a0   : > { %6645 = vmatmul.mubr.msk.f32.gmra.mrb[28].mxu1 %vm2407_vm3, %v7927_v41  ;;  %9377 = vst [vmem:[#allocation19_spill] sm:$0xff] %v8341_v5  ;;  %v1221_v25 = vadd.s32 88, %v7919_v49 }
 0x1a1   : > { %6501 = vmatmul.mubr.msk.f32.gmra.mrb[66].mxu0 %vm2407_vm3, %v8304_v33  ;;  %6647 = vmatprep.mubr.msk.f32.mxu1 %vm2407_vm3, %v7945_v59  ;;  %v1217_v33 = vadd.s32 56, %v7919_v49  ;;  %vm2192_vm12 = vcmp.lt.s32.totalorder %v1577_v53, 15 }
 0x1a2   : > { %6505 = vmatprep.mubr.msk.f32.mxu0 %vm2407_vm3, %v8295_v47 }
 0x1a3   : > { %v1591_v36 = vand.u32 15, %v1217_v33  ;;  %v1605_v33 = vand.u32 15, %v1219_v31  ;;  %v2233_v31 = vrot.slane %v7763_v7, 1 }
 0x1a4   : > { %6648 = vmatmul.mubr.msk.f32.gmra.mrb[30].mxu1 %vm2407_vm3, %v7952_v4 }
 0x1a5   : > { %6506 = vmatmul.mubr.msk.f32.vlgmr.msra.gmra.mrb[36].mxu0 %vm2407_vm3, %v2369_v26  ;;  %6650 = vmatprep.mubr.msk.f32.mxu1 %vm2407_vm3, %v7959_v61  ;;  %v2289_v26 = vsel %vm2259_vm10, %v2228_v14, %v2229_v55  ;;  %vm2194_vm13 = vcmp.lt.s32.totalorder %v1591_v36, 15  ;;  %v2232_v36 = vrot.slane %v7738_v39, 1  ;;  %vm2196_vm14 = vcmp.lt.s32.totalorder %v1605_v33, 15 }
 0x1a6   : > { %6508 = vmatprep.mubr.msk.f32.mxu0 %vm2407_vm3, %v2292_v6  ;;  %6554 = vmatpush3.msk.msra.mxu0 %vm2504_vm2, %v8006_v3  ;;  %v2230_v3 = vrot.slane %v7721_v17, 1  ;;  %v8350_v53 = vsel %vm2192_vm12, %v2289_v26, 0.0  ;;  %v1223_v26 = vadd.s32 104, %v7919_v49  ;;  %v2235_v33 = vrot.slane %v7802_v63, 1 }
 0x1a7   : > { %9378 = vst [vmem:[#allocation20_spill] sm:$0xff] %v8350_v53 }
 0x1a8   : > { %6651 = vmatmul.mubr.msk.f32.gmra.mrb[0].mxu1 %vm2407_vm3, %v7954_v46  ;;  %v8365_v14 = vsel %vm2259_vm10, %v2229_v55, %v2230_v3  ;;  %v1619_v55 = vand.u32 15, %v1221_v25 }
 0x1a9   : > { %6509 = vmatmul.mubr.msk.f32.gmra.mrb[38].mxu0 %vm2407_vm3, %v2371_v42  ;;  %6655 = vmatprep.mubr.msk.f32.mxu1 %vm2407_vm3, %v2292_v6  ;;  %v8357_v6 = vld [vmem:[%s9299_s5 + $0xe] sm:$0x3]  ;;  %9379 = vst [vmem:[#allocation21_spill] sm:$0xff] %v8365_v14 }
 0x1aa   : > { %6511 = vmatprep.mubr.msk.f32.mxu0 %vm2407_vm3, %v8341_v5  ;;  %vm2198_vm15 = vcmp.lt.s32.totalorder %v1619_v55, 15  ;;  %v2237_v55 = vrot.slane %v7817_v28, 1 }
 0x1ac   : > { %6656 = vmatmul.mubr.msk.f32.vlgmr.msra.gmra.mrb[2].mxu1 %vm2407_vm3, %v2371_v42  ;;  %v2287_v42 = vsel %vm2259_vm10, %v2230_v3, %v2231_v37  ;;  %v8386_v3 = vsel %vm2259_vm10, %v2231_v37, %v2232_v36  ;;  %v1633_v37 = vand.u32 15, %v1223_v26 }
 0x1ad   : > { %6512 = vmatmul.mubr.msk.f32.gmra.mrb[40].mxu0 %vm2407_vm3, %v8350_v53  ;;  %6704 = vmatpush3.msk.msra.mxu1 %vm2504_vm2, %v8049_v18  ;;  %v8377_v18 = vsel %vm2194_vm13, %v2287_v42, 0.0  ;;  %9381 = vst [vmem:[#allocation23_spill] sm:$0xff] %v8386_v3  ;;  %v2285_v42 = vsel %vm2259_vm10, %v2232_v36, %v2233_v31 }
 0x1ae   : > { %6514 = vmatprep.mubr.msk.f32.mxu0 %vm2407_vm3, %v8365_v14  ;;  %6658 = vmatprep.mubr.msk.f32.mxu1 %vm2407_vm3, %v8341_v5  ;;  %9380 = vst [vmem:[#allocation22_spill] sm:$0xff] %v8377_v18  ;;  %v2234_v5 = vrot.slane %v7770_v13, 1  ;;  %v8396_v25 = vsel %vm2196_vm14, %v2285_v42, 0.0  ;;  %vm2200_vm0 = vcmp.lt.s32.totalorder %v1633_v37, 15  ;;  %v1227_v37 = vadd.s32 136, %v7919_v49 }
 0x1af   : > { %6753 = vmatprep.subr.msk.mxu1 %vm2504_vm2, %v8357_v6  ;;  %9382 = vst [vmem:[#allocation24_spill] sm:$0xff] %v8396_v25 }
 0x1b0   : > { %6659 = vmatmul.mubr.msk.f32.gmra.mrb[4].mxu1 %vm2407_vm3, %v8350_v53  ;;  %v1225_v53 = vadd.s32 120, %v7919_v49  ;;  %v8405_v36 = vsel %vm2259_vm10, %v2233_v31, %v2234_v5  ;;  %v2283_v42 = vsel %vm2259_vm10, %v2234_v5, %v2235_v33  ;;  %v2238_v31 = vrot.slane %v7819_v43, 1 }
 0x1b1   : > { %6515 = vmatmul.mubr.msk.f32.gmra.mrb[42].mxu0 %vm2407_vm3, %v8377_v18  ;;  %6661 = vmatprep.mubr.msk.f32.mxu1 %vm2407_vm3, %v8365_v14  ;;  %9383 = vst [vmem:[#allocation25_spill] sm:$0xff] %v8405_v36  ;;  %v2236_v14 = vrot.slane %v7804_v10, 1  ;;  %v8415_v26 = vsel %vm2198_vm15, %v2283_v42, 0.0 }
 0x1b2   : > { %6517 = vmatprep.mubr.msk.f32.mxu0 %vm2407_vm3, %v8386_v3  ;;  %9384 = vst [vmem:[#allocation26_spill] sm:$0xff] %v8415_v26 }
 0x1b3   : > { %v8424_v5 = vsel %vm2259_vm10, %v2235_v33, %v2236_v14  ;;  %v2281_v42 = vsel %vm2259_vm10, %v2236_v14, %v2237_v55  ;;  %v8440_v33 = vsel %vm2259_vm10, %v2237_v55, %v2238_v31 }
 0x1b4   : > { %6662 = vmatmul.mubr.msk.f32.gmra.mrb[6].mxu1 %vm2407_vm3, %v8377_v18  ;;  %v1647_v18 = vand.u32 15, %v1225_v53  ;;  %9385 = vst [vmem:[#allocation27_spill] sm:$0xff] %v8424_v5  ;;  %v8434_v53 = vsel %vm2200_vm0, %v2281_v42, 0.0  ;;  %9387 = vst [vmem:[#allocation29_spill] sm:$0xff] %v8440_v33  ;;  %v1661_v42 = vand.u32 15, %v1227_v37 }
 0x1b5   : > { %6518 = vmatmul.mubr.msk.f32.gmra.mrb[44].mxu0 %vm2407_vm3, %v8396_v25  ;;  %6664 = vmatprep.mubr.msk.f32.mxu1 %vm2407_vm3, %v8386_v3  ;;  %v2239_v3 = vrot.slane %v7835_v1, 1  ;;  %9386 = vst [vmem:[#allocation28_spill] sm:$0xff] %v8434_v53 }
 0x1b6   : > { %6520 = vmatprep.mubr.msk.f32.mxu0 %vm2407_vm3, %v8405_v36  ;;  %vm2202_vm4 = vcmp.lt.s32.totalorder %v1647_v18, 15  ;;  %vm2204_vm6 = vcmp.lt.s32.totalorder %v1661_v42, 15  ;;  %v2244_v42 = vrot.slane %v7882_v60, 1 }
 0x1b7   : > { %v2279_v14 = vsel %vm2259_vm10, %v2238_v31, %v2239_v3  ;;  %v2243_v31 = vrot.slane %v7876_v8, 1 }
 0x1b8   : > { %6665 = vmatmul.mubr.msk.f32.gmra.mrb[8].mxu1 %vm2407_vm3, %v8396_v25  ;;  %v2241_v25 = vrot.slane %v7864_v50, 1  ;;  %v8453_v18 = vsel %vm2202_vm4, %v2279_v14, 0.0 }
 0x1b9   : > { %6521 = vmatmul.mubr.msk.f32.gmra.mrb[46].mxu0 %vm2407_vm3, %v8415_v26  ;;  %6667 = vmatprep.mubr.msk.f32.mxu1 %vm2407_vm3, %v8405_v36  ;;  %v2240_v36 = vrot.slane %v7841_v52, 1  ;;  %9388 = vst [vmem:[#allocation30_spill] sm:$0xff] %v8453_v18 }
 0x1ba   : > { %6523 = vmatprep.mubr.msk.f32.mxu0 %vm2407_vm3, %v8424_v5 }
 0x1bb   : > { %v8459_v55 = vsel %vm2259_vm10, %v2239_v3, %v2240_v36  ;;  %v2277_v37 = vsel %vm2259_vm10, %v2240_v36, %v2241_v25 }
 0x1bc   : > { %6668 = vmatmul.mubr.msk.f32.gmra.mrb[10].mxu1 %vm2407_vm3, %v8415_v26  ;;  %v1229_v26 = vadd.s32 152, %v7919_v49  ;;  %9389 = vst [vmem:[#allocation31_spill] sm:$0xff] %v8459_v55  ;;  %v8472_v3 = vsel %vm2204_vm6, %v2277_v37, 0.0  ;;  %v1233_v37 = vadd.s32 184, %v7919_v49 }
 0x1bd   : > { %6524 = vmatmul.mubr.msk.f32.gmra.mrb[48].mxu0 %vm2407_vm3, %v8434_v53  ;;  %6670 = vmatprep.mubr.msk.f32.mxu1 %vm2407_vm3, %v8424_v5  ;;  %v2242_v5 = vrot.slane %v7862_v34, 1  ;;  %9390 = vst [vmem:[#allocation32_spill] sm:$0xff] %v8472_v3 }
 0x1be   : > { %6526 = vmatprep.mubr.msk.f32.mxu0 %vm2407_vm3, %v8440_v33  ;;  %v1675_v14 = vand.u32 15, %v1229_v26 }
 0x1bf   : > { %v8478_v8 = vsel %vm2259_vm10, %v2241_v25, %v2242_v5  ;;  %v2275_v36 = vsel %vm2259_vm10, %v2242_v5, %v2243_v31 }
 0x1c0   : > { %6671 = vmatmul.mubr.msk.f32.gmra.mrb[12].mxu1 %vm2407_vm3, %v8434_v53  ;;  %v1231_v53 = vadd.s32 168, %v7919_v49  ;;  %9391 = vst [vmem:[#allocation33_spill] sm:$0xff] %v8478_v8  ;;  %vm2206_vm7 = vcmp.lt.s32.totalorder %v1675_v14, 15  ;;  %v2246_v14 = vrot.slane %v7893_v62, 1 }
 0x1c1   : > { %6527 = vmatmul.mubr.msk.f32.gmra.mrb[50].mxu0 %vm2407_vm3, %v8453_v18  ;;  %6673 = vmatprep.mubr.msk.f32.mxu1 %vm2407_vm3, %v8440_v33  ;;  %v2245_v33 = vrot.slane %v7891_v40, 1  ;;  %v8491_v25 = vsel %vm2206_vm7, %v2275_v36, 0.0  ;;  %v1235_v36 = vadd.s32 200, %v7919_v49 }
 0x1c2   : > { %6529 = vmatprep.mubr.msk.f32.mxu0 %vm2407_vm3, %v8459_v55  ;;  %v1689_v26 = vand.u32 15, %v1231_v53  ;;  %9392 = vst [vmem:[#allocation34_spill] sm:$0xff] %v8491_v25  ;;  %v1703_v53 = vand.u32 15, %v1233_v37 }
 0x1c3   : > { %v2273_v5 = vsel %vm2259_vm10, %v2244_v42, %v2245_v33  ;;  %v1717_v37 = vand.u32 15, %v1235_v36 }
 0x1c4   : > { %6674 = vmatmul.mubr.msk.f32.gmra.mrb[14].mxu1 %vm2407_vm3, %v8453_v18  ;;  %v8497_v18 = vsel %vm2259_vm10, %v2243_v31, %v2244_v42  ;;  %vm2208_vm8 = vcmp.lt.s32.totalorder %v1689_v26, 15  ;;  %v2248_v42 = vrot.slane %v7903_v27, 1  ;;  %vm2210_vm9 = vcmp.lt.s32.totalorder %v1703_v53, 15 }
 0x1c5   : > { %6530 = vmatmul.mubr.msk.f32.gmra.mrb[52].mxu0 %vm2407_vm3, %v8472_v3  ;;  %6676 = vmatprep.mubr.msk.f32.mxu1 %vm2407_vm3, %v8459_v55  ;;  %9393 = vst [vmem:[#allocation35_spill] sm:$0xff] %v8497_v18  ;;  %v2247_v55 = vrot.slane %v7899_v29, 1  ;;  %v8510_v31 = vsel %vm2208_vm8, %v2273_v5, 0.0  ;;  %v2249_v5 = vrot.slane %v7911_v57, 1  ;;  %v2251_v53 = vrot.slane %v7924_v22, 1 }
 0x1c6   : > { %6532 = vmatprep.mubr.msk.f32.mxu0 %vm2407_vm3, %v8478_v8  ;;  %9394 = vst [vmem:[#allocation36_spill] sm:$0xff] %v8510_v31  ;;  %vm2212_vm11 = vcmp.lt.s32.totalorder %v1717_v37, 15 }
 0x1c7   : > { %v2271_v26 = vsel %vm2259_vm10, %v2246_v14, %v2247_v55  ;;  %v2269_v36 = vsel %vm2259_vm10, %v2248_v42, %v2249_v5 }
 0x1c8   : > { %6677 = vmatmul.mubr.msk.f32.gmra.mrb[16].mxu1 %vm2407_vm3, %v8472_v3  ;;  %v8516_v3 = vsel %vm2259_vm10, %v2245_v33, %v2246_v14  ;;  %v8529_v33 = vsel %vm2210_vm9, %v2271_v26, 0.0  ;;  %v8535_v14 = vsel %vm2259_vm10, %v2247_v55, %v2248_v42  ;;  %v8548_v55 = vsel %vm2212_vm11, %v2269_v36, 0.0 }
 0x1c9   : > { %6533 = vmatmul.mubr.msk.f32.gmra.mrb[54].mxu0 %vm2407_vm3, %v8491_v25  ;;  %6679 = vmatprep.mubr.msk.f32.mxu1 %vm2407_vm3, %v8478_v8  ;;  %9395 = vst [vmem:[#allocation37_spill] sm:$0xff] %v8529_v33  ;;  %9396 = vst [vmem:[#allocation38_spill] sm:$0xff] %v8535_v14  ;;  %v2252_v42 = vrot.slane %v7927_v41, 1  ;;  %v2253_v36 = vrot.slane %v7945_v59, 1 }
 0x1ca   : > { %6535 = vmatprep.mubr.msk.f32.mxu0 %vm2407_vm3, %v8497_v18  ;;  %9397 = vst [vmem:[#allocation39_spill] sm:$0xff] %v8548_v55 }
 0x1cc   : > { %6680 = vmatmul.mubr.msk.f32.gmra.mrb[18].mxu1 %vm2407_vm3, %v8491_v25  ;;  %v1237_v25 = vadd.s32 216, %v7919_v49 }
 0x1cd   : > { %6536 = vmatmul.mubr.msk.f32.gmra.mrb[56].mxu0 %vm2407_vm3, %v8510_v31  ;;  %6682 = vmatprep.mubr.msk.f32.mxu1 %vm2407_vm3, %v8497_v18  ;;  %v2250_v18 = vrot.slane %v7913_v21, 1 }
 0x1ce   : > { %6538 = vmatprep.mubr.msk.f32.mxu0 %vm2407_vm3, %v8516_v3  ;;  %v1731_v26 = vand.u32 15, %v1237_v25 }
 0x1cf   : > { %v8554_v8 = vsel %vm2259_vm10, %v2249_v5, %v2250_v18  ;;  %v2267_v37 = vsel %vm2259_vm10, %v2250_v18, %v2251_v53  ;;  %v8573_v18 = vsel %vm2259_vm10, %v2251_v53, %v2252_v42 }
 0x1d0   : > { %6683 = vmatmul.mubr.msk.f32.gmra.mrb[20].mxu1 %vm2407_vm3, %v8510_v31  ;;  %v1239_v31 = vadd.s32 232, %v7919_v49  ;;  %vm2214_vm5 = vcmp.lt.s32.totalorder %v1731_v26, 15 }
 0x1d1   : > { %6539 = vmatmul.mubr.msk.f32.gmra.mrb[58].mxu0 %vm2407_vm3, %v8529_v33  ;;  %6685 = vmatprep.mubr.msk.f32.mxu1 %vm2407_vm3, %v8516_v3  ;;  %v8567_v5 = vsel %vm2214_vm5, %v2267_v37, 0.0  ;;  %v2255_v37 = vrot.slane %v7959_v61, 1 }
 0x1d2   : > { %6541 = vmatprep.mubr.msk.f32.mxu0 %vm2407_vm3, %v8535_v14  ;;  %v1745_v25 = vand.u32 15, %v1239_v31  ;;  %9398 = vst [vmem:[#allocation40_spill] sm:$0xff] %v8567_v5  ;;  %v2265_v31 = vsel %vm2259_vm10, %v2252_v42, %v2253_v36 }
 0x1d4   : > { %6686 = vmatmul.mubr.msk.f32.gmra.mrb[22].mxu1 %vm2407_vm3, %v8529_v33  ;;  %v1241_v33 = vadd.s32 248, %v7919_v49  ;;  %vm2216_vm12 = vcmp.lt.s32.totalorder %v1745_v25, 15 }
 0x1d5   : > { %6542 = vmatmul.mubr.msk.f32.gmra.mrb[60].mxu0 %vm2407_vm3, %v8548_v55  ;;  %6688 = vmatprep.mubr.msk.f32.mxu1 %vm2407_vm3, %v8535_v14  ;;  %v2254_v14 = vrot.slane %v7952_v4, 1  ;;  %v8585_v53 = vsel %vm2216_vm12, %v2265_v31, 0.0  ;;  %v2256_v31 = vrot.slane %v7954_v46, 1 }
 0x1d6   : > { %6544 = vmatprep.mubr.msk.f32.mxu0 %vm2407_vm3, %v8554_v8  ;;  %v1759_v26 = vand.u32 15, %v1241_v33 }
 0x1d7   : > { %v8594_v25 = vsel %vm2259_vm10, %v2253_v36, %v2254_v14  ;;  %v2263_v33 = vsel %vm2259_vm10, %v2254_v14, %v2255_v37  ;;  %v8617_v14 = vsel %vm2259_vm10, %v2255_v37, %v2256_v31  ;;  %v9413_v36 = vld [vmem:[#allocation4_spill] sm:$0xff] }
 0x1d8   : > { %6689 = vmatmul.mubr.msk.f32.gmra.mrb[24].mxu1 %vm2407_vm3, %v8548_v55  ;;  %v1243_v55 = vadd.s32 264, %v7919_v49  ;;  %vm2218_vm13 = vcmp.lt.s32.totalorder %v1759_v26, 15 }
 0x1d9   : > { %6545 = vmatmul.mubr.msk.f32.gmra.mrb[62].mxu0 %vm2407_vm3, %v8567_v5  ;;  %6691 = vmatprep.mubr.msk.f32.mxu1 %vm2407_vm3, %v8554_v8  ;;  %v8602_v42 = vsel %vm2218_vm13, %v2263_v33, 0.0 }
 0x1da   : > { %6547 = vmatprep.mubr.msk.f32.mxu0 %vm2407_vm3, %v8573_v18 }
 0x1dc   : > { %6692 = vmatmul.mubr.msk.f32.gmra.mrb[26].mxu1 %vm2407_vm3, %v8567_v5  ;;  %v1773_v5 = vand.u32 15, %v1243_v55  ;;  %v2261_v55 = vsel %vm2259_vm10, %v2256_v31, %v8295_v47 }
 0x1dd   : > { %6548 = vmatmul.mubr.msk.f32.gmra.mrb[64].mxu0 %vm2407_vm3, %v8585_v53  ;;  %6694 = vmatprep.mubr.msk.f32.mxu1 %vm2407_vm3, %v8573_v18 }
 0x1de   : > { %6550 = vmatprep.mubr.msk.f32.mxu0 %vm2407_vm3, %v8594_v25  ;;  %vm2220_vm14 = vcmp.lt.s32.totalorder %v1773_v5, 15  ;;  %v9414_v5 = vld [vmem:[#allocation2_spill] sm:$0xff] }
 0x1e0   : > { %6695 = vmatmul.mubr.msk.f32.gmra.mrb[28].mxu1 %vm2407_vm3, %v8585_v53 }
 0x1e1   : > { %6551 = vmatmul.mubr.msk.f32.gmra.mrb[66].mxu0 %vm2407_vm3, %v8602_v42  ;;  %6697 = vmatprep.mubr.msk.f32.mxu1 %vm2407_vm3, %v8594_v25 }
 0x1e2   : > { %6555 = vmatprep.mubr.msk.f32.mxu0 %vm2407_vm3, %v7975_v23  ;;  %v8628_v23 = vsel %vm2220_vm14, %v2261_v55, 0.0 }
 0x1e4   : > { %6698 = vmatmul.mubr.msk.f32.gmra.mrb[30].mxu1 %vm2407_vm3, %v8602_v42 }
 0x1e5   : > { %6556 = vmatmul.mubr.msk.f32.vlgmr.msra.gmra.mrb[36].mxu0 %vm2407_vm3, %v8012_v11  ;;  %6700 = vmatprep.mubr.msk.f32.mxu1 %vm2407_vm3, %v8617_v14  ;;  %v8643_v11 = vld [vmem:[%s9299_s5 + $0x10] sm:$0x3] }
 0x1e6   : > { %6558 = vmatprep.mubr.msk.f32.mxu0 %vm2407_vm3, %v8028_v56 }
 0x1e8   : > { %6701 = vmatmul.mubr.msk.f32.gmra.mrb[0].mxu1 %vm2407_vm3, %v8628_v23 }
 0x1e9   : > { %6559 = vmatmul.mubr.msk.f32.gmra.mrb[38].mxu0 %vm2407_vm3, %v8041_v48  ;;  %6705 = vmatprep.mubr.msk.f32.mxu1 %vm2407_vm3, %v8028_v56  ;;  %v9399_v56 = vld [vmem:[#allocation8_spill] sm:$0xff] }
 0x1ea   : > { %6561 = vmatprep.mubr.msk.f32.mxu0 %vm2407_vm3, %v8054_v9 }
 0x1ec   : > { %6706 = vmatmul.mubr.msk.f32.vlgmr.msra.gmra.mrb[2].mxu1 %vm2407_vm3, %v8041_v48  ;;  %v9400_v48 = vld [vmem:[#allocation9_spill] sm:$0xff] }
 0x1ed   : > { %6562 = vmatmul.mubr.msk.f32.gmra.mrb[40].mxu0 %vm2407_vm3, %v8068_v45  ;;  %6754 = vmatpush3.msk.msra.mxu1 %vm2504_vm2, %v8357_v6 }
 0x1ee   : > { %6564 = vmatprep.mubr.msk.f32.mxu0 %vm2407_vm3, %v8075_v44  ;;  %6708 = vmatprep.mubr.msk.f32.mxu1 %vm2407_vm3, %v8054_v9  ;;  %v9404_v9 = vld [vmem:[#allocation13_spill] sm:$0xff] }
 0x1ef   : > { %6803 = vmatprep.subr.msk.mxu1 %vm2504_vm2, %v8643_v11 }
 0x1f0   : > { %6709 = vmatmul.mubr.msk.f32.gmra.mrb[4].mxu1 %vm2407_vm3, %v8068_v45  ;;  %v9405_v45 = vld [vmem:[#allocation14_spill] sm:$0xff] }
 0x1f1   : > { %6565 = vmatmul.mubr.msk.f32.gmra.mrb[42].mxu0 %vm2407_vm3, %v8087_v20  ;;  %6711 = vmatprep.mubr.msk.f32.mxu1 %vm2407_vm3, %v8075_v44  ;;  %v9406_v44 = vld [vmem:[#allocation15_spill] sm:$0xff] }
 0x1f2   : > { %6567 = vmatprep.mubr.msk.f32.mxu0 %vm2407_vm3, %v8094_v15 }
 0x1f4   : > { %6712 = vmatmul.mubr.msk.f32.gmra.mrb[6].mxu1 %vm2407_vm3, %v8087_v20  ;;  %v9407_v20 = vld [vmem:[#allocation16_spill] sm:$0xff] }
 0x1f5   : > { %6568 = vmatmul.mubr.msk.f32.gmra.mrb[44].mxu0 %vm2407_vm3, %v8106_v30  ;;  %6714 = vmatprep.mubr.msk.f32.mxu1 %vm2407_vm3, %v8094_v15  ;;  %v9408_v15 = vld [vmem:[#allocation17_spill] sm:$0xff] }
 0x1f6   : > { %6570 = vmatprep.mubr.msk.f32.mxu0 %vm2407_vm3, %v8113_v24 }
 0x1f8   : > { %6715 = vmatmul.mubr.msk.f32.gmra.mrb[8].mxu1 %vm2407_vm3, %v8106_v30  ;;  %v9409_v30 = vld [vmem:[#allocation18_spill] sm:$0xff] }
 0x1f9   : > { %6571 = vmatmul.mubr.msk.f32.gmra.mrb[46].mxu0 %vm2407_vm3, %v8125_v35  ;;  %6717 = vmatprep.mubr.msk.f32.mxu1 %vm2407_vm3, %v8113_v24 }
 0x1fa   : > { %6573 = vmatprep.mubr.msk.f32.mxu0 %vm2407_vm3, %v8139_v2 }
 0x1fc   : > { %6718 = vmatmul.mubr.msk.f32.gmra.mrb[10].mxu1 %vm2407_vm3, %v8125_v35  ;;  %v9410_v35 = vld [vmem:[#allocation5_spill] sm:$0xff] }
 0x1fd   : > { %6574 = vmatmul.mubr.msk.f32.gmra.mrb[48].mxu0 %vm2407_vm3, %v8151_v51  ;;  %6720 = vmatprep.mubr.msk.f32.mxu1 %vm2407_vm3, %v8139_v2  ;;  %v9411_v2 = vld [vmem:[#allocation6_spill] sm:$0xff] }
 0x1fe   : > { %6576 = vmatprep.mubr.msk.f32.mxu0 %vm2407_vm3, %v8158_v38 }
 0x200   : > { %6721 = vmatmul.mubr.msk.f32.gmra.mrb[12].mxu1 %vm2407_vm3, %v8151_v51  ;;  %v9401_v51 = vld [vmem:[#allocation10_spill] sm:$0xff] }
 0x201   : > { %6577 = vmatmul.mubr.msk.f32.gmra.mrb[50].mxu0 %vm2407_vm3, %v8170_v0  ;;  %6723 = vmatprep.mubr.msk.f32.mxu1 %vm2407_vm3, %v8158_v38  ;;  %v9402_v38 = vld [vmem:[#allocation11_spill] sm:$0xff] }
 0x202   : > { %6579 = vmatprep.mubr.msk.f32.mxu0 %vm2407_vm3, %v8177_v16 }
 0x204   : > { %6724 = vmatmul.mubr.msk.f32.gmra.mrb[14].mxu1 %vm2407_vm3, %v8170_v0  ;;  %v9403_v0 = vld [vmem:[#allocation12_spill] sm:$0xff] }
 0x205   : > { %6580 = vmatmul.mubr.msk.f32.gmra.mrb[52].mxu0 %vm2407_vm3, %v9399_v56  ;;  %6726 = vmatprep.mubr.msk.f32.mxu1 %vm2407_vm3, %v8177_v16  ;;  %v9412_v16 = vld [vmem:[#allocation7_spill] sm:$0xff] }
 0x206   : > { %6582 = vmatprep.mubr.msk.f32.mxu0 %vm2407_vm3, %v9400_v48 }
 0x208   : > { %6727 = vmatmul.mubr.msk.f32.gmra.mrb[16].mxu1 %vm2407_vm3, %v9399_v56 }
 0x209   : > { %6583 = vmatmul.mubr.msk.f32.gmra.mrb[54].mxu0 %vm2407_vm3, %v9401_v51  ;;  %6729 = vmatprep.mubr.msk.f32.mxu1 %vm2407_vm3, %v9400_v48 }
 0x20a   : > { %6585 = vmatprep.mubr.msk.f32.mxu0 %vm2407_vm3, %v9402_v38 }
 0x20c   : > { %6730 = vmatmul.mubr.msk.f32.gmra.mrb[18].mxu1 %vm2407_vm3, %v9401_v51 }
 0x20d   : > { %6586 = vmatmul.mubr.msk.f32.gmra.mrb[56].mxu0 %vm2407_vm3, %v9403_v0  ;;  %6732 = vmatprep.mubr.msk.f32.mxu1 %vm2407_vm3, %v9402_v38 }
 0x20e   : > { %6588 = vmatprep.mubr.msk.f32.mxu0 %vm2407_vm3, %v9404_v9 }
 0x210   : > { %6733 = vmatmul.mubr.msk.f32.gmra.mrb[20].mxu1 %vm2407_vm3, %v9403_v0 }
 0x211   : > { %6589 = vmatmul.mubr.msk.f32.gmra.mrb[58].mxu0 %vm2407_vm3, %v8246_v54  ;;  %6735 = vmatprep.mubr.msk.f32.mxu1 %vm2407_vm3, %v9404_v9 }
 0x212   : > { %6591 = vmatprep.mubr.msk.f32.mxu0 %vm2407_vm3, %v9405_v45 }
 0x214   : > { %6736 = vmatmul.mubr.msk.f32.gmra.mrb[22].mxu1 %vm2407_vm3, %v8246_v54  ;;  %v1244_v54 = vadd.s32 272, %v7919_v49 }
 0x215   : > { %6592 = vmatmul.mubr.msk.f32.gmra.mrb[60].mxu0 %vm2407_vm3, %v9406_v44  ;;  %6738 = vmatprep.mubr.msk.f32.mxu1 %vm2407_vm3, %v9405_v45 }
 0x216   : > { %6594 = vmatprep.mubr.msk.f32.mxu0 %vm2407_vm3, %v9407_v20  ;;  %v1780_v24 = vand.u32 15, %v1244_v54 }
 0x218   : > { %6739 = vmatmul.mubr.msk.f32.gmra.mrb[24].mxu1 %vm2407_vm3, %v9406_v44  ;;  %vm2004_vm10 = vcmp.gt.s32.totalorder %v1780_v24, 0 }
 0x219   : > { %6595 = vmatmul.mubr.msk.f32.gmra.mrb[62].mxu0 %vm2407_vm3, %v9408_v15  ;;  %6741 = vmatprep.mubr.msk.f32.mxu1 %vm2407_vm3, %v9407_v20  ;;  %v2185_v6 = vsel %vm2004_vm10, %v9412_v16, 0.0  ;;  %v8940_v16 = vld [vmem:[%s9300_s6] ss:$0 sm:$0xff] }
 0x21a   : > { %6597 = vmatprep.mubr.msk.f32.mxu0 %vm2407_vm3, %v8290_v19 }
 0x21c   : > { %6742 = vmatmul.mubr.msk.f32.gmra.mrb[26].mxu1 %vm2407_vm3, %v9408_v15 }
 0x21d   : > { %6598 = vmatmul.mubr.msk.f32.gmra.mrb[64].mxu0 %vm2407_vm3, %v9409_v30  ;;  %6744 = vmatprep.mubr.msk.f32.mxu1 %vm2407_vm3, %v8290_v19 }
 0x220   : > { %6745 = vmatmul.mubr.msk.f32.gmra.mrb[28].mxu1 %vm2407_vm3, %v9409_v30 }
 0x221   : > { %6747 = vmatprep.mubr.msk.f32.mxu1 %vm2407_vm3, %v9410_v35 }
 0x224   : > { %6748 = vmatmul.mubr.msk.f32.gmra.mrb[30].mxu1 %vm2407_vm3, %v9411_v2 }
 0x225   : > { %6750 = vmatprep.mubr.msk.f32.mxu1 %vm2407_vm3, %v2185_v6 }
 0x228   : > { %6751 = vmatmul.mubr.msk.f32.gmra.mrb[0].mxu1 %vm2407_vm3, %v9413_v36 }
 0x229   : > { %6755 = vmatprep.mubr.msk.f32.mxu1 %vm2407_vm3, %v9414_v5 }
 0x22c   : > { %6756 = vmatmul.mubr.msk.f32.vlgmr.msra.gmra.mrb[2].mxu1 %vm2407_vm3, %v7701_v58  ;;  %v9415_v58 = vld [vmem:[#allocation3_spill] sm:$0xff] }
 0x22d   : > { %6804 = vmatpush3.msk.msra.mxu1 %vm2504_vm2, %v8643_v11  ;;  %6758 = vmatprep.mubr.msk.f32.mxu1 %vm2407_vm3, %v7718_v12  ;;  %v9416_v12 = vmov 0.0  }
 0x230   : > { %6759 = vmatmul.mubr.msk.f32.gmra.mrb[4].mxu1 %vm2407_vm3, %v7721_v17  ;;  %v9417_v17 = vld [vmem:[#allocation19_spill] sm:$0xff] }
 0x231   : > { %6761 = vmatprep.mubr.msk.f32.mxu1 %vm2407_vm3, %v7735_v32  ;;  %v9418_v32 = vld [vmem:[#allocation20_spill] sm:$0xff] }
 0x234   : > { %6762 = vmatmul.mubr.msk.f32.gmra.mrb[6].mxu1 %vm2407_vm3, %v7738_v39  ;;  %v9419_v39 = vld [vmem:[#allocation21_spill] sm:$0xff] }
 0x235   : > { %6764 = vmatprep.mubr.msk.f32.mxu1 %vm2407_vm3, %v7763_v7  ;;  %v9420_v7 = vld [vmem:[#allocation22_spill] sm:$0xff] }
 0x238   : > { %6765 = vmatmul.mubr.msk.f32.gmra.mrb[8].mxu1 %vm2407_vm3, %v7770_v13  ;;  %v9421_v13 = vld [vmem:[#allocation23_spill] sm:$0xff] }
 0x239   : > { %6767 = vmatprep.mubr.msk.f32.mxu1 %vm2407_vm3, %v7802_v63  ;;  %v9422_v63 = vld [vmem:[#allocation24_spill] sm:$0xff] }
 0x23c   : > { %6768 = vmatmul.mubr.msk.f32.gmra.mrb[10].mxu1 %vm2407_vm3, %v7804_v10  ;;  %v9423_v10 = vld [vmem:[#allocation25_spill] sm:$0xff] }
 0x23d   : > { %6770 = vmatprep.mubr.msk.f32.mxu1 %vm2407_vm3, %v7817_v28  ;;  %v9424_v28 = vld [vmem:[#allocation26_spill] sm:$0xff] }
 0x240   : > { %6771 = vmatmul.mubr.msk.f32.gmra.mrb[12].mxu1 %vm2407_vm3, %v7819_v43  ;;  %v9425_v43 = vld [vmem:[#allocation27_spill] sm:$0xff] }
 0x241   : > { %6773 = vmatprep.mubr.msk.f32.mxu1 %vm2407_vm3, %v7835_v1  ;;  %v9426_v1 = vld [vmem:[#allocation28_spill] sm:$0xff] }
 0x244   : > { %6774 = vmatmul.mubr.msk.f32.gmra.mrb[14].mxu1 %vm2407_vm3, %v7841_v52  ;;  %v9427_v52 = vld [vmem:[#allocation29_spill] sm:$0xff] }
 0x245   : > { %6776 = vmatprep.mubr.msk.f32.mxu1 %vm2407_vm3, %v7864_v50  ;;  %v9429_v50 = vld [vmem:[#allocation31_spill] sm:$0xff] }
 0x248   : > { %6777 = vmatmul.mubr.msk.f32.gmra.mrb[16].mxu1 %vm2407_vm3, %v7862_v34  ;;  %v9428_v34 = vld [vmem:[#allocation30_spill] sm:$0xff] }
 0x249   : > { %6779 = vmatprep.mubr.msk.f32.mxu1 %vm2407_vm3, %v9415_v58 }
 0x24c   : > { %6780 = vmatmul.mubr.msk.f32.gmra.mrb[18].mxu1 %vm2407_vm3, %v7882_v60  ;;  %v9430_v60 = vld [vmem:[#allocation32_spill] sm:$0xff] }
 0x24d   : > { %6782 = vmatprep.mubr.msk.f32.mxu1 %vm2407_vm3, %v7891_v40  ;;  %v9431_v40 = vld [vmem:[#allocation33_spill] sm:$0xff] }
 0x250   : > { %6783 = vmatmul.mubr.msk.f32.gmra.mrb[20].mxu1 %vm2407_vm3, %v7893_v62  ;;  %v9432_v62 = vld [vmem:[#allocation34_spill] sm:$0xff] }
 0x251   : > { %6785 = vmatprep.mubr.msk.f32.mxu1 %vm2407_vm3, %v7899_v29  ;;  %v9433_v29 = vld [vmem:[#allocation35_spill] sm:$0xff] }
 0x254   : > { %6786 = vmatmul.mubr.msk.f32.gmra.mrb[22].mxu1 %vm2407_vm3, %v7903_v27  ;;  %v9434_v27 = vld [vmem:[#allocation36_spill] sm:$0xff] }
 0x255   : > { %6788 = vmatprep.mubr.msk.f32.mxu1 %vm2407_vm3, %v7911_v57  ;;  %v9435_v57 = vld [vmem:[#allocation37_spill] sm:$0xff] }
 0x258   : > { %6789 = vmatmul.mubr.msk.f32.gmra.mrb[24].mxu1 %vm2407_vm3, %v7913_v21  ;;  %v9436_v21 = vld [vmem:[#allocation38_spill] sm:$0xff] }
 0x259   : > { %6791 = vmatprep.mubr.msk.f32.mxu1 %vm2407_vm3, %v7924_v22  ;;  %v9437_v22 = vld [vmem:[#allocation39_spill] sm:$0xff] }
 0x25c   : > { %6792 = vmatmul.mubr.msk.f32.gmra.mrb[26].mxu1 %vm2407_vm3, %v7927_v41  ;;  %v9438_v41 = vld [vmem:[#allocation40_spill] sm:$0xff] }
 0x25d   : > { %6794 = vmatprep.mubr.msk.f32.mxu1 %vm2407_vm3, %v7945_v59  ;;  %v1245_v59 = vadd.s32 280, %v7919_v49 }
 0x260   : > { %6795 = vmatmul.mubr.msk.f32.gmra.mrb[28].mxu1 %vm2407_vm3, %v7952_v4  ;;  %v1787_v4 = vand.u32 15, %v1245_v59 }
 0x261   : > { %6797 = vmatprep.mubr.msk.f32.mxu1 %vm2407_vm3, %v7959_v61 }
 0x262   : > { %vm2222_vm2 = vcmp.lt.s32.totalorder %v1787_v4, 15 }
 0x264   : > { %6798 = vmatmul.mubr.msk.f32.gmra.mrb[30].mxu1 %vm2407_vm3, %v7954_v46 }
 0x265   : > { %6800 = vmatprep.mubr.f32.mxu1 %v9416_v12 }
 0x268   : > { %6801 = vmatmul.mubr.f32.gmra.mrb[0].mxu1 %v9416_v12 }
 0x269   : > { %6805 = vmatprep.mubr.msk.f32.mxu1 %vm2407_vm3, %v9417_v17 }
 0x26c   : > { %6806 = vmatmul.mubr.msk.f32.vlgmr.msra.gmra.mrb[2].mxu1 %vm2407_vm3, %v9418_v32 }
 0x26d   : > { %6808 = vmatprep.mubr.msk.f32.mxu1 %vm2407_vm3, %v9419_v39 }
 0x270   : > { %6809 = vmatmul.mubr.msk.f32.gmra.mrb[4].mxu1 %vm2407_vm3, %v9420_v7 }
 0x271   : > { %6811 = vmatprep.mubr.msk.f32.mxu1 %vm2407_vm3, %v9421_v13 }
 0x274   : > { %6812 = vmatmul.mubr.msk.f32.gmra.mrb[6].mxu1 %vm2407_vm3, %v9422_v63 }
 0x275   : > { %6814 = vmatprep.mubr.msk.f32.mxu1 %vm2407_vm3, %v9423_v10 }
 0x278   : > { %6815 = vmatmul.mubr.msk.f32.gmra.mrb[8].mxu1 %vm2407_vm3, %v9424_v28 }
 0x279   : > { %6817 = vmatprep.mubr.msk.f32.mxu1 %vm2407_vm3, %v9425_v43 }
 0x27c   : > { %6818 = vmatmul.mubr.msk.f32.gmra.mrb[10].mxu1 %vm2407_vm3, %v9426_v1 }
 0x27d   : > { %6820 = vmatprep.mubr.msk.f32.mxu1 %vm2407_vm3, %v9427_v52 }
 0x280   : > { %6821 = vmatmul.mubr.msk.f32.gmra.mrb[12].mxu1 %vm2407_vm3, %v9428_v34 }
 0x281   : > { %6823 = vmatprep.mubr.msk.f32.mxu1 %vm2407_vm3, %v9429_v50 }
 0x284   : > { %6824 = vmatmul.mubr.msk.f32.gmra.mrb[14].mxu1 %vm2407_vm3, %v9430_v60 }
 0x285   : > { %6826 = vmatprep.mubr.msk.f32.mxu1 %vm2407_vm3, %v9431_v40 }
 0x288   : > { %6827 = vmatmul.mubr.msk.f32.gmra.mrb[16].mxu1 %vm2407_vm3, %v9432_v62 }
 0x289   : > { %6829 = vmatprep.mubr.msk.f32.mxu1 %vm2407_vm3, %v9433_v29 }
 0x28c   : > { %6830 = vmatmul.mubr.msk.f32.gmra.mrb[18].mxu1 %vm2407_vm3, %v9434_v27 }
 0x28d   : > { %6832 = vmatprep.mubr.msk.f32.mxu1 %vm2407_vm3, %v8516_v3 }
 0x290   : > { %6833 = vmatmul.mubr.msk.f32.gmra.mrb[20].mxu1 %vm2407_vm3, %v9435_v57 }
 0x291   : > { %6835 = vmatprep.mubr.msk.f32.mxu1 %vm2407_vm3, %v9436_v21 }
 0x294   : > { %6836 = vmatmul.mubr.msk.f32.gmra.mrb[22].mxu1 %vm2407_vm3, %v9437_v22 }
 0x295   : > { %6838 = vmatprep.mubr.msk.f32.mxu1 %vm2407_vm3, %v8554_v8  ;;  %v2403_v8 = vsel %vm2222_vm2, %v8295_v47, 0.0 }
 0x298   : > { %6839 = vmatmul.mubr.msk.f32.gmra.mrb[24].mxu1 %vm2407_vm3, %v9438_v41 }
 0x299   : > { %6841 = vmatprep.mubr.msk.f32.mxu1 %vm2407_vm3, %v8573_v18 }
 0x29c   : > { %6842 = vmatmul.mubr.msk.f32.gmra.mrb[26].mxu1 %vm2407_vm3, %v8585_v53 }
 0x29d   : > { %6844 = vmatprep.mubr.msk.f32.mxu1 %vm2407_vm3, %v8594_v25 }
 0x2a0   : > { %6845 = vmatmul.mubr.msk.f32.gmra.mrb[28].mxu1 %vm2407_vm3, %v8602_v42 }
 0x2a1   : > { %6847 = vmatprep.mubr.msk.f32.mxu1 %vm2407_vm3, %v8617_v14 }
 0x2a4   : > { %6848 = vmatmul.mubr.msk.f32.gmra.mrb[30].mxu1 %vm2407_vm3, %v8628_v23 }
 0x2a5   : > { %6850 = vmatprep.mubr.msk.f32.mxu1 %vm2407_vm3, %v8295_v47 }
 0x2a8   : > { %6851 = vmatmul.mubr.msk.f32.gmra.mrb[0].mxu1 %vm2407_vm3, %v2403_v8 }
 0x2b4   : > { %v8889_v49 = vpop.f32.mrb[66].mxu0 }
 0x2b5   : > { %v8891_v46 = vpop.f32.mrb[67].mxu0 }
 0x2b8   : > { %v6557_v61 = vpop.f32.mrb[36].mxu0 }
 0x2b9   : > { %v3492_v19 = vpop.f32.mrb[37].mxu0 }
 0x2bc   : > { %v6560_v3 = vpop.f32.mrb[38].mxu0 }
 0x2bd   : > { %v3502_v18 = vpop.f32.mrb[39].mxu0 }
 0x2c0   : > { %v6563_v26 = vpop.f32.mrb[40].mxu0 }
 0x2c1   : > { %v3512_v37 = vpop.f32.mrb[41].mxu0 }
 0x2c4   : > { %v6566_v53 = vpop.f32.mrb[42].mxu0 }
 0x2c5   : > { %v3522_v25 = vpop.f32.mrb[43].mxu0 }
 0x2c8   : > { %v8893_v33 = vpop.f32.mrb[44].mxu0 }
 0x2c9   : > { %v8895_v42 = vpop.f32.mrb[45].mxu0 }
 0x2cc   : > { %v8897_v31 = vpop.f32.mrb[46].mxu0 }
 0x2cd   : > { %v8899_v47 = vpop.f32.mrb[47].mxu0 }
 0x2d0   : > { %v8901_v14 = vpop.f32.mrb[48].mxu0 }
 0x2d1   : > { %v8903_v55 = vpop.f32.mrb[49].mxu0 }
 0x2d4   : > { %v8905_v23 = vpop.f32.mrb[50].mxu0 }
 0x2d5   : > { %v8907_v11 = vpop.f32.mrb[51].mxu0 }
 0x2d8   : > { %v8909_v56 = vpop.f32.mrb[52].mxu0 }
 0x2d9   : > { %v8911_v48 = vpop.f32.mrb[53].mxu0 }
 0x2dc   : > { %v8913_v51 = vpop.f32.mrb[54].mxu0 }
 0x2dd   : > { %v8915_v38 = vpop.f32.mrb[55].mxu0 }
 0x2e0   : > { %v8917_v0 = vpop.f32.mrb[56].mxu0 }
 0x2e1   : > { %v8919_v9 = vpop.f32.mrb[57].mxu0 }
 0x2e4   : > { %v8921_v45 = vpop.f32.mrb[58].mxu0 }
 0x2e5   : > { %v8923_v44 = vpop.f32.mrb[59].mxu0 }
 0x2e8   : > { %v8925_v20 = vpop.f32.mrb[60].mxu0 }
 0x2e9   : > { %v8927_v15 = vpop.f32.mrb[61].mxu0 }
 0x2ec   : > { %v8929_v54 = vpop.f32.mrb[62].mxu0 }
 0x2ed   : > { %v8931_v30 = vpop.f32.mrb[63].mxu0 }
 0x2f0   : > { %v8933_v24 = vpop.f32.mrb[64].mxu0 }
 0x2f1   : > { %v8935_v35 = vpop.f32.mrb[65].mxu0 }
 0x33f   : > { %v6807_v2 = vpop.f32.mrb[2].mxu1 }
 0x340   : > { %v6855_v6 = vadd.f32 %v6807_v2, %v6557_v61  ;;  %v4832_v36 = vpop.f32.mrb[3].mxu1 }
 0x341   : > { %v6856_v5 = vadd.f32 %v4832_v36, %v3492_v19 }
 0x342   : > { %v8943_v58 = vadd.f32 %v6855_v6, %v8940_v16 }
 0x343   : > { %v8946_v12 = vadd.f32 %v6856_v5, %v8940_v16  ;;  %v6810_v17 = vpop.f32.mrb[4].mxu1 }
 0x344   : > { %v5063_v32 = vmin.f32 %v8943_v58, 20.0  ;;  %v6857_v39 = vadd.f32 %v6810_v17, %v6560_v3  ;;  %v4842_v7 = vpop.f32.mrb[5].mxu1 }
 0x345   : > { %v5062_v13 = vmin.f32 %v8946_v12, 20.0  ;;  %v6858_v63 = vadd.f32 %v4842_v7, %v3502_v18 }
 0x346   : > { %v5096_v10 = vmul.f32 1.442695, %v5063_v32  ;;  %v8951_v28 = vadd.f32 %v6857_v39, %v8940_v16 }
 0x347   : > { %v5094_v43 = vmul.f32 1.442695, %v5062_v13  ;;  %v8954_v1 = vadd.f32 %v6858_v63, %v8940_v16  ;;  %v6813_v52 = vpop.f32.mrb[6].mxu1 }
 0x348   : > { %7264 = vpow2.f32 %v5096_v10  ;;  %v5065_v34 = vmin.f32 %v8951_v28, 20.0  ;;  %v6859_v50 = vadd.f32 %v6813_v52, %v6563_v26  ;;  %v4852_v60 = vpop.f32.mrb[7].mxu1 }
 0x349   : > { %7266 = vpow2.f32 %v5094_v43  ;;  %v5064_v40 = vmin.f32 %v8954_v1, 20.0  ;;  %v6860_v62 = vadd.f32 %v4852_v60, %v3512_v37 }
 0x34a   : > { %v5100_v29 = vmul.f32 1.442695, %v5065_v34  ;;  %v8959_v27 = vadd.f32 %v6859_v50, %v8940_v16 }
 0x34b   : > { %v5098_v57 = vmul.f32 1.442695, %v5064_v40  ;;  %v8962_v21 = vadd.f32 %v6860_v62, %v8940_v16  ;;  %v6816_v22 = vpop.f32.mrb[8].mxu1 }
 0x34c   : > { %7268 = vpow2.f32 %v5100_v29  ;;  %v5067_v41 = vmin.f32 %v8959_v27, 20.0  ;;  %v6861_v59 = vadd.f32 %v6816_v22, %v6566_v53  ;;  %v4862_v4 = vpop.f32.mrb[9].mxu1 }
 0x34d   : > { %7270 = vpow2.f32 %v5098_v57  ;;  %v5066_v8 = vmin.f32 %v8962_v21, 20.0  ;;  %v6862_v61 = vadd.f32 %v4862_v4, %v3522_v25 }
 0x34e   : > { %v5104_v19 = vmul.f32 1.442695, %v5067_v41  ;;  %v8967_v3 = vadd.f32 %v6861_v59, %v8940_v16 }
 0x34f   : > { %v5102_v18 = vmul.f32 1.442695, %v5066_v8  ;;  %v8970_v26 = vadd.f32 %v6862_v61, %v8940_v16  ;;  %v6819_v37 = vpop.f32.mrb[10].mxu1 }
 0x350   : > { %7272 = vpow2.f32 %v5104_v19  ;;  %v5069_v2 = vmin.f32 %v8967_v3, 20.0  ;;  %v6863_v6 = vadd.f32 %v6819_v37, %v8893_v33  ;;  %v4872_v53 = vpop.f32.mrb[11].mxu1 }
 0x351   : > { %7274 = vpow2.f32 %v5102_v18  ;;  %v5068_v36 = vmin.f32 %v8970_v26, 20.0  ;;  %v6864_v25 = vadd.f32 %v4872_v53, %v8895_v42 }
 0x352   : > { %v7265_v5 = vpop.eup %7264  ;;  %v5108_v17 = vmul.f32 1.442695, %v5069_v2  ;;  %v8977_v32 = vadd.f32 %v6863_v6, %v8940_v16 }
 0x353   : > { %v7267_v39 = vpop.eup %7266  ;;  %v5159_v7 = vadd.f32 1.0, %v7265_v5  ;;  %v5106_v13 = vmul.f32 1.442695, %v5068_v36  ;;  %v8980_v63 = vadd.f32 %v6864_v25, %v8940_v16  ;;  %v6822_v10 = vpop.f32.mrb[12].mxu1 }
 0x354   : > { %v5158_v43 = vadd.f32 1.0, %v7267_v39  ;;  %7276 = vpow2.f32 %v5108_v17  ;;  %v5071_v33 = vmin.f32 %v8977_v32, 20.0  ;;  %v6865_v52 = vadd.f32 %v6822_v10, %v8897_v31  ;;  %v4882_v34 = vpop.f32.mrb[13].mxu1 }
 0x355   : > { %v5191_v42 = vmul.f32 %v5159_v7, %v5159_v7  ;;  %7278 = vpow2.f32 %v5106_v13  ;;  %v5070_v50 = vmin.f32 %v8980_v63, 20.0  ;;  %v6866_v60 = vadd.f32 %v4882_v34, %v8899_v47 }
 0x356   : > { %v7269_v40 = vpop.eup %7268  ;;  %v5190_v62 = vmul.f32 %v5158_v43, %v5158_v43  ;;  %v5112_v29 = vmul.f32 1.442695, %v5071_v33  ;;  %v8987_v57 = vadd.f32 %v6865_v52, %v8940_v16 }
 0x357   : > { %v7271_v22 = vpop.eup %7270  ;;  %v5974_v41 = vadd.f32 -1.0, %v5191_v42  ;;  %v5287_v59 = vadd.f32 1.0, %v5191_v42  ;;  %v5161_v4 = vadd.f32 1.0, %v7269_v40  ;;  %v5110_v8 = vmul.f32 1.442695, %v5070_v50  ;;  %v6825_v61 = vpop.f32.mrb[14].mxu1 }
 0x358   : > { %v5973_v31 = vadd.f32 -1.0, %v5190_v62  ;;  %v5286_v19 = vadd.f32 1.0, %v5190_v62  ;;  %v5160_v18 = vadd.f32 1.0, %v7271_v22  ;;  %7280 = vpow2.f32 %v5112_v29  ;;  %v4892_v37 = vpop.f32.mrb[15].mxu1 }
 0x359   : > { %7282 = vrcp.f32 %v5287_v59  ;;  %v5193_v2 = vmul.f32 %v5161_v4, %v5161_v4  ;;  %v5073_v47 = vmin.f32 %v8987_v57, 20.0  ;;  %v5255_v53 = vmul.f32 %v5974_v41, %v8943_v58 }
 0x35a   : > { %v7273_v6 = vpop.eup %7272  ;;  %7284 = vrcp.f32 %v5286_v19  ;;  %v5192_v36 = vmul.f32 %v5160_v18, %v5160_v18  ;;  %v8992_v25 = vadd.f32 %v6866_v60, %v8940_v16  ;;  %v5254_v10 = vmul.f32 %v5973_v31, %v8946_v12 }
 0x35b   : > { %v7275_v5 = vpop.eup %7274  ;;  %v5976_v17 = vadd.f32 -1.0, %v5193_v2  ;;  %v5289_v39 = vadd.f32 1.0, %v5193_v2  ;;  %v5163_v7 = vadd.f32 1.0, %v7273_v6  ;;  %7286 = vpow2.f32 %v5110_v8  ;;  %v8994_v13 = vpop.f32.mrb[16].mxu1 }
 0x35c   : > { %v5288_v43 = vadd.f32 1.0, %v5192_v36  ;;  %v5162_v33 = vadd.f32 1.0, %v7275_v5  ;;  %v5116_v52 = vmul.f32 1.442695, %v5073_v47  ;;  %v8997_v34 = vpop.f32.mrb[17].mxu1  ;;  %v5975_v58 = vadd.f32 -1.0, %v5192_v36 }
 0x35d   : > { %7288 = vrcp.f32 %v5289_v39  ;;  %v5195_v42 = vmul.f32 %v5163_v7, %v5163_v7  ;;  %v5072_v50 = vmin.f32 %v8992_v25, 20.0  ;;  %v5257_v40 = vmul.f32 %v5976_v17, %v8951_v28 }
 0x35e   : > { %v7277_v60 = vpop.eup %7276  ;;  %7290 = vrcp.f32 %v5288_v43  ;;  %v5194_v62 = vmul.f32 %v5162_v33, %v5162_v33  ;;  %v6867_v29 = vadd.f32 %v6825_v61, %v8901_v14  ;;  %v5256_v47 = vmul.f32 %v5975_v58, %v8954_v1 }
 0x35f   : > { %v7279_v22 = vpop.eup %7278  ;;  %v5978_v41 = vadd.f32 -1.0, %v5195_v42  ;;  %v5291_v12 = vadd.f32 1.0, %v5195_v42  ;;  %v5165_v59 = vadd.f32 1.0, %v7277_v60  ;;  %7292 = vpow2.f32 %v5116_v52  ;;  %v9002_v4 = vpop.f32.mrb[18].mxu1 }
 0x360   : > { %v5977_v8 = vadd.f32 -1.0, %v5194_v62  ;;  %v5290_v31 = vadd.f32 1.0, %v5194_v62  ;;  %v5164_v19 = vadd.f32 1.0, %v7279_v22  ;;  %v5114_v18 = vmul.f32 1.442695, %v5072_v50  ;;  %v9004_v2 = vpop.f32.mrb[19].mxu1 }
 0x361   : > { %7294 = vrcp.f32 %v5291_v12  ;;  %v5197_v28 = vmul.f32 %v5165_v59, %v5165_v59  ;;  %v9008_v6 = vadd.f32 %v6867_v29, %v8940_v16  ;;  %v5259_v61 = vmul.f32 %v5978_v41, %v8959_v27  ;;  %v7395_v12 = vld [vmem:[%s7518_s10] sm:$0xff] }
 0x362   : > { %v7281_v14 = vpop.eup %7280  ;;  %7296 = vrcp.f32 %v5290_v31  ;;  %v5196_v36 = vmul.f32 %v5164_v19, %v5164_v19  ;;  %v6868_v5 = vadd.f32 %v4892_v37, %v8903_v55  ;;  %v5258_v58 = vmul.f32 %v5977_v8, %v8962_v21 }
 0x363   : > { %v7283_v17 = vpop.eup %7282  ;;  %v5980_v39 = vadd.f32 -1.0, %v5197_v28  ;;  %v5293_v7 = vadd.f32 1.0, %v5197_v28  ;;  %v5167_v43 = vadd.f32 1.0, %v7281_v14  ;;  %7298 = vpow2.f32 %v5114_v18  ;;  %v9012_v1 = vpop.f32.mrb[20].mxu1 }
 0x364   : > { %v7285_v33 = vpop.eup %7284  ;;  %v5351_v52 = vmul.f32 %v7283_v17, %v5255_v53  ;;  %v5292_v42 = vadd.f32 1.0, %v5196_v36  ;;  %v5075_v27 = vmin.f32 %v9008_v6, 20.0  ;;  %v9016_v50 = vpop.f32.mrb[21].mxu1  ;;  %v5979_v37 = vadd.f32 -1.0, %v5196_v36  ;;  %v7394_v53 = vld [vmem:[%s7518_s10 + $0x8] sm:$0xff] }
 0x365   : > { %v7287_v60 = vpop.eup %7286  ;;  %v5350_v55 = vmul.f32 %v7285_v33, %v5254_v10  ;;  %7300 = vrcp.f32 %v5293_v7  ;;  %v5199_v62 = vmul.f32 %v5167_v43, %v5167_v43  ;;  %v5261_v21 = vmul.f32 %v5980_v39, %v8967_v3  ;;  %v7396_v33 = vld [vmem:[%s7518_s10 + $0x18] sm:$0xff] }
 0x366   : > { %v5383_v29 = vadd.f32 %v7394_v53, %v5351_v52  ;;  %7302 = vrcp.f32 %v5292_v42  ;;  %v5166_v22 = vadd.f32 1.0, %v7287_v60  ;;  %v5120_v19 = vmul.f32 1.442695, %v5075_v27 }
 0x367   : > { %v7289_v41 = vpop.eup %7288  ;;  %v5382_v59 = vadd.f32 %v7395_v12, %v5350_v55  ;;  %v5982_v8 = vadd.f32 -1.0, %v5199_v62  ;;  %v5295_v31 = vadd.f32 1.0, %v5199_v62  ;;  %v9027_v18 = vpop.f32.mrb[22].mxu1  ;;  %v9032_v3 = vadd.f32 %v6868_v5, %v8940_v16 }
 0x368   : > { %v7291_v10 = vpop.eup %7290  ;;  %5415 = vst.msk [vmem:[%s9022_s9 + $0x8] sm:$0xff] %vm491_vm1, %v5383_v29  ;;  %v5353_v28 = vmul.f32 %v7289_v41, %v5257_v40  ;;  %v5198_v14 = vmul.f32 %v5166_v22, %v5166_v22  ;;  %v6869_v36 = vadd.f32 %v8994_v13, %v8905_v23  ;;  %v9036_v17 = vpop.f32.mrb[23].mxu1  ;;  %v5260_v43 = vmul.f32 %v5979_v37, %v8970_v26  ;;  %v7397_v13 = vld [vmem:[%s7518_s10 + $0x10] sm:$0xff] }
 0x369   : > { %v7293_v39 = vpop.eup %7292  ;;  %5414 = vst.msk [vmem:[%s9022_s9] sm:$0xff] %vm491_vm1, %v5382_v59  ;;  %v5352_v7 = vmul.f32 %v7291_v10, %v5256_v47  ;;  %7304 = vrcp.f32 %v5295_v31  ;;  %v6870_v40 = vadd.f32 %v8997_v34, %v8907_v11  ;;  %v5263_v5 = vmul.f32 %v5982_v8, %v8977_v32  ;;  %v7398_v59 = vld [vmem:[%s7518_s10 + $0x28] sm:$0xff] }
 0x36a   : > { %v5385_v52 = vadd.f32 %v7396_v33, %v5353_v28  ;;  %v5294_v42 = vadd.f32 1.0, %v5198_v14  ;;  %v5169_v27 = vadd.f32 1.0, %v7293_v39  ;;  %7306 = vpow2.f32 %v5120_v19  ;;  %v7399_v28 = vld [vmem:[%s7518_s10 + $0x20] sm:$0xff] }
 0x36b   : > { %v7295_v23 = vpop.eup %7294  ;;  %v5384_v60 = vadd.f32 %v7397_v13, %v5352_v7  ;;  %v5074_v47 = vmin.f32 %v9032_v3, 20.0  ;;  %v9048_v26 = vadd.f32 %v6869_v36, %v8940_v16  ;;  %v9050_v55 = vpop.f32.mrb[24].mxu1  ;;  %v5981_v32 = vadd.f32 -1.0, %v5198_v14 }
 0x36c   : > { %v7297_v11 = vpop.eup %7296  ;;  %5417 = vst.msk [vmem:[%s9022_s9 + $0x18] sm:$0xff] %vm491_vm1, %v5385_v52  ;;  %v5355_v34 = vmul.f32 %v7295_v23, %v5259_v61  ;;  %7308 = vrcp.f32 %v5294_v42  ;;  %v5201_v37 = vmul.f32 %v5169_v27, %v5169_v27  ;;  %v9054_v62 = vpop.f32.mrb[25].mxu1  ;;  %v9060_v12 = vadd.f32 %v6870_v40, %v8940_v16 }
 0x36d   : > { %v7299_v53 = vpop.eup %7298  ;;  %5416 = vst.msk [vmem:[%s9022_s9 + $0x10] sm:$0xff] %vm491_vm1, %v5384_v60  ;;  %v5354_v29 = vmul.f32 %v7297_v11, %v5258_v58  ;;  %v5118_v22 = vmul.f32 1.442695, %v5074_v47  ;;  %v5077_v41 = vmin.f32 %v9048_v26, 20.0  ;;  %v5262_v33 = vmul.f32 %v5981_v32, %v8980_v63  ;;  %v7400_v60 = vld [vmem:[%s7518_s10 + $0x38] sm:$0xff]  ;;  %v7401_v32 = vld [vmem:[%s7518_s10 + $0x30] sm:$0xff] }
 0x36e   : > { %v5387_v8 = vadd.f32 %v7398_v59, %v5355_v34  ;;  %v5984_v61 = vadd.f32 -1.0, %v5201_v37  ;;  %v5297_v31 = vadd.f32 1.0, %v5201_v37  ;;  %v5168_v19 = vadd.f32 1.0, %v7299_v53  ;;  %v7402_v59 = vld [vmem:[%s7518_s10 + $0x48] sm:$0xff] }
 0x36f   : > { %v7301_v10 = vpop.eup %7300  ;;  %v5386_v14 = vadd.f32 %v7399_v28, %v5354_v29  ;;  %7310 = vpow2.f32 %v5118_v22  ;;  %v5124_v36 = vmul.f32 1.442695, %v5077_v41  ;;  %v5076_v58 = vmin.f32 %v9060_v12, 20.0  ;;  %v9065_v39 = vpop.f32.mrb[26].mxu1 }
 0x370   : > { %v7303_v7 = vpop.eup %7302  ;;  %5419 = vst.msk [vmem:[%s9022_s9 + $0x28] sm:$0xff] %vm491_vm1, %v5387_v8  ;;  %v5357_v40 = vmul.f32 %v7301_v10, %v5261_v21  ;;  %7312 = vrcp.f32 %v5297_v31  ;;  %v5200_v52 = vmul.f32 %v5168_v19, %v5168_v19  ;;  %v9070_v42 = vpop.f32.mrb[27].mxu1  ;;  %v6871_v13 = vadd.f32 %v9002_v4, %v8909_v56 }
 0x371   : > { %5418 = vst.msk [vmem:[%s9022_s9 + $0x20] sm:$0xff] %vm491_vm1, %v5386_v14  ;;  %v5356_v27 = vmul.f32 %v7303_v7, %v5260_v43  ;;  %7314 = vpow2.f32 %v5124_v36  ;;  %v5122_v23 = vmul.f32 1.442695, %v5076_v58  ;;  %v5265_v21 = vmul.f32 %v5984_v61, %v8987_v57  ;;  %v7403_v7 = vld [vmem:[%s7518_s10 + $0x40] sm:$0xff] }
 0x372   : > { %v5389_v47 = vadd.f32 %v7400_v60, %v5357_v40  ;;  %v5296_v11 = vadd.f32 1.0, %v5200_v52  ;;  %v6872_v63 = vadd.f32 %v9004_v2, %v8911_v48  ;;  %v9082_v43 = vadd.f32 %v6871_v13, %v8940_v16 }
 0x373   : > { %v7305_v34 = vpop.eup %7304  ;;  %v5388_v37 = vadd.f32 %v7401_v32, %v5356_v27  ;;  %7316 = vpow2.f32 %v5122_v23  ;;  %v6873_v56 = vadd.f32 %v9012_v1, %v8913_v51  ;;  %v9086_v4 = vpop.f32.mrb[28].mxu1  ;;  %v5983_v53 = vadd.f32 -1.0, %v5200_v52 }
 0x374   : > { %5421 = vst.msk [vmem:[%s9022_s9 + $0x38] sm:$0xff] %vm491_vm1, %v5389_v47  ;;  %v5359_v57 = vmul.f32 %v7305_v34, %v5263_v5  ;;  %7318 = vrcp.f32 %v5296_v11  ;;  %v9091_v48 = vadd.f32 %v6872_v63, %v8940_v16  ;;  %v9093_v2 = vpop.f32.mrb[29].mxu1  ;;  %v7307_v29 = vpop.eup %7306  ;;  %v5079_v22 = vmin.f32 %v9082_v43, 20.0 }
 0x375   : > { %5420 = vst.msk [vmem:[%s9022_s9 + $0x30] sm:$0xff] %vm491_vm1, %v5388_v37  ;;  %v9099_v51 = vadd.f32 %v6873_v56, %v8940_v16  ;;  %v6874_v1 = vadd.f32 %v9016_v50, %v8915_v38  ;;  %v6875_v5 = vadd.f32 %v9027_v18, %v8917_v0  ;;  %v5171_v61 = vadd.f32 1.0, %v7307_v29  ;;  %v7404_v29 = vld [vmem:[%s7518_s10 + $0x58] sm:$0xff] }
 0x376   : > { %v7309_v41 = vpop.eup %7308  ;;  %v5391_v8 = vadd.f32 %v7402_v59, %v5359_v57  ;;  %v5078_v31 = vmin.f32 %v9091_v48, 20.0  ;;  %v6876_v19 = vadd.f32 %v9036_v17, %v8919_v9  ;;  %v5128_v28 = vmul.f32 1.442695, %v5079_v22 }
 0x377   : > { %v5358_v10 = vmul.f32 %v7309_v41, %v5262_v33  ;;  %v5081_v14 = vmin.f32 %v9099_v51, 20.0  ;;  %v9111_v36 = vadd.f32 %v6874_v1, %v8940_v16  ;;  %v9113_v38 = vpop.f32.mrb[30].mxu1  ;;  %v5203_v0 = vmul.f32 %v5171_v61, %v5171_v61 }
 0x378   : > { %5423 = vst.msk [vmem:[%s9022_s9 + $0x48] sm:$0xff] %vm491_vm1, %v5391_v8  ;;  %v5126_v50 = vmul.f32 1.442695, %v5078_v31  ;;  %v9118_v18 = vadd.f32 %v6875_v5, %v8940_v16  ;;  %v9121_v58 = vadd.f32 %v6876_v19, %v8940_v16  ;;  %v9123_v9 = vpop.f32.mrb[31].mxu1  ;;  %7320 = vpow2.f32 %v5128_v28 }
 0x379   : > { %v7311_v17 = vpop.eup %7310  ;;  %v5390_v40 = vadd.f32 %v7403_v7, %v5358_v10  ;;  %v5132_v33 = vmul.f32 1.442695, %v5081_v14  ;;  %v5080_v52 = vmin.f32 %v9111_v36, 20.0  ;;  %v5264_v23 = vmul.f32 %v5983_v53, %v8992_v25  ;;  %v7405_v14 = vld [vmem:[%s7518_s10 + $0x50] sm:$0xff] }
 0x37a   : > { %v7313_v27 = vpop.eup %7312  ;;  %v5299_v13 = vadd.f32 1.0, %v5203_v0  ;;  %v5170_v60 = vadd.f32 1.0, %v7311_v17  ;;  %7322 = vpow2.f32 %v5126_v50  ;;  %v5083_v34 = vmin.f32 %v9118_v18, 20.0 }
 0x37b   : > { %v7315_v47 = vpop.eup %7314  ;;  %5422 = vst.msk [vmem:[%s9022_s9 + $0x40] sm:$0xff] %vm491_vm1, %v5390_v40  ;;  %v5361_v11 = vmul.f32 %v7313_v27, %v5265_v21  ;;  %7324 = vpow2.f32 %v5132_v33  ;;  %v5130_v63 = vmul.f32 1.442695, %v5080_v52  ;;  %v9131_v32 = vpop.f32.mrb[0].mxu1  ;;  %v5986_v37 = vadd.f32 -1.0, %v5203_v0 }
 0x37c   : > { %7326 = vrcp.f32 %v5299_v13  ;;  %v5202_v56 = vmul.f32 %v5170_v60, %v5170_v60  ;;  %v5173_v57 = vadd.f32 1.0, %v7315_v47  ;;  %v9133_v25 = vpop.f32.mrb[1].mxu1  ;;  %v5136_v1 = vmul.f32 1.442695, %v5083_v34 }
 0x37d   : > { %v7317_v53 = vpop.eup %7316  ;;  %v5393_v22 = vadd.f32 %v7404_v29, %v5361_v11  ;;  %7328 = vpow2.f32 %v5130_v63  ;;  %v5082_v21 = vmin.f32 %v9121_v58, 20.0  ;;  %v6877_v19 = vadd.f32 %v9050_v55, %v8921_v45 }
 0x37e   : > { %v7319_v5 = vpop.eup %7318  ;;  %v5298_v41 = vadd.f32 1.0, %v5202_v56  ;;  %v5205_v59 = vmul.f32 %v5173_v57, %v5173_v57  ;;  %v5172_v8 = vadd.f32 1.0, %v7317_v53  ;;  %7330 = vpow2.f32 %v5136_v1 }
 0x37f   : > { %5425 = vst.msk [vmem:[%s9022_s9 + $0x58] sm:$0xff] %vm491_vm1, %v5393_v22  ;;  %v5360_v61 = vmul.f32 %v7319_v5, %v5264_v23  ;;  %v5134_v31 = vmul.f32 1.442695, %v5082_v21  ;;  %v5267_v10 = vmul.f32 %v5986_v37, %v9008_v6  ;;  %v9144_v17 = vadd.f32 %v6877_v19, %v8940_v16  ;;  %v7406_v5 = vld [vmem:[%s7518_s10 + $0x68] sm:$0xff] }
 0x380   : > { %7332 = vrcp.f32 %v5298_v41  ;;  %v5301_v28 = vadd.f32 1.0, %v5205_v59  ;;  %v5204_v50 = vmul.f32 %v5172_v8, %v5172_v8  ;;  %v5985_v7 = vadd.f32 -1.0, %v5202_v56 }
 0x381   : > { %v5392_v0 = vadd.f32 %v7405_v14, %v5360_v61  ;;  %7334 = vpow2.f32 %v5134_v31  ;;  %v6878_v40 = vadd.f32 %v9054_v62, %v8923_v44  ;;  %v6879_v33 = vadd.f32 %v9065_v39, %v8925_v20 }
 0x382   : > { %7336 = vrcp.f32 %v5301_v28  ;;  %v7321_v45 = vpop.eup %7320  ;;  %v5988_v6 = vadd.f32 -1.0, %v5205_v59  ;;  %v5300_v55 = vadd.f32 1.0, %v5204_v50  ;;  %v5085_v52 = vmin.f32 %v9144_v17, 20.0 }
 0x383   : > { %5424 = vst.msk [vmem:[%s9022_s9 + $0x50] sm:$0xff] %vm491_vm1, %v5392_v0  ;;  %v6880_v27 = vadd.f32 %v9070_v42, %v8927_v15  ;;  %v5987_v13 = vadd.f32 -1.0, %v5204_v50  ;;  %v5175_v60 = vadd.f32 1.0, %v7321_v45  ;;  %v9156_v47 = vadd.f32 %v6878_v40, %v8940_v16 }
 0x384   : > { %v7323_v23 = vpop.eup %7322  ;;  %v9160_v44 = vadd.f32 %v9086_v4, %v8929_v54  ;;  %7338 = vrcp.f32 %v5300_v55  ;;  %v5140_v39 = vmul.f32 1.442695, %v5085_v52  ;;  %v9163_v11 = vadd.f32 %v6879_v33, %v8940_v16  ;;  %v7407_v33 = vld [vmem:[%s7518_s10 + $0x60] sm:$0xff] }
 0x385   : > { %v7325_v20 = vpop.eup %7324  ;;  %v5174_v62 = vadd.f32 1.0, %v7323_v23  ;;  %v5266_v15 = vmul.f32 %v5985_v7, %v9032_v3  ;;  %v5207_v42 = vmul.f32 %v5175_v60, %v5175_v60  ;;  %v5084_v37 = vmin.f32 %v9156_v47, 20.0 }
 0x386   : > { %v7327_v63 = vpop.eup %7326  ;;  %v5177_v34 = vadd.f32 1.0, %v7325_v20  ;;  %v5269_v54 = vmul.f32 %v5988_v6, %v9048_v26  ;;  %7340 = vpow2.f32 %v5140_v39  ;;  %v5268_v53 = vmul.f32 %v5987_v13, %v9060_v12  ;;  %v7408_v20 = vld [vmem:[%s7518_s10 + $0x78] sm:$0xff] }
 0x387   : > { %v7329_v56 = vpop.eup %7328  ;;  %v5363_v57 = vmul.f32 %v7327_v63, %v5267_v10  ;;  %v5206_v4 = vmul.f32 %v5174_v62, %v5174_v62  ;;  %v5303_v29 = vadd.f32 1.0, %v5207_v42  ;;  %v5087_v59 = vmin.f32 %v9163_v11, 20.0 }
 0x388   : > { %v5209_v22 = vmul.f32 %v5177_v34, %v5177_v34  ;;  %v5176_v1 = vadd.f32 1.0, %v7329_v56  ;;  %v7331_v21 = vpop.eup %7330  ;;  %v9172_v8 = vadd.f32 %v6880_v27, %v8940_v16  ;;  %v5990_v26 = vadd.f32 -1.0, %v5207_v42 }
 0x389   : > { %v5395_v41 = vadd.f32 %v7406_v5, %v5363_v57  ;;  %v5302_v3 = vadd.f32 1.0, %v5206_v4  ;;  %7342 = vrcp.f32 %v5303_v29  ;;  %v5138_v19 = vmul.f32 1.442695, %v5084_v37 }
 0x38a   : > { %v7333_v61 = vpop.eup %7332  ;;  %v5305_v31 = vadd.f32 1.0, %v5209_v22  ;;  %v5989_v28 = vadd.f32 -1.0, %v5206_v4  ;;  %v5208_v14 = vmul.f32 %v5176_v1, %v5176_v1  ;;  %v5992_v50 = vadd.f32 -1.0, %v5209_v22 }
 0x38b   : > { %v7335_v12 = vpop.eup %7334  ;;  %5427 = vst.msk [vmem:[%s9022_s9 + $0x68] sm:$0xff] %vm491_vm1, %v5395_v41  ;;  %v5362_v10 = vmul.f32 %v7333_v61, %v5266_v15  ;;  %7344 = vrcp.f32 %v5302_v3  ;;  %v5179_v7 = vadd.f32 1.0, %v7331_v21  ;;  %v5144_v13 = vmul.f32 1.442695, %v5087_v59 }
 0x38c   : > { %v7337_v0 = vpop.eup %7336  ;;  %7346 = vrcp.f32 %v5305_v31  ;;  %v5178_v40 = vadd.f32 1.0, %v7335_v12  ;;  %v5991_v55 = vadd.f32 -1.0, %v5208_v14  ;;  %v5304_v52 = vadd.f32 1.0, %v5208_v14 }
 0x38d   : > { %v5394_v45 = vadd.f32 %v7407_v33, %v5362_v10  ;;  %v5365_v6 = vmul.f32 %v7337_v0, %v5269_v54  ;;  %v5211_v27 = vmul.f32 %v5179_v7, %v5179_v7  ;;  %7348 = vpow2.f32 %v5138_v19  ;;  %v7411_v10 = vld [vmem:[%s7518_s10 + $0x80] sm:$0xff]  ;;  %v7412_v7 = vld [vmem:[%s7518_s10 + $0x98] sm:$0xff] }
 0x38e   : > { %v5210_v23 = vmul.f32 %v5178_v40, %v5178_v40  ;;  %v7339_v60 = vpop.eup %7338  ;;  %v5271_v39 = vmul.f32 %v5990_v26, %v9082_v43  ;;  %7350 = vrcp.f32 %v5304_v52  ;;  %v5086_v63 = vmin.f32 %v9172_v8, 20.0  ;;  %v7409_v43 = vld [vmem:[%s7518_s10 + $0x70] sm:$0xff] }
 0x38f   : > { %5426 = vst.msk [vmem:[%s9022_s9 + $0x60] sm:$0xff] %vm491_vm1, %v5394_v45  ;;  %v5397_v62 = vadd.f32 %v7408_v20, %v5365_v6  ;;  %v5364_v15 = vmul.f32 %v7339_v60, %v5268_v53  ;;  %v5270_v42 = vmul.f32 %v5989_v28, %v9091_v48  ;;  %v5273_v34 = vmul.f32 %v5992_v50, %v9099_v51 }
 0x390   : > { %v5307_v37 = vadd.f32 1.0, %v5211_v27  ;;  %v7341_v56 = vpop.eup %7340  ;;  %v5306_v57 = vadd.f32 1.0, %v5210_v23  ;;  %7352 = vpow2.f32 %v5144_v13  ;;  %v5142_v54 = vmul.f32 1.442695, %v5086_v63 }
 0x391   : > { %5429 = vst.msk [vmem:[%s9022_s9 + $0x78] sm:$0xff] %vm491_vm1, %v5397_v62  ;;  %v9188_v4 = vadd.f32 %v9160_v44, %v8940_v16  ;;  %v5396_v29 = vadd.f32 %v7409_v43, %v5364_v15  ;;  %v5272_v53 = vmul.f32 %v5991_v55, %v9111_v36  ;;  %v5994_v22 = vadd.f32 -1.0, %v5211_v27  ;;  %v7414_v43 = vld [vmem:[%s7518_s10 + $0xa8] sm:$0xff] }
 0x392   : > { %7354 = vrcp.f32 %v5307_v37  ;;  %v5181_v48 = vadd.f32 1.0, %v7341_v56  ;;  %v6882_v1 = vadd.f32 %v9093_v2, %v8931_v30  ;;  %v6883_v44 = vadd.f32 %v9113_v38, %v8933_v24 }
 0x393   : > { %7356 = vrcp.f32 %v5306_v57  ;;  %v5089_v51 = vmin.f32 %v9188_v4, 20.0  ;;  %v7343_v21 = vpop.eup %7342  ;;  %5428 = vst.msk [vmem:[%s9022_s9 + $0x70] sm:$0xff] %vm491_vm1, %v5396_v29  ;;  %v6884_v36 = vadd.f32 %v9123_v9, %v8935_v35  ;;  %v6885_v5 = vadd.f32 %v9131_v32, %v8889_v49  ;;  %v7410_v49 = vld [vmem:[%s7518_s10 + $0x88] sm:$0xff] }
 0x394   : > { %7358 = vpow2.f32 %v5142_v54  ;;  %v5367_v3 = vmul.f32 %v7343_v21, %v5271_v39  ;;  %v5213_v59 = vmul.f32 %v5181_v48, %v5181_v48  ;;  %v9204_v30 = vadd.f32 %v6882_v1, %v8940_v16  ;;  %v7413_v39 = vld [vmem:[%s7518_s10 + $0x90] sm:$0xff] }
 0x395   : > { %v7345_v41 = vpop.eup %7344  ;;  %v5148_v61 = vmul.f32 1.442695, %v5089_v51  ;;  %v5993_v31 = vadd.f32 -1.0, %v5210_v23  ;;  %v9207_v24 = vadd.f32 %v6883_v44, %v8940_v16  ;;  %v9210_v35 = vadd.f32 %v6884_v36, %v8940_v16 }
 0x396   : > { %v7347_v2 = vpop.eup %7346  ;;  %v5366_v26 = vmul.f32 %v7345_v41, %v5270_v42  ;;  %v5399_v38 = vadd.f32 %v7410_v49, %v5367_v3  ;;  %v5309_v32 = vadd.f32 1.0, %v5213_v59  ;;  %v9214_v19 = vadd.f32 %v6885_v5, %v8940_v16 }
 0x397   : > { %v5369_v9 = vmul.f32 %v7347_v2, %v5273_v34  ;;  %v7349_v12 = vpop.eup %7348  ;;  %7360 = vpow2.f32 %v5148_v61  ;;  %v5088_v14 = vmin.f32 %v9204_v30, 20.0  ;;  %v5091_v0 = vmin.f32 %v9207_v24, 20.0 }
 0x398   : > { %v5398_v28 = vadd.f32 %v7411_v10, %v5366_v26  ;;  %v7351_v50 = vpop.eup %7350  ;;  %5431 = vst.msk [vmem:[%s9022_s9 + $0x88] sm:$0xff] %vm491_vm1, %v5399_v38  ;;  %v5275_v33 = vmul.f32 %v5994_v22, %v9118_v18  ;;  %7362 = vrcp.f32 %v5309_v32  ;;  %v5180_v45 = vadd.f32 1.0, %v7349_v12  ;;  %v7415_v22 = vld [vmem:[%s7518_s10 + $0xa0] sm:$0xff] }
 0x399   : > { %v5401_v40 = vadd.f32 %v7412_v7, %v5369_v9  ;;  %v5368_v6 = vmul.f32 %v7351_v50, %v5272_v53  ;;  %v5146_v55 = vmul.f32 1.442695, %v5088_v14  ;;  %v5152_v52 = vmul.f32 1.442695, %v5091_v0 }
 0x39a   : > { %5430 = vst.msk [vmem:[%s9022_s9 + $0x80] sm:$0xff] %vm491_vm1, %v5398_v28  ;;  %v5090_v27 = vmin.f32 %v9210_v35, 20.0  ;;  %v7353_v23 = vpop.eup %7352  ;;  %v5274_v13 = vmul.f32 %v5993_v31, %v9121_v58  ;;  %v5212_v60 = vmul.f32 %v5180_v45, %v5180_v45  ;;  %v5093_v20 = vmin.f32 %v9214_v19, 20.0 }
 0x39b   : > { %5433 = vst.msk [vmem:[%s9022_s9 + $0x98] sm:$0xff] %vm491_vm1, %v5401_v40  ;;  %v6886_v18 = vadd.f32 %v9133_v25, %v8891_v46  ;;  %v5400_v63 = vadd.f32 %v7413_v39, %v5368_v6  ;;  %v5183_v15 = vadd.f32 1.0, %v7353_v23  ;;  %7364 = vpow2.f32 %v5146_v55 }
 0x39c   : > { %v7355_v62 = vpop.eup %7354  ;;  %v5150_v42 = vmul.f32 1.442695, %v5090_v27  ;;  %v5996_v56 = vadd.f32 -1.0, %v5213_v59  ;;  %v5308_v57 = vadd.f32 1.0, %v5212_v60  ;;  %7366 = vpow2.f32 %v5152_v52 }
 0x39d   : > { %v7357_v34 = vpop.eup %7356  ;;  %v5371_v37 = vmul.f32 %v7355_v62, %v5275_v33  ;;  %5432 = vst.msk [vmem:[%s9022_s9 + $0x90] sm:$0xff] %vm491_vm1, %v5400_v63  ;;  %v5215_v46 = vmul.f32 %v5183_v15, %v5183_v15  ;;  %v5156_v25 = vmul.f32 1.442695, %v5093_v20  ;;  %v9240_v21 = vadd.f32 %v6886_v18, %v8940_v16  ;;  %v7416_v16 = vld [vmem:[%s7518_s10 + $0xb8] sm:$0xff] }
 0x39e   : > { %v7359_v58 = vpop.eup %7358  ;;  %v5370_v54 = vmul.f32 %v7357_v34, %v5274_v13  ;;  %7368 = vpow2.f32 %v5150_v42  ;;  %v5277_v36 = vmul.f32 %v5996_v56, %v9144_v17  ;;  %v5995_v2 = vadd.f32 -1.0, %v5212_v60  ;;  %v7417_v60 = vld [vmem:[%s7518_s10 + $0xb0] sm:$0xff]  ;;  %v7418_v42 = vld [vmem:[%s7518_s10 + $0xc8] sm:$0xff] }
 0x39f   : > { %v5403_v29 = vadd.f32 %v7414_v43, %v5371_v37  ;;  %7370 = vrcp.f32 %v5308_v57  ;;  %v5182_v53 = vadd.f32 1.0, %v7359_v58  ;;  %v5311_v51 = vadd.f32 1.0, %v5215_v46 }
 0x3a0   : > { %v5402_v48 = vadd.f32 %v7415_v22, %v5370_v54  ;;  %7372 = vpow2.f32 %v5156_v25  ;;  %v5092_v59 = vmin.f32 %v9240_v21, 20.0  ;;  %v5998_v32 = vadd.f32 -1.0, %v5215_v46  ;;  %v7419_v54 = vld [vmem:[%s7518_s10 + $0xc0] sm:$0xff] }
 0x3a1   : > { %5435 = vst.msk [vmem:[%s9022_s9 + $0xa8] sm:$0xff] %vm491_vm1, %v5403_v29  ;;  %v5214_v1 = vmul.f32 %v5182_v53, %v5182_v53  ;;  %v7361_v44 = vpop.eup %7360  ;;  %7374 = vrcp.f32 %v5311_v51  ;;  %v5276_v28 = vmul.f32 %v5995_v2, %v9156_v47  ;;  %v7420_v51 = vld [vmem:[%s7518_s10 + $0xd8] sm:$0xff] }
 0x3a2   : > { %5434 = vst.msk [vmem:[%s9022_s9 + $0xa0] sm:$0xff] %vm491_vm1, %v5402_v48  ;;  %v7363_v5 = vpop.eup %7362  ;;  %v5185_v3 = vadd.f32 1.0, %v7361_v44  ;;  %v5154_v31 = vmul.f32 1.442695, %v5092_v59  ;;  %v5279_v55 = vmul.f32 %v5998_v32, %v9163_v11  ;;  %v7423_v32 = vld [vmem:[%s7518_s10 + $0xe0] sm:$0xff] }
 0x3a3   : > { %v5310_v41 = vadd.f32 1.0, %v5214_v1  ;;  %v5373_v61 = vmul.f32 %v7363_v5, %v5277_v36  ;;  %v5997_v45 = vadd.f32 -1.0, %v5214_v1 }
 0x3a4   : > { %v5217_v26 = vmul.f32 %v5185_v3, %v5185_v3 }
 0x3a5   : > { %7376 = vrcp.f32 %v5310_v41  ;;  %v7365_v49 = vpop.eup %7364  ;;  %v5405_v38 = vadd.f32 %v7416_v16, %v5373_v61  ;;  %v5278_v39 = vmul.f32 %v5997_v45, %v9172_v8 }
 0x3a6   : > { %v7367_v9 = vpop.eup %7366  ;;  %v5313_v12 = vadd.f32 1.0, %v5217_v26  ;;  %v5184_v10 = vadd.f32 1.0, %v7365_v49  ;;  %7378 = vpow2.f32 %v5154_v31  ;;  %v6000_v62 = vadd.f32 -1.0, %v5217_v26  ;;  %v7422_v49 = vld [vmem:[%s7518_s10 + $0xe8] sm:$0xff] }
 0x3a7   : > { %5437 = vst.msk [vmem:[%s9022_s9 + $0xb8] sm:$0xff] %vm491_vm1, %v5405_v38  ;;  %v5187_v14 = vadd.f32 1.0, %v7367_v9 }
 0x3a8   : > { %v7369_v17 = vpop.eup %7368  ;;  %7380 = vrcp.f32 %v5313_v12  ;;  %v5216_v50 = vmul.f32 %v5184_v10, %v5184_v10  ;;  %v5281_v58 = vmul.f32 %v6000_v62, %v9188_v4 }
 0x3a9   : > { %v7371_v0 = vpop.eup %7370  ;;  %v5186_v7 = vadd.f32 1.0, %v7369_v17  ;;  %v5219_v6 = vmul.f32 %v5187_v14, %v5187_v14  ;;  %v7424_v17 = vld [vmem:[%s7518_s10 + $0xf8] sm:$0xff] }
 0x3aa   : > { %v7373_v40 = vpop.eup %7372  ;;  %v5372_v33 = vmul.f32 %v7371_v0, %v5276_v28  ;;  %v5312_v52 = vadd.f32 1.0, %v5216_v50  ;;  %v5999_v25 = vadd.f32 -1.0, %v5216_v50  ;;  %v7425_v50 = vld [vmem:[%s7518_s10 + $0xf0] sm:$0xff] }
 0x3ab   : > { %v5218_v27 = vmul.f32 %v5186_v7, %v5186_v7  ;;  %v5189_v23 = vadd.f32 1.0, %v7373_v40  ;;  %v7375_v13 = vpop.eup %7374  ;;  %v5315_v47 = vadd.f32 1.0, %v5219_v6  ;;  %v6002_v29 = vadd.f32 -1.0, %v5219_v6 }
 0x3ac   : > { %v5404_v20 = vadd.f32 %v7417_v60, %v5372_v33  ;;  %v5375_v18 = vmul.f32 %v7375_v13, %v5279_v55  ;;  %7382 = vrcp.f32 %v5312_v52  ;;  %v5280_v44 = vmul.f32 %v5999_v25, %v9204_v30  ;;  %v7421_v30 = vld [vmem:[%s7518_s10 + $0xd0] sm:$0xff] }
 0x3ad   : > { %7384 = vrcp.f32 %v5315_v47  ;;  %v5314_v63 = vadd.f32 1.0, %v5218_v27  ;;  %v5221_v11 = vmul.f32 %v5189_v23, %v5189_v23  ;;  %v6001_v48 = vadd.f32 -1.0, %v5218_v27 }
 0x3ae   : > { %5436 = vst.msk [vmem:[%s9022_s9 + $0xb0] sm:$0xff] %vm491_vm1, %v5404_v20  ;;  %v5407_v34 = vadd.f32 %v7418_v42, %v5375_v18  ;;  %v5283_v5 = vmul.f32 %v6002_v29, %v9207_v24 }
 0x3af   : > { %v7377_v15 = vpop.eup %7376  ;;  %7386 = vrcp.f32 %v5314_v63  ;;  %v5317_v56 = vadd.f32 1.0, %v5221_v11  ;;  %v6004_v41 = vadd.f32 -1.0, %v5221_v11  ;;  %v5282_v2 = vmul.f32 %v6001_v48, %v9210_v35 }
 0x3b0   : > { %v5374_v37 = vmul.f32 %v7377_v15, %v5278_v39  ;;  %v7379_v57 = vpop.eup %7378  ;;  %5439 = vst.msk [vmem:[%s9022_s9 + $0xc8] sm:$0xff] %vm491_vm1, %v5407_v34 }
 0x3b1   : > { %7388 = vrcp.f32 %v5317_v56  ;;  %v5188_v8 = vadd.f32 1.0, %v7379_v57  ;;  %v5285_v38 = vmul.f32 %v6004_v41, %v9214_v19 }
 0x3b2   : > { %v5406_v46 = vadd.f32 %v7419_v54, %v5374_v37  ;;  %v7381_v43 = vpop.eup %7380 }
 0x3b3   : > { %v5377_v53 = vmul.f32 %v7381_v43, %v5281_v58  ;;  %v5220_v22 = vmul.f32 %v5188_v8, %v5188_v8 }
 0x3b4   : > { %5438 = vst.msk [vmem:[%s9022_s9 + $0xc0] sm:$0xff] %vm491_vm1, %v5406_v46 }
 0x3b5   : > { %v5409_v1 = vadd.f32 %v7420_v51, %v5377_v53  ;;  %v5316_v4 = vadd.f32 1.0, %v5220_v22  ;;  %v6003_v10 = vadd.f32 -1.0, %v5220_v22 }
 0x3b6   : > { %v7383_v36 = vpop.eup %7382 }
 0x3b7   : > { %v7385_v3 = vpop.eup %7384  ;;  %5441 = vst.msk [vmem:[%s9022_s9 + $0xd8] sm:$0xff] %vm491_vm1, %v5409_v1  ;;  %v5376_v59 = vmul.f32 %v7383_v36, %v5280_v44  ;;  %7390 = vrcp.f32 %v5316_v4  ;;  %v5284_v14 = vmul.f32 %v6003_v10, %v9240_v21 }
 0x3b8   : > { %v5379_v61 = vmul.f32 %v7385_v3, %v5283_v5 }
 0x3b9   : > { %v7387_v26 = vpop.eup %7386  ;;  %v5408_v31 = vadd.f32 %v7421_v30, %v5376_v59 }
 0x3ba   : > { %v5411_v24 = vadd.f32 %v7422_v49, %v5379_v61  ;;  %v5378_v16 = vmul.f32 %v7387_v26, %v5282_v2 }
 0x3bb   : > { %v7389_v9 = vpop.eup %7388  ;;  %5440 = vst.msk [vmem:[%s9022_s9 + $0xd0] sm:$0xff] %vm491_vm1, %v5408_v31 }
 0x3bc   : > { %5443 = vst.msk [vmem:[%s9022_s9 + $0xe8] sm:$0xff] %vm491_vm1, %v5411_v24  ;;  %v5410_v12 = vadd.f32 %v7423_v32, %v5378_v16  ;;  %v5381_v35 = vmul.f32 %v7389_v9, %v5285_v38 }
 0x3be   : > { %5442 = vst.msk [vmem:[%s9022_s9 + $0xe0] sm:$0xff] %vm491_vm1, %v5410_v12  ;;  %v5413_v28 = vadd.f32 %v7424_v17, %v5381_v35 }
 0x3c0   : > { %5445 = vst.msk [vmem:[%s9022_s9 + $0xf8] sm:$0xff] %vm491_vm1, %v5413_v28 }
 0x3c1   : > { %v7391_v0 = vpop.eup %7390 }
 0x3c2   : > { %v5380_v19 = vmul.f32 %v7391_v0, %v5284_v14 }
 0x3c4   : > { %v5412_v7 = vadd.f32 %v7425_v50, %v5380_v19 }
 0x3c6   : > { %5444 = vst.msk [vmem:[%s9022_s9 + $0xf0] sm:$0xff] %vm491_vm1, %v5412_v7 }
 0x3c7 PF: > { %s17_s26 = sadd.s32 1, %s7448_s26   ;;  %s9439_s24 = smov %s7444_s25 }
 0x3c8   : > { %p14_p5 = scmp.ge.s32.totalorder %s17_s26, 4   ;;  %s9440_s25 = smov %s9442_s27 }
 0x3ca   :  { %16 = sbr.rel (!%p14_p5) target bundleno = 2 (0x2), region = 92 }

// kernel: tpu_custom_call.1
= control target key start
LH: loop header
LB: loop body
LE: loop exit
PB: predicated region body
PF: predicated region fallthrough
CT: control target
= control target key end

     0   :  { %s6902_s24 = smov 0   ;;  %s6904_s25 = smov 0   ;;  %s8910_s0 = inlined_call_operand.vmem [shape: f32[2,16,16,4], index: 0, kind: input, shape index: {}]   ;;  %s8911_s1 = inlined_call_operand.vmem [shape: f32[2,16,16,4], index: 1, kind: input, shape index: {}]   ;;  %s8912_s2 = inlined_call_operand.vmem [shape: f32[2,16,16,4], index: 2, kind: input, shape index: {}]   ;;  %s8913_s3 = inlined_call_operand.vmem [shape: f32[4,2], index: 3, kind: input, shape index: {}]   ;;  %s8914_s4 = inlined_call_operand.vmem [shape: f32[1,2], index: 4, kind: input, shape index: {}]   ;;  %s8915_s5 = inlined_call_operand.vmem [shape: f32[3,3,2,4], index: 5, kind: input, shape index: {}]   ;;  %s8916_s6 = inlined_call_operand.vmem [shape: f32[1,4], index: 6, kind: input, shape index: {}]   ;;  %s8917_s7 = inlined_call_operand.vmem [shape: f32[2,16,16,4], index: 7, kind: output, shape index: {}]  }
   0x1   :  { %s6906_s26 = smov 0  }
   0x2 LB: > { %s29_s27 = sadd.s32 1, %s6855_s25  ;;  %p4995_p0 = scmp.ge.s32.totalorder %s6859_s26, 1  ;;  %s6859_s26 = sphi %s6906_s26, %s17_s26   ;;  %s6855_s25 = sphi %s6904_s25, %s9177_s25   ;;  %s6851_s24 = sphi %s6902_s24, %s9176_s24  }
   0x3   : > { %p31_p1 = scmp.ge.s32.totalorder %s29_s27, 2  ;;  %p323_p2 = scmp.lt.s32.totalorder %s6859_s26, 3 }
   0x5   : > { %s9179_s27 = smov (%p31_p1, %s29_s27), 0  ;;  %p324_p3 = pnand %p4995_p0, %p323_p2 }
   0x7   : > { %327 = sbr.rel (%p324_p3) target bundleno = 992 (0x3e0), region = 48 }
   0xe   : > { %v483_v0 = vld [vmem:[%s8913_s3] sm:$0xf]  ;;  %vm600_vm0 = vcmask 1043456   ;;  %p392_p4 = scmp.lt.s32.totalorder %s6851_s24, 1  ;;  %vm491_vm1 = vcmask 31744   ;;  %vm1574_vm2 = vcmask 1040384  }
   0xf   : > { %5758 = vmatprep.subr.msk.mxu0 %vm600_vm0, %v483_v0  ;;  %v6861_v35 = vmov 0.0   ;;  %v5078_v43 = vld [vmem:[%s8915_s5 + $0x2] sm:$0x3]  ;;  %vm1987_vm3 = vcmask 1041408   ;;  %vm1737_vm4 = vcmask 1046528   ;;  %vm1922_vm5 = vcmask 15360  }
  0x10   : > { %5759 = vmatpush3.msk.msra.mxu0 %vm600_vm0, %v483_v0  ;;  %s9181_s24 = smov (!%p392_p4, %s6851_s24), 1  ;;  %v7005_v36 = vrot.slane %v6861_v35, 7  ;;  %v7038_v49 = vld [vmem:[%s8914_s4] ss:$0 sm:$0xff]  ;;  %vm1828_vm6 = vcmask 1045504  }
  0x11   : > { %s6923_s30 = sshll.u32 %s9181_s24, 8  ;;  %5814 = vmatprep.subr.msk.mxu0 %vm1987_vm3, %v5078_v43 }
  0x12   : > { %s6929_s10 = scalar_lea.vmem %s8910_s0, %s6923_s30  ;;  %s414_s13 = scalar_lea.vmem %s8911_s1, %s6923_s30  ;;  %9016 = vst [vmem:[#allocation2_spill] sm:$0xff] %v7005_v36  ;;  %v7010_v39 = vsel %vm1574_vm2, 0.0, %v7005_v36  ;;  %v1739_v41 = vrot.slane %v7005_v36, 1  ;;  %v7017_v42 = vsel %vm1574_vm2, %v7005_v36, 0.0 }
  0x13   : > { %v447_v1 = vld [vmem:[%s414_s13] sm:$0xff]  ;;  %v448_v2 = vld [vmem:[%s414_s13 + $0x8] sm:$0xff]  ;;  %v451_v5 = vld [vmem:[%s6929_s10 + $0x10] sm:$0xff]  ;;  %s5421_s14 = sadd.s32 240, %s6923_s30  ;;  %9017 = vst [vmem:[#allocation3_spill] sm:$0xff] %v7010_v39  ;;  %v1738_v40 = vrot.slane %v7010_v39, 1  ;;  %s8638_s9 = scalar_lea.vmem %s8917_s7, %s6923_s30 }
  0x14   : > { %v449_v3 = vld [vmem:[%s6929_s10] sm:$0xff]  ;;  %5760 = vmatprep.mubr.msk.f32.mxu0 %vm491_vm1, %v447_v1  ;;  %v450_v4 = vld [vmem:[%s6929_s10 + $0x8] sm:$0xff]  ;;  %v452_v6 = vld [vmem:[%s6929_s10 + $0x18] sm:$0xff]  ;;  %s431_s17 = scalar_lea.vmem %s8912_s2, %s5421_s14  ;;  %9018 = vst [vmem:[#allocation4_spill] sm:$0xff] %v7017_v42  ;;  %v1741_v44 = vrot.slane %v7017_v42, 1 }
  0x15   : > { %5761 = vmatmul.mubr.msk.f32.vlgmr.msra.gmra.mrb[0].mxu0 %vm491_vm1, %v448_v2  ;;  %v453_v7 = vld [vmem:[%s6929_s10 + $0x20] sm:$0xff]  ;;  %v454_v8 = vld [vmem:[%s6929_s10 + $0x28] sm:$0xff]  ;;  %v455_v9 = vld [vmem:[%s6929_s10 + $0x30] sm:$0xff]  ;;  %v7025_v45 = vsel %vm1737_vm4, %v1738_v40, %v1739_v41 }
  0x16   : > { %5763 = vmatprep.mubr.msk.f32.mxu0 %vm491_vm1, %v449_v3  ;;  %v456_v10 = vld [vmem:[%s6929_s10 + $0x38] sm:$0xff]  ;;  %v457_v11 = vld [vmem:[%s6929_s10 + $0x40] sm:$0xff]  ;;  %v458_v12 = vld [vmem:[%s6929_s10 + $0x48] sm:$0xff]  ;;  %9019 = vst [vmem:[#allocation5_spill] sm:$0xff] %v7025_v45  ;;  %5815 = vmatpush3.msk.msra.mxu0 %vm1987_vm3, %v5078_v43  ;;  %v7031_v46 = vsel %vm1737_vm4, %v1739_v41, %v1741_v44 }
  0x17   : > { %v459_v13 = vld [vmem:[%s6929_s10 + $0x50] sm:$0xff]  ;;  %v460_v14 = vld [vmem:[%s6929_s10 + $0x58] sm:$0xff]  ;;  %v461_v15 = vld [vmem:[%s6929_s10 + $0x60] sm:$0xff]  ;;  %9020 = vst [vmem:[#allocation6_spill] sm:$0xff] %v7031_v46 }
  0x18   : > { %v462_v16 = vld [vmem:[%s6929_s10 + $0x68] sm:$0xff]  ;;  %v463_v17 = vld [vmem:[%s6929_s10 + $0x70] sm:$0xff]  ;;  %v464_v18 = vld [vmem:[%s6929_s10 + $0x78] sm:$0xff] }
  0x19   : > { %5764 = vmatmul.mubr.msk.f32.gmra.mrb[2].mxu0 %vm491_vm1, %v450_v4  ;;  %v465_v19 = vld [vmem:[%s6929_s10 + $0x80] sm:$0xff]  ;;  %v466_v20 = vld [vmem:[%s6929_s10 + $0x88] sm:$0xff]  ;;  %v467_v21 = vld [vmem:[%s6929_s10 + $0x90] sm:$0xff] }
  0x1a   : > { %5766 = vmatprep.mubr.msk.f32.mxu0 %vm491_vm1, %v451_v5  ;;  %v468_v22 = vld [vmem:[%s6929_s10 + $0x98] sm:$0xff]  ;;  %v469_v23 = vld [vmem:[%s6929_s10 + $0xa0] sm:$0xff]  ;;  %v470_v24 = vld [vmem:[%s6929_s10 + $0xa8] sm:$0xff] }
  0x1b   : > { %v471_v25 = vld [vmem:[%s6929_s10 + $0xb0] sm:$0xff]  ;;  %v472_v26 = vld [vmem:[%s6929_s10 + $0xb8] sm:$0xff]  ;;  %v473_v27 = vld [vmem:[%s6929_s10 + $0xc0] sm:$0xff] }
  0x1c   : > { %v474_v28 = vld [vmem:[%s6929_s10 + $0xc8] sm:$0xff]  ;;  %v475_v29 = vld [vmem:[%s6929_s10 + $0xd0] sm:$0xff]  ;;  %v476_v30 = vld [vmem:[%s6929_s10 + $0xd8] sm:$0xff] }
  0x1d   : > { %5767 = vmatmul.mubr.msk.f32.gmra.mrb[4].mxu0 %vm491_vm1, %v452_v6  ;;  %v477_v31 = vld [vmem:[%s6929_s10 + $0xe0] sm:$0xff]  ;;  %v478_v32 = vld [vmem:[%s6929_s10 + $0xe8] sm:$0xff]  ;;  %v479_v33 = vld [vmem:[%s6929_s10 + $0xf0] sm:$0xff] }
  0x1e   : > { %5769 = vmatprep.mubr.msk.f32.mxu0 %vm491_vm1, %v453_v7  ;;  %v480_v34 = vld [vmem:[%s6929_s10 + $0xf8] sm:$0xff]  ;;  %v481_v37 = vld [vmem:[%s431_s17] sm:$0xff]  ;;  %v482_v38 = vld [vmem:[%s431_s17 + $0x8] sm:$0xff] }
  0x21   : > { %5770 = vmatmul.mubr.msk.f32.gmra.mrb[6].mxu0 %vm491_vm1, %v454_v8 }
  0x22   : > { %5772 = vmatprep.mubr.msk.f32.mxu0 %vm491_vm1, %v455_v9 }
  0x25   : > { %5773 = vmatmul.mubr.msk.f32.gmra.mrb[8].mxu0 %vm491_vm1, %v456_v10 }
  0x26   : > { %5775 = vmatprep.mubr.msk.f32.mxu0 %vm491_vm1, %v457_v11 }
  0x29   : > { %5776 = vmatmul.mubr.msk.f32.gmra.mrb[10].mxu0 %vm491_vm1, %v458_v12 }
  0x2a   : > { %5778 = vmatprep.mubr.msk.f32.mxu0 %vm491_vm1, %v459_v13 }
  0x2d   : > { %5779 = vmatmul.mubr.msk.f32.gmra.mrb[12].mxu0 %vm491_vm1, %v460_v14 }
  0x2e   : > { %5781 = vmatprep.mubr.msk.f32.mxu0 %vm491_vm1, %v461_v15 }
  0x31   : > { %5782 = vmatmul.mubr.msk.f32.gmra.mrb[14].mxu0 %vm491_vm1, %v462_v16 }
  0x32   : > { %5784 = vmatprep.mubr.msk.f32.mxu0 %vm491_vm1, %v463_v17 }
  0x35   : > { %5785 = vmatmul.mubr.msk.f32.gmra.mrb[16].mxu0 %vm491_vm1, %v464_v18 }
  0x36   : > { %5787 = vmatprep.mubr.msk.f32.mxu0 %vm491_vm1, %v465_v19 }
  0x39   : > { %5788 = vmatmul.mubr.msk.f32.gmra.mrb[18].mxu0 %vm491_vm1, %v466_v20 }
  0x3a   : > { %5790 = vmatprep.mubr.msk.f32.mxu0 %vm491_vm1, %v467_v21 }
  0x3d   : > { %5791 = vmatmul.mubr.msk.f32.gmra.mrb[20].mxu0 %vm491_vm1, %v468_v22 }
  0x3e   : > { %5793 = vmatprep.mubr.msk.f32.mxu0 %vm491_vm1, %v469_v23 }
  0x41   : > { %5794 = vmatmul.mubr.msk.f32.gmra.mrb[22].mxu0 %vm491_vm1, %v470_v24 }
  0x42   : > { %5796 = vmatprep.mubr.msk.f32.mxu0 %vm491_vm1, %v471_v25 }
  0x45   : > { %5797 = vmatmul.mubr.msk.f32.gmra.mrb[24].mxu0 %vm491_vm1, %v472_v26 }
  0x46   : > { %5799 = vmatprep.mubr.msk.f32.mxu0 %vm491_vm1, %v473_v27 }
  0x49   : > { %5800 = vmatmul.mubr.msk.f32.gmra.mrb[26].mxu0 %vm491_vm1, %v474_v28 }
  0x4a   : > { %5802 = vmatprep.mubr.msk.f32.mxu0 %vm491_vm1, %v475_v29 }
  0x4d   : > { %5803 = vmatmul.mubr.msk.f32.gmra.mrb[28].mxu0 %vm491_vm1, %v476_v30  ;;  %v5179_v30 = vld [vmem:[%s8915_s5 + $0x6] sm:$0x3] }
  0x4e   : > { %5805 = vmatprep.mubr.msk.f32.mxu0 %vm491_vm1, %v477_v31  ;;  %6264 = vmatprep.subr.msk.mxu1 %vm1987_vm3, %v5179_v30 }
  0x4f   : > { %6265 = vmatpush3.msk.msra.mxu1 %vm1987_vm3, %v5179_v30 }
  0x51   : > { %5806 = vmatmul.mubr.msk.f32.gmra.mrb[30].mxu0 %vm491_vm1, %v478_v32 }
  0x52   : > { %5808 = vmatprep.mubr.msk.f32.mxu0 %vm491_vm1, %v479_v33 }
  0x55   : > { %5809 = vmatmul.mubr.msk.f32.gmra.mrb[32].mxu0 %vm491_vm1, %v480_v34 }
  0x56   : > { %5811 = vmatprep.mubr.msk.f32.mxu0 %vm491_vm1, %v481_v37 }
  0x59   : > { %5812 = vmatmul.mubr.msk.f32.gmra.mrb[34].mxu0 %vm491_vm1, %v482_v38 }
  0x5a   : > { %5816 = vmatprep.mubr.msk.f32.mxu0 %vm1922_vm5, %v7025_v45 }
  0x5d   : > { %5817 = vmatmul.mubr.msk.f32.vlgmr.msra.gmra.mrb[36].mxu0 %vm1922_vm5, %v7031_v46 }
  0xe8   : > { %v5762_v47 = vpop.f32.mrb[0].mxu0 }
  0xe9   : > { %v670_v48 = vpop.f32.mrb[1].mxu0 }
  0xec   : > { %v5765_v50 = vpop.f32.mrb[2].mxu0 }
  0xed   : > { %v7041_v51 = vadd.f32 %v5765_v50, %v7038_v49  ;;  %v680_v52 = vpop.f32.mrb[3].mxu0 }
  0xee   : > { %v7044_v53 = vadd.f32 %v7038_v49, %v680_v52  ;;  %v5213_v52 = vld [vmem:[%s8915_s5 + $0x8] sm:$0x3] }
  0xef   : > { %v852_v54 = vmin.f32 %v7041_v51, 20.0  ;;  %6014 = vmatprep.subr.msk.mxu1 %vm1987_vm3, %v5213_v52 }
  0xf0   : > { %v851_v55 = vmin.f32 %v7044_v53, 20.0  ;;  %v5768_v56 = vpop.f32.mrb[4].mxu0 }
  0xf1   : > { %v891_v57 = vmul.f32 1.442695, %v852_v54  ;;  %v7049_v58 = vadd.f32 %v5768_v56, %v7038_v49  ;;  %v690_v59 = vpop.f32.mrb[5].mxu0  ;;  %v1919_v54 = vld [vmem:[%s8915_s5] sm:$0x3] }
  0xf2   : > { %v889_v60 = vmul.f32 1.442695, %v851_v55  ;;  %v7052_v61 = vadd.f32 %v7038_v49, %v690_v59  ;;  %5864 = vmatprep.subr.msk.mxu0 %vm1987_vm3, %v1919_v54 }
  0xf3   : > { %6547 = vpow2.f32 %v891_v57  ;;  %v854_v62 = vmin.f32 %v7049_v58, 20.0  ;;  %5865 = vmatpush3.msk.msra.mxu0 %vm1987_vm3, %v1919_v54 }
  0xf4   : > { %6549 = vpow2.f32 %v889_v60  ;;  %v853_v63 = vmin.f32 %v7052_v61, 20.0  ;;  %v5771_v0 = vpop.f32.mrb[6].mxu0 }
  0xf5   : > { %v895_v1 = vmul.f32 1.442695, %v854_v62  ;;  %v7057_v2 = vadd.f32 %v5771_v0, %v7038_v49  ;;  %v700_v3 = vpop.f32.mrb[7].mxu0 }
  0xf6   : > { %v893_v4 = vmul.f32 1.442695, %v853_v63  ;;  %v7060_v5 = vadd.f32 %v7038_v49, %v700_v3 }
  0xf7   : > { %6551 = vpow2.f32 %v895_v1  ;;  %v856_v6 = vmin.f32 %v7057_v2, 20.0 }
  0xf8   : > { %6553 = vpow2.f32 %v893_v4  ;;  %v855_v7 = vmin.f32 %v7060_v5, 20.0  ;;  %v5774_v8 = vpop.f32.mrb[8].mxu0 }
  0xf9   : > { %v899_v9 = vmul.f32 1.442695, %v856_v6  ;;  %v7065_v10 = vadd.f32 %v5774_v8, %v7038_v49  ;;  %v710_v11 = vpop.f32.mrb[9].mxu0 }
  0xfa   : > { %v897_v12 = vmul.f32 1.442695, %v855_v7  ;;  %v7068_v13 = vadd.f32 %v7038_v49, %v710_v11 }
  0xfb   : > { %6555 = vpow2.f32 %v899_v9  ;;  %v858_v14 = vmin.f32 %v7065_v10, 20.0 }
  0xfc   : > { %6557 = vpow2.f32 %v897_v12  ;;  %v857_v15 = vmin.f32 %v7068_v13, 20.0  ;;  %v5777_v16 = vpop.f32.mrb[10].mxu0 }
  0xfd   : > { %v6548_v17 = vpop.eup %6547  ;;  %v903_v18 = vmul.f32 1.442695, %v858_v14  ;;  %v7073_v19 = vadd.f32 %v5777_v16, %v7038_v49  ;;  %v720_v20 = vpop.f32.mrb[11].mxu0 }
  0xfe   : > { %v6550_v21 = vpop.eup %6549  ;;  %v960_v22 = vadd.f32 1.0, %v6548_v17  ;;  %v901_v23 = vmul.f32 1.442695, %v857_v15  ;;  %v7076_v24 = vadd.f32 %v7038_v49, %v720_v20 }
  0xff   : > { %v959_v25 = vadd.f32 1.0, %v6550_v21  ;;  %6559 = vpow2.f32 %v903_v18  ;;  %v860_v26 = vmin.f32 %v7073_v19, 20.0 }
 0x100   : > { %v996_v27 = vmul.f32 %v960_v22, %v960_v22  ;;  %6561 = vpow2.f32 %v901_v23  ;;  %v859_v28 = vmin.f32 %v7076_v24, 20.0  ;;  %v5780_v29 = vpop.f32.mrb[12].mxu0 }
 0x101   : > { %v6552_v31 = vpop.eup %6551  ;;  %v995_v32 = vmul.f32 %v959_v25, %v959_v25  ;;  %v907_v33 = vmul.f32 1.442695, %v860_v26  ;;  %v7084_v34 = vadd.f32 %v5780_v29, %v7038_v49  ;;  %v730_v35 = vpop.f32.mrb[13].mxu0 }
 0x102   : > { %v6554_v37 = vpop.eup %6553  ;;  %v1104_v38 = vadd.f32 1.0, %v996_v27  ;;  %v962_v40 = vadd.f32 1.0, %v6552_v31  ;;  %v905_v41 = vmul.f32 1.442695, %v859_v28  ;;  %v7096_v57 = vadd.f32 %v7038_v49, %v730_v35 }
 0x103   : > { %v1103_v43 = vadd.f32 1.0, %v995_v32  ;;  %v961_v44 = vadd.f32 1.0, %v6554_v37  ;;  %6563 = vpow2.f32 %v907_v33  ;;  %v862_v48 = vmin.f32 %v7084_v34, 20.0 }
 0x104   : > { %6565 = vrcp.f32 %v1104_v38  ;;  %v998_v47 = vmul.f32 %v962_v40, %v962_v40  ;;  %v5783_v50 = vpop.f32.mrb[14].mxu0  ;;  %v5045_v4 = vadd.f32 -1.0, %v996_v27  ;;  %v861_v7 = vmin.f32 %v7096_v57, 20.0 }
 0x105   : > { %v6556_v55 = vpop.eup %6555  ;;  %6567 = vrcp.f32 %v1103_v43  ;;  %v997_v56 = vmul.f32 %v961_v44, %v961_v44  ;;  %v740_v59 = vpop.f32.mrb[15].mxu0  ;;  %v911_v3 = vmul.f32 1.442695, %v862_v48  ;;  %v5044_v11 = vadd.f32 -1.0, %v995_v32 }
 0x106   : > { %v6558_v60 = vpop.eup %6557  ;;  %v1106_v62 = vadd.f32 1.0, %v998_v47  ;;  %v964_v63 = vadd.f32 1.0, %v6556_v55  ;;  %6569 = vpow2.f32 %v905_v41  ;;  %v7105_v14 = vadd.f32 %v5783_v50, %v7038_v49 }
 0x107   : > { %v1105_v0 = vadd.f32 1.0, %v997_v56  ;;  %v963_v1 = vadd.f32 1.0, %v6558_v60  ;;  %v5047_v17 = vadd.f32 -1.0, %v998_v47  ;;  %v909_v23 = vmul.f32 1.442695, %v861_v7 }
 0x108   : > { %6571 = vrcp.f32 %v1106_v62  ;;  %v1000_v6 = vmul.f32 %v964_v63, %v964_v63  ;;  %v7102_v8 = vpop.f32.mrb[16].mxu0  ;;  %v1068_v25 = vmul.f32 %v5045_v4, %v7041_v51  ;;  %v864_v27 = vmin.f32 %v7105_v14, 20.0 }
 0x109   : > { %v6560_v9 = vpop.eup %6559  ;;  %6573 = vrcp.f32 %v1105_v0  ;;  %v999_v12 = vmul.f32 %v963_v1, %v963_v1  ;;  %v7107_v15 = vpop.f32.mrb[17].mxu0  ;;  %v1067_v30 = vmul.f32 %v5044_v11, %v7044_v53  ;;  %v5046_v31 = vadd.f32 -1.0, %v997_v56 }
 0x10a   : > { %v6562_v16 = vpop.eup %6561  ;;  %v1108_v18 = vadd.f32 1.0, %v1000_v6  ;;  %v966_v20 = vadd.f32 1.0, %v6560_v9  ;;  %6575 = vpow2.f32 %v911_v3  ;;  %v1070_v37 = vmul.f32 %v5047_v17, %v7049_v58 }
 0x10b   : > { %v1107_v21 = vadd.f32 1.0, %v999_v12  ;;  %v965_v22 = vadd.f32 1.0, %v6562_v16  ;;  %v915_v44 = vmul.f32 1.442695, %v864_v27  ;;  %v7120_v47 = vadd.f32 %v7038_v49, %v740_v59 }
 0x10c   : > { %6577 = vrcp.f32 %v1108_v18  ;;  %v1002_v26 = vmul.f32 %v966_v20, %v966_v20  ;;  %v7111_v28 = vpop.f32.mrb[18].mxu0  ;;  %v5049_v50 = vadd.f32 -1.0, %v1000_v6  ;;  %v5048_v55 = vadd.f32 -1.0, %v999_v12 }
 0x10d   : > { %v6564_v29 = vpop.eup %6563  ;;  %6579 = vrcp.f32 %v1107_v21  ;;  %v1001_v32 = vmul.f32 %v965_v22, %v965_v22  ;;  %v7114_v33 = vpop.f32.mrb[19].mxu0  ;;  %v1069_v59 = vmul.f32 %v5046_v31, %v7052_v61  ;;  %v863_v6 = vmin.f32 %v7120_v47, 20.0 }
 0x10e   : > { %v6566_v35 = vpop.eup %6565  ;;  %v1110_v38 = vadd.f32 1.0, %v1002_v26  ;;  %v968_v40 = vadd.f32 1.0, %v6564_v29  ;;  %6581 = vpow2.f32 %v909_v23  ;;  %v1072_v61 = vmul.f32 %v5049_v50, %v7057_v2 }
 0x10f   : > { %v6568_v51 = vpop.eup %6567  ;;  %v7117_v41 = vmul.f32 %v6566_v35, %v1068_v25  ;;  %v1109_v43 = vadd.f32 1.0, %v1001_v32  ;;  %v5051_v12 = vadd.f32 -1.0, %v1002_v26  ;;  %v1071_v18 = vmul.f32 %v5048_v55, %v7060_v5 }
 0x110   : > { %v6570_v53 = vpop.eup %6569  ;;  %v7122_v48 = vmul.f32 %v6568_v51, %v1067_v30  ;;  %6583 = vrcp.f32 %v1110_v38  ;;  %v1004_v52 = vmul.f32 %v968_v40, %v968_v40  ;;  %v7124_v54 = vpop.f32.mrb[20].mxu0  ;;  %v5050_v20 = vadd.f32 -1.0, %v1001_v32 }
 0x111   : > { %v1579_v58 = vrot.slane %v7117_v41, 7  ;;  %6585 = vrcp.f32 %v1109_v43  ;;  %v967_v56 = vadd.f32 1.0, %v6570_v53  ;;  %v7127_v60 = vpop.f32.mrb[21].mxu0  ;;  %v913_v29 = vmul.f32 1.442695, %v863_v6 }
 0x112   : > { %v6572_v62 = vpop.eup %6571  ;;  %v1578_v63 = vrot.slane %v7122_v48, 7  ;;  %v1112_v0 = vadd.f32 1.0, %v1004_v52  ;;  %6587 = vpow2.f32 %v915_v44  ;;  %v7155_v2 = vadd.f32 %v7102_v8, %v7038_v49 }
 0x113   : > { %v6574_v1 = vpop.eup %6573  ;;  %v7131_v3 = vmul.f32 %v6572_v62, %v1070_v37  ;;  %v1003_v4 = vmul.f32 %v967_v56, %v967_v56  ;;  %v1074_v35 = vmul.f32 %v5051_v12, %v7065_v10  ;;  %v1073_v53 = vmul.f32 %v5050_v20, %v7068_v13 }
 0x114   : > { %v6576_v7 = vpop.eup %6575  ;;  %v7139_v9 = vsel %vm1574_vm2, %v1578_v63, %v1579_v58  ;;  %v7141_v11 = vmul.f32 %v6574_v1, %v1069_v59  ;;  %v7144_v16 = vpop.f32.mrb[22].mxu0  ;;  %6589 = vrcp.f32 %v1112_v0  ;;  %v5053_v50 = vadd.f32 -1.0, %v1004_v52 }
 0x115   : > { %9021 = vst [vmem:[#allocation7_spill] sm:$0xff] %v7139_v9  ;;  %v1582_v17 = vrot.slane %v7131_v3, 7  ;;  %v7148_v21 = vpop.f32.mrb[23].mxu0  ;;  %v1111_v25 = vadd.f32 1.0, %v1003_v4  ;;  %v970_v27 = vadd.f32 1.0, %v6576_v7  ;;  %v866_v55 = vmin.f32 %v7155_v2, 20.0 }
 0x116   : > { %v6578_v22 = vpop.eup %6577  ;;  %v8924_v23 = vrot.slane %v7141_v11, 7  ;;  %v7179_v59 = vadd.f32 %v7038_v49, %v7107_v15  ;;  %v7183_v0 = vadd.f32 %v7111_v28, %v7038_v49  ;;  %v5052_v6 = vadd.f32 -1.0, %v1003_v4 }
 0x117   : > { %v6580_v30 = vpop.eup %6579  ;;  %v7151_v31 = vmul.f32 %v6578_v22, %v1072_v61  ;;  %6591 = vrcp.f32 %v1111_v25  ;;  %v1006_v40 = vmul.f32 %v970_v27, %v970_v27  ;;  %v1076_v22 = vmul.f32 %v5053_v50, %v7073_v19 }
 0x118   : > { %v6582_v26 = vpop.eup %6581  ;;  %v7162_v5 = vsel %vm1574_vm2, %v8924_v23, %v1582_v17  ;;  %v7164_v32 = vmul.f32 %v6580_v30, %v1071_v18  ;;  %v7167_v37 = vpop.f32.mrb[24].mxu0  ;;  %6593 = vpow2.f32 %v913_v29  ;;  %v919_v27 = vmul.f32 1.442695, %v866_v55 }
 0x119   : > { %v8923_v38 = vrot.slane %v7151_v31, 7  ;;  %v969_v8 = vadd.f32 1.0, %v6582_v26  ;;  %v7170_v51 = vpop.f32.mrb[25].mxu0  ;;  %v1114_v62 = vadd.f32 1.0, %v1006_v40  ;;  %v5055_v12 = vadd.f32 -1.0, %v1006_v40 }
 0x11a   : > { %v6584_v43 = vpop.eup %6583  ;;  %v8922_v44 = vrot.slane %v7164_v32, 7  ;;  %v865_v4 = vmin.f32 %v7179_v59, 20.0  ;;  %v868_v26 = vmin.f32 %v7183_v0, 20.0 }
 0x11b   : > { %v6586_v56 = vpop.eup %6585  ;;  %v7175_v10 = vmul.f32 %v6584_v43, %v1074_v35  ;;  %v1005_v7 = vmul.f32 %v969_v8, %v969_v8  ;;  %6595 = vrcp.f32 %v1114_v62  ;;  %v1075_v8 = vmul.f32 %v5052_v6, %v7076_v24 }
 0x11c   : > { %v6588_v1 = vpop.eup %6587  ;;  %v7190_v13 = vsel %vm1574_vm2, %v8922_v44, %v8923_v38  ;;  %v7192_v52 = vmul.f32 %v6586_v56, %v1073_v53  ;;  %v7194_v61 = vpop.f32.mrb[26].mxu0  ;;  %v1078_v43 = vmul.f32 %v5055_v12, %v7084_v34  ;;  %v917_v50 = vmul.f32 1.442695, %v865_v4 }
 0x11d   : > { %v8921_v15 = vrot.slane %v7175_v10, 7  ;;  %v972_v28 = vadd.f32 1.0, %v6588_v1  ;;  %v7197_v18 = vpop.f32.mrb[27].mxu0  ;;  %v1113_v25 = vadd.f32 1.0, %v1005_v7  ;;  %v5054_v62 = vadd.f32 -1.0, %v1005_v7 }
 0x11e   : > { %v8920_v20 = vrot.slane %v7192_v52, 7  ;;  %v6590_v29 = vpop.eup %6589  ;;  %v923_v1 = vmul.f32 1.442695, %v868_v26  ;;  %v7227_v34 = vadd.f32 %v7124_v54, %v7038_v49  ;;  %v7236_v4 = vadd.f32 %v7038_v49, %v7127_v60 }
 0x11f   : > { %v1008_v30 = vmul.f32 %v972_v28, %v972_v28  ;;  %v7210_v40 = vmul.f32 %v6590_v29, %v1076_v22  ;;  %6597 = vrcp.f32 %v1113_v25  ;;  %v7220_v28 = vadd.f32 %v7038_v49, %v7114_v33 }
 0x120   : > { %v7208_v35 = vsel %vm1574_vm2, %v8920_v20, %v8921_v15  ;;  %v7213_v19 = vpop.f32.mrb[28].mxu0  ;;  %6599 = vpow2.f32 %v919_v27  ;;  %v870_v29 = vmin.f32 %v7227_v34, 20.0 }
 0x121   : > { %v1116_v53 = vadd.f32 1.0, %v1008_v30  ;;  %v7216_v55 = vpop.f32.mrb[29].mxu0  ;;  %v6592_v56 = vpop.eup %6591  ;;  %v8919_v24 = vrot.slane %v7210_v40, 7  ;;  %v5057_v12 = vadd.f32 -1.0, %v1008_v30  ;;  %v867_v7 = vmin.f32 %v7220_v28, 20.0 }
 0x122   : > { %v6594_v22 = vpop.eup %6593  ;;  %v7223_v6 = vmul.f32 %v6592_v56, %v1075_v8  ;;  %v7242_v30 = vadd.f32 %v7144_v16, %v7038_v49  ;;  %v7251_v56 = vsel %vm1574_vm2, %v1579_v58, 0.0  ;;  %v869_v16 = vmin.f32 %v7236_v4, 20.0 }
 0x123   : > { %6601 = vrcp.f32 %v1116_v53  ;;  %v971_v25 = vadd.f32 1.0, %v6594_v22  ;;  %v921_v8 = vmul.f32 1.442695, %v867_v7  ;;  %v7246_v53 = vadd.f32 %v7038_v49, %v7148_v21  ;;  %9022 = vst [vmem:[#allocation8_spill] sm:$0xff] %v7251_v56 }
 0x124   : > { %6603 = vpow2.f32 %v917_v50  ;;  %v7230_v27 = vpop.f32.mrb[30].mxu0  ;;  %v8918_v33 = vrot.slane %v7223_v6, 7  ;;  %v7264_v21 = vsel %vm1574_vm2, 0.0, %v1578_v63  ;;  %v872_v7 = vmin.f32 %v7242_v30, 20.0 }
 0x125   : > { %6605 = vpow2.f32 %v923_v1  ;;  %v7238_v26 = vpop.f32.mrb[31].mxu0  ;;  %v1007_v54 = vmul.f32 %v971_v25, %v971_v25  ;;  %v6596_v50 = vpop.eup %6595  ;;  %v927_v1 = vmul.f32 1.442695, %v870_v29  ;;  %9023 = vst [vmem:[#allocation9_spill] sm:$0xff] %v7264_v21  ;;  %v925_v25 = vmul.f32 1.442695, %v869_v16 }
 0x126   : > { %v7258_v60 = vsel %vm1574_vm2, %v8918_v33, %v8919_v24  ;;  %v7266_v22 = vmul.f32 %v6596_v50, %v1078_v43  ;;  %6607 = vpow2.f32 %v921_v8  ;;  %v871_v33 = vmin.f32 %v7246_v53, 20.0 }
 0x127   : > { %v1115_v41 = vadd.f32 1.0, %v1007_v54  ;;  %6609 = vpow2.f32 %v927_v1  ;;  %v1077_v24 = vmul.f32 %v5054_v62, %v7096_v57  ;;  %v1080_v48 = vmul.f32 %v5057_v12, %v7105_v14 }
 0x128   : > { %v7268_v58 = vpop.f32.mrb[32].mxu0  ;;  %v7278_v63 = vadd.f32 %v7167_v37, %v7038_v49  ;;  %v931_v8 = vmul.f32 1.442695, %v872_v7  ;;  %v929_v50 = vmul.f32 1.442695, %v871_v33  ;;  %v1743_v1 = vrot.slane %v7264_v21, 1 }
 0x129   : > { %v7272_v29 = vpop.f32.mrb[33].mxu0  ;;  %6611 = vrcp.f32 %v1115_v41  ;;  %v6598_v43 = vpop.eup %6597  ;;  %v8926_v20 = vrot.slane %v7266_v22, 7  ;;  %v1744_v14 = vrot.slane %v7139_v9, 1  ;;  %v5056_v12 = vadd.f32 -1.0, %v1007_v54 }
 0x12a   : > { %6613 = vpow2.f32 %v925_v25  ;;  %v6600_v16 = vpop.eup %6599  ;;  %v7282_v15 = vmul.f32 %v6598_v43, %v1077_v24  ;;  %v874_v57 = vmin.f32 %v7278_v63, 20.0  ;;  %v7288_v37 = vadd.f32 %v7038_v49, %v7170_v51 }
 0x12b   : > { %v974_v41 = vadd.f32 1.0, %v6600_v16  ;;  %6615 = vpow2.f32 %v931_v8  ;;  %v1746_v24 = vrot.slane %v7251_v56, 1  ;;  %v7293_v23 = vsel %vm1737_vm4, %v1743_v1, %v1744_v14 }
 0x12c   : > { %v8925_v25 = vrot.slane %v7282_v15, 7  ;;  %6617 = vpow2.f32 %v929_v50  ;;  %v935_v7 = vmul.f32 1.442695, %v874_v57  ;;  %v873_v54 = vmin.f32 %v7288_v37, 20.0  ;;  %5819 = vmatprep.mubr.msk.f32.mxu0 %vm1922_vm5, %v7293_v23 }
 0x12d   : > { %v6602_v62 = vpop.eup %6601  ;;  %v1010_v44 = vmul.f32 %v974_v41, %v974_v41  ;;  %v7299_v51 = vsel %vm1574_vm2, %v1582_v17, 0.0  ;;  %v9026_v17 = vrot.slane %v7141_v11, 7 }
 0x12e   : > { %v6604_v33 = vpop.eup %6603  ;;  %9024 = vst [vmem:[#allocation10_spill] sm:$0xff] %v7299_v51  ;;  %v7306_v8 = vsel %vm1574_vm2, %v8925_v25, %v8926_v20  ;;  %v7310_v1 = vmul.f32 %v6602_v62, %v1080_v48  ;;  %6619 = vpow2.f32 %v935_v7  ;;  %v7323_v20 = vsel %vm1737_vm4, %v1744_v14, %v1746_v24 }
 0x12f   : > { %v6606_v43 = vpop.eup %6605  ;;  %v973_v38 = vadd.f32 1.0, %v6604_v33  ;;  %9025 = vst [vmem:[#allocation11_spill] sm:$0xff] %v7306_v8  ;;  %v1118_v16 = vadd.f32 1.0, %v1010_v44  ;;  %v7315_v41 = vsel %vm1574_vm2, 0.0, %v9026_v17  ;;  %v9027_v33 = vrot.slane %v7151_v31, 7  ;;  %9029 = vst [vmem:[#allocation13_spill] sm:$0xff] %v7323_v20  ;;  %5820 = vmatmul.mubr.msk.f32.gmra.mrb[38].mxu0 %vm1922_vm5, %v7323_v20 }
 0x130   : > { %v976_v50 = vadd.f32 1.0, %v6606_v43  ;;  %v6608_v3 = vpop.eup %6607  ;;  %v1079_v62 = vmul.f32 %v5056_v12, %v7120_v47  ;;  %v933_v7 = vmul.f32 1.442695, %v873_v54  ;;  %v9030_v17 = vrot.slane %v7164_v32, 7 }
 0x131   : > { %v1009_v57 = vmul.f32 %v973_v38, %v973_v38  ;;  %v7320_v25 = vsel %vm1574_vm2, %v9027_v33, 0.0  ;;  %v6610_v48 = vpop.eup %6609  ;;  %6621 = vrcp.f32 %v1118_v16  ;;  %v7338_v47 = vadd.f32 %v7194_v61, %v7038_v49 }
 0x132   : > { %9028 = vst [vmem:[#allocation12_spill] sm:$0xff] %v7320_v25  ;;  %v1012_v43 = vmul.f32 %v976_v50, %v976_v50  ;;  %v7331_v31 = vsel %vm1574_vm2, 0.0, %v9030_v17  ;;  %v975_v50 = vadd.f32 1.0, %v6608_v3  ;;  %v978_v46 = vadd.f32 1.0, %v6610_v48 }
 0x133   : > { %v1117_v38 = vadd.f32 1.0, %v1009_v57  ;;  %v6612_v11 = vpop.eup %6611  ;;  %v5059_v12 = vadd.f32 -1.0, %v1010_v44  ;;  %v5058_v42 = vadd.f32 -1.0, %v1009_v57  ;;  %v9031_v24 = vrot.slane %v7175_v10, 7 }
 0x134   : > { %v1120_v33 = vadd.f32 1.0, %v1012_v43  ;;  %v6614_v14 = vpop.eup %6613  ;;  %v7334_v45 = vmul.f32 %v6612_v11, %v1079_v62  ;;  %v1011_v54 = vmul.f32 %v975_v50, %v975_v50  ;;  %v1014_v32 = vmul.f32 %v978_v46, %v978_v46 }
 0x135   : > { %6623 = vrcp.f32 %v1117_v38  ;;  %v6616_v16 = vpop.eup %6615  ;;  %v977_v3 = vadd.f32 1.0, %v6614_v14  ;;  %v7344_v62 = vsel %vm1574_vm2, %v9031_v24, 0.0  ;;  %v5061_v38 = vadd.f32 -1.0, %v1012_v43 }
 0x136   : > { %6625 = vrcp.f32 %v1120_v33  ;;  %v8933_v17 = vrot.slane %v7334_v45, 7  ;;  %v6618_v48 = vpop.eup %6617  ;;  %9032 = vst [vmem:[#allocation14_spill] sm:$0xff] %v7344_v62  ;;  %v1119_v11 = vadd.f32 1.0, %v1011_v54  ;;  %v1122_v61 = vadd.f32 1.0, %v1014_v32 }
 0x137   : > { %6627 = vpow2.f32 %v933_v7  ;;  %v9033_v44 = vrot.slane %v7310_v1, 7  ;;  %v1013_v33 = vmul.f32 %v977_v3, %v977_v3  ;;  %v980_v57 = vadd.f32 1.0, %v6616_v16 }
 0x138   : > { %v876_v7 = vmin.f32 %v7338_v47, 20.0  ;;  %v9034_v50 = vrot.slane %v7192_v52, 7  ;;  %v1082_v43 = vmul.f32 %v5059_v12, %v7155_v2  ;;  %6629 = vrcp.f32 %v1119_v11  ;;  %v6620_v24 = vpop.eup %6619 }
 0x139   : > { %v7351_v46 = vsel %vm1574_vm2, %v8933_v17, %v9033_v44  ;;  %v979_v14 = vadd.f32 1.0, %v6618_v48  ;;  %v1081_v56 = vmul.f32 %v5058_v42, %v7179_v59  ;;  %6631 = vrcp.f32 %v1122_v61 }
 0x13a   : > { %v7357_v10 = vsel %vm1574_vm2, 0.0, %v9034_v50  ;;  %v1121_v9 = vadd.f32 1.0, %v1013_v33  ;;  %v1016_v44 = vmul.f32 %v980_v57, %v980_v57  ;;  %v1084_v3 = vmul.f32 %v5061_v38, %v7183_v0 }
 0x13b   : > { %v5060_v16 = vadd.f32 -1.0, %v1011_v54  ;;  %v1015_v17 = vmul.f32 %v979_v14, %v979_v14  ;;  %v982_v21 = vadd.f32 1.0, %v6620_v24  ;;  %v6622_v36 = vpop.eup %6621  ;;  %v5063_v52 = vadd.f32 -1.0, %v1014_v32 }
 0x13c   : > { %6633 = vrcp.f32 %v1121_v9  ;;  %v1124_v50 = vadd.f32 1.0, %v1016_v44  ;;  %v939_v39 = vmul.f32 1.442695, %v876_v7  ;;  %v7362_v20 = vmul.f32 %v6622_v36, %v1082_v43 }
 0x13d   : > { %v1123_v2 = vadd.f32 1.0, %v1015_v17  ;;  %v1018_v12 = vmul.f32 %v982_v21, %v982_v21  ;;  %v1748_v48 = vrot.slane %v7315_v41, 1  ;;  %v5062_v59 = vadd.f32 -1.0, %v1013_v33 }
 0x13e   : > { %6635 = vrcp.f32 %v1124_v50  ;;  %v1749_v11 = vrot.slane %v7162_v5, 1  ;;  %v7368_v0 = vadd.f32 %v7038_v49, %v7197_v18  ;;  %v9035_v9 = vrot.slane %v7210_v40, 7 }
 0x13f   : > { %v6624_v42 = vpop.eup %6623  ;;  %v1600_v36 = vrot.slane %v7362_v20, 7  ;;  %6637 = vrcp.f32 %v1123_v2  ;;  %v1083_v33 = vmul.f32 %v5060_v16, %v7220_v28  ;;  %v1126_v57 = vadd.f32 1.0, %v1018_v12 }
 0x140   : > { %v6626_v54 = vpop.eup %6625  ;;  %v7373_v32 = vsel %vm1574_vm2, %v9035_v9, 0.0  ;;  %v7376_v21 = vmul.f32 %v6624_v42, %v1081_v56  ;;  %6639 = vpow2.f32 %v939_v39  ;;  %v1086_v7 = vmul.f32 %v5063_v52, %v7227_v34 }
 0x141   : > { %9036 = vst [vmem:[#allocation15_spill] sm:$0xff] %v7373_v32  ;;  %v6628_v38 = vpop.eup %6627  ;;  %v7378_v61 = vmul.f32 %v6626_v54, %v1084_v3  ;;  %v7384_v43 = vsel %vm1737_vm4, %v1748_v48, %v1749_v11  ;;  %v1085_v14 = vmul.f32 %v5062_v59, %v7236_v4  ;;  %v5065_v56 = vadd.f32 -1.0, %v1016_v44  ;;  %v7401_v4 = vld [vmem:[%s8915_s5 + $0x4] sm:$0x3] }
 0x142   : > { %v8947_v18 = vrot.slane %v7376_v21, 7  ;;  %v981_v40 = vadd.f32 1.0, %v6628_v38  ;;  %6641 = vrcp.f32 %v1126_v57  ;;  %5822 = vmatprep.mubr.msk.f32.mxu0 %vm1922_vm5, %v7384_v43  ;;  %v875_v24 = vmin.f32 %v7368_v0, 20.0  ;;  %v6630_v28 = vpop.eup %6629  ;;  %5914 = vmatprep.subr.msk.mxu0 %vm1987_vm3, %v7401_v4 }
 0x143   : > { %v5064_v34 = vadd.f32 -1.0, %v1015_v17  ;;  %v1751_v16 = vrot.slane %v7299_v51, 1  ;;  %v6632_v44 = vpop.eup %6631  ;;  %v8943_v52 = vrot.slane %v7378_v61, 7  ;;  %v7404_v50 = vmul.f32 %v6630_v28, %v1083_v33 }
 0x144   : > { %v7395_v39 = vsel %vm1574_vm2, %v8947_v18, %v1600_v36  ;;  %v1017_v3 = vmul.f32 %v981_v40, %v981_v40  ;;  %v937_v2 = vmul.f32 1.442695, %v875_v24  ;;  %v7408_v48 = vadd.f32 %v7213_v19, %v7038_v49 }
 0x145   : > { %9037 = vst [vmem:[#allocation16_spill] sm:$0xff] %v7395_v39  ;;  %v7412_v17 = vmul.f32 %v6632_v44, %v1086_v7  ;;  %v5067_v42 = vadd.f32 -1.0, %v1018_v12  ;;  %v7415_v54 = vsel %vm1737_vm4, %v1749_v11, %v1751_v16  ;;  %v8944_v38 = vrot.slane %v7404_v50, 7 }
 0x146   : > { %v1125_v59 = vadd.f32 1.0, %v1017_v3  ;;  %v6634_v9 = vpop.eup %6633  ;;  %6643 = vpow2.f32 %v937_v2  ;;  %5823 = vmatmul.mubr.msk.f32.gmra.mrb[40].mxu0 %vm1922_vm5, %v7415_v54  ;;  %v878_v19 = vmin.f32 %v7408_v48, 20.0  ;;  %v1753_v33 = vrot.slane %v7331_v31, 1 }
 0x147   : > { %v8941_v57 = vrot.slane %v7412_v17, 7  ;;  %v7423_v7 = vmul.f32 %v6634_v9, %v1085_v14  ;;  %v1088_v12 = vmul.f32 %v5065_v56, %v7242_v30  ;;  %v7431_v40 = vsel %vm1574_vm2, %v8944_v38, %v8943_v52 }
 0x148   : > { %6645 = vrcp.f32 %v1125_v59  ;;  %v6636_v11 = vpop.eup %6635  ;;  %9038 = vst [vmem:[#allocation17_spill] sm:$0xff] %v7431_v40  ;;  %v1087_v24 = vmul.f32 %v5064_v34, %v7246_v53  ;;  %v943_v28 = vmul.f32 1.442695, %v878_v19  ;;  %v1754_v16 = vrot.slane %v7190_v13, 1 }
 0x149   : > { %v6638_v44 = vpop.eup %6637  ;;  %v8942_v14 = vrot.slane %v7423_v7, 7  ;;  %v7436_v2 = vmul.f32 %v6636_v11, %v1088_v12  ;;  %v1090_v30 = vmul.f32 %v5067_v42, %v7278_v63  ;;  %v7441_v56 = vadd.f32 %v7038_v49, %v7216_v55 }
 0x14a   : > { %v6640_v59 = vpop.eup %6639  ;;  %v7443_v9 = vmul.f32 %v6638_v44, %v1087_v24  ;;  %6647 = vpow2.f32 %v943_v28  ;;  %v7446_v53 = vsel %vm1737_vm4, %v1753_v33, %v1754_v16  ;;  %v1756_v34 = vrot.slane %v7320_v25, 1 }
 0x14b   : > { %v7454_v19 = vsel %vm1574_vm2, %v8942_v14, %v8941_v57  ;;  %v8945_v63 = vrot.slane %v7436_v2, 7  ;;  %v5066_v55 = vadd.f32 -1.0, %v1017_v3  ;;  %v984_v42 = vadd.f32 1.0, %v6640_v59  ;;  %5825 = vmatprep.mubr.msk.f32.mxu0 %vm1922_vm5, %v7446_v53 }
 0x14c   : > { %9039 = vst [vmem:[#allocation18_spill] sm:$0xff] %v7454_v19  ;;  %v6642_v12 = vpop.eup %6641  ;;  %v8946_v33 = vrot.slane %v7443_v9, 7  ;;  %v877_v11 = vmin.f32 %v7441_v56, 20.0  ;;  %v7462_v24 = vsel %vm1737_vm4, %v1754_v16, %v1756_v34  ;;  %v7466_v28 = vadd.f32 %v7230_v27, %v7038_v49 }
 0x14d   : > { %v9040_v44 = vrot.slane %v7223_v6, 7  ;;  %v9041_v59 = vrot.slane %v7266_v22, 7  ;;  %v7478_v14 = vmul.f32 %v6642_v12, %v1090_v30  ;;  %v1020_v52 = vmul.f32 %v984_v42, %v984_v42  ;;  %5826 = vmatmul.mubr.msk.f32.gmra.mrb[42].mxu0 %vm1922_vm5, %v7462_v24 }
 0x14e   : > { %v7487_v6 = vsel %vm1574_vm2, %v8946_v33, %v8945_v63  ;;  %v941_v27 = vmul.f32 1.442695, %v877_v11  ;;  %v880_v16 = vmin.f32 %v7466_v28, 20.0  ;;  %v1758_v22 = vrot.slane %v7357_v10, 1 }
 0x14f   : > { %v7471_v3 = vsel %vm1574_vm2, 0.0, %v9040_v44  ;;  %v7476_v57 = vsel %vm1574_vm2, %v9041_v59, 0.0  ;;  %9043 = vst [vmem:[#allocation20_spill] sm:$0xff] %v7487_v6  ;;  %v9044_v34 = vrot.slane %v7282_v15, 7  ;;  %v1089_v42 = vmul.f32 %v5066_v55, %v7288_v37 }
 0x150   : > { %9042 = vst [vmem:[#allocation19_spill] sm:$0xff] %v7476_v57  ;;  %v1128_v12 = vadd.f32 1.0, %v1020_v52  ;;  %v1759_v44 = vrot.slane %v7208_v35, 1  ;;  %v6644_v59 = vpop.eup %6643  ;;  %6649 = vpow2.f32 %v941_v27  ;;  %v947_v38 = vmul.f32 1.442695, %v880_v16 }
 0x151   : > { %v7494_v30 = vsel %vm1574_vm2, 0.0, %v9044_v34  ;;  %v7500_v11 = vadd.f32 %v7038_v49, %v7238_v26  ;;  %v1761_v63 = vrot.slane %v7344_v62, 1  ;;  %v9046_v15 = vrot.slane %v7310_v1, 7 }
 0x152   : > { %9045 = vst [vmem:[#allocation21_spill] sm:$0xff] %v7494_v30  ;;  %v6646_v33 = vpop.eup %6645  ;;  %6651 = vrcp.f32 %v1128_v12  ;;  %v983_v55 = vadd.f32 1.0, %v6644_v59  ;;  %v7512_v27 = vsel %vm1737_vm4, %v1758_v22, %v1759_v44  ;;  %v1764_v12 = vrot.slane %v7258_v60, 1 }
 0x153   : > { %v7506_v34 = vsel %vm1574_vm2, %v9046_v15, 0.0  ;;  %v7509_v18 = vmul.f32 %v6646_v33, %v1089_v42  ;;  %6653 = vpow2.f32 %v947_v38  ;;  %v879_v26 = vmin.f32 %v7500_v11, 20.0  ;;  %5828 = vmatprep.mubr.msk.f32.mxu0 %vm1922_vm5, %v7512_v27 }
 0x154   : > { %9047 = vst [vmem:[#allocation22_spill] sm:$0xff] %v7506_v34  ;;  %v1019_v16 = vmul.f32 %v983_v55, %v983_v55  ;;  %v7518_v1 = vsel %vm1737_vm4, %v1759_v44, %v1761_v63  ;;  %v7522_v15 = vadd.f32 %v7268_v58, %v7038_v49  ;;  %v1763_v33 = vrot.slane %v7471_v3, 1  ;;  %v6648_v42 = vpop.eup %6647 }
 0x155   : > { %v945_v22 = vmul.f32 1.442695, %v879_v26  ;;  %5829 = vmatmul.mubr.msk.f32.gmra.mrb[44].mxu0 %vm1922_vm5, %v7518_v1  ;;  %v7531_v59 = vadd.f32 %v7038_v49, %v7272_v29  ;;  %v9048_v63 = vrot.slane %v7334_v45, 7  ;;  %v986_v55 = vadd.f32 1.0, %v6648_v42 }
 0x156   : > { %v1127_v44 = vadd.f32 1.0, %v1019_v16  ;;  %v882_v37 = vmin.f32 %v7522_v15, 20.0  ;;  %v7542_v26 = vsel %vm1574_vm2, %v1600_v36, 0.0  ;;  %v9050_v38 = vrot.slane %v7478_v14, 7 }
 0x157   : > { %v7536_v58 = vsel %vm1574_vm2, 0.0, %v9048_v63  ;;  %9049 = vst [vmem:[#allocation23_spill] sm:$0xff] %v7542_v26  ;;  %v9051_v62 = vrot.slane %v7509_v18, 7  ;;  %6655 = vpow2.f32 %v945_v22  ;;  %v7552_v45 = vsel %vm1737_vm4, %v1763_v33, %v1764_v12 }
 0x158   : > { %v5069_v29 = vadd.f32 -1.0, %v1020_v52  ;;  %6657 = vrcp.f32 %v1127_v44  ;;  %v1022_v42 = vmul.f32 %v986_v55, %v986_v55  ;;  %v951_v63 = vmul.f32 1.442695, %v882_v37  ;;  %5831 = vmatprep.mubr.msk.f32.mxu0 %vm1922_vm5, %v7552_v45 }
 0x159   : > { %v7549_v49 = vsel %vm1574_vm2, %v9051_v62, %v9050_v38  ;;  %v881_v20 = vmin.f32 %v7531_v59, 20.0  ;;  %v1766_v36 = vrot.slane %v7373_v32, 1  ;;  %v1768_v25 = vrot.slane %v7494_v30, 1 }
 0x15a   : > { %v1769_v62 = vrot.slane %v7306_v8, 1  ;;  %v9052_v38 = vrot.slane %v7376_v21, 7  ;;  %v1130_v52 = vadd.f32 1.0, %v1022_v42  ;;  %6659 = vpow2.f32 %v951_v63  ;;  %v6650_v22 = vpop.eup %6649 }
 0x15b   : > { %v1771_v37 = vrot.slane %v7476_v57, 1  ;;  %v949_v44 = vmul.f32 1.442695, %v881_v20  ;;  %v7567_v55 = vsel %vm1737_vm4, %v1764_v12, %v1766_v36  ;;  %v1773_v51 = vrot.slane %v7536_v58, 1 }
 0x15c   : > { %v7563_v33 = vsel %vm1574_vm2, 0.0, %v9052_v38  ;;  %v7570_v32 = vsel %vm1737_vm4, %v1768_v25, %v1769_v62  ;;  %v6652_v8 = vpop.eup %6651  ;;  %v1092_v21 = vmul.f32 %v5069_v29, %v7338_v47  ;;  %v5068_v30 = vadd.f32 -1.0, %v1019_v16  ;;  %5832 = vmatmul.mubr.msk.f32.gmra.mrb[46].mxu0 %vm1922_vm5, %v7567_v55 }
 0x15d   : > { %9053 = vst [vmem:[#allocation24_spill] sm:$0xff] %v7563_v33  ;;  %6661 = vrcp.f32 %v1130_v52  ;;  %v985_v38 = vadd.f32 1.0, %v6650_v22  ;;  %v6654_v63 = vpop.eup %6653  ;;  %5834 = vmatprep.mubr.msk.f32.mxu0 %vm1922_vm5, %v7570_v32  ;;  %v7579_v12 = vsel %vm1737_vm4, %v1769_v62, %v1771_v37  ;;  %v1774_v25 = vrot.slane %v7351_v46, 1 }
 0x15e   : > { %6663 = vpow2.f32 %v949_v44  ;;  %9054 = vst [vmem:[#allocation25_spill] sm:$0xff] %v7579_v12  ;;  %v1776_v20 = vrot.slane %v7506_v34, 1  ;;  %v988_v47 = vadd.f32 1.0, %v6654_v63  ;;  %v1778_v16 = vrot.slane %v7563_v33, 1 }
 0x15f   : > { %v1021_v36 = vmul.f32 %v985_v38, %v985_v38  ;;  %v1779_v29 = vrot.slane %v7395_v39, 1  ;;  %v9055_v52 = vrot.slane %v7404_v50, 7  ;;  %v7590_v44 = vmul.f32 %v6652_v8, %v1092_v21 }
 0x160   : > { %v7593_v62 = vsel %vm1737_vm4, %v1773_v51, %v1774_v25  ;;  %v9058_v37 = vrot.slane %v7378_v61, 7  ;;  %v1024_v63 = vmul.f32 %v988_v47, %v988_v47  ;;  %5835 = vmatmul.mubr.msk.f32.gmra.mrb[48].mxu0 %vm1922_vm5, %v7579_v12  ;;  %v1781_v50 = vrot.slane %v7542_v26, 1 }
 0x161   : > { %v7588_v22 = vsel %vm1574_vm2, 0.0, %v9055_v52  ;;  %9057 = vst [vmem:[#allocation27_spill] sm:$0xff] %v7593_v62  ;;  %v1129_v38 = vadd.f32 1.0, %v1021_v36  ;;  %v6656_v57 = vpop.eup %6655  ;;  %v9060_v52 = vrot.slane %v7423_v7, 7  ;;  %v1091_v51 = vmul.f32 %v5068_v30, %v7368_v0  ;;  %5837 = vmatprep.mubr.msk.f32.mxu0 %vm1922_vm5, %v7593_v62 }
 0x162   : > { %9056 = vst [vmem:[#allocation26_spill] sm:$0xff] %v7588_v22  ;;  %v7598_v34 = vsel %vm1574_vm2, %v9058_v37, 0.0  ;;  %v7612_v61 = vsel %vm1737_vm4, %v1774_v25, %v1776_v20  ;;  %v7615_v21 = vsel %vm1737_vm4, %v1778_v16, %v1779_v29  ;;  %v6658_v47 = vpop.eup %6657  ;;  %v1132_v37 = vadd.f32 1.0, %v1024_v63 }
 0x163   : > { %9059 = vst [vmem:[#allocation28_spill] sm:$0xff] %v7598_v34  ;;  %v7606_v8 = vsel %vm1574_vm2, 0.0, %v9060_v52  ;;  %9061 = vst [vmem:[#allocation29_spill] sm:$0xff] %v7612_v61  ;;  %6665 = vrcp.f32 %v1129_v38  ;;  %v1783_v26 = vrot.slane %v7588_v22, 1  ;;  %v1784_v7 = vrot.slane %v7431_v40, 1 }
 0x164   : > { %9062 = vst [vmem:[#allocation30_spill] sm:$0xff] %v7615_v21  ;;  %v1615_v52 = vrot.slane %v7590_v44, 7  ;;  %v1199_v39 = vmul.f32 %v6658_v47, %v1091_v51  ;;  %v5071_v0 = vadd.f32 -1.0, %v1022_v42  ;;  %v987_v30 = vadd.f32 1.0, %v6656_v57  ;;  %v6660_v33 = vpop.eup %6659  ;;  %5838 = vmatmul.mubr.msk.f32.gmra.mrb[50].mxu0 %vm1922_vm5, %v7612_v61 }
 0x165   : > { %6667 = vrcp.f32 %v1132_v37  ;;  %v7623_v25 = vsel %vm1737_vm4, %v1779_v29, %v1781_v50  ;;  %v1786_v20 = vrot.slane %v7598_v34, 1  ;;  %v1788_v16 = vrot.slane %v7606_v8, 1  ;;  %5840 = vmatprep.mubr.msk.f32.mxu0 %vm1922_vm5, %v7615_v21 }
 0x166   : > { %9063 = vst [vmem:[#allocation31_spill] sm:$0xff] %v7623_v25  ;;  %v1614_v38 = vrot.slane %v1199_v39, 7  ;;  %v1023_v22 = vmul.f32 %v987_v30, %v987_v30  ;;  %v990_v40 = vadd.f32 1.0, %v6660_v33  ;;  %v1789_v57 = vrot.slane %v7454_v19, 1 }
 0x167   : > { %v6662_v42 = vpop.eup %6661  ;;  %v9064_v44 = vrot.slane %v7412_v17, 7  ;;  %v9066_v29 = vrot.slane %v7443_v9, 7  ;;  %v7641_v39 = vsel %vm1737_vm4, %v1783_v26, %v1784_v7  ;;  %v9068_v47 = vrot.slane %v7436_v2, 7 }
 0x168   : > { %9067 = vst [vmem:[#allocation33_spill] sm:$0xff] %v7641_v39  ;;  %v6664_v33 = vpop.eup %6663  ;;  %v7649_v30 = vsel %vm1574_vm2, %v1614_v38, %v1615_v52  ;;  %v1094_v17 = vmul.f32 %v5071_v0, %v7408_v48  ;;  %v1131_v34 = vadd.f32 1.0, %v1023_v22  ;;  %v1026_v9 = vmul.f32 %v990_v40, %v990_v40  ;;  %5841 = vmatmul.mubr.msk.f32.gmra.mrb[52].mxu0 %vm1922_vm5, %v7623_v25 }
 0x169   : > { %v7633_v51 = vsel %vm1574_vm2, %v9064_v44, 0.0  ;;  %v7638_v50 = vsel %vm1574_vm2, 0.0, %v9066_v29  ;;  %v7646_v37 = vsel %vm1574_vm2, %v9068_v47, 0.0  ;;  %v5070_v44 = vadd.f32 -1.0, %v1021_v36  ;;  %5843 = vmatprep.mubr.msk.f32.mxu0 %vm1922_vm5, %v7641_v39 }
 0x16a   : > { %9065 = vst [vmem:[#allocation32_spill] sm:$0xff] %v7633_v51  ;;  %9069 = vst [vmem:[#allocation34_spill] sm:$0xff] %v7646_v37  ;;  %v989_v19 = vadd.f32 1.0, %v6664_v33  ;;  %v7655_v26 = vsel %vm1737_vm4, %v1784_v7, %v1786_v20  ;;  %v1202_v29 = vmul.f32 %v6662_v42, %v1094_v17  ;;  %v7660_v2 = vsel %vm1737_vm4, %v1788_v16, %v1789_v57 }
 0x16b   : > { %9070 = vst [vmem:[#allocation35_spill] sm:$0xff] %v7655_v26  ;;  %9071 = vst [vmem:[#allocation36_spill] sm:$0xff] %v7660_v2  ;;  %v1791_v47 = vrot.slane %v7633_v51, 1  ;;  %v1793_v48 = vrot.slane %v7638_v50, 1  ;;  %6669 = vrcp.f32 %v1131_v34  ;;  %v1134_v40 = vadd.f32 1.0, %v1026_v9 }
 0x16c   : > { %v1025_v36 = vmul.f32 %v989_v19, %v989_v19  ;;  %v1794_v0 = vrot.slane %v7487_v6, 1  ;;  %v9072_v33 = vrot.slane %v7509_v18, 7  ;;  %v1093_v20 = vmul.f32 %v5070_v44, %v7441_v56  ;;  %5844 = vmatmul.mubr.msk.f32.gmra.mrb[54].mxu0 %vm1922_vm5, %v7655_v26 }
 0x16d   : > { %v5073_v42 = vadd.f32 -1.0, %v1024_v63  ;;  %v6666_v17 = vpop.eup %6665  ;;  %v9073_v16 = vrot.slane %v7478_v14, 7  ;;  %6671 = vrcp.f32 %v1134_v40  ;;  %v1618_v19 = vrot.slane %v1202_v29, 7  ;;  %5846 = vmatprep.mubr.msk.f32.mxu0 %vm1922_vm5, %v7660_v2 }
 0x16e   : > { %v7668_v7 = vsel %vm1574_vm2, 0.0, %v9072_v33  ;;  %v1133_v34 = vadd.f32 1.0, %v1025_v36  ;;  %v1201_v6 = vmul.f32 %v6666_v17, %v1093_v20  ;;  %v7681_v18 = vsel %vm1737_vm4, %v1789_v57, %v1791_v47 }
 0x16f   : > { %v7674_v51 = vsel %vm1574_vm2, %v9073_v16, 0.0  ;;  %9075 = vst [vmem:[#allocation38_spill] sm:$0xff] %v7681_v18  ;;  %v1796_v56 = vrot.slane %v7646_v37, 1  ;;  %v6668_v63 = vpop.eup %6667  ;;  %v7685_v14 = vsel %vm1737_vm4, %v1793_v48, %v1794_v0  ;;  %v1798_v44 = vrot.slane %v7668_v7, 1 }
 0x170   : > { %9074 = vst [vmem:[#allocation37_spill] sm:$0xff] %v7674_v51  ;;  %6673 = vrcp.f32 %v1133_v34  ;;  %9076 = vst [vmem:[#allocation39_spill] sm:$0xff] %v7685_v14  ;;  %v1799_v40 = vrot.slane %v7549_v49, 1  ;;  %v7690_v29 = vsel %vm1574_vm2, 0.0, %v1614_v38  ;;  %v1617_v33 = vrot.slane %v1201_v6, 7  ;;  %5847 = vmatmul.mubr.msk.f32.gmra.mrb[56].mxu0 %vm1922_vm5, %v7681_v18 }
 0x171   : > { %v1096_v20 = vmul.f32 %v5073_v42, %v7466_v28  ;;  %v5072_v17 = vadd.f32 -1.0, %v1023_v22  ;;  %v7694_v57 = vsel %vm1574_vm2, %v1615_v52, 0.0  ;;  %v5075_v47 = vadd.f32 -1.0, %v1026_v9  ;;  %5849 = vmatprep.mubr.msk.f32.mxu0 %vm1922_vm5, %v7685_v14 }
 0x172   : > { %9077 = vst [vmem:[#allocation40_spill] sm:$0xff] %v7694_v57  ;;  %v7699_v48 = vsel %vm1574_vm2, %v1617_v33, %v1618_v19  ;;  %v7704_v38 = vsel %vm1737_vm4, %v1794_v0, %v1796_v56  ;;  %v1801_v28 = vrot.slane %v7674_v51, 1  ;;  %v7708_v6 = vsel %vm1737_vm4, %v1798_v44, %v1799_v40 }
 0x173   : > { %v1204_v16 = vmul.f32 %v6668_v63, %v1096_v20  ;;  %9078 = vst [vmem:[#allocation41_spill] sm:$0xff] %v7704_v38  ;;  %9079 = vst [vmem:[#allocation42_spill] sm:$0xff] %v7708_v6  ;;  %v1803_v22 = vrot.slane %v7690_v29, 1  ;;  %v1804_v52 = vrot.slane %v7649_v30, 1  ;;  %v7713_v9 = vsel %vm1574_vm2, 0.0, %v1617_v33 }
 0x174   : > { %v1095_v42 = vmul.f32 %v5072_v17, %v7500_v11  ;;  %v5074_v34 = vadd.f32 -1.0, %v1025_v36  ;;  %v7717_v20 = vsel %vm1574_vm2, %v1618_v19, 0.0  ;;  %5850 = vmatmul.mubr.msk.f32.gmra.mrb[58].mxu0 %vm1922_vm5, %v7704_v38  ;;  %v1806_v0 = vrot.slane %v7694_v57, 1 }
 0x175   : > { %v6670_v63 = vpop.eup %6669  ;;  %v1621_v56 = vrot.slane %v1204_v16, 7  ;;  %v1098_v51 = vmul.f32 %v5075_v47, %v7522_v15  ;;  %5852 = vmatprep.mubr.msk.f32.mxu0 %vm1922_vm5, %v7708_v6  ;;  %v7726_v33 = vsel %vm1737_vm4, %v1799_v40, %v1801_v28  ;;  %v7729_v36 = vsel %vm1737_vm4, %v1803_v22, %v1804_v52 }
 0x176   : > { %v1203_v44 = vmul.f32 %v6670_v63, %v1095_v42  ;;  %9080 = vst [vmem:[#allocation43_spill] sm:$0xff] %v7726_v33  ;;  %9081 = vst [vmem:[#allocation44_spill] sm:$0xff] %v7729_v36  ;;  %v1808_v19 = vrot.slane %v7713_v9, 1  ;;  %v1809_v17 = vrot.slane %v7699_v48, 1  ;;  %v1097_v16 = vmul.f32 %v5074_v34, %v7531_v59  ;;  %v5813_v59 = vpop.f32.mrb[34].mxu0 }
 0x177   : > { %v6672_v11 = vpop.eup %6671  ;;  %v7739_v40 = vsel %vm1737_vm4, %v1804_v52, %v1806_v0  ;;  %v1811_v47 = vrot.slane %v7717_v20, 1  ;;  %v7752_v34 = vsel %vm1574_vm2, %v1621_v56, 0.0  ;;  %v9087_v59 = vld [vmem:[#allocation13_spill] sm:$0xff] }
 0x178   : > { %v1620_v37 = vrot.slane %v1203_v44, 7  ;;  %v7733_v57 = vmul.f32 %v6672_v11, %v1098_v51  ;;  %5853 = vmatmul.mubr.msk.f32.gmra.mrb[60].mxu0 %vm1922_vm5, %v7726_v33  ;;  %9082 = vst [vmem:[#allocation45_spill] sm:$0xff] %v7739_v40  ;;  %v7755_v52 = vsel %vm1737_vm4, %v1808_v19, %v1809_v17  ;;  %v840_v44 = vpop.f32.mrb[35].mxu0 }
 0x179   : > { %5855 = vmatprep.mubr.msk.f32.mxu0 %vm1922_vm5, %v7729_v36  ;;  %9083 = vst [vmem:[#allocation46_spill] sm:$0xff] %v7755_v52  ;;  %v7764_v11 = vsel %vm1737_vm4, %v1809_v17, %v1811_v47  ;;  %v5247_v17 = vld [vmem:[%s8915_s5 + $0xa] sm:$0x3]  ;;  %v6803_v47 = vld [vmem:[%s8915_s5 + $0x8] sm:$0x3]  ;;  %v9090_v44 = vld [vmem:[#allocation9_spill] sm:$0xff] }
 0x17a   : > { %v6674_v15 = vpop.eup %6673  ;;  %v7743_v28 = vsel %vm1574_vm2, %v1620_v37, %v1621_v56  ;;  %v7746_v22 = vsel %vm1574_vm2, 0.0, %v1620_v37  ;;  %v8976_v51 = vrot.slane %v7733_v57, 7  ;;  %9084 = vst [vmem:[#allocation47_spill] sm:$0xff] %v7764_v11  ;;  %v1816_v56 = vrot.slane %v7752_v34, 1 }
 0x17b   : > { %v1205_v42 = vmul.f32 %v6674_v15, %v1097_v16  ;;  %v1813_v63 = vrot.slane %v7746_v22, 1  ;;  %v1814_v0 = vrot.slane %v7743_v28, 1 }
 0x17c   : > { %5856 = vmatmul.mubr.msk.f32.gmra.mrb[62].mxu0 %vm1922_vm5, %v7739_v40 }
 0x17d   : > { %v1623_v37 = vrot.slane %v1205_v42, 7  ;;  %5858 = vmatprep.mubr.msk.f32.mxu0 %vm1922_vm5, %v7755_v52  ;;  %v7776_v15 = vsel %vm1737_vm4, %v1813_v63, %v1814_v0  ;;  %v7794_v42 = vsel %vm1737_vm4, %v1814_v0, %v1816_v56  ;;  %v7804_v63 = vld [vmem:[%s8915_s5 + $0xc] sm:$0x3] }
 0x17e   : > { %9085 = vst [vmem:[#allocation48_spill] sm:$0xff] %v7776_v15  ;;  %9086 = vst [vmem:[#allocation49_spill] sm:$0xff] %v7794_v42  ;;  %v9088_v0 = vld [vmem:[#allocation3_spill] sm:$0xff] }
 0x17f   : > { %v7768_v19 = vsel %vm1574_vm2, 0.0, %v1623_v37  ;;  %v7773_v16 = vsel %vm1574_vm2, %v1623_v37, %v8976_v51  ;;  %v7828_v37 = vld [vmem:[%s8915_s5 + $0x6] sm:$0x3]  ;;  %v9091_v56 = vld [vmem:[#allocation7_spill] sm:$0xff] }
 0x180   : > { %6011 = vmatprep.mubr.msk.f32.mxu1 %vm1922_vm5, %v7768_v19  ;;  %5859 = vmatmul.mubr.msk.f32.gmra.mrb[64].mxu0 %vm1922_vm5, %v7764_v11  ;;  %v9096_v51 = vld [vmem:[#allocation26_spill] sm:$0xff] }
 0x181   : > { %6012 = vmatmul.mubr.msk.f32.vlgmr.msra.gmra.mrb[0].mxu1 %vm1922_vm5, %v7773_v16  ;;  %5861 = vmatprep.mubr.msk.f32.mxu0 %vm1922_vm5, %v7776_v15 }
 0x182   : > { %6015 = vmatpush3.msk.msra.mxu1 %vm1987_vm3, %v6803_v47  ;;  %6016 = vmatprep.mubr.msk.f32.mxu1 %vm1922_vm5, %v7293_v23  ;;  %v9089_v23 = vld [vmem:[#allocation2_spill] sm:$0xff]  ;;  %v9094_v47 = vld [vmem:[#allocation24_spill] sm:$0xff] }
 0x183   : > { %6064 = vmatprep.subr.msk.mxu1 %vm1987_vm3, %v5247_v17 }
 0x184   : > { %5862 = vmatmul.mubr.msk.f32.gmra.mrb[66].mxu0 %vm1922_vm5, %v7794_v42 }
 0x185   : > { %6017 = vmatmul.mubr.msk.f32.vlgmr.msra.gmra.mrb[2].mxu1 %vm1922_vm5, %v9087_v59  ;;  %5866 = vmatprep.mubr.msk.f32.mxu0 %vm1922_vm5, %v9088_v0  ;;  %v9095_v59 = vld [vmem:[#allocation16_spill] sm:$0xff] }
 0x186   : > { %6065 = vmatpush3.msk.msra.mxu1 %vm1987_vm3, %v5247_v17  ;;  %6019 = vmatprep.mubr.msk.f32.mxu1 %vm1922_vm5, %v7384_v43  ;;  %v9093_v17 = vld [vmem:[#allocation11_spill] sm:$0xff] }
 0x187   : > { %6114 = vmatprep.subr.msk.mxu1 %vm1987_vm3, %v7804_v63 }
 0x188   : > { %5867 = vmatmul.mubr.msk.f32.vlgmr.msra.gmra.mrb[36].mxu0 %vm1922_vm5, %v9089_v23 }
 0x189   : > { %6020 = vmatmul.mubr.msk.f32.gmra.mrb[4].mxu1 %vm1922_vm5, %v7415_v54  ;;  %5869 = vmatprep.mubr.msk.f32.mxu0 %vm1922_vm5, %v9090_v44 }
 0x18a   : > { %6022 = vmatprep.mubr.msk.f32.mxu1 %vm1922_vm5, %v7446_v53  ;;  %5915 = vmatpush3.msk.msra.mxu0 %vm1987_vm3, %v7401_v4  ;;  %v9092_v4 = vld [vmem:[#allocation21_spill] sm:$0xff] }
 0x18b   : > { %5964 = vmatprep.subr.msk.mxu0 %vm1987_vm3, %v7828_v37 }
 0x18c   : > { %5870 = vmatmul.mubr.msk.f32.gmra.mrb[38].mxu0 %vm1922_vm5, %v9091_v56 }
 0x18d   : > { %6023 = vmatmul.mubr.msk.f32.gmra.mrb[6].mxu1 %vm1922_vm5, %v7462_v24  ;;  %5872 = vmatprep.mubr.msk.f32.mxu0 %vm1922_vm5, %v7315_v41 }
 0x18e   : > { %6025 = vmatprep.mubr.msk.f32.mxu1 %vm1922_vm5, %v7512_v27 }
 0x190   : > { %5873 = vmatmul.mubr.msk.f32.gmra.mrb[40].mxu0 %vm1922_vm5, %v7162_v5 }
 0x191   : > { %6026 = vmatmul.mubr.msk.f32.gmra.mrb[8].mxu1 %vm1922_vm5, %v7518_v1  ;;  %5875 = vmatprep.mubr.msk.f32.mxu0 %vm1922_vm5, %v7331_v31 }
 0x192   : > { %6028 = vmatprep.mubr.msk.f32.mxu1 %vm1922_vm5, %v7552_v45 }
 0x194   : > { %5876 = vmatmul.mubr.msk.f32.gmra.mrb[42].mxu0 %vm1922_vm5, %v7190_v13 }
 0x195   : > { %6029 = vmatmul.mubr.msk.f32.gmra.mrb[10].mxu1 %vm1922_vm5, %v7567_v55  ;;  %5878 = vmatprep.mubr.msk.f32.mxu0 %vm1922_vm5, %v7357_v10 }
 0x196   : > { %6031 = vmatprep.mubr.msk.f32.mxu1 %vm1922_vm5, %v7570_v32 }
 0x198   : > { %5879 = vmatmul.mubr.msk.f32.gmra.mrb[44].mxu0 %vm1922_vm5, %v7208_v35 }
 0x199   : > { %6032 = vmatmul.mubr.msk.f32.gmra.mrb[12].mxu1 %vm1922_vm5, %v7579_v12  ;;  %5881 = vmatprep.mubr.msk.f32.mxu0 %vm1922_vm5, %v7471_v3  ;;  %v7977_v12 = vld [vmem:[%s8915_s5 + $0xe] sm:$0x3] }
 0x19a   : > { %6034 = vmatprep.mubr.msk.f32.mxu1 %vm1922_vm5, %v7593_v62  ;;  %v1845_v62 = vrot.slane %v7190_v13, 2 }
 0x19c   : > { %5882 = vmatmul.mubr.msk.f32.gmra.mrb[46].mxu0 %vm1922_vm5, %v7258_v60 }
 0x19d   : > { %6035 = vmatmul.mubr.msk.f32.gmra.mrb[14].mxu1 %vm1922_vm5, %v7612_v61  ;;  %5884 = vmatprep.mubr.msk.f32.mxu0 %vm1922_vm5, %v9092_v4  ;;  %v1844_v61 = vrot.slane %v7331_v31, 2 }
 0x19e   : > { %6037 = vmatprep.mubr.msk.f32.mxu1 %vm1922_vm5, %v7615_v21 }
 0x1a0   : > { %5885 = vmatmul.mubr.msk.f32.gmra.mrb[48].mxu0 %vm1922_vm5, %v9093_v17 }
 0x1a1   : > { %6038 = vmatmul.mubr.msk.f32.gmra.mrb[16].mxu1 %vm1922_vm5, %v7623_v25  ;;  %5887 = vmatprep.mubr.msk.f32.mxu0 %vm1922_vm5, %v7536_v58 }
 0x1a2   : > { %6040 = vmatprep.mubr.msk.f32.mxu1 %vm1922_vm5, %v7641_v39 }
 0x1a4   : > { %5888 = vmatmul.mubr.msk.f32.gmra.mrb[50].mxu0 %vm1922_vm5, %v7351_v46 }
 0x1a5   : > { %6041 = vmatmul.mubr.msk.f32.gmra.mrb[18].mxu1 %vm1922_vm5, %v7655_v26  ;;  %5890 = vmatprep.mubr.msk.f32.mxu0 %vm1922_vm5, %v9094_v47  ;;  %v9097_v26 = vld [vmem:[#allocation17_spill] sm:$0xff] }
 0x1a6   : > { %6043 = vmatprep.mubr.msk.f32.mxu1 %vm1922_vm5, %v7660_v2  ;;  %v1830_v2 = vrot.slane %v9089_v23, 2 }
 0x1a8   : > { %5891 = vmatmul.mubr.msk.f32.gmra.mrb[52].mxu0 %vm1922_vm5, %v9095_v59 }
 0x1a9   : > { %6044 = vmatmul.mubr.msk.f32.gmra.mrb[20].mxu1 %vm1922_vm5, %v7681_v18  ;;  %5893 = vmatprep.mubr.msk.f32.mxu0 %vm1922_vm5, %v9096_v51  ;;  %v9098_v18 = vld [vmem:[#allocation18_spill] sm:$0xff] }
 0x1aa   : > { %6046 = vmatprep.mubr.msk.f32.mxu1 %vm1922_vm5, %v7685_v14  ;;  %v1819_v14 = vrot.slane %v7773_v16, 1 }
 0x1ac   : > { %5894 = vmatmul.mubr.msk.f32.gmra.mrb[54].mxu0 %vm1922_vm5, %v9097_v26 }
 0x1ad   : > { %6047 = vmatmul.mubr.msk.f32.gmra.mrb[22].mxu1 %vm1922_vm5, %v7704_v38  ;;  %5896 = vmatprep.mubr.msk.f32.mxu0 %vm1922_vm5, %v7606_v8  ;;  %v9099_v38 = vld [vmem:[#allocation20_spill] sm:$0xff] }
 0x1ae   : > { %6049 = vmatprep.mubr.msk.f32.mxu1 %vm1922_vm5, %v7708_v6 }
 0x1b0   : > { %5897 = vmatmul.mubr.msk.f32.gmra.mrb[56].mxu0 %vm1922_vm5, %v9098_v18 }
 0x1b1   : > { %6050 = vmatmul.mubr.msk.f32.gmra.mrb[24].mxu1 %vm1922_vm5, %v7726_v33  ;;  %5899 = vmatprep.mubr.msk.f32.mxu0 %vm1922_vm5, %v7638_v50  ;;  %v9100_v33 = vrot.slane %v7733_v57, 7 }
 0x1b2   : > { %6052 = vmatprep.mubr.msk.f32.mxu1 %vm1922_vm5, %v7729_v36  ;;  %v1818_v36 = vrot.slane %v7768_v19, 1 }
 0x1b3   : > { %v7923_v6 = vsel %vm1574_vm2, %v9100_v33, 0.0 }
 0x1b4   : > { %5900 = vmatmul.mubr.msk.f32.gmra.mrb[58].mxu0 %vm1922_vm5, %v9099_v38  ;;  %v1821_v57 = vrot.slane %v7923_v6, 1  ;;  %v7939_v33 = vsel %vm1737_vm4, %v1818_v36, %v1819_v14  ;;  %v1829_v36 = vrot.slane %v9088_v0, 2 }
 0x1b5   : > { %6053 = vmatmul.mubr.msk.f32.gmra.mrb[26].mxu1 %vm1922_vm5, %v7739_v40  ;;  %5902 = vmatprep.mubr.msk.f32.mxu0 %vm1922_vm5, %v7668_v7  ;;  %9101 = vst [vmem:[#allocation13_spill] sm:$0xff] %v7939_v33 }
 0x1b6   : > { %6055 = vmatprep.mubr.msk.f32.mxu1 %vm1922_vm5, %v7755_v52  ;;  %v1834_v52 = vrot.slane %v9090_v44, 2  ;;  %v7967_v25 = vsel %vm1828_vm6, %v1829_v36, %v1830_v2 }
 0x1b7   : > { %9105 = vst [vmem:[#allocation2_spill] sm:$0xff] %v7967_v25 }
 0x1b8   : > { %5903 = vmatmul.mubr.msk.f32.gmra.mrb[60].mxu0 %vm1922_vm5, %v7549_v49 }
 0x1b9   : > { %6056 = vmatmul.mubr.msk.f32.gmra.mrb[28].mxu1 %vm1922_vm5, %v7764_v11  ;;  %5905 = vmatprep.mubr.msk.f32.mxu0 %vm1922_vm5, %v7690_v29  ;;  %v1835_v11 = vrot.slane %v9091_v56, 2 }
 0x1ba   : > { %6058 = vmatprep.mubr.msk.f32.mxu1 %vm1922_vm5, %v7776_v15  ;;  %v9102_v15 = vld [vmem:[#allocation8_spill] sm:$0xff] }
 0x1bb   : > { %v1837_v40 = vrot.slane %v9102_v15, 2  ;;  %v1836_v39 = vsel %vm1828_vm6, %v1834_v52, %v1835_v11  ;;  %v1840_v15 = vrot.slane %v7162_v5, 2  ;;  %v9106_v52 = vld [vmem:[#allocation10_spill] sm:$0xff] }
 0x1bc   : > { %5906 = vmatmul.mubr.msk.f32.gmra.mrb[62].mxu0 %vm1922_vm5, %v7649_v30  ;;  %v1842_v21 = vrot.slane %v9106_v52, 2 }
 0x1bd   : > { %6059 = vmatmul.mubr.msk.f32.gmra.mrb[30].mxu1 %vm1922_vm5, %v7794_v42  ;;  %5908 = vmatprep.mubr.msk.f32.mxu0 %vm1922_vm5, %v7713_v9  ;;  %v7951_v42 = vsel %vm1737_vm4, %v1819_v14, %v1821_v57  ;;  %v9104_v14 = vld [vmem:[#allocation4_spill] sm:$0xff] }
 0x1be   : > { %6061 = vmatprep.mubr.msk.f32.mxu1 %vm1922_vm5, %v7939_v33  ;;  %9103 = vst [vmem:[#allocation3_spill] sm:$0xff] %v7951_v42  ;;  %v1839_v33 = vrot.slane %v7315_v41, 2  ;;  %v1832_v57 = vrot.slane %v9104_v14, 2  ;;  %v7994_v36 = vsel %vm1828_vm6, %v1840_v15, %v1842_v21  ;;  %v9108_v14 = vld [vmem:[#allocation12_spill] sm:$0xff] }
 0x1bf   : > { %v1847_v52 = vrot.slane %v9108_v14, 2  ;;  %v1854_v14 = vrot.slane %v7471_v3, 2 }
 0x1c0   : > { %5909 = vmatmul.mubr.msk.f32.gmra.mrb[64].mxu0 %vm1922_vm5, %v7699_v48 }
 0x1c1   : > { %6062 = vmatmul.mubr.msk.f32.gmra.mrb[0].mxu1 %vm1922_vm5, %v7951_v42  ;;  %5911 = vmatprep.mubr.msk.f32.mxu0 %vm1922_vm5, %v7746_v22  ;;  %v1838_v42 = vsel %vm1828_vm6, %v1835_v11, %v1837_v40  ;;  %v7984_v40 = vsel %vm1828_vm6, %v1839_v33, %v1840_v15  ;;  %v7989_v11 = vsel %vm1828_vm6, %v1830_v2, %v1832_v57  ;;  %v1849_v2 = vrot.slane %v7357_v10, 2 }
 0x1c2   : > { %6066 = vmatprep.mubr.msk.f32.mxu1 %vm1922_vm5, %v1836_v39  ;;  %9107 = vst [vmem:[#allocation9_spill] sm:$0xff] %v7989_v11  ;;  %v1850_v33 = vrot.slane %v7208_v35, 2  ;;  %v8014_v21 = vsel %vm1828_vm6, %v1845_v62, %v1847_v52 }
 0x1c3   : > { %9110 = vst [vmem:[#allocation21_spill] sm:$0xff] %v8014_v21 }
 0x1c4   : > { %5912 = vmatmul.mubr.msk.f32.gmra.mrb[66].mxu0 %vm1922_vm5, %v7743_v28  ;;  %v8020_v57 = vsel %vm1828_vm6, %v1849_v2, %v1850_v33  ;;  %v1859_v2 = vrot.slane %v9092_v4, 2 }
 0x1c5   : > { %6067 = vmatmul.mubr.msk.f32.vlgmr.msra.gmra.mrb[2].mxu1 %vm1922_vm5, %v1838_v42  ;;  %5916 = vmatprep.mubr.msk.f32.mxu0 %vm1922_vm5, %v7967_v25  ;;  %9112 = vst [vmem:[#allocation11_spill] sm:$0xff] %v8020_v57  ;;  %v1865_v25 = vrot.slane %v7351_v46, 2 }
 0x1c6   : > { %6115 = vmatpush3.msk.msra.mxu1 %vm1987_vm3, %v7804_v63  ;;  %6069 = vmatprep.mubr.msk.f32.mxu1 %vm1922_vm5, %v7984_v40  ;;  %v8002_v63 = vsel %vm1828_vm6, %v1844_v61, %v1845_v62  ;;  %v9111_v61 = vld [vmem:[#allocation14_spill] sm:$0xff] }
 0x1c7   : > { %6164 = vmatprep.subr.msk.mxu1 %vm1987_vm3, %v7977_v12  ;;  %9109 = vst [vmem:[#allocation7_spill] sm:$0xff] %v8002_v63  ;;  %v1852_v15 = vrot.slane %v9111_v61, 2  ;;  %v9117_v61 = vld [vmem:[#allocation19_spill] sm:$0xff] }
 0x1c8   : > { %5917 = vmatmul.mubr.msk.f32.vlgmr.msra.gmra.mrb[36].mxu0 %vm1922_vm5, %v7989_v11  ;;  %v1855_v11 = vrot.slane %v7258_v60, 2 }
 0x1c9   : > { %6070 = vmatmul.mubr.msk.f32.gmra.mrb[4].mxu1 %vm1922_vm5, %v7994_v36  ;;  %5919 = vmatprep.mubr.msk.f32.mxu0 %vm1922_vm5, %v1836_v39  ;;  %v8030_v62 = vsel %vm1828_vm6, %v1850_v33, %v1852_v15  ;;  %v9114_v39 = vld [vmem:[#allocation15_spill] sm:$0xff]  ;;  %v1862_v15 = vrot.slane %v9117_v61, 2 }
 0x1ca   : > { %6072 = vmatprep.mubr.msk.f32.mxu1 %vm1922_vm5, %v8002_v63  ;;  %5965 = vmatpush3.msk.msra.mxu0 %vm1987_vm3, %v7828_v37  ;;  %9113 = vst [vmem:[#allocation24_spill] sm:$0xff] %v8030_v62  ;;  %v1857_v37 = vrot.slane %v9114_v39, 2  ;;  %v8036_v52 = vsel %vm1828_vm6, %v1854_v14, %v1855_v11  ;;  %v1864_v39 = vrot.slane %v7536_v58, 2 }
 0x1cb   : > { %9115 = vst [vmem:[#allocation16_spill] sm:$0xff] %v8036_v52 }
 0x1cc   : > { %5920 = vmatmul.mubr.msk.f32.gmra.mrb[38].mxu0 %vm1922_vm5, %v1838_v42  ;;  %v1860_v42 = vrot.slane %v9093_v17, 2  ;;  %v8047_v33 = vsel %vm1828_vm6, %v1855_v11, %v1857_v37  ;;  %v9120_v37 = vld [vmem:[#allocation22_spill] sm:$0xff] }
 0x1cd   : > { %6073 = vmatmul.mubr.msk.f32.gmra.mrb[6].mxu1 %vm1922_vm5, %v8014_v21  ;;  %5922 = vmatprep.mubr.msk.f32.mxu0 %vm1922_vm5, %v7984_v40  ;;  %9116 = vst [vmem:[#allocation26_spill] sm:$0xff] %v8047_v33  ;;  %v1867_v61 = vrot.slane %v9120_v37, 2 }
 0x1ce   : > { %6075 = vmatprep.mubr.msk.f32.mxu1 %vm1922_vm5, %v8020_v57  ;;  %v8053_v14 = vsel %vm1828_vm6, %v1859_v2, %v1860_v42  ;;  %v8064_v11 = vsel %vm1828_vm6, %v1860_v42, %v1862_v15  ;;  %v8070_v2 = vsel %vm1828_vm6, %v1864_v39, %v1865_v25  ;;  %v9123_v15 = vld [vmem:[#allocation23_spill] sm:$0xff] }
 0x1cf   : > { %9118 = vst [vmem:[#allocation17_spill] sm:$0xff] %v8053_v14  ;;  %9119 = vst [vmem:[#allocation18_spill] sm:$0xff] %v8064_v11  ;;  %v8081_v42 = vsel %vm1828_vm6, %v1865_v25, %v1867_v61  ;;  %v1872_v37 = vrot.slane %v9123_v15, 2  ;;  %v9126_v61 = vld [vmem:[#allocation28_spill] sm:$0xff] }
 0x1d0   : > { %5923 = vmatmul.mubr.msk.f32.gmra.mrb[40].mxu0 %vm1922_vm5, %v7994_v36  ;;  %9121 = vst [vmem:[#allocation20_spill] sm:$0xff] %v8070_v2  ;;  %9122 = vst [vmem:[#allocation8_spill] sm:$0xff] %v8081_v42  ;;  %v1877_v15 = vrot.slane %v9126_v61, 2 }
 0x1d1   : > { %6076 = vmatmul.mubr.msk.f32.gmra.mrb[8].mxu1 %vm1922_vm5, %v8030_v62  ;;  %5925 = vmatprep.mubr.msk.f32.mxu0 %vm1922_vm5, %v8002_v63  ;;  %v1869_v63 = vrot.slane %v9094_v47, 2 }
 0x1d2   : > { %6078 = vmatprep.mubr.msk.f32.mxu1 %vm1922_vm5, %v8036_v52 }
 0x1d4   : > { %5926 = vmatmul.mubr.msk.f32.gmra.mrb[42].mxu0 %vm1922_vm5, %v8014_v21  ;;  %v1870_v21 = vrot.slane %v9095_v59, 2 }
 0x1d5   : > { %6079 = vmatmul.mubr.msk.f32.gmra.mrb[10].mxu1 %vm1922_vm5, %v8047_v33  ;;  %5928 = vmatprep.mubr.msk.f32.mxu0 %vm1922_vm5, %v8020_v57  ;;  %v1874_v57 = vrot.slane %v9096_v51, 2 }
 0x1d6   : > { %6081 = vmatprep.mubr.msk.f32.mxu1 %vm1922_vm5, %v8053_v14  ;;  %v8087_v39 = vsel %vm1828_vm6, %v1869_v63, %v1870_v21  ;;  %v8098_v25 = vsel %vm1828_vm6, %v1870_v21, %v1872_v37  ;;  %v9129_v37 = vld [vmem:[#allocation32_spill] sm:$0xff] }
 0x1d7   : > { %9124 = vst [vmem:[#allocation4_spill] sm:$0xff] %v8087_v39  ;;  %9125 = vst [vmem:[#allocation10_spill] sm:$0xff] %v8098_v25  ;;  %v1882_v61 = vrot.slane %v9129_v37, 2 }
 0x1d8   : > { %5929 = vmatmul.mubr.msk.f32.gmra.mrb[44].mxu0 %vm1922_vm5, %v8030_v62  ;;  %v1875_v62 = vrot.slane %v9097_v26, 2 }
 0x1d9   : > { %6082 = vmatmul.mubr.msk.f32.gmra.mrb[12].mxu1 %vm1922_vm5, %v8064_v11  ;;  %5931 = vmatprep.mubr.msk.f32.mxu0 %vm1922_vm5, %v8036_v52  ;;  %v1879_v52 = vrot.slane %v7606_v8, 2 }
 0x1da   : > { %6084 = vmatprep.mubr.msk.f32.mxu1 %vm1922_vm5, %v8070_v2  ;;  %v8104_v63 = vsel %vm1828_vm6, %v1874_v57, %v1875_v62  ;;  %v8115_v21 = vsel %vm1828_vm6, %v1875_v62, %v1877_v15  ;;  %v9131_v15 = vld [vmem:[#allocation34_spill] sm:$0xff] }
 0x1db   : > { %9127 = vst [vmem:[#allocation12_spill] sm:$0xff] %v8104_v63  ;;  %9128 = vst [vmem:[#allocation14_spill] sm:$0xff] %v8115_v21  ;;  %v1887_v37 = vrot.slane %v9131_v15, 2 }
 0x1dc   : > { %5932 = vmatmul.mubr.msk.f32.gmra.mrb[46].mxu0 %vm1922_vm5, %v8047_v33  ;;  %v1880_v33 = vrot.slane %v9098_v18, 2 }
 0x1dd   : > { %6085 = vmatmul.mubr.msk.f32.gmra.mrb[14].mxu1 %vm1922_vm5, %v8081_v42  ;;  %5934 = vmatprep.mubr.msk.f32.mxu0 %vm1922_vm5, %v8053_v14  ;;  %v1884_v14 = vrot.slane %v7638_v50, 2 }
 0x1de   : > { %6087 = vmatprep.mubr.msk.f32.mxu1 %vm1922_vm5, %v8087_v39  ;;  %v8121_v57 = vsel %vm1828_vm6, %v1879_v52, %v1880_v33  ;;  %v8132_v62 = vsel %vm1828_vm6, %v1880_v33, %v1882_v61  ;;  %v9133_v61 = vld [vmem:[#allocation37_spill] sm:$0xff] }
 0x1df   : > { %9130 = vst [vmem:[#allocation15_spill] sm:$0xff] %v8132_v62  ;;  %v1892_v15 = vrot.slane %v9133_v61, 2 }
 0x1e0   : > { %5935 = vmatmul.mubr.msk.f32.gmra.mrb[48].mxu0 %vm1922_vm5, %v8064_v11  ;;  %v1885_v11 = vrot.slane %v9099_v38, 2 }
 0x1e1   : > { %6088 = vmatmul.mubr.msk.f32.gmra.mrb[16].mxu1 %vm1922_vm5, %v8098_v25  ;;  %5937 = vmatprep.mubr.msk.f32.mxu0 %vm1922_vm5, %v8070_v2  ;;  %v1889_v2 = vrot.slane %v7668_v7, 2 }
 0x1e2   : > { %6090 = vmatprep.mubr.msk.f32.mxu1 %vm1922_vm5, %v8104_v63  ;;  %v8138_v52 = vsel %vm1828_vm6, %v1884_v14, %v1885_v11  ;;  %v8149_v33 = vsel %vm1828_vm6, %v1885_v11, %v1887_v37  ;;  %v9134_v37 = vld [vmem:[#allocation40_spill] sm:$0xff] }
 0x1e3   : > { %9132 = vst [vmem:[#allocation19_spill] sm:$0xff] %v8149_v33  ;;  %v1897_v61 = vrot.slane %v9134_v37, 2  ;;  %v1904_v37 = vrot.slane %v7746_v22, 2 }
 0x1e4   : > { %5938 = vmatmul.mubr.msk.f32.gmra.mrb[50].mxu0 %vm1922_vm5, %v8081_v42  ;;  %v1890_v42 = vrot.slane %v7549_v49, 2 }
 0x1e5   : > { %6091 = vmatmul.mubr.msk.f32.gmra.mrb[18].mxu1 %vm1922_vm5, %v8115_v21  ;;  %5940 = vmatprep.mubr.msk.f32.mxu0 %vm1922_vm5, %v8087_v39  ;;  %v1894_v39 = vrot.slane %v7690_v29, 2 }
 0x1e6   : > { %6093 = vmatprep.mubr.msk.f32.mxu1 %vm1922_vm5, %v8121_v57  ;;  %v8155_v14 = vsel %vm1828_vm6, %v1889_v2, %v1890_v42  ;;  %v8166_v11 = vsel %vm1828_vm6, %v1890_v42, %v1892_v15  ;;  %v1902_v15 = vrot.slane %v7717_v20, 2 }
 0x1e8   : > { %5941 = vmatmul.mubr.msk.f32.gmra.mrb[52].mxu0 %vm1922_vm5, %v8098_v25  ;;  %v1895_v25 = vrot.slane %v7649_v30, 2 }
 0x1e9   : > { %6094 = vmatmul.mubr.msk.f32.gmra.mrb[20].mxu1 %vm1922_vm5, %v8132_v62  ;;  %5943 = vmatprep.mubr.msk.f32.mxu0 %vm1922_vm5, %v8104_v63  ;;  %v1899_v63 = vrot.slane %v7713_v9, 2 }
 0x1ea   : > { %6096 = vmatprep.mubr.msk.f32.mxu1 %vm1922_vm5, %v8138_v52  ;;  %v8172_v2 = vsel %vm1828_vm6, %v1894_v39, %v1895_v25  ;;  %v8183_v42 = vsel %vm1828_vm6, %v1895_v25, %v1897_v61  ;;  %v1907_v25 = vrot.slane %v7752_v34, 2  ;;  %v1910_v61 = vrot.slane %v7773_v16, 2 }
 0x1ec   : > { %5944 = vmatmul.mubr.msk.f32.gmra.mrb[54].mxu0 %vm1922_vm5, %v8115_v21  ;;  %v1900_v21 = vrot.slane %v7699_v48, 2 }
 0x1ed   : > { %6097 = vmatmul.mubr.msk.f32.gmra.mrb[22].mxu1 %vm1922_vm5, %v8149_v33  ;;  %5946 = vmatprep.mubr.msk.f32.mxu0 %vm1922_vm5, %v8121_v57 }
 0x1ee   : > { %6099 = vmatprep.mubr.msk.f32.mxu1 %vm1922_vm5, %v8155_v14  ;;  %v8189_v39 = vsel %vm1828_vm6, %v1899_v63, %v1900_v21  ;;  %v8200_v20 = vsel %vm1828_vm6, %v1900_v21, %v1902_v15  ;;  %v1909_v63 = vrot.slane %v7768_v19, 2  ;;  %v1912_v21 = vrot.slane %v7923_v6, 2  ;;  %v8247_v6 = vld [vmem:[%s8915_s5 + $0x10] sm:$0x3] }
 0x1f0   : > { %5947 = vmatmul.mubr.msk.f32.gmra.mrb[56].mxu0 %vm1922_vm5, %v8132_v62  ;;  %v1905_v62 = vrot.slane %v7743_v28, 2  ;;  %v8223_v15 = vsel %vm1828_vm6, %v1909_v63, %v1910_v61 }
 0x1f1   : > { %6100 = vmatmul.mubr.msk.f32.gmra.mrb[24].mxu1 %vm1922_vm5, %v8166_v11  ;;  %5949 = vmatprep.mubr.msk.f32.mxu0 %vm1922_vm5, %v8138_v52 }
 0x1f2   : > { %6102 = vmatprep.mubr.msk.f32.mxu1 %vm1922_vm5, %v8172_v2  ;;  %v8217_v34 = vsel %vm1828_vm6, %v1905_v62, %v1907_v25 }
 0x1f4   : > { %5950 = vmatmul.mubr.msk.f32.gmra.mrb[58].mxu0 %vm1922_vm5, %v8149_v33  ;;  %v8208_v33 = vsel %vm1828_vm6, %v1904_v37, %v1905_v62  ;;  %v8232_v62 = vsel %vm1828_vm6, %v1910_v61, %v1912_v21 }
 0x1f5   : > { %6103 = vmatmul.mubr.msk.f32.gmra.mrb[26].mxu1 %vm1922_vm5, %v8183_v42  ;;  %5952 = vmatprep.mubr.msk.f32.mxu0 %vm1922_vm5, %v8155_v14 }
 0x1f6   : > { %6105 = vmatprep.mubr.msk.f32.mxu1 %vm1922_vm5, %v8189_v39 }
 0x1f8   : > { %5953 = vmatmul.mubr.msk.f32.gmra.mrb[60].mxu0 %vm1922_vm5, %v8166_v11 }
 0x1f9   : > { %6106 = vmatmul.mubr.msk.f32.gmra.mrb[28].mxu1 %vm1922_vm5, %v8200_v20  ;;  %5955 = vmatprep.mubr.msk.f32.mxu0 %vm1922_vm5, %v8172_v2 }
 0x1fa   : > { %6108 = vmatprep.mubr.msk.f32.mxu1 %vm1922_vm5, %v8208_v33 }
 0x1fc   : > { %5956 = vmatmul.mubr.msk.f32.gmra.mrb[62].mxu0 %vm1922_vm5, %v8183_v42 }
 0x1fd   : > { %6109 = vmatmul.mubr.msk.f32.gmra.mrb[30].mxu1 %vm1922_vm5, %v8217_v34  ;;  %5958 = vmatprep.mubr.msk.f32.mxu0 %vm1922_vm5, %v8189_v39 }
 0x1fe   : > { %6111 = vmatprep.mubr.msk.f32.mxu1 %vm1922_vm5, %v8223_v15 }
 0x200   : > { %5959 = vmatmul.mubr.msk.f32.gmra.mrb[64].mxu0 %vm1922_vm5, %v8200_v20 }
 0x201   : > { %6112 = vmatmul.mubr.msk.f32.gmra.mrb[0].mxu1 %vm1922_vm5, %v8232_v62  ;;  %5961 = vmatprep.mubr.msk.f32.mxu0 %vm1922_vm5, %v8208_v33 }
 0x202   : > { %6116 = vmatprep.mubr.msk.f32.mxu1 %vm1922_vm5, %v7315_v41 }
 0x204   : > { %5962 = vmatmul.mubr.msk.f32.gmra.mrb[66].mxu0 %vm1922_vm5, %v8217_v34 }
 0x205   : > { %6117 = vmatmul.mubr.msk.f32.vlgmr.msra.gmra.mrb[2].mxu1 %vm1922_vm5, %v7162_v5  ;;  %5966 = vmatprep.mubr.msk.f32.mxu0 %vm1922_vm5, %v9090_v44  ;;  %v9173_v44 = vld [vmem:[#allocation19_spill] sm:$0xff] }
 0x206   : > { %6165 = vmatpush3.msk.msra.mxu1 %vm1987_vm3, %v7977_v12  ;;  %6119 = vmatprep.mubr.msk.f32.mxu1 %vm1922_vm5, %v7331_v31  ;;  %v9155_v12 = vld [vmem:[#allocation3_spill] sm:$0xff] }
 0x207   : > { %6214 = vmatprep.subr.msk.mxu1 %vm1987_vm3, %v8247_v6 }
 0x208   : > { %5967 = vmatmul.mubr.msk.f32.vlgmr.msra.gmra.mrb[36].mxu0 %vm1922_vm5, %v9091_v56  ;;  %v9174_v56 = vld [vmem:[#allocation2_spill] sm:$0xff] }
 0x209   : > { %6120 = vmatmul.mubr.msk.f32.gmra.mrb[4].mxu1 %vm1922_vm5, %v7190_v13  ;;  %5969 = vmatprep.mubr.msk.f32.mxu0 %vm1922_vm5, %v7315_v41  ;;  %v9139_v41 = vld [vmem:[#allocation31_spill] sm:$0xff] }
 0x20a   : > { %6122 = vmatprep.mubr.msk.f32.mxu1 %vm1922_vm5, %v7357_v10 }
 0x20c   : > { %5970 = vmatmul.mubr.msk.f32.gmra.mrb[38].mxu0 %vm1922_vm5, %v7162_v5  ;;  %v9135_v5 = vld [vmem:[#allocation25_spill] sm:$0xff] }
 0x20d   : > { %6123 = vmatmul.mubr.msk.f32.gmra.mrb[6].mxu1 %vm1922_vm5, %v7208_v35  ;;  %5972 = vmatprep.mubr.msk.f32.mxu0 %vm1922_vm5, %v7331_v31  ;;  %v9140_v31 = vld [vmem:[#allocation33_spill] sm:$0xff] }
 0x20e   : > { %6125 = vmatprep.mubr.msk.f32.mxu1 %vm1922_vm5, %v7471_v3 }
 0x210   : > { %5973 = vmatmul.mubr.msk.f32.gmra.mrb[40].mxu0 %vm1922_vm5, %v7190_v13  ;;  %v9136_v13 = vld [vmem:[#allocation27_spill] sm:$0xff] }
 0x211   : > { %6126 = vmatmul.mubr.msk.f32.gmra.mrb[8].mxu1 %vm1922_vm5, %v7258_v60  ;;  %5975 = vmatprep.mubr.msk.f32.mxu0 %vm1922_vm5, %v7357_v10  ;;  %v9142_v10 = vld [vmem:[#allocation36_spill] sm:$0xff] }
 0x212   : > { %6128 = vmatprep.mubr.msk.f32.mxu1 %vm1922_vm5, %v9092_v4 }
 0x214   : > { %5976 = vmatmul.mubr.msk.f32.gmra.mrb[42].mxu0 %vm1922_vm5, %v7208_v35  ;;  %v9137_v35 = vld [vmem:[#allocation29_spill] sm:$0xff] }
 0x215   : > { %6129 = vmatmul.mubr.msk.f32.gmra.mrb[10].mxu1 %vm1922_vm5, %v9093_v17  ;;  %5978 = vmatprep.mubr.msk.f32.mxu0 %vm1922_vm5, %v7471_v3  ;;  %v9148_v3 = vld [vmem:[#allocation44_spill] sm:$0xff] }
 0x216   : > { %6131 = vmatprep.mubr.msk.f32.mxu1 %vm1922_vm5, %v7536_v58 }
 0x218   : > { %5979 = vmatmul.mubr.msk.f32.gmra.mrb[44].mxu0 %vm1922_vm5, %v7258_v60  ;;  %v9138_v60 = vld [vmem:[#allocation30_spill] sm:$0xff] }
 0x219   : > { %6132 = vmatmul.mubr.msk.f32.gmra.mrb[12].mxu1 %vm1922_vm5, %v7351_v46  ;;  %5981 = vmatprep.mubr.msk.f32.mxu0 %vm1922_vm5, %v9092_v4  ;;  %v9175_v4 = vld [vmem:[#allocation9_spill] sm:$0xff] }
 0x21a   : > { %6134 = vmatprep.mubr.msk.f32.mxu1 %vm1922_vm5, %v9094_v47 }
 0x21c   : > { %5982 = vmatmul.mubr.msk.f32.gmra.mrb[46].mxu0 %vm1922_vm5, %v9093_v17 }
 0x21d   : > { %6135 = vmatmul.mubr.msk.f32.gmra.mrb[14].mxu1 %vm1922_vm5, %v9095_v59  ;;  %5984 = vmatprep.mubr.msk.f32.mxu0 %vm1922_vm5, %v7536_v58  ;;  %v9151_v58 = vld [vmem:[#allocation47_spill] sm:$0xff] }
 0x21e   : > { %6137 = vmatprep.mubr.msk.f32.mxu1 %vm1922_vm5, %v9096_v51 }
 0x220   : > { %5985 = vmatmul.mubr.msk.f32.gmra.mrb[48].mxu0 %vm1922_vm5, %v7351_v46  ;;  %v9141_v46 = vld [vmem:[#allocation35_spill] sm:$0xff] }
 0x221   : > { %6138 = vmatmul.mubr.msk.f32.gmra.mrb[16].mxu1 %vm1922_vm5, %v9097_v26  ;;  %5987 = vmatprep.mubr.msk.f32.mxu0 %vm1922_vm5, %v9094_v47 }
 0x222   : > { %6140 = vmatprep.mubr.msk.f32.mxu1 %vm1922_vm5, %v7606_v8 }
 0x224   : > { %5988 = vmatmul.mubr.msk.f32.gmra.mrb[50].mxu0 %vm1922_vm5, %v9095_v59 }
 0x225   : > { %6141 = vmatmul.mubr.msk.f32.gmra.mrb[18].mxu1 %vm1922_vm5, %v9098_v18  ;;  %5990 = vmatprep.mubr.msk.f32.mxu0 %vm1922_vm5, %v9096_v51  ;;  %v9168_v51 = vld [vmem:[#allocation4_spill] sm:$0xff] }
 0x226   : > { %6143 = vmatprep.mubr.msk.f32.mxu1 %vm1922_vm5, %v7638_v50 }
 0x228   : > { %5991 = vmatmul.mubr.msk.f32.gmra.mrb[52].mxu0 %vm1922_vm5, %v9097_v26  ;;  %v9159_v26 = vld [vmem:[#allocation21_spill] sm:$0xff] }
 0x229   : > { %6144 = vmatmul.mubr.msk.f32.gmra.mrb[20].mxu1 %vm1922_vm5, %v9099_v38  ;;  %5993 = vmatprep.mubr.msk.f32.mxu0 %vm1922_vm5, %v7606_v8  ;;  %v9156_v8 = vld [vmem:[#allocation5_spill] sm:$0xff] }
 0x22a   : > { %6146 = vmatprep.mubr.msk.f32.mxu1 %vm1922_vm5, %v7668_v7 }
 0x22c   : > { %5994 = vmatmul.mubr.msk.f32.gmra.mrb[54].mxu0 %vm1922_vm5, %v9098_v18  ;;  %v9161_v18 = vld [vmem:[#allocation24_spill] sm:$0xff] }
 0x22d   : > { %6147 = vmatmul.mubr.msk.f32.gmra.mrb[22].mxu1 %vm1922_vm5, %v7549_v49  ;;  %5996 = vmatprep.mubr.msk.f32.mxu0 %vm1922_vm5, %v7638_v50  ;;  %v9157_v50 = vld [vmem:[#allocation6_spill] sm:$0xff] }
 0x22e   : > { %6149 = vmatprep.mubr.msk.f32.mxu1 %vm1922_vm5, %v7690_v29 }
 0x230   : > { %5997 = vmatmul.mubr.msk.f32.gmra.mrb[56].mxu0 %vm1922_vm5, %v9099_v38  ;;  %v9164_v38 = vld [vmem:[#allocation17_spill] sm:$0xff] }
 0x231   : > { %6150 = vmatmul.mubr.msk.f32.gmra.mrb[24].mxu1 %vm1922_vm5, %v7649_v30  ;;  %5999 = vmatprep.mubr.msk.f32.mxu0 %vm1922_vm5, %v7668_v7  ;;  %v9160_v7 = vld [vmem:[#allocation11_spill] sm:$0xff] }
 0x232   : > { %6152 = vmatprep.mubr.msk.f32.mxu1 %vm1922_vm5, %v7713_v9 }
 0x234   : > { %6000 = vmatmul.mubr.msk.f32.gmra.mrb[58].mxu0 %vm1922_vm5, %v7549_v49  ;;  %v9152_v49 = vld [vmem:[#allocation48_spill] sm:$0xff] }
 0x235   : > { %6153 = vmatmul.mubr.msk.f32.gmra.mrb[26].mxu1 %vm1922_vm5, %v7699_v48  ;;  %6002 = vmatprep.mubr.msk.f32.mxu0 %vm1922_vm5, %v7690_v29  ;;  %v9162_v29 = vld [vmem:[#allocation16_spill] sm:$0xff] }
 0x236   : > { %6155 = vmatprep.mubr.msk.f32.mxu1 %vm1922_vm5, %v7746_v22 }
 0x238   : > { %6003 = vmatmul.mubr.msk.f32.gmra.mrb[60].mxu0 %vm1922_vm5, %v7649_v30  ;;  %v9158_v30 = vld [vmem:[#allocation7_spill] sm:$0xff] }
 0x239   : > { %6156 = vmatmul.mubr.msk.f32.gmra.mrb[28].mxu1 %vm1922_vm5, %v7743_v28  ;;  %6005 = vmatprep.mubr.msk.f32.mxu0 %vm1922_vm5, %v7713_v9  ;;  %v9165_v9 = vld [vmem:[#allocation18_spill] sm:$0xff] }
 0x23a   : > { %6158 = vmatprep.mubr.msk.f32.mxu1 %vm1922_vm5, %v7768_v19  ;;  %v9169_v19 = vld [vmem:[#allocation10_spill] sm:$0xff] }
 0x23c   : > { %6006 = vmatmul.mubr.msk.f32.gmra.mrb[62].mxu0 %vm1922_vm5, %v7699_v48  ;;  %v9163_v48 = vld [vmem:[#allocation26_spill] sm:$0xff] }
 0x23d   : > { %6159 = vmatmul.mubr.msk.f32.gmra.mrb[30].mxu1 %vm1922_vm5, %v7773_v16  ;;  %6008 = vmatprep.mubr.msk.f32.mxu0 %vm1922_vm5, %v7746_v22  ;;  %v9167_v22 = vld [vmem:[#allocation8_spill] sm:$0xff] }
 0x23e   : > { %6161 = vmatprep.mubr.msk.f32.mxu1 %vm1922_vm5, %v9088_v0  ;;  %v9170_v16 = vld [vmem:[#allocation12_spill] sm:$0xff]  ;;  %v9171_v0 = vld [vmem:[#allocation14_spill] sm:$0xff] }
 0x240   : > { %6009 = vmatmul.mubr.msk.f32.gmra.mrb[64].mxu0 %vm1922_vm5, %v7743_v28  ;;  %v9166_v28 = vld [vmem:[#allocation20_spill] sm:$0xff] }
 0x241   : > { %6162 = vmatmul.mubr.msk.f32.gmra.mrb[0].mxu1 %vm1922_vm5, %v9089_v23  ;;  %v9172_v23 = vld [vmem:[#allocation15_spill] sm:$0xff] }
 0x242   : > { %6166 = vmatprep.mubr.msk.f32.mxu1 %vm1922_vm5, %v7384_v43  ;;  %v9144_v43 = vld [vmem:[#allocation39_spill] sm:$0xff] }
 0x245   : > { %6167 = vmatmul.mubr.msk.f32.vlgmr.msra.gmra.mrb[2].mxu1 %vm1922_vm5, %v7415_v54  ;;  %v9145_v54 = vld [vmem:[#allocation41_spill] sm:$0xff] }
 0x246   : > { %6215 = vmatpush3.msk.msra.mxu1 %vm1987_vm3, %v8247_v6  ;;  %6169 = vmatprep.mubr.msk.f32.mxu1 %vm1922_vm5, %v7446_v53  ;;  %v9146_v53 = vld [vmem:[#allocation42_spill] sm:$0xff] }
 0x249   : > { %6170 = vmatmul.mubr.msk.f32.gmra.mrb[4].mxu1 %vm1922_vm5, %v7462_v24  ;;  %v9147_v24 = vld [vmem:[#allocation43_spill] sm:$0xff] }
 0x24a   : > { %6172 = vmatprep.mubr.msk.f32.mxu1 %vm1922_vm5, %v7512_v27  ;;  %v9149_v27 = vld [vmem:[#allocation45_spill] sm:$0xff] }
 0x24d   : > { %6173 = vmatmul.mubr.msk.f32.gmra.mrb[6].mxu1 %vm1922_vm5, %v7518_v1  ;;  %v9150_v1 = vld [vmem:[#allocation46_spill] sm:$0xff] }
 0x24e   : > { %6175 = vmatprep.mubr.msk.f32.mxu1 %vm1922_vm5, %v7552_v45  ;;  %v9153_v45 = vld [vmem:[#allocation49_spill] sm:$0xff] }
 0x251   : > { %6176 = vmatmul.mubr.msk.f32.gmra.mrb[8].mxu1 %vm1922_vm5, %v7567_v55  ;;  %v9154_v55 = vld [vmem:[#allocation13_spill] sm:$0xff] }
 0x252   : > { %6178 = vmatprep.mubr.msk.f32.mxu1 %vm1922_vm5, %v7570_v32  ;;  %v9143_v32 = vld [vmem:[#allocation38_spill] sm:$0xff] }
 0x255   : > { %6179 = vmatmul.mubr.msk.f32.gmra.mrb[10].mxu1 %vm1922_vm5, %v9135_v5 }
 0x256   : > { %6181 = vmatprep.mubr.msk.f32.mxu1 %vm1922_vm5, %v9136_v13 }
 0x259   : > { %6182 = vmatmul.mubr.msk.f32.gmra.mrb[12].mxu1 %vm1922_vm5, %v9137_v35 }
 0x25a   : > { %6184 = vmatprep.mubr.msk.f32.mxu1 %vm1922_vm5, %v9138_v60 }
 0x25d   : > { %6185 = vmatmul.mubr.msk.f32.gmra.mrb[14].mxu1 %vm1922_vm5, %v9139_v41 }
 0x25e   : > { %6187 = vmatprep.mubr.msk.f32.mxu1 %vm1922_vm5, %v9140_v31 }
 0x261   : > { %6188 = vmatmul.mubr.msk.f32.gmra.mrb[16].mxu1 %vm1922_vm5, %v9141_v46 }
 0x262   : > { %6190 = vmatprep.mubr.msk.f32.mxu1 %vm1922_vm5, %v9142_v10 }
 0x265   : > { %6191 = vmatmul.mubr.msk.f32.gmra.mrb[18].mxu1 %vm1922_vm5, %v9143_v32 }
 0x266   : > { %6193 = vmatprep.mubr.msk.f32.mxu1 %vm1922_vm5, %v9144_v43 }
 0x269   : > { %6194 = vmatmul.mubr.msk.f32.gmra.mrb[20].mxu1 %vm1922_vm5, %v9145_v54  ;;  %v8556_v54 = vld [vmem:[%s8916_s6] ss:$0 sm:$0xff] }
 0x26a   : > { %6196 = vmatprep.mubr.msk.f32.mxu1 %vm1922_vm5, %v9146_v53 }
 0x26d   : > { %6197 = vmatmul.mubr.msk.f32.gmra.mrb[22].mxu1 %vm1922_vm5, %v9147_v24 }
 0x26e   : > { %6199 = vmatprep.mubr.msk.f32.mxu1 %vm1922_vm5, %v9148_v3 }
 0x271   : > { %6200 = vmatmul.mubr.msk.f32.gmra.mrb[24].mxu1 %vm1922_vm5, %v9149_v27 }
 0x272   : > { %6202 = vmatprep.mubr.msk.f32.mxu1 %vm1922_vm5, %v9150_v1 }
 0x275   : > { %6203 = vmatmul.mubr.msk.f32.gmra.mrb[26].mxu1 %vm1922_vm5, %v9151_v58 }
 0x276   : > { %6205 = vmatprep.mubr.msk.f32.mxu1 %vm1922_vm5, %v9152_v49 }
 0x279   : > { %6206 = vmatmul.mubr.msk.f32.gmra.mrb[28].mxu1 %vm1922_vm5, %v9153_v45 }
 0x27a   : > { %6208 = vmatprep.mubr.msk.f32.mxu1 %vm1922_vm5, %v9154_v55 }
 0x27d   : > { %6209 = vmatmul.mubr.msk.f32.gmra.mrb[30].mxu1 %vm1922_vm5, %v9155_v12 }
 0x27e   : > { %6211 = vmatprep.mubr.msk.f32.mxu1 %vm1922_vm5, %v9156_v8 }
 0x281   : > { %6212 = vmatmul.mubr.msk.f32.gmra.mrb[0].mxu1 %vm1922_vm5, %v9157_v50 }
 0x282   : > { %6216 = vmatprep.mubr.msk.f32.mxu1 %vm1922_vm5, %v7984_v40 }
 0x285   : > { %6217 = vmatmul.mubr.msk.f32.vlgmr.msra.gmra.mrb[2].mxu1 %vm1922_vm5, %v7994_v36 }
 0x286   : > { %6219 = vmatprep.mubr.msk.f32.mxu1 %vm1922_vm5, %v9158_v30 }
 0x289   : > { %6220 = vmatmul.mubr.msk.f32.gmra.mrb[4].mxu1 %vm1922_vm5, %v9159_v26 }
 0x28a   : > { %6222 = vmatprep.mubr.msk.f32.mxu1 %vm1922_vm5, %v9160_v7 }
 0x28d   : > { %6223 = vmatmul.mubr.msk.f32.gmra.mrb[6].mxu1 %vm1922_vm5, %v9161_v18 }
 0x28e   : > { %6225 = vmatprep.mubr.msk.f32.mxu1 %vm1922_vm5, %v9162_v29 }
 0x291   : > { %6226 = vmatmul.mubr.msk.f32.gmra.mrb[8].mxu1 %vm1922_vm5, %v9163_v48 }
 0x292   : > { %6228 = vmatprep.mubr.msk.f32.mxu1 %vm1922_vm5, %v9164_v38 }
 0x295   : > { %6229 = vmatmul.mubr.msk.f32.gmra.mrb[10].mxu1 %vm1922_vm5, %v9165_v9 }
 0x296   : > { %6231 = vmatprep.mubr.msk.f32.mxu1 %vm1922_vm5, %v9166_v28 }
 0x299   : > { %6232 = vmatmul.mubr.msk.f32.gmra.mrb[12].mxu1 %vm1922_vm5, %v9167_v22 }
 0x29a   : > { %6234 = vmatprep.mubr.msk.f32.mxu1 %vm1922_vm5, %v9168_v51 }
 0x29d   : > { %6235 = vmatmul.mubr.msk.f32.gmra.mrb[14].mxu1 %vm1922_vm5, %v9169_v19 }
 0x29e   : > { %6237 = vmatprep.mubr.msk.f32.mxu1 %vm1922_vm5, %v9170_v16 }
 0x2a1   : > { %6238 = vmatmul.mubr.msk.f32.gmra.mrb[16].mxu1 %vm1922_vm5, %v9171_v0 }
 0x2a2   : > { %6240 = vmatprep.mubr.msk.f32.mxu1 %vm1922_vm5, %v8121_v57 }
 0x2a5   : > { %6241 = vmatmul.mubr.msk.f32.gmra.mrb[18].mxu1 %vm1922_vm5, %v9172_v23 }
 0x2a6   : > { %6243 = vmatprep.mubr.msk.f32.mxu1 %vm1922_vm5, %v8138_v52 }
 0x2a9   : > { %6244 = vmatmul.mubr.msk.f32.gmra.mrb[20].mxu1 %vm1922_vm5, %v9173_v44 }
 0x2aa   : > { %6246 = vmatprep.mubr.msk.f32.mxu1 %vm1922_vm5, %v8155_v14 }
 0x2ad   : > { %6247 = vmatmul.mubr.msk.f32.gmra.mrb[22].mxu1 %vm1922_vm5, %v8166_v11 }
 0x2ae   : > { %6249 = vmatprep.mubr.msk.f32.mxu1 %vm1922_vm5, %v8172_v2 }
 0x2b1   : > { %6250 = vmatmul.mubr.msk.f32.gmra.mrb[24].mxu1 %vm1922_vm5, %v8183_v42 }
 0x2b2   : > { %6252 = vmatprep.mubr.msk.f32.mxu1 %vm1922_vm5, %v8189_v39 }
 0x2b5   : > { %6253 = vmatmul.mubr.msk.f32.gmra.mrb[26].mxu1 %vm1922_vm5, %v8200_v20 }
 0x2b6   : > { %6255 = vmatprep.mubr.msk.f32.mxu1 %vm1922_vm5, %v8208_v33 }
 0x2b9   : > { %6256 = vmatmul.mubr.msk.f32.gmra.mrb[28].mxu1 %vm1922_vm5, %v8217_v34 }
 0x2ba   : > { %6258 = vmatprep.mubr.msk.f32.mxu1 %vm1922_vm5, %v8223_v15 }
 0x2bd   : > { %6259 = vmatmul.mubr.msk.f32.gmra.mrb[30].mxu1 %vm1922_vm5, %v8232_v62 }
 0x2be   : > { %6261 = vmatprep.mubr.msk.f32.mxu1 %vm1922_vm5, %v9174_v56 }
 0x2c1   : > { %6262 = vmatmul.mubr.msk.f32.gmra.mrb[0].mxu1 %vm1922_vm5, %v9175_v4 }
 0x2d7   : > { %v8505_v17 = vpop.f32.mrb[66].mxu0 }
 0x2d8   : > { %v8507_v47 = vpop.f32.mrb[67].mxu0 }
 0x2db   : > { %v5968_v59 = vpop.f32.mrb[36].mxu0 }
 0x2dc   : > { %v2909_v40 = vpop.f32.mrb[37].mxu0 }
 0x2df   : > { %v5971_v36 = vpop.f32.mrb[38].mxu0 }
 0x2e0   : > { %v2919_v57 = vpop.f32.mrb[39].mxu0 }
 0x2e3   : > { %v5974_v52 = vpop.f32.mrb[40].mxu0 }
 0x2e4   : > { %v2929_v33 = vpop.f32.mrb[41].mxu0 }
 0x2e7   : > { %v5977_v14 = vpop.f32.mrb[42].mxu0 }
 0x2e8   : > { %v2939_v11 = vpop.f32.mrb[43].mxu0 }
 0x2eb   : > { %v8509_v2 = vpop.f32.mrb[44].mxu0 }
 0x2ec   : > { %v8511_v42 = vpop.f32.mrb[45].mxu0 }
 0x2ef   : > { %v8513_v39 = vpop.f32.mrb[46].mxu0 }
 0x2f0   : > { %v8515_v37 = vpop.f32.mrb[47].mxu0 }
 0x2f3   : > { %v8517_v20 = vpop.f32.mrb[48].mxu0 }
 0x2f4   : > { %v8519_v25 = vpop.f32.mrb[49].mxu0 }
 0x2f7   : > { %v8521_v63 = vpop.f32.mrb[50].mxu0 }
 0x2f8   : > { %v8523_v61 = vpop.f32.mrb[51].mxu0 }
 0x2fb   : > { %v8525_v34 = vpop.f32.mrb[52].mxu0 }
 0x2fc   : > { %v8527_v21 = vpop.f32.mrb[53].mxu0 }
 0x2ff   : > { %v8529_v15 = vpop.f32.mrb[54].mxu0 }
 0x300   : > { %v8531_v62 = vpop.f32.mrb[55].mxu0 }
 0x303   : > { %v8533_v6 = vpop.f32.mrb[56].mxu0 }
 0x304   : > { %v8535_v5 = vpop.f32.mrb[57].mxu0 }
 0x307   : > { %v8537_v13 = vpop.f32.mrb[58].mxu0 }
 0x308   : > { %v8539_v35 = vpop.f32.mrb[59].mxu0 }
 0x30b   : > { %v8541_v60 = vpop.f32.mrb[60].mxu0 }
 0x30c   : > { %v8543_v41 = vpop.f32.mrb[61].mxu0 }
 0x30f   : > { %v8545_v31 = vpop.f32.mrb[62].mxu0 }
 0x310   : > { %v8547_v46 = vpop.f32.mrb[63].mxu0 }
 0x313   : > { %v8549_v10 = vpop.f32.mrb[64].mxu0 }
 0x314   : > { %v8551_v32 = vpop.f32.mrb[65].mxu0 }
 0x358   : > { %v6218_v43 = vpop.f32.mrb[2].mxu1 }
 0x359   : > { %v6266_v53 = vadd.f32 %v6218_v43, %v5968_v59  ;;  %v4239_v24 = vpop.f32.mrb[3].mxu1 }
 0x35a   : > { %v6267_v3 = vadd.f32 %v4239_v24, %v2909_v40 }
 0x35b   : > { %v8559_v27 = vadd.f32 %v6266_v53, %v8556_v54 }
 0x35c   : > { %v8562_v1 = vadd.f32 %v6267_v3, %v8556_v54  ;;  %v6221_v58 = vpop.f32.mrb[4].mxu1 }
 0x35d   : > { %v4470_v49 = vmin.f32 %v8559_v27, 20.0  ;;  %v6268_v45 = vadd.f32 %v6221_v58, %v5971_v36  ;;  %v4249_v55 = vpop.f32.mrb[5].mxu1 }
 0x35e   : > { %v4469_v12 = vmin.f32 %v8562_v1, 20.0  ;;  %v6269_v8 = vadd.f32 %v4249_v55, %v2919_v57 }
 0x35f   : > { %v4503_v50 = vmul.f32 1.442695, %v4470_v49  ;;  %v8567_v30 = vadd.f32 %v6268_v45, %v8556_v54 }
 0x360   : > { %v4501_v26 = vmul.f32 1.442695, %v4469_v12  ;;  %v8570_v7 = vadd.f32 %v6269_v8, %v8556_v54  ;;  %v6224_v18 = vpop.f32.mrb[6].mxu1 }
 0x361   : > { %6675 = vpow2.f32 %v4503_v50  ;;  %v4472_v29 = vmin.f32 %v8567_v30, 20.0  ;;  %v6270_v48 = vadd.f32 %v6224_v18, %v5974_v52  ;;  %v4259_v38 = vpop.f32.mrb[7].mxu1 }
 0x362   : > { %6677 = vpow2.f32 %v4501_v26  ;;  %v4471_v9 = vmin.f32 %v8570_v7, 20.0  ;;  %v6271_v28 = vadd.f32 %v4259_v38, %v2929_v33 }
 0x363   : > { %v4507_v22 = vmul.f32 1.442695, %v4472_v29  ;;  %v8575_v51 = vadd.f32 %v6270_v48, %v8556_v54 }
 0x364   : > { %v4505_v19 = vmul.f32 1.442695, %v4471_v9  ;;  %v8578_v16 = vadd.f32 %v6271_v28, %v8556_v54  ;;  %v6227_v0 = vpop.f32.mrb[8].mxu1 }
 0x365   : > { %6679 = vpow2.f32 %v4507_v22  ;;  %v4474_v23 = vmin.f32 %v8575_v51, 20.0  ;;  %v6272_v44 = vadd.f32 %v6227_v0, %v5977_v14  ;;  %v4269_v56 = vpop.f32.mrb[9].mxu1 }
 0x366   : > { %6681 = vpow2.f32 %v4505_v19  ;;  %v4473_v4 = vmin.f32 %v8578_v16, 20.0  ;;  %v6273_v59 = vadd.f32 %v4269_v56, %v2939_v11 }
 0x367   : > { %v4511_v40 = vmul.f32 1.442695, %v4474_v23  ;;  %v8583_v36 = vadd.f32 %v6272_v44, %v8556_v54 }
 0x368   : > { %v4509_v57 = vmul.f32 1.442695, %v4473_v4  ;;  %v8586_v52 = vadd.f32 %v6273_v59, %v8556_v54  ;;  %v6230_v33 = vpop.f32.mrb[10].mxu1 }
 0x369   : > { %6683 = vpow2.f32 %v4511_v40  ;;  %v4476_v43 = vmin.f32 %v8583_v36, 20.0  ;;  %v6274_v53 = vadd.f32 %v6230_v33, %v8509_v2  ;;  %v4279_v14 = vpop.f32.mrb[11].mxu1 }
 0x36a   : > { %6685 = vpow2.f32 %v4509_v57  ;;  %v4475_v24 = vmin.f32 %v8586_v52, 20.0  ;;  %v6275_v11 = vadd.f32 %v4279_v14, %v8511_v42 }
 0x36b   : > { %v6676_v3 = vpop.eup %6675  ;;  %v4515_v58 = vmul.f32 1.442695, %v4476_v43  ;;  %v8593_v49 = vadd.f32 %v6274_v53, %v8556_v54 }
 0x36c   : > { %v6678_v45 = vpop.eup %6677  ;;  %v4566_v55 = vadd.f32 1.0, %v6676_v3  ;;  %v4513_v12 = vmul.f32 1.442695, %v4475_v24  ;;  %v8596_v8 = vadd.f32 %v6275_v11, %v8556_v54  ;;  %v6233_v50 = vpop.f32.mrb[12].mxu1 }
 0x36d   : > { %v4565_v26 = vadd.f32 1.0, %v6678_v45  ;;  %6687 = vpow2.f32 %v4515_v58  ;;  %v4478_v2 = vmin.f32 %v8593_v49, 20.0  ;;  %v6276_v18 = vadd.f32 %v6233_v50, %v8513_v39  ;;  %v4289_v29 = vpop.f32.mrb[13].mxu1 }
 0x36e   : > { %v4598_v42 = vmul.f32 %v4566_v55, %v4566_v55  ;;  %6689 = vpow2.f32 %v4513_v12  ;;  %v4477_v48 = vmin.f32 %v8596_v8, 20.0  ;;  %v6277_v38 = vadd.f32 %v4289_v29, %v8515_v37 }
 0x36f   : > { %v6680_v9 = vpop.eup %6679  ;;  %v4597_v28 = vmul.f32 %v4565_v26, %v4565_v26  ;;  %v4519_v22 = vmul.f32 1.442695, %v4478_v2  ;;  %v8603_v19 = vadd.f32 %v6276_v18, %v8556_v54 }
 0x370   : > { %v6682_v0 = vpop.eup %6681  ;;  %v5385_v23 = vadd.f32 -1.0, %v4598_v42  ;;  %v4694_v44 = vadd.f32 1.0, %v4598_v42  ;;  %v4568_v56 = vadd.f32 1.0, %v6680_v9  ;;  %v4517_v4 = vmul.f32 1.442695, %v4477_v48  ;;  %v6236_v59 = vpop.f32.mrb[14].mxu1 }
 0x371   : > { %v5384_v39 = vadd.f32 -1.0, %v4597_v28  ;;  %v4693_v40 = vadd.f32 1.0, %v4597_v28  ;;  %v4567_v57 = vadd.f32 1.0, %v6682_v0  ;;  %6691 = vpow2.f32 %v4519_v22  ;;  %v4299_v33 = vpop.f32.mrb[15].mxu1 }
 0x372   : > { %6693 = vrcp.f32 %v4694_v44  ;;  %v4600_v43 = vmul.f32 %v4568_v56, %v4568_v56  ;;  %v4480_v37 = vmin.f32 %v8603_v19, 20.0  ;;  %v4662_v14 = vmul.f32 %v5385_v23, %v8559_v27 }
 0x373   : > { %v6684_v53 = vpop.eup %6683  ;;  %6695 = vrcp.f32 %v4693_v40  ;;  %v4599_v24 = vmul.f32 %v4567_v57, %v4567_v57  ;;  %v8608_v11 = vadd.f32 %v6277_v38, %v8556_v54  ;;  %v4661_v50 = vmul.f32 %v5384_v39, %v8562_v1 }
 0x374   : > { %v6686_v3 = vpop.eup %6685  ;;  %v5387_v58 = vadd.f32 -1.0, %v4600_v43  ;;  %v4696_v45 = vadd.f32 1.0, %v4600_v43  ;;  %v4570_v55 = vadd.f32 1.0, %v6684_v53  ;;  %6697 = vpow2.f32 %v4517_v4  ;;  %v8610_v12 = vpop.f32.mrb[16].mxu1 }
 0x375   : > { %v4695_v26 = vadd.f32 1.0, %v4599_v24  ;;  %v4569_v2 = vadd.f32 1.0, %v6686_v3  ;;  %v4523_v18 = vmul.f32 1.442695, %v4480_v37  ;;  %v8613_v29 = vpop.f32.mrb[17].mxu1  ;;  %v5386_v27 = vadd.f32 -1.0, %v4599_v24 }
 0x376   : > { %6699 = vrcp.f32 %v4696_v45  ;;  %v4602_v42 = vmul.f32 %v4570_v55, %v4570_v55  ;;  %v4479_v48 = vmin.f32 %v8608_v11, 20.0  ;;  %v4664_v9 = vmul.f32 %v5387_v58, %v8567_v30 }
 0x377   : > { %v6688_v38 = vpop.eup %6687  ;;  %6701 = vrcp.f32 %v4695_v26  ;;  %v4601_v28 = vmul.f32 %v4569_v2, %v4569_v2  ;;  %v6278_v22 = vadd.f32 %v6236_v59, %v8517_v20  ;;  %v4663_v37 = vmul.f32 %v5386_v27, %v8570_v7 }
 0x378   : > { %v6690_v0 = vpop.eup %6689  ;;  %v5389_v23 = vadd.f32 -1.0, %v4602_v42  ;;  %v4698_v1 = vadd.f32 1.0, %v4602_v42  ;;  %v4572_v44 = vadd.f32 1.0, %v6688_v38  ;;  %6703 = vpow2.f32 %v4523_v18  ;;  %v8618_v56 = vpop.f32.mrb[18].mxu1 }
 0x379   : > { %v5388_v4 = vadd.f32 -1.0, %v4601_v28  ;;  %v4697_v39 = vadd.f32 1.0, %v4601_v28  ;;  %v4571_v40 = vadd.f32 1.0, %v6690_v0  ;;  %v4521_v57 = vmul.f32 1.442695, %v4479_v48  ;;  %v8620_v43 = vpop.f32.mrb[19].mxu1 }
 0x37a   : > { %6705 = vrcp.f32 %v4698_v1  ;;  %v4604_v30 = vmul.f32 %v4572_v44, %v4572_v44  ;;  %v8624_v53 = vadd.f32 %v6278_v22, %v8556_v54  ;;  %v4666_v59 = vmul.f32 %v5389_v23, %v8575_v51  ;;  %v6806_v1 = vld [vmem:[%s6929_s10] sm:$0xff] }
 0x37b   : > { %v6692_v20 = vpop.eup %6691  ;;  %6707 = vrcp.f32 %v4697_v39  ;;  %v4603_v24 = vmul.f32 %v4571_v40, %v4571_v40  ;;  %v6279_v3 = vadd.f32 %v4299_v33, %v8519_v25  ;;  %v4665_v27 = vmul.f32 %v5388_v4, %v8578_v16 }
 0x37c   : > { %v6694_v58 = vpop.eup %6693  ;;  %v5391_v45 = vadd.f32 -1.0, %v4604_v30  ;;  %v4700_v55 = vadd.f32 1.0, %v4604_v30  ;;  %v4574_v26 = vadd.f32 1.0, %v6692_v20  ;;  %6709 = vpow2.f32 %v4521_v57  ;;  %v8628_v7 = vpop.f32.mrb[20].mxu1 }
 0x37d   : > { %v6696_v2 = vpop.eup %6695  ;;  %v4758_v18 = vmul.f32 %v6694_v58, %v4662_v14  ;;  %v4699_v42 = vadd.f32 1.0, %v4603_v24  ;;  %v4482_v51 = vmin.f32 %v8624_v53, 20.0  ;;  %v8632_v48 = vpop.f32.mrb[21].mxu1  ;;  %v5390_v33 = vadd.f32 -1.0, %v4603_v24  ;;  %v6805_v14 = vld [vmem:[%s6929_s10 + $0x8] sm:$0xff] }
 0x37e   : > { %v6698_v38 = vpop.eup %6697  ;;  %v4757_v25 = vmul.f32 %v6696_v2, %v4661_v50  ;;  %6711 = vrcp.f32 %v4700_v55  ;;  %v4606_v28 = vmul.f32 %v4574_v26, %v4574_v26  ;;  %v4668_v16 = vmul.f32 %v5391_v45, %v8583_v36  ;;  %v6807_v2 = vld [vmem:[%s6929_s10 + $0x18] sm:$0xff] }
 0x37f   : > { %v4790_v22 = vadd.f32 %v6805_v14, %v4758_v18  ;;  %6713 = vrcp.f32 %v4699_v42  ;;  %v4573_v0 = vadd.f32 1.0, %v6698_v38  ;;  %v4527_v40 = vmul.f32 1.442695, %v4482_v51 }
 0x380   : > { %v6700_v23 = vpop.eup %6699  ;;  %v4789_v44 = vadd.f32 %v6806_v1, %v4757_v25  ;;  %v5393_v4 = vadd.f32 -1.0, %v4606_v28  ;;  %v4702_v39 = vadd.f32 1.0, %v4606_v28  ;;  %v8643_v57 = vpop.f32.mrb[22].mxu1  ;;  %v8648_v36 = vadd.f32 %v6279_v3, %v8556_v54 }
 0x381   : > { %v6702_v50 = vpop.eup %6701  ;;  %4822 = vst.msk [vmem:[%s8638_s9 + $0x8] sm:$0xff] %vm491_vm1, %v4790_v22  ;;  %v4760_v30 = vmul.f32 %v6700_v23, %v4664_v9  ;;  %v4605_v20 = vmul.f32 %v4573_v0, %v4573_v0  ;;  %v6280_v24 = vadd.f32 %v8610_v12, %v8521_v63  ;;  %v8652_v58 = vpop.f32.mrb[23].mxu1  ;;  %v4667_v26 = vmul.f32 %v5390_v33, %v8586_v52  ;;  %v6808_v12 = vld [vmem:[%s6929_s10 + $0x10] sm:$0xff] }
 0x382   : > { %v6704_v45 = vpop.eup %6703  ;;  %4821 = vst.msk [vmem:[%s8638_s9] sm:$0xff] %vm491_vm1, %v4789_v44  ;;  %v4759_v55 = vmul.f32 %v6702_v50, %v4663_v37  ;;  %6715 = vrcp.f32 %v4702_v39  ;;  %v6281_v9 = vadd.f32 %v8613_v29, %v8523_v61  ;;  %v4670_v3 = vmul.f32 %v5393_v4, %v8593_v49  ;;  %v6809_v44 = vld [vmem:[%s6929_s10 + $0x28] sm:$0xff] }
 0x383   : > { %v4792_v18 = vadd.f32 %v6807_v2, %v4760_v30  ;;  %v4701_v42 = vadd.f32 1.0, %v4605_v20  ;;  %v4576_v51 = vadd.f32 1.0, %v6704_v45  ;;  %6717 = vpow2.f32 %v4527_v40  ;;  %v6810_v30 = vld [vmem:[%s6929_s10 + $0x20] sm:$0xff] }
 0x384   : > { %v6706_v63 = vpop.eup %6705  ;;  %v4791_v38 = vadd.f32 %v6808_v12, %v4759_v55  ;;  %v4481_v37 = vmin.f32 %v8648_v36, 20.0  ;;  %v8664_v52 = vadd.f32 %v6280_v24, %v8556_v54  ;;  %v8666_v25 = vpop.f32.mrb[24].mxu1  ;;  %v5392_v49 = vadd.f32 -1.0, %v4605_v20 }
 0x385   : > { %v6708_v61 = vpop.eup %6707  ;;  %4824 = vst.msk [vmem:[%s8638_s9 + $0x18] sm:$0xff] %vm491_vm1, %v4792_v18  ;;  %v4762_v29 = vmul.f32 %v6706_v63, %v4666_v59  ;;  %6719 = vrcp.f32 %v4701_v42  ;;  %v4608_v33 = vmul.f32 %v4576_v51, %v4576_v51  ;;  %v8670_v28 = vpop.f32.mrb[25].mxu1  ;;  %v8676_v1 = vadd.f32 %v6281_v9, %v8556_v54 }
 0x386   : > { %v6710_v14 = vpop.eup %6709  ;;  %4823 = vst.msk [vmem:[%s8638_s9 + $0x10] sm:$0xff] %vm491_vm1, %v4791_v38  ;;  %v4761_v22 = vmul.f32 %v6708_v61, %v4665_v27  ;;  %v4525_v0 = vmul.f32 1.442695, %v4481_v37  ;;  %v4484_v23 = vmin.f32 %v8664_v52, 20.0  ;;  %v4669_v2 = vmul.f32 %v5392_v49, %v8596_v8  ;;  %v6811_v38 = vld [vmem:[%s6929_s10 + $0x38] sm:$0xff]  ;;  %v6812_v49 = vld [vmem:[%s6929_s10 + $0x30] sm:$0xff] }
 0x387   : > { %v4794_v4 = vadd.f32 %v6809_v44, %v4762_v29  ;;  %v5395_v59 = vadd.f32 -1.0, %v4608_v33  ;;  %v4704_v39 = vadd.f32 1.0, %v4608_v33  ;;  %v4575_v40 = vadd.f32 1.0, %v6710_v14  ;;  %v6813_v44 = vld [vmem:[%s6929_s10 + $0x48] sm:$0xff] }
 0x388   : > { %v6712_v50 = vpop.eup %6711  ;;  %v4793_v20 = vadd.f32 %v6810_v30, %v4761_v22  ;;  %6721 = vpow2.f32 %v4525_v0  ;;  %v4531_v24 = vmul.f32 1.442695, %v4484_v23  ;;  %v4483_v27 = vmin.f32 %v8676_v1, 20.0  ;;  %v8681_v45 = vpop.f32.mrb[26].mxu1 }
 0x389   : > { %v6714_v55 = vpop.eup %6713  ;;  %4826 = vst.msk [vmem:[%s8638_s9 + $0x28] sm:$0xff] %vm491_vm1, %v4794_v4  ;;  %v4764_v9 = vmul.f32 %v6712_v50, %v4668_v16  ;;  %6723 = vrcp.f32 %v4704_v39  ;;  %v4607_v18 = vmul.f32 %v4575_v40, %v4575_v40  ;;  %v8686_v42 = vpop.f32.mrb[27].mxu1  ;;  %v6282_v12 = vadd.f32 %v8618_v56, %v8525_v34 }
 0x38a   : > { %4825 = vst.msk [vmem:[%s8638_s9 + $0x20] sm:$0xff] %vm491_vm1, %v4793_v20  ;;  %v4763_v51 = vmul.f32 %v6714_v55, %v4667_v26  ;;  %6725 = vpow2.f32 %v4531_v24  ;;  %v4529_v63 = vmul.f32 1.442695, %v4483_v27  ;;  %v4672_v16 = vmul.f32 %v5395_v59, %v8603_v19  ;;  %v6814_v55 = vld [vmem:[%s6929_s10 + $0x40] sm:$0xff] }
 0x38b   : > { %v4796_v37 = vadd.f32 %v6811_v38, %v4764_v9  ;;  %v4703_v61 = vadd.f32 1.0, %v4607_v18  ;;  %v6283_v8 = vadd.f32 %v8620_v43, %v8527_v21  ;;  %v8698_v26 = vadd.f32 %v6282_v12, %v8556_v54 }
 0x38c   : > { %v6716_v29 = vpop.eup %6715  ;;  %v4795_v33 = vadd.f32 %v6812_v49, %v4763_v51  ;;  %6727 = vpow2.f32 %v4529_v63  ;;  %v6284_v34 = vadd.f32 %v8628_v7, %v8529_v15  ;;  %v8702_v56 = vpop.f32.mrb[28].mxu1  ;;  %v5394_v14 = vadd.f32 -1.0, %v4607_v18 }
 0x38d   : > { %4828 = vst.msk [vmem:[%s8638_s9 + $0x38] sm:$0xff] %vm491_vm1, %v4796_v37  ;;  %v4766_v19 = vmul.f32 %v6716_v29, %v4670_v3  ;;  %6729 = vrcp.f32 %v4703_v61  ;;  %v8707_v21 = vadd.f32 %v6283_v8, %v8556_v54  ;;  %v8709_v43 = vpop.f32.mrb[29].mxu1  ;;  %v6718_v22 = vpop.eup %6717  ;;  %v4486_v0 = vmin.f32 %v8698_v26, 20.0 }
 0x38e   : > { %4827 = vst.msk [vmem:[%s8638_s9 + $0x30] sm:$0xff] %vm491_vm1, %v4795_v33  ;;  %v8715_v15 = vadd.f32 %v6284_v34, %v8556_v54  ;;  %v6285_v7 = vadd.f32 %v8632_v48, %v8531_v62  ;;  %v6286_v3 = vadd.f32 %v8643_v57, %v8533_v6  ;;  %v4578_v59 = vadd.f32 1.0, %v6718_v22  ;;  %v6815_v22 = vld [vmem:[%s6929_s10 + $0x58] sm:$0xff] }
 0x38f   : > { %v6720_v23 = vpop.eup %6719  ;;  %v4798_v4 = vadd.f32 %v6813_v44, %v4766_v19  ;;  %v4485_v39 = vmin.f32 %v8707_v21, 20.0  ;;  %v6287_v40 = vadd.f32 %v8652_v58, %v8535_v5  ;;  %v4535_v30 = vmul.f32 1.442695, %v4486_v0 }
 0x390   : > { %v4765_v50 = vmul.f32 %v6720_v23, %v4669_v2  ;;  %v4488_v20 = vmin.f32 %v8715_v15, 20.0  ;;  %v8727_v24 = vadd.f32 %v6285_v7, %v8556_v54  ;;  %v8729_v62 = vpop.f32.mrb[30].mxu1  ;;  %v4610_v6 = vmul.f32 %v4578_v59, %v4578_v59 }
 0x391   : > { %4830 = vst.msk [vmem:[%s8638_s9 + $0x48] sm:$0xff] %vm491_vm1, %v4798_v4  ;;  %v4533_v48 = vmul.f32 1.442695, %v4485_v39  ;;  %v8734_v57 = vadd.f32 %v6286_v3, %v8556_v54  ;;  %v8737_v27 = vadd.f32 %v6287_v40, %v8556_v54  ;;  %v8739_v5 = vpop.f32.mrb[31].mxu1  ;;  %6731 = vpow2.f32 %v4535_v30 }
 0x392   : > { %v6722_v58 = vpop.eup %6721  ;;  %v4797_v9 = vadd.f32 %v6814_v55, %v4765_v50  ;;  %v4539_v2 = vmul.f32 1.442695, %v4488_v20  ;;  %v4487_v18 = vmin.f32 %v8727_v24, 20.0  ;;  %v4671_v63 = vmul.f32 %v5394_v14, %v8608_v11  ;;  %v6816_v20 = vld [vmem:[%s6929_s10 + $0x50] sm:$0xff] }
 0x393   : > { %v6724_v51 = vpop.eup %6723  ;;  %v4706_v12 = vadd.f32 1.0, %v4610_v6  ;;  %v4577_v38 = vadd.f32 1.0, %v6722_v58  ;;  %6733 = vpow2.f32 %v4533_v48  ;;  %v4490_v29 = vmin.f32 %v8734_v57, 20.0 }
 0x394   : > { %v6726_v37 = vpop.eup %6725  ;;  %4829 = vst.msk [vmem:[%s8638_s9 + $0x40] sm:$0xff] %vm491_vm1, %v4797_v9  ;;  %v4768_v61 = vmul.f32 %v6724_v51, %v4672_v16  ;;  %6735 = vpow2.f32 %v4539_v2  ;;  %v4537_v8 = vmul.f32 1.442695, %v4487_v18  ;;  %v8747_v49 = vpop.f32.mrb[0].mxu1  ;;  %v5397_v33 = vadd.f32 -1.0, %v4610_v6 }
 0x395   : > { %6737 = vrcp.f32 %v4706_v12  ;;  %v4609_v34 = vmul.f32 %v4577_v38, %v4577_v38  ;;  %v4580_v19 = vadd.f32 1.0, %v6726_v37  ;;  %v8749_v11 = vpop.f32.mrb[1].mxu1  ;;  %v4543_v7 = vmul.f32 1.442695, %v4490_v29 }
 0x396   : > { %v6728_v14 = vpop.eup %6727  ;;  %v4800_v0 = vadd.f32 %v6815_v22, %v4768_v61  ;;  %6739 = vpow2.f32 %v4537_v8  ;;  %v4489_v16 = vmin.f32 %v8737_v27, 20.0  ;;  %v6288_v40 = vadd.f32 %v8666_v25, %v8537_v13 }
 0x397   : > { %v6730_v3 = vpop.eup %6729  ;;  %v4705_v23 = vadd.f32 1.0, %v4609_v34  ;;  %v4612_v44 = vmul.f32 %v4580_v19, %v4580_v19  ;;  %v4579_v4 = vadd.f32 1.0, %v6728_v14  ;;  %6741 = vpow2.f32 %v4543_v7 }
 0x398   : > { %4832 = vst.msk [vmem:[%s8638_s9 + $0x58] sm:$0xff] %vm491_vm1, %v4800_v0  ;;  %v4767_v59 = vmul.f32 %v6730_v3, %v4671_v63  ;;  %v4541_v39 = vmul.f32 1.442695, %v4489_v16  ;;  %v4674_v50 = vmul.f32 %v5397_v33, %v8624_v53  ;;  %v8760_v58 = vadd.f32 %v6288_v40, %v8556_v54  ;;  %v6817_v3 = vld [vmem:[%s6929_s10 + $0x68] sm:$0xff] }
 0x399   : > { %6743 = vrcp.f32 %v4705_v23  ;;  %v4708_v30 = vadd.f32 1.0, %v4612_v44  ;;  %v4611_v48 = vmul.f32 %v4579_v4, %v4579_v4  ;;  %v5396_v55 = vadd.f32 -1.0, %v4609_v34 }
 0x39a   : > { %v4799_v6 = vadd.f32 %v6816_v20, %v4767_v59  ;;  %6745 = vpow2.f32 %v4541_v39  ;;  %v6289_v9 = vadd.f32 %v8670_v28, %v8539_v35  ;;  %v6290_v2 = vadd.f32 %v8681_v45, %v8541_v60 }
 0x39b   : > { %6747 = vrcp.f32 %v4708_v30  ;;  %v6732_v13 = vpop.eup %6731  ;;  %v5399_v53 = vadd.f32 -1.0, %v4612_v44  ;;  %v4707_v25 = vadd.f32 1.0, %v4611_v48  ;;  %v4492_v18 = vmin.f32 %v8760_v58, 20.0 }
 0x39c   : > { %4831 = vst.msk [vmem:[%s8638_s9 + $0x50] sm:$0xff] %vm491_vm1, %v4799_v6  ;;  %v6291_v51 = vadd.f32 %v8686_v42, %v8543_v41  ;;  %v5398_v12 = vadd.f32 -1.0, %v4611_v48  ;;  %v4582_v38 = vadd.f32 1.0, %v6732_v13  ;;  %v8772_v37 = vadd.f32 %v6289_v9, %v8556_v54 }
 0x39d   : > { %v6734_v63 = vpop.eup %6733  ;;  %v8776_v35 = vadd.f32 %v8702_v56, %v8545_v31  ;;  %6749 = vrcp.f32 %v4707_v25  ;;  %v4547_v45 = vmul.f32 1.442695, %v4492_v18  ;;  %v8779_v61 = vadd.f32 %v6290_v2, %v8556_v54  ;;  %v6818_v2 = vld [vmem:[%s6929_s10 + $0x60] sm:$0xff] }
 0x39e   : > { %v6736_v60 = vpop.eup %6735  ;;  %v4581_v28 = vadd.f32 1.0, %v6734_v63  ;;  %v4673_v41 = vmul.f32 %v5396_v55, %v8648_v36  ;;  %v4614_v42 = vmul.f32 %v4582_v38, %v4582_v38  ;;  %v4491_v33 = vmin.f32 %v8772_v37, 20.0 }
 0x39f   : > { %v6738_v8 = vpop.eup %6737  ;;  %v4584_v29 = vadd.f32 1.0, %v6736_v60  ;;  %v4676_v31 = vmul.f32 %v5399_v53, %v8664_v52  ;;  %6751 = vpow2.f32 %v4547_v45  ;;  %v4675_v14 = vmul.f32 %v5398_v12, %v8676_v1  ;;  %v6819_v60 = vld [vmem:[%s6929_s10 + $0x78] sm:$0xff] }
 0x3a0   : > { %v6740_v34 = vpop.eup %6739  ;;  %v4770_v19 = vmul.f32 %v6738_v8, %v4674_v50  ;;  %v4613_v56 = vmul.f32 %v4581_v28, %v4581_v28  ;;  %v4710_v22 = vadd.f32 1.0, %v4614_v42  ;;  %v4494_v44 = vmin.f32 %v8779_v61, 20.0 }
 0x3a1   : > { %v4616_v0 = vmul.f32 %v4584_v29, %v4584_v29  ;;  %v4583_v7 = vadd.f32 1.0, %v6740_v34  ;;  %v6742_v16 = vpop.eup %6741  ;;  %v8788_v4 = vadd.f32 %v6291_v51, %v8556_v54  ;;  %v5401_v52 = vadd.f32 -1.0, %v4614_v42 }
 0x3a2   : > { %v4802_v23 = vadd.f32 %v6817_v3, %v4770_v19  ;;  %v4709_v36 = vadd.f32 1.0, %v4613_v56  ;;  %6753 = vrcp.f32 %v4710_v22  ;;  %v4545_v40 = vmul.f32 1.442695, %v4491_v33 }
 0x3a3   : > { %v6744_v59 = vpop.eup %6743  ;;  %v4712_v39 = vadd.f32 1.0, %v4616_v0  ;;  %v5400_v30 = vadd.f32 -1.0, %v4613_v56  ;;  %v4615_v20 = vmul.f32 %v4583_v7, %v4583_v7  ;;  %v5403_v48 = vadd.f32 -1.0, %v4616_v0 }
 0x3a4   : > { %v6746_v1 = vpop.eup %6745  ;;  %4834 = vst.msk [vmem:[%s8638_s9 + $0x68] sm:$0xff] %vm491_vm1, %v4802_v23  ;;  %v4769_v50 = vmul.f32 %v6744_v59, %v4673_v41  ;;  %6755 = vrcp.f32 %v4709_v36  ;;  %v4586_v55 = vadd.f32 1.0, %v6742_v16  ;;  %v4551_v12 = vmul.f32 1.442695, %v4494_v44 }
 0x3a5   : > { %v6748_v6 = vpop.eup %6747  ;;  %6757 = vrcp.f32 %v4712_v39  ;;  %v4585_v9 = vadd.f32 1.0, %v6746_v1  ;;  %v5402_v25 = vadd.f32 -1.0, %v4615_v20  ;;  %v4711_v18 = vadd.f32 1.0, %v4615_v20 }
 0x3a6   : > { %v4801_v13 = vadd.f32 %v6818_v2, %v4769_v50  ;;  %v4772_v53 = vmul.f32 %v6748_v6, %v4676_v31  ;;  %v4618_v51 = vmul.f32 %v4586_v55, %v4586_v55  ;;  %6759 = vpow2.f32 %v4545_v40  ;;  %v6822_v50 = vld [vmem:[%s6929_s10 + $0x80] sm:$0xff]  ;;  %v6823_v55 = vld [vmem:[%s6929_s10 + $0x98] sm:$0xff] }
 0x3a7   : > { %v4617_v63 = vmul.f32 %v4585_v9, %v4585_v9  ;;  %v6750_v38 = vpop.eup %6749  ;;  %v4678_v45 = vmul.f32 %v5401_v52, %v8698_v26  ;;  %6761 = vrcp.f32 %v4711_v18  ;;  %v4493_v8 = vmin.f32 %v8788_v4, 20.0  ;;  %v6820_v26 = vld [vmem:[%s6929_s10 + $0x70] sm:$0xff] }
 0x3a8   : > { %4833 = vst.msk [vmem:[%s8638_s9 + $0x60] sm:$0xff] %vm491_vm1, %v4801_v13  ;;  %v4804_v28 = vadd.f32 %v6819_v60, %v4772_v53  ;;  %v4771_v41 = vmul.f32 %v6750_v38, %v4675_v14  ;;  %v4677_v42 = vmul.f32 %v5400_v30, %v8707_v21  ;;  %v4680_v29 = vmul.f32 %v5403_v48, %v8715_v15 }
 0x3a9   : > { %v4714_v33 = vadd.f32 1.0, %v4618_v51  ;;  %v6752_v34 = vpop.eup %6751  ;;  %v4713_v19 = vadd.f32 1.0, %v4617_v63  ;;  %6763 = vpow2.f32 %v4551_v12  ;;  %v4549_v31 = vmul.f32 1.442695, %v4493_v8 }
 0x3aa   : > { %4836 = vst.msk [vmem:[%s8638_s9 + $0x78] sm:$0xff] %vm491_vm1, %v4804_v28  ;;  %v8804_v56 = vadd.f32 %v8776_v35, %v8556_v54  ;;  %v4803_v22 = vadd.f32 %v6820_v26, %v4771_v41  ;;  %v4679_v14 = vmul.f32 %v5402_v25, %v8727_v24  ;;  %v5405_v0 = vadd.f32 -1.0, %v4618_v51  ;;  %v6825_v26 = vld [vmem:[%s6929_s10 + $0xa8] sm:$0xff] }
 0x3ab   : > { %6765 = vrcp.f32 %v4714_v33  ;;  %v4588_v21 = vadd.f32 1.0, %v6752_v34  ;;  %v6293_v7 = vadd.f32 %v8709_v43, %v8547_v46  ;;  %v6294_v35 = vadd.f32 %v8729_v62, %v8549_v10 }
 0x3ac   : > { %6767 = vrcp.f32 %v4713_v19  ;;  %v4496_v15 = vmin.f32 %v8804_v56, 20.0  ;;  %v6754_v16 = vpop.eup %6753  ;;  %4835 = vst.msk [vmem:[%s8638_s9 + $0x70] sm:$0xff] %vm491_vm1, %v4803_v22  ;;  %v6295_v24 = vadd.f32 %v8739_v5, %v8551_v32  ;;  %v6296_v3 = vadd.f32 %v8747_v49, %v8505_v17  ;;  %v6821_v17 = vld [vmem:[%s6929_s10 + $0x88] sm:$0xff] }
 0x3ad   : > { %6769 = vpow2.f32 %v4549_v31  ;;  %v4774_v36 = vmul.f32 %v6754_v16, %v4678_v45  ;;  %v4620_v44 = vmul.f32 %v4588_v21, %v4588_v21  ;;  %v8820_v46 = vadd.f32 %v6293_v7, %v8556_v54  ;;  %v6824_v45 = vld [vmem:[%s6929_s10 + $0x90] sm:$0xff] }
 0x3ae   : > { %v6756_v23 = vpop.eup %6755  ;;  %v4555_v59 = vmul.f32 1.442695, %v4496_v15  ;;  %v5404_v39 = vadd.f32 -1.0, %v4617_v63  ;;  %v8823_v10 = vadd.f32 %v6294_v35, %v8556_v54  ;;  %v8826_v32 = vadd.f32 %v6295_v24, %v8556_v54 }
 0x3af   : > { %v6758_v43 = vpop.eup %6757  ;;  %v4773_v52 = vmul.f32 %v6756_v23, %v4677_v42  ;;  %v4806_v62 = vadd.f32 %v6821_v17, %v4774_v36  ;;  %v4716_v49 = vadd.f32 1.0, %v4620_v44  ;;  %v8830_v40 = vadd.f32 %v6296_v3, %v8556_v54 }
 0x3b0   : > { %v4776_v5 = vmul.f32 %v6758_v43, %v4680_v29  ;;  %v6760_v1 = vpop.eup %6759  ;;  %6771 = vpow2.f32 %v4555_v59  ;;  %v4495_v20 = vmin.f32 %v8820_v46, 20.0  ;;  %v4498_v6 = vmin.f32 %v8823_v10, 20.0 }
 0x3b1   : > { %v4805_v30 = vadd.f32 %v6822_v50, %v4773_v52  ;;  %v6762_v48 = vpop.eup %6761  ;;  %4838 = vst.msk [vmem:[%s8638_s9 + $0x88] sm:$0xff] %vm491_vm1, %v4806_v62  ;;  %v4682_v2 = vmul.f32 %v5405_v0, %v8734_v57  ;;  %6773 = vrcp.f32 %v4716_v49  ;;  %v4587_v13 = vadd.f32 1.0, %v6760_v1  ;;  %v6826_v0 = vld [vmem:[%s6929_s10 + $0xa0] sm:$0xff] }
 0x3b2   : > { %v4808_v9 = vadd.f32 %v6823_v55, %v4776_v5  ;;  %v4775_v53 = vmul.f32 %v6762_v48, %v4679_v14  ;;  %v4553_v25 = vmul.f32 1.442695, %v4495_v20  ;;  %v4559_v18 = vmul.f32 1.442695, %v4498_v6 }
 0x3b3   : > { %4837 = vst.msk [vmem:[%s8638_s9 + $0x80] sm:$0xff] %vm491_vm1, %v4805_v30  ;;  %v4497_v51 = vmin.f32 %v8826_v32, 20.0  ;;  %v6764_v63 = vpop.eup %6763  ;;  %v4681_v12 = vmul.f32 %v5404_v39, %v8737_v27  ;;  %v4619_v38 = vmul.f32 %v4587_v13, %v4587_v13  ;;  %v4500_v60 = vmin.f32 %v8830_v40, 20.0 }
 0x3b4   : > { %4840 = vst.msk [vmem:[%s8638_s9 + $0x98] sm:$0xff] %vm491_vm1, %v4808_v9  ;;  %v6297_v57 = vadd.f32 %v8749_v11, %v8507_v47  ;;  %v4807_v8 = vadd.f32 %v6824_v45, %v4775_v53  ;;  %v4590_v41 = vadd.f32 1.0, %v6764_v63  ;;  %6775 = vpow2.f32 %v4553_v25 }
 0x3b5   : > { %v6766_v28 = vpop.eup %6765  ;;  %v4557_v42 = vmul.f32 1.442695, %v4497_v51  ;;  %v5407_v34 = vadd.f32 -1.0, %v4620_v44  ;;  %v4715_v19 = vadd.f32 1.0, %v4619_v38  ;;  %6777 = vpow2.f32 %v4559_v18 }
 0x3b6   : > { %v6768_v29 = vpop.eup %6767  ;;  %v4778_v33 = vmul.f32 %v6766_v28, %v4682_v2  ;;  %4839 = vst.msk [vmem:[%s8638_s9 + $0x90] sm:$0xff] %vm491_vm1, %v4807_v8  ;;  %v4622_v47 = vmul.f32 %v4590_v41, %v4590_v41  ;;  %v4563_v11 = vmul.f32 1.442695, %v4500_v60  ;;  %v8856_v16 = vadd.f32 %v6297_v57, %v8556_v54  ;;  %v6827_v54 = vld [vmem:[%s6929_s10 + $0xb8] sm:$0xff] }
 0x3b7   : > { %v6770_v27 = vpop.eup %6769  ;;  %v4777_v31 = vmul.f32 %v6768_v29, %v4681_v12  ;;  %6779 = vpow2.f32 %v4557_v42  ;;  %v4684_v24 = vmul.f32 %v5407_v34, %v8760_v58  ;;  %v5406_v43 = vadd.f32 -1.0, %v4619_v38  ;;  %v6828_v38 = vld [vmem:[%s6929_s10 + $0xb0] sm:$0xff]  ;;  %v6829_v42 = vld [vmem:[%s6929_s10 + $0xc8] sm:$0xff] }
 0x3b8   : > { %v4810_v22 = vadd.f32 %v6825_v26, %v4778_v33  ;;  %6781 = vrcp.f32 %v4715_v19  ;;  %v4589_v14 = vadd.f32 1.0, %v6770_v27  ;;  %v4718_v15 = vadd.f32 1.0, %v4622_v47 }
 0x3b9   : > { %v4809_v21 = vadd.f32 %v6826_v0, %v4777_v31  ;;  %6783 = vpow2.f32 %v4563_v11  ;;  %v4499_v44 = vmin.f32 %v8856_v16, 20.0  ;;  %v5409_v49 = vadd.f32 -1.0, %v4622_v47  ;;  %v6830_v31 = vld [vmem:[%s6929_s10 + $0xc0] sm:$0xff] }
 0x3ba   : > { %4842 = vst.msk [vmem:[%s8638_s9 + $0xa8] sm:$0xff] %vm491_vm1, %v4810_v22  ;;  %v4621_v7 = vmul.f32 %v4589_v14, %v4589_v14  ;;  %v6772_v35 = vpop.eup %6771  ;;  %6785 = vrcp.f32 %v4718_v15  ;;  %v4683_v30 = vmul.f32 %v5406_v43, %v8772_v37  ;;  %v6831_v15 = vld [vmem:[%s6929_s10 + $0xd8] sm:$0xff] }
 0x3bb   : > { %4841 = vst.msk [vmem:[%s8638_s9 + $0xa0] sm:$0xff] %vm491_vm1, %v4809_v21  ;;  %v6774_v3 = vpop.eup %6773  ;;  %v4592_v36 = vadd.f32 1.0, %v6772_v35  ;;  %v4561_v39 = vmul.f32 1.442695, %v4499_v44  ;;  %v4686_v25 = vmul.f32 %v5409_v49, %v8779_v61  ;;  %v6834_v49 = vld [vmem:[%s6929_s10 + $0xe0] sm:$0xff] }
 0x3bc   : > { %v4717_v23 = vadd.f32 1.0, %v4621_v7  ;;  %v4780_v59 = vmul.f32 %v6774_v3, %v4684_v24  ;;  %v5408_v13 = vadd.f32 -1.0, %v4621_v7 }
 0x3bd   : > { %v4624_v52 = vmul.f32 %v4592_v36, %v4592_v36 }
 0x3be   : > { %6787 = vrcp.f32 %v4717_v23  ;;  %v6776_v17 = vpop.eup %6775  ;;  %v4812_v62 = vadd.f32 %v6827_v54, %v4780_v59  ;;  %v4685_v45 = vmul.f32 %v5408_v13, %v8788_v4 }
 0x3bf   : > { %v6778_v5 = vpop.eup %6777  ;;  %v4720_v1 = vadd.f32 1.0, %v4624_v52  ;;  %v4591_v50 = vadd.f32 1.0, %v6776_v17  ;;  %6789 = vpow2.f32 %v4561_v39  ;;  %v5411_v28 = vadd.f32 -1.0, %v4624_v52  ;;  %v6833_v17 = vld [vmem:[%s6929_s10 + $0xe8] sm:$0xff] }
 0x3c0   : > { %4844 = vst.msk [vmem:[%s8638_s9 + $0xb8] sm:$0xff] %vm491_vm1, %v4812_v62  ;;  %v4594_v20 = vadd.f32 1.0, %v6778_v5 }
 0x3c1   : > { %v6780_v58 = vpop.eup %6779  ;;  %6791 = vrcp.f32 %v4720_v1  ;;  %v4623_v48 = vmul.f32 %v4591_v50, %v4591_v50  ;;  %v4688_v27 = vmul.f32 %v5411_v28, %v8804_v56 }
 0x3c2   : > { %v6782_v6 = vpop.eup %6781  ;;  %v4593_v55 = vadd.f32 1.0, %v6780_v58  ;;  %v4626_v53 = vmul.f32 %v4594_v20, %v4594_v20  ;;  %v6835_v58 = vld [vmem:[%s6929_s10 + $0xf8] sm:$0xff] }
 0x3c3   : > { %v6784_v9 = vpop.eup %6783  ;;  %v4779_v2 = vmul.f32 %v6782_v6, %v4683_v30  ;;  %v4719_v18 = vadd.f32 1.0, %v4623_v48  ;;  %v5410_v11 = vadd.f32 -1.0, %v4623_v48  ;;  %v6836_v48 = vld [vmem:[%s6929_s10 + $0xf0] sm:$0xff] }
 0x3c4   : > { %v4625_v51 = vmul.f32 %v4593_v55, %v4593_v55  ;;  %v4596_v63 = vadd.f32 1.0, %v6784_v9  ;;  %v6786_v12 = vpop.eup %6785  ;;  %v4722_v37 = vadd.f32 1.0, %v4626_v53  ;;  %v5413_v22 = vadd.f32 -1.0, %v4626_v53 }
 0x3c5   : > { %v4811_v60 = vadd.f32 %v6828_v38, %v4779_v2  ;;  %v4782_v57 = vmul.f32 %v6786_v12, %v4686_v25  ;;  %6793 = vrcp.f32 %v4719_v18  ;;  %v4687_v35 = vmul.f32 %v5410_v11, %v8820_v46  ;;  %v6832_v46 = vld [vmem:[%s6929_s10 + $0xd0] sm:$0xff] }
 0x3c6   : > { %6795 = vrcp.f32 %v4722_v37  ;;  %v4721_v8 = vadd.f32 1.0, %v4625_v51  ;;  %v4628_v61 = vmul.f32 %v4596_v63, %v4596_v63  ;;  %v5412_v21 = vadd.f32 -1.0, %v4625_v51 }
 0x3c7   : > { %4843 = vst.msk [vmem:[%s8638_s9 + $0xb0] sm:$0xff] %vm491_vm1, %v4811_v60  ;;  %v4814_v29 = vadd.f32 %v6829_v42, %v4782_v57  ;;  %v4690_v3 = vmul.f32 %v5413_v22, %v8823_v10 }
 0x3c8   : > { %v6788_v41 = vpop.eup %6787  ;;  %6797 = vrcp.f32 %v4721_v8  ;;  %v4724_v34 = vadd.f32 1.0, %v4628_v61  ;;  %v5415_v23 = vadd.f32 -1.0, %v4628_v61  ;;  %v4689_v43 = vmul.f32 %v5412_v21, %v8826_v32 }
 0x3c9   : > { %v4781_v33 = vmul.f32 %v6788_v41, %v4685_v45  ;;  %v6790_v19 = vpop.eup %6789  ;;  %4846 = vst.msk [vmem:[%s8638_s9 + $0xc8] sm:$0xff] %vm491_vm1, %v4814_v29 }
 0x3ca   : > { %6799 = vrcp.f32 %v4724_v34  ;;  %v4595_v4 = vadd.f32 1.0, %v6790_v19  ;;  %v4692_v62 = vmul.f32 %v5415_v23, %v8830_v40 }
 0x3cb   : > { %v4813_v47 = vadd.f32 %v6830_v31, %v4781_v33  ;;  %v6792_v26 = vpop.eup %6791 }
 0x3cc   : > { %v4784_v14 = vmul.f32 %v6792_v26, %v4688_v27  ;;  %v4627_v0 = vmul.f32 %v4595_v4, %v4595_v4 }
 0x3cd   : > { %4845 = vst.msk [vmem:[%s8638_s9 + $0xc0] sm:$0xff] %vm491_vm1, %v4813_v47 }
 0x3ce   : > { %v4816_v7 = vadd.f32 %v6831_v15, %v4784_v14  ;;  %v4723_v56 = vadd.f32 1.0, %v4627_v0  ;;  %v5414_v50 = vadd.f32 -1.0, %v4627_v0 }
 0x3cf   : > { %v6794_v24 = vpop.eup %6793 }
 0x3d0   : > { %v6796_v36 = vpop.eup %6795  ;;  %4848 = vst.msk [vmem:[%s8638_s9 + $0xd8] sm:$0xff] %vm491_vm1, %v4816_v7  ;;  %v4783_v44 = vmul.f32 %v6794_v24, %v4687_v35  ;;  %6801 = vrcp.f32 %v4723_v56  ;;  %v4691_v20 = vmul.f32 %v5414_v50, %v8856_v16 }
 0x3d1   : > { %v4786_v59 = vmul.f32 %v6796_v36, %v4690_v3 }
 0x3d2   : > { %v6798_v52 = vpop.eup %6797  ;;  %v4815_v39 = vadd.f32 %v6832_v46, %v4783_v44 }
 0x3d3   : > { %v4818_v10 = vadd.f32 %v6833_v17, %v4786_v59  ;;  %v4785_v54 = vmul.f32 %v6798_v52, %v4689_v43 }
 0x3d4   : > { %v6800_v5 = vpop.eup %6799  ;;  %4847 = vst.msk [vmem:[%s8638_s9 + $0xd0] sm:$0xff] %vm491_vm1, %v4815_v39 }
 0x3d5   : > { %4850 = vst.msk [vmem:[%s8638_s9 + $0xe8] sm:$0xff] %vm491_vm1, %v4818_v10  ;;  %v4817_v1 = vadd.f32 %v6834_v49, %v4785_v54  ;;  %v4788_v32 = vmul.f32 %v6800_v5, %v4692_v62 }
 0x3d7   : > { %4849 = vst.msk [vmem:[%s8638_s9 + $0xe0] sm:$0xff] %vm491_vm1, %v4817_v1  ;;  %v4820_v30 = vadd.f32 %v6835_v58, %v4788_v32 }
 0x3d9   : > { %4852 = vst.msk [vmem:[%s8638_s9 + $0xf8] sm:$0xff] %vm491_vm1, %v4820_v30 }
 0x3da   : > { %v6802_v6 = vpop.eup %6801 }
 0x3db   : > { %v4787_v40 = vmul.f32 %v6802_v6, %v4691_v20 }
 0x3dd   : > { %v4819_v55 = vadd.f32 %v6836_v48, %v4787_v40 }
 0x3df   : > { %4851 = vst.msk [vmem:[%s8638_s9 + $0xf0] sm:$0xff] %vm491_vm1, %v4819_v55 }
 0x3e0 PF: > { %s17_s26 = sadd.s32 1, %s6859_s26   ;;  %s9176_s24 = smov %s6855_s25 }
 0x3e1   : > { %p14_p5 = scmp.ge.s32.totalorder %s17_s26, 4   ;;  %s9177_s25 = smov %s9179_s27 }
 0x3e3   :  { %16 = sbr.rel (!%p14_p5) target bundleno = 2 (0x2), region = 92 }

</bundles_post_ra>
